<compile_context>
chip_gen: v7x
topology: tpu7x:2x2x1
jax: 0.10.0
libtpu: 0.0.40
codegen_flags: <defaults>
</compile_context>

<pallas_src>
import jax
import jax.numpy as jnp
from jax.experimental import pallas as pl
from jax.experimental.pallas import tpu as pltpu

S = 64        # sequence length (forced by the forward's reshapes)
D = 256       # 2 * word_rnn_size (forced by Conv1d in_channels)
H = 200       # q/k/v projection width / conv out channels
HPAD = 256    # lane-aligned padded head width used inside the kernel
KW = 4        # conv kernel width == stride
LOUT = 16     # conv output length = 64 / 4
DKW = D * KW  # 1024


def _word_span_kernel(x_ref, xcol_ref, wqkv_ref, bqkv_ref, wc_ref, bc_ref,
                      sa_ref, conv_ref):
    bt = x_ref.shape[0]

    # ---- fused q/k/v projection: one (bt*64, 256) @ (256, 768) bf16 matmul ----
    x2 = x_ref[...].astype(jnp.bfloat16).reshape(bt * S, D)   # in-kernel f32->bf16 cast
    qkv = jnp.dot(x2, wqkv_ref[...], preferred_element_type=jnp.float32)
    qkv = jnp.maximum(qkv + bqkv_ref[...], 0.0).astype(jnp.bfloat16)   # ReLU (f32) -> bf16
    # Lane-aligned head slices (offsets 0 / 256 / 512); padded columns are exact zeros.
    q = qkv[:, 0:HPAD].reshape(bt, S, HPAD)
    k = qkv[:, HPAD:2 * HPAD].reshape(bt, S, HPAD)
    v = qkv[:, 2 * HPAD:3 * HPAD].reshape(bt, S, HPAD)

    # ---- attention: bf16 operands on the MXU, f32 accumulation; softmax in f32 ----
    # scores[b,i,j] = q[b,i,:] . k[b,j,:]  == torch.bmm(q, k.permute(0, 2, 1));
    # zero-padded head columns contribute nothing to the contraction.
    scores = jnp.einsum('bih,bjh->bij', q, k, preferred_element_type=jnp.float32)
    # torch nn.Softmax(dim=1) on a (B, S, S) tensor -> normalize over axis=1 (the i axis).
    m = jnp.max(scores, axis=1, keepdims=True)
    e = jnp.exp(scores - m)
    soft = e * pl.reciprocal(jnp.sum(e, axis=1, keepdims=True), approx=True)
    att = jnp.einsum('bij,bjh->bih', soft.astype(jnp.bfloat16), v,
                     preferred_element_type=jnp.float32)
    sa_ref[...] = att[:, :, :H].astype(jnp.bfloat16)   # drop padded cols, bf16 store

    # ---- Conv1d(256, 200, 4, stride=4) as a lane-dense (bt*16,1024)@(1024,200) ----
    xc = xcol_ref[...].reshape(bt * LOUT, DKW)                            # bf16
    conv = jnp.dot(xc, wc_ref[...], preferred_element_type=jnp.float32) + bc_ref[...]
    conv_ref[...] = conv.reshape(bt, LOUT, H).astype(jnp.bfloat16)


def _choose_bt(batch):
    """Batch tile.  >= 8 keeps the conv matmul at M = bt*16 >= 128 rows (full MXU rows
    on v5e, half-to-full on v6e/v7x); <= 32 keeps the per-step working set well inside
    the 48 MiB scoped-VMEM budget we request (v7x has 64 MiB physical).  For batches
    above 32 we minimize zero-padding first, then prefer an even grid (two v7x cores),
    then the larger tile (amortizes the ~0.35 us/step overhead)."""
    if batch <= 32:
        return batch

    def key(bt):
        steps = -(-batch // bt)
        return (steps * bt - batch, steps % 2, -bt)

    return min((32, 24, 16, 8), key=key)


def word_span_encoder_forward(x, params, bt=None):
    B = x.shape[0]
    assert x.shape[1:] == (S, D), x.shape
    if bt is None:
        bt = _choose_bt(B)
    b_pad = -(-B // bt) * bt
    x_p = x if b_pad == B else jnp.concatenate(
        [x, jnp.zeros((b_pad - B, S, D), x.dtype)], axis=0)
    grid = (b_pad // bt,)

    # --- wrapper-side prep (layout / packing only) --------------------------------
    # im2col for the stride==kernel conv in ONE fused XLA pass (read f32 x, write bf16
    # xcol), laid out (B, LOUT, D*KW) so the kernel's conv matmul output is lane-dense:
    #   xcol[b, l, c*KW + t] = word_att[b, c, 4*l + t],  word_att = x.reshape(B, 256, 64)
    xcol = (x_p.reshape(b_pad, D, S)
            .reshape(b_pad, D, LOUT, KW)
            .transpose(0, 2, 1, 3)
            .reshape(b_pad, LOUT, DKW)
            .astype(jnp.bfloat16))

    def pad_w(w):   # (D, H) -> (D, HPAD), zero-pad the out dim
        return jnp.pad(w, ((0, 0), (0, HPAD - H)))

    def pad_b(b):   # (H,) -> (HPAD,)
        return jnp.pad(b, (0, HPAD - H))

    wqkv = jnp.concatenate([pad_w(params["wq"]), pad_w(params["wk"]),
                            pad_w(params["wv"])], axis=1).astype(jnp.bfloat16)   # (256, 768)
    bqkv = jnp.concatenate([pad_b(params["bq"]), pad_b(params["bk"]),
                            pad_b(params["bv"])]).reshape(1, 3 * HPAD)           # f32
    wc = params["wconv"].reshape(H, DKW).T.astype(jnp.bfloat16)                  # (1024, 200)
    bc = params["bconv"].reshape(1, H)                                           # f32

    def fixed(shape):
        return pl.BlockSpec(shape, lambda b, _r=len(shape): (0,) * _r)

    grid_spec = pltpu.PrefetchScalarGridSpec(
        num_scalar_prefetch=0,
        grid=grid,
        in_specs=[
            pl.BlockSpec((bt, S, D), lambda b: (b, 0, 0)),         # x (f32)
            pl.BlockSpec((bt, LOUT, DKW), lambda b: (b, 0, 0)),    # im2col(x) (bf16)
            fixed((D, 3 * HPAD)), fixed((1, 3 * HPAD)),            # fused Wqkv, bias
            fixed((DKW, H)), fixed((1, H)),                        # Wconv^T, bias
        ],
        out_specs=[
            pl.BlockSpec((bt, S, H), lambda b: (b, 0, 0)),         # self-attention out
            pl.BlockSpec((bt, LOUT, H), lambda b: (b, 0, 0)),      # conv out (transposed)
        ],
    )

    sa, conv_t = pl.pallas_call(
        _word_span_kernel,
        out_shape=(jax.ShapeDtypeStruct((b_pad, S, H), jnp.bfloat16),
                   jax.ShapeDtypeStruct((b_pad, LOUT, H), jnp.bfloat16)),
        grid_spec=grid_spec,
        compiler_params=pltpu.CompilerParams(
            dimension_semantics=("parallel",),
            vmem_limit_bytes=48 * 1024 * 1024),
    )(x_p, xcol, wqkv, bqkv, wc, bc)

    sa = sa[:B].astype(jnp.float32)
    conv_t = conv_t[:B].astype(jnp.float32)

    # --- glue: reshape/mean pooling + final flat reshape (as in torch forward) ----
    # conv_t[b, l, o] == torch conv output [b, o, l]; transpose back to NCL first.
    conv_nchw = jnp.transpose(conv_t, (0, 2, 1))                   # (B, 200, 16)
    # TODO(synk): the (200, 4, 16) mean-pool reinterpretation of sa and the final flat
    # reshape cross vreg tiles, so they stay in glue JAX rather than inside the kernel.
    pooled = sa.reshape(B, H, 4, LOUT).mean(axis=2)                # (B, 200, 16)
    return (conv_nchw + pooled).reshape(B, LOUT, H)                # (B, 16, 200)


def reference(x, params):
    """Pure-JAX f32 reference mirroring the torch forward exactly."""
    B = x.shape[0]
    q = jax.nn.relu(x @ params["wq"] + params["bq"])
    k = jax.nn.relu(x @ params["wk"] + params["bk"])
    v = jax.nn.relu(x @ params["wv"] + params["bv"])
    scores = jnp.einsum("bih,bjh->bij", q, k)
    soft = jax.nn.softmax(scores, axis=1)                          # torch Softmax(dim=1)
    sa = jnp.einsum("bij,bjh->bih", soft, v)
    pooled = sa.reshape(B, -1, 4, 16).mean(axis=2).reshape(B, 16, -1)
    word_att = x.reshape(B, -1, 64)
    conv = jax.lax.conv_general_dilated(
        word_att, params["wconv"], window_strides=(4,), padding="VALID",
        dimension_numbers=("NCH", "OIH", "NCH"))
    conv = conv + params["bconv"][None, :, None]
    return conv.reshape(B, 16, -1) + pooled


def init_params(key):
    ks = jax.random.split(key, 8)

    def u(k, fan_in, shape):
        bound = 1.0 / float(fan_in) ** 0.5
        return jax.random.uniform(k, shape, jnp.float32, -bound, bound)

    # Linear weights stored pre-transposed as (in, out); conv weight as (out, in, kw).
    return dict(
        wq=u(ks[0], D, (D, H)), bq=u(ks[1], D, (H,)),
        wk=u(ks[2], D, (D, H)), bk=u(ks[3], D, (H,)),
        wv=u(ks[4], D, (D, H)), bv=u(ks[5], D, (H,)),
        wconv=u(ks[6], D * KW, (H, D, KW)), bconv=u(ks[7], D * KW, (H,)),
    )


if __name__ == "__main__":
    key = jax.random.PRNGKey(0)
    pkey, xkey = jax.random.split(key)
    params = init_params(pkey)

    B = 8                                   # <= 32 -> single grid step, bt = 8
    x = jax.random.normal(xkey, (B, S, D), jnp.float32)

    fwd = jax.jit(word_span_encoder_forward)
    out = jax.block_until_ready(fwd(x, params))

    ref = reference(x, params)
    assert out.shape == (B, LOUT, H), out.shape
    # bf16 matmul operands + bf16 output storage (all with f32 accumulation) vs an f32
    # reference; the softmax mildly amplifies the ~0.4% bf16 rounding of x/weights/q/k,
    # so elementwise tolerance is 5e-2 with a tighter 3e-2 global (Frobenius) check.
    max_err = float(jnp.max(jnp.abs(out - ref)))
    rel_err = float(jnp.linalg.norm(out - ref) / jnp.linalg.norm(ref))
    assert jnp.allclose(out, ref, rtol=5e-2, atol=5e-2), max_err
    assert rel_err < 3e-2, rel_err
    print("KERNEL_OK")
</pallas_src>

<mosaic_0001>
module attributes {stable_mosaic.version = 11 : i64} {
  func.func @_word_span_kernel(%arg0: i32, %arg1: memref<8x64x256xf32, #tpu.memory_space<vmem>>, %arg2: memref<8x16x1024xbf16, #tpu.memory_space<vmem>>, %arg3: memref<256x768xbf16, #tpu.memory_space<vmem>>, %arg4: memref<1x768xf32, #tpu.memory_space<vmem>>, %arg5: memref<1024x200xbf16, #tpu.memory_space<vmem>>, %arg6: memref<1x200xf32, #tpu.memory_space<vmem>>, %arg7: memref<8x64x200xbf16, #tpu.memory_space<vmem>>, %arg8: memref<8x16x200xbf16, #tpu.memory_space<vmem>>) attributes {dimension_semantics = [#tpu.dimension_semantics<parallel>], iteration_bounds = array<i64: 1>, scalar_prefetch = 0 : i64, scratch_operands = 0 : i64, tpu.core_type = #tpu.core_type<tc>, window_params = [{transform_indices = @transform_0, window_bounds = array<i64: 8, 64, 256>}, {transform_indices = @transform_1, window_bounds = array<i64: 8, 16, 1024>}, {pipeline_mode = #tpu.pipeline_mode<synchronous>, transform_indices = @transform_2, window_bounds = array<i64: 256, 768>}, {pipeline_mode = #tpu.pipeline_mode<synchronous>, transform_indices = @transform_3, window_bounds = array<i64: 1, 768>}, {pipeline_mode = #tpu.pipeline_mode<synchronous>, transform_indices = @transform_4, window_bounds = array<i64: 1024, 200>}, {pipeline_mode = #tpu.pipeline_mode<synchronous>, transform_indices = @transform_5, window_bounds = array<i64: 1, 200>}, {transform_indices = @transform_6, window_bounds = array<i64: 8, 64, 200>}, {transform_indices = @transform_7, window_bounds = array<i64: 8, 16, 200>}]} {
    %c0 = arith.constant 0 : index
    %c0_0 = arith.constant 0 : index
    %c0_1 = arith.constant 0 : index
    %0 = vector.load %arg1[%c0, %c0_0, %c0_1] : memref<8x64x256xf32, #tpu.memory_space<vmem>>, vector<8x64x256xf32>
    %1 = arith.truncf %0 : vector<8x64x256xf32> to vector<8x64x256xbf16>
    %2 = vector.shape_cast %1 : vector<8x64x256xbf16> to vector<512x256xbf16>
    %c0_2 = arith.constant 0 : index
    %c0_3 = arith.constant 0 : index
    %3 = vector.load %arg3[%c0_2, %c0_3] : memref<256x768xbf16, #tpu.memory_space<vmem>>, vector<256x768xbf16>
    %cst = arith.constant dense<0.000000e+00> : vector<512x768xf32>
    %4 = tpu.matmul %2, %3, %cst {dimension_numbers = #tpu.dot_dimension_numbers<[1], [0], [0], [1], [0, 0, 1, 1], [], []>} : vector<512x256xbf16>, vector<256x768xbf16>, vector<512x768xf32> -> vector<512x768xf32>
    %c0_4 = arith.constant 0 : index
    %c0_5 = arith.constant 0 : index
    %5 = vector.load %arg4[%c0_4, %c0_5] : memref<1x768xf32, #tpu.memory_space<vmem>>, vector<1x768xf32>
    %6 = vector.broadcast %5 : vector<1x768xf32> to vector<512x768xf32>
    %7 = arith.addf %4, %6 : vector<512x768xf32>
    %cst_6 = arith.constant 0.000000e+00 : f32
    %8 = vector.broadcast %cst_6 : f32 to vector<512x768xf32>
    %9 = arith.maximumf %7, %8 : vector<512x768xf32>
    %10 = arith.truncf %9 : vector<512x768xf32> to vector<512x768xbf16>
    %11 = vector.extract_strided_slice %10 {offsets = [0, 0], sizes = [512, 256], strides = [1, 1]} : vector<512x768xbf16> to vector<512x256xbf16>
    %12 = vector.shape_cast %11 : vector<512x256xbf16> to vector<8x64x256xbf16>
    %13 = vector.extract_strided_slice %10 {offsets = [0, 256], sizes = [512, 256], strides = [1, 1]} : vector<512x768xbf16> to vector<512x256xbf16>
    %14 = vector.shape_cast %13 : vector<512x256xbf16> to vector<8x64x256xbf16>
    %15 = vector.extract_strided_slice %10 {offsets = [0, 512], sizes = [512, 256], strides = [1, 1]} : vector<512x768xbf16> to vector<512x256xbf16>
    %16 = vector.shape_cast %15 : vector<512x256xbf16> to vector<8x64x256xbf16>
    "tpu.trace_start"() <{level = 10 : i32, message = "bih,bjh->bij"}> : () -> ()
    %cst_7 = arith.constant dense<0.000000e+00> : vector<8x64x64xf32>
    %17 = tpu.matmul %12, %14, %cst_7 {dimension_numbers = #tpu.dot_dimension_numbers<[2], [2], [1], [1], [0, 0, 0, 1, 1, 1], [0], [0]>} : vector<8x64x256xbf16>, vector<8x64x256xbf16>, vector<8x64x64xf32> -> vector<8x64x64xf32>
    "tpu.trace_stop"() : () -> ()
    %cst_8 = arith.constant dense<0xFF800000> : vector<8x64xf32>
    %18 = vector.multi_reduction <maximumf>, %17, %cst_8 [1] : vector<8x64x64xf32> to vector<8x64xf32>
    %19 = vector.shape_cast %18 : vector<8x64xf32> to vector<8x1x64xf32>
    %20 = vector.broadcast %19 : vector<8x1x64xf32> to vector<8x64x64xf32>
    %21 = arith.subf %17, %20 : vector<8x64x64xf32>
    %22 = math.exp %21 : vector<8x64x64xf32>
    %cst_9 = arith.constant dense<0.000000e+00> : vector<8x64xf32>
    %23 = vector.multi_reduction <add>, %22, %cst_9 [1] : vector<8x64x64xf32> to vector<8x64xf32>
    %24 = vector.shape_cast %23 : vector<8x64xf32> to vector<8x1x64xf32>
    %25 = tpu.reciprocal %24 {approx = true} : vector<8x1x64xf32> -> vector<8x1x64xf32>
    %26 = vector.broadcast %25 : vector<8x1x64xf32> to vector<8x64x64xf32>
    %27 = arith.mulf %22, %26 : vector<8x64x64xf32>
    %28 = arith.truncf %27 : vector<8x64x64xf32> to vector<8x64x64xbf16>
    "tpu.trace_start"() <{level = 10 : i32, message = "bij,bjh->bih"}> : () -> ()
    %cst_10 = arith.constant dense<0.000000e+00> : vector<8x64x256xf32>
    %29 = tpu.matmul %28, %16, %cst_10 {dimension_numbers = #tpu.dot_dimension_numbers<[2], [1], [1], [2], [0, 0, 0, 1, 1, 2], [0], [0]>} : vector<8x64x64xbf16>, vector<8x64x256xbf16>, vector<8x64x256xf32> -> vector<8x64x256xf32>
    "tpu.trace_stop"() : () -> ()
    %30 = vector.extract_strided_slice %29 {offsets = [0, 0, 0], sizes = [8, 64, 200], strides = [1, 1, 1]} : vector<8x64x256xf32> to vector<8x64x200xf32>
    %31 = arith.truncf %30 : vector<8x64x200xf32> to vector<8x64x200xbf16>
    %c0_11 = arith.constant 0 : index
    %c0_12 = arith.constant 0 : index
    %c0_13 = arith.constant 0 : index
    %32 = vector.load %arg7[%c0_11, %c0_12, %c0_13] : memref<8x64x200xbf16, #tpu.memory_space<vmem>>, vector<8x64x200xbf16>
    tpu.vector_store %arg7[%c0_11, %c0_12, %c0_13], %31 {strides = array<i32>} : memref<8x64x200xbf16, #tpu.memory_space<vmem>>, vector<8x64x200xbf16>,
    %c0_14 = arith.constant 0 : index
    %c0_15 = arith.constant 0 : index
    %c0_16 = arith.constant 0 : index
    %33 = vector.load %arg2[%c0_14, %c0_15, %c0_16] : memref<8x16x1024xbf16, #tpu.memory_space<vmem>>, vector<8x16x1024xbf16>
    %34 = vector.shape_cast %33 : vector<8x16x1024xbf16> to vector<128x1024xbf16>
    %c0_17 = arith.constant 0 : index
    %c0_18 = arith.constant 0 : index
    %35 = vector.load %arg5[%c0_17, %c0_18] : memref<1024x200xbf16, #tpu.memory_space<vmem>>, vector<1024x200xbf16>
    %cst_19 = arith.constant dense<0.000000e+00> : vector<128x200xf32>
    %36 = tpu.matmul %34, %35, %cst_19 {dimension_numbers = #tpu.dot_dimension_numbers<[1], [0], [0], [1], [0, 0, 1, 1], [], []>} : vector<128x1024xbf16>, vector<1024x200xbf16>, vector<128x200xf32> -> vector<128x200xf32>
    %c0_20 = arith.constant 0 : index
    %c0_21 = arith.constant 0 : index
    %37 = vector.load %arg6[%c0_20, %c0_21] : memref<1x200xf32, #tpu.memory_space<vmem>>, vector<1x200xf32>
    %38 = vector.broadcast %37 : vector<1x200xf32> to vector<128x200xf32>
    %39 = arith.addf %36, %38 : vector<128x200xf32>
    %40 = vector.shape_cast %39 : vector<128x200xf32> to vector<8x16x200xf32>
    %41 = arith.truncf %40 : vector<8x16x200xf32> to vector<8x16x200xbf16>
    %c0_22 = arith.constant 0 : index
    %c0_23 = arith.constant 0 : index
    %c0_24 = arith.constant 0 : index
    %42 = vector.load %arg8[%c0_22, %c0_23, %c0_24] : memref<8x16x200xbf16, #tpu.memory_space<vmem>>, vector<8x16x200xbf16>
    tpu.vector_store %arg8[%c0_22, %c0_23, %c0_24], %41 {strides = array<i32>} : memref<8x16x200xbf16, #tpu.memory_space<vmem>>, vector<8x16x200xbf16>,
    return
  }
  func.func @transform_0(%arg0: i32) -> (i32, i32, i32) {
    %c0_i32 = arith.constant 0 : i32
    %c0_i32_0 = arith.constant 0 : i32
    %c0_i32_1 = arith.constant 0 : i32
    return %arg0, %c0_i32, %c0_i32_0 : i32, i32, i32
  }
  func.func @transform_1(%arg0: i32) -> (i32, i32, i32) {
    %c0_i32 = arith.constant 0 : i32
    %c0_i32_0 = arith.constant 0 : i32
    %c0_i32_1 = arith.constant 0 : i32
    return %arg0, %c0_i32, %c0_i32_0 : i32, i32, i32
  }
  func.func @transform_2(%arg0: i32) -> (i32, i32) {
    %c0_i32 = arith.constant 0 : i32
    %c0_i32_0 = arith.constant 0 : i32
    %c0_i32_1 = arith.constant 0 : i32
    return %c0_i32, %c0_i32_0 : i32, i32
  }
  func.func @transform_3(%arg0: i32) -> (i32, i32) {
    %c0_i32 = arith.constant 0 : i32
    %c0_i32_0 = arith.constant 0 : i32
    %c0_i32_1 = arith.constant 0 : i32
    return %c0_i32, %c0_i32_0 : i32, i32
  }
  func.func @transform_4(%arg0: i32) -> (i32, i32) {
    %c0_i32 = arith.constant 0 : i32
    %c0_i32_0 = arith.constant 0 : i32
    %c0_i32_1 = arith.constant 0 : i32
    return %c0_i32, %c0_i32_0 : i32, i32
  }
  func.func @transform_5(%arg0: i32) -> (i32, i32) {
    %c0_i32 = arith.constant 0 : i32
    %c0_i32_0 = arith.constant 0 : i32
    %c0_i32_1 = arith.constant 0 : i32
    return %c0_i32, %c0_i32_0 : i32, i32
  }
  func.func @transform_6(%arg0: i32) -> (i32, i32, i32) {
    %c0_i32 = arith.constant 0 : i32
    %c0_i32_0 = arith.constant 0 : i32
    %c0_i32_1 = arith.constant 0 : i32
    return %arg0, %c0_i32, %c0_i32_0 : i32, i32, i32
  }
  func.func @transform_7(%arg0: i32) -> (i32, i32, i32) {
    %c0_i32 = arith.constant 0 : i32
    %c0_i32_0 = arith.constant 0 : i32
    %c0_i32_1 = arith.constant 0 : i32
    return %arg0, %c0_i32, %c0_i32_0 : i32, i32, i32
  }
}

</mosaic_0001>

<bundles_post_ra>
// kernel: word_span_encoder_forward.1
= control target key start
LH: loop header
LB: loop body
LE: loop exit
PB: predicated region body
PF: predicated region fallthrough
CT: control target
= control target key end

     0   :  { %vm2981_vm0 = vcmask 523264   ;;  %vm4678_vm1 = vcmask 1043456   ;;  %vm4679_vm2 = vcmask 588804   ;;  %s11300_s2 = inlined_call_operand.vmem [shape: bf16[256,768], index: 2, kind: input, shape index: {}]   ;;  %s11301_s0 = inlined_call_operand.vmem [shape: f32[8,64,256], index: 0, kind: input, shape index: {}]   ;;  %s11302_s3 = inlined_call_operand.vmem [shape: f32[1,768], index: 3, kind: input, shape index: {}]   ;;  %s11303_s4 = inlined_call_operand.vmem [shape: bf16[1024,200], index: 4, kind: input, shape index: {}]   ;;  %s11304_s1 = inlined_call_operand.vmem [shape: bf16[8,16,1024], index: 1, kind: input, shape index: {}]   ;;  %s11305_s6 = inlined_call_operand.vmem [shape: bf16[8,64,200], index: 6, kind: output, shape index: {0}]   ;;  %s11306_s5 = inlined_call_operand.vmem [shape: f32[1,200], index: 5, kind: input, shape index: {}]   ;;  %s11307_s7 = inlined_call_operand.vmem [shape: bf16[8,16,200], index: 7, kind: output, shape index: {1}]  }
   0x1   :  { %v7122_v0 = vld [vmem:[%s11300_s2 + $0x4] ss:$24 sps:$4 sm:$0xff]   ;;  %v7124_v1 = vld [vmem:[%s11300_s2] ss:$24 sps:$4 sm:$0xff]   ;;  %v7125_v2 = vld [vmem:[%s11300_s2 + $0x34] ss:$24 sps:$4 sm:$0xff]  }
   0x2   :  { %6961 = vmatprep.subr.bf16.mxu1 %v7122_v0  ;;  %826 = vmatprep.subr.bf16.mxu0 %v7122_v0  ;;  %v7127_v3 = vld [vmem:[%s11300_s2 + $0x30] ss:$24 sps:$4 sm:$0xff]   ;;  %v7128_v4 = vld [vmem:[%s11300_s2 + $0x64] ss:$24 sps:$4 sm:$0xff]   ;;  %v7130_v5 = vld [vmem:[%s11300_s2 + $0x60] ss:$24 sps:$4 sm:$0xff]  }
   0x3   :  { %6977 = vmatpush1.bf16.msra.mxu1 %v7124_v1  ;;  %827 = vmatpush1.bf16.msra.mxu0 %v7124_v1  ;;  %v7131_v6 = vld [vmem:[%s11300_s2 + $0x94] ss:$24 sps:$4 sm:$0xff]   ;;  %v7133_v7 = vld [vmem:[%s11300_s2 + $0x90] ss:$24 sps:$4 sm:$0xff]   ;;  %v7134_v8 = vld [vmem:[%s11300_s2 + $0xc4] ss:$24 sps:$4 sm:$0xff]  }
   0x4   :  { %6962 = vmatprep.subr.bf16.mxu1 %v7125_v2  ;;  %828 = vmatprep.subr.bf16.mxu0 %v7125_v2  ;;  %v7136_v9 = vld [vmem:[%s11300_s2 + $0xc0] ss:$24 sps:$4 sm:$0xff]   ;;  %v7137_v10 = vld [vmem:[%s11300_s2 + $0xf4] ss:$24 sps:$4 sm:$0xff]   ;;  %v7139_v11 = vld [vmem:[%s11300_s2 + $0xf0] ss:$24 sps:$4 sm:$0xff]  }
   0x5   :  { %v7140_v12 = vld [vmem:[%s11300_s2 + $0x124] ss:$24 sps:$4 sm:$0xff]   ;;  %v83_v13 = vld [vmem:[%s11301_s0 + $0x1c8] sm:$0xff]  ;;  %v7142_v16 = vld [vmem:[%s11300_s2 + $0x120] ss:$24 sps:$4 sm:$0xff]  }
   0x6   :  { %v85_v14 = vld [vmem:[%s11301_s0 + $0x1d8] sm:$0xff]  ;;  %v7143_v17 = vld [vmem:[%s11300_s2 + $0x154] ss:$24 sps:$4 sm:$0xff]   ;;  %v7145_v18 = vld [vmem:[%s11300_s2 + $0x150] ss:$24 sps:$4 sm:$0xff]  }
   0x7   :  { %6978 = vmatpush1.bf16.msra.mxu1 %v7127_v3  ;;  %829 = vmatpush1.bf16.msra.mxu0 %v7127_v3  ;;  %v7690_v15 = vpack.c.bf16 %v85_v14, %v83_v13  ;;  %v7146_v19 = vld [vmem:[%s11300_s2 + $0x184] ss:$24 sps:$4 sm:$0xff]   ;;  %v7148_v20 = vld [vmem:[%s11300_s2 + $0x180] ss:$24 sps:$4 sm:$0xff]   ;;  %v7149_v21 = vld [vmem:[%s11300_s2 + $0x1b4] ss:$24 sps:$4 sm:$0xff]  }
   0x8   :  { %6963 = vmatprep.subr.bf16.mxu1 %v7128_v4  ;;  %830 = vmatprep.subr.bf16.mxu0 %v7128_v4  ;;  %v7151_v22 = vld [vmem:[%s11300_s2 + $0x1b0] ss:$24 sps:$4 sm:$0xff]   ;;  %v7152_v23 = vld [vmem:[%s11300_s2 + $0x1e4] ss:$24 sps:$4 sm:$0xff]   ;;  %v7154_v24 = vld [vmem:[%s11300_s2 + $0x1e0] ss:$24 sps:$4 sm:$0xff]  }
   0x9   :  { %11369 = vst [vmem:[#allocation2_spill] sm:$0xff] %v7690_v15  ;;  %998 = vmatprep.mubr.bf16.mxu1 %v7690_v15  ;;  %v7155_v25 = vld [vmem:[%s11300_s2 + $0x214] ss:$24 sps:$4 sm:$0xff]   ;;  %v7157_v26 = vld [vmem:[%s11300_s2 + $0x210] ss:$24 sps:$4 sm:$0xff]   ;;  %v82_v35 = vld [vmem:[%s11301_s0 + $0x1c0] sm:$0xff] }
   0xa   :  { %v7158_v27 = vld [vmem:[%s11300_s2 + $0x244] ss:$24 sps:$4 sm:$0xff]   ;;  %v7160_v28 = vld [vmem:[%s11300_s2 + $0x240] ss:$24 sps:$4 sm:$0xff]   ;;  %v7161_v29 = vld [vmem:[%s11300_s2 + $0x274] ss:$24 sps:$4 sm:$0xff]  }
   0xb   :  { %6979 = vmatpush1.bf16.msra.mxu1 %v7130_v5  ;;  %831 = vmatpush1.bf16.msra.mxu0 %v7130_v5  ;;  %v7163_v30 = vld [vmem:[%s11300_s2 + $0x270] ss:$24 sps:$4 sm:$0xff]   ;;  %v7164_v31 = vld [vmem:[%s11300_s2 + $0x2a4] ss:$24 sps:$4 sm:$0xff]   ;;  %v7166_v32 = vld [vmem:[%s11300_s2 + $0x2a0] ss:$24 sps:$4 sm:$0xff]  }
   0xc   :  { %6964 = vmatprep.subr.bf16.mxu1 %v7131_v6  ;;  %832 = vmatprep.subr.bf16.mxu0 %v7131_v6  ;;  %v7167_v33 = vld [vmem:[%s11300_s2 + $0x2d4] ss:$24 sps:$4 sm:$0xff]   ;;  %v7169_v34 = vld [vmem:[%s11300_s2 + $0x2d0] ss:$24 sps:$4 sm:$0xff]   ;;  %v89_v38 = vld [vmem:[%s11301_s0 + $0x1f8] sm:$0xff] }
   0xd   :  { %v84_v36 = vld [vmem:[%s11301_s0 + $0x1d0] sm:$0xff]  ;;  %v87_v37 = vld [vmem:[%s11301_s0 + $0x1e8] sm:$0xff]  ;;  %v86_v44 = vld [vmem:[%s11301_s0 + $0x1e0] sm:$0xff] }
   0xe   :  { %v7172_v39 = vld [vmem:[%s11300_s2 + $0xc] ss:$24 sps:$4 sm:$0xff]   ;;  %v7170_v40 = vld [vmem:[%s11300_s2 + $0x8] ss:$24 sps:$4 sm:$0xff]   ;;  %v7768_v41 = vpack.c.bf16 %v84_v36, %v82_v35  ;;  %v7770_v42 = vpack.c.bf16 %v89_v38, %v87_v37  ;;  %v7175_v43 = vld [vmem:[%s11300_s2 + $0x3c] ss:$24 sps:$4 sm:$0xff]  }
   0xf   :  { %6980 = vmatpush1.bf16.msra.mxu1 %v7133_v7  ;;  %833 = vmatpush1.bf16.msra.mxu0 %v7133_v7  ;;  %v88_v45 = vld [vmem:[%s11301_s0 + $0x1f0] sm:$0xff]  ;;  %v91_v46 = vld [vmem:[%s11301_s0 + $0x208] sm:$0xff]  ;;  %v93_v47 = vld [vmem:[%s11301_s0 + $0x218] sm:$0xff] }
  0x10   :  { %6965 = vmatprep.subr.bf16.mxu1 %v7134_v8  ;;  %834 = vmatprep.subr.bf16.mxu0 %v7134_v8  ;;  %11370 = vst [vmem:[#allocation3_spill] sm:$0xff] %v7768_v41  ;;  %11371 = vst [vmem:[#allocation4_spill] sm:$0xff] %v7770_v42  ;;  %v7173_v48 = vld [vmem:[%s11300_s2 + $0x38] ss:$24 sps:$4 sm:$0xff]   ;;  %v7178_v49 = vld [vmem:[%s11300_s2 + $0x6c] ss:$24 sps:$4 sm:$0xff]   ;;  %v7798_v51 = vpack.c.bf16 %v88_v45, %v86_v44  ;;  %v7800_v52 = vpack.c.bf16 %v93_v47, %v91_v46 }
  0x11   :  { %v7176_v50 = vld [vmem:[%s11300_s2 + $0x68] ss:$24 sps:$4 sm:$0xff]   ;;  %v7181_v53 = vld [vmem:[%s11300_s2 + $0x9c] ss:$24 sps:$4 sm:$0xff]   ;;  %v7179_v58 = vld [vmem:[%s11300_s2 + $0x98] ss:$24 sps:$4 sm:$0xff]  }
  0x12   :  { %11372 = vst [vmem:[#allocation5_spill] sm:$0xff] %v7798_v51  ;;  %11373 = vst [vmem:[#allocation6_spill] sm:$0xff] %v7800_v52  ;;  %v90_v54 = vld [vmem:[%s11301_s0 + $0x200] sm:$0xff]  ;;  %v92_v55 = vld [vmem:[%s11301_s0 + $0x210] sm:$0xff] }
  0x13   :  { %6981 = vmatpush1.bf16.msra.mxu1 %v7136_v9  ;;  %835 = vmatpush1.bf16.msra.mxu0 %v7136_v9  ;;  %v95_v56 = vld [vmem:[%s11301_s0 + $0x228] sm:$0xff]  ;;  %v97_v57 = vld [vmem:[%s11301_s0 + $0x238] sm:$0xff]  ;;  %v26_v62 = vld [vmem:[%s11301_s0] sm:$0xff]  ;;  %v7841_v2 = vpack.c.bf16 %v92_v55, %v90_v54 }
  0x14   :  { %6966 = vmatprep.subr.bf16.mxu1 %v7137_v10  ;;  %836 = vmatprep.subr.bf16.mxu0 %v7137_v10  ;;  %v7184_v59 = vld [vmem:[%s11300_s2 + $0xcc] ss:$24 sps:$4 sm:$0xff]   ;;  %v29_v61 = vld [vmem:[%s11301_s0 + $0x18] sm:$0xff]  ;;  %v28_v63 = vld [vmem:[%s11301_s0 + $0x10] sm:$0xff]  ;;  %v7844_v3 = vpack.c.bf16 %v97_v57, %v95_v56 }
  0x15   :  { %v27_v60 = vld [vmem:[%s11301_s0 + $0x8] sm:$0xff]  ;;  %v7839_v1 = vpack.c.bf16 %v28_v63, %v26_v62  ;;  %11374 = vst [vmem:[#allocation7_spill] sm:$0xff] %v7841_v2  ;;  %v7187_v5 = vld [vmem:[%s11300_s2 + $0xfc] ss:$24 sps:$4 sm:$0xff]   ;;  %v94_v6 = vld [vmem:[%s11301_s0 + $0x220] sm:$0xff] }
  0x16   :  { %v7837_v0 = vpack.c.bf16 %v29_v61, %v27_v60  ;;  %11375 = vst [vmem:[#allocation8_spill] sm:$0xff] %v7844_v3  ;;  %v7182_v4 = vld [vmem:[%s11300_s2 + $0xc8] ss:$24 sps:$4 sm:$0xff]   ;;  %v96_v7 = vld [vmem:[%s11301_s0 + $0x230] sm:$0xff]  ;;  %v33_v9 = vld [vmem:[%s11301_s0 + $0x38] sm:$0xff] }
  0x17   :  { %6982 = vmatpush1.bf16.msra.mxu1 %v7139_v11  ;;  %837 = vmatpush1.bf16.msra.mxu0 %v7139_v11  ;;  %v31_v8 = vld [vmem:[%s11301_s0 + $0x28] sm:$0xff]  ;;  %v7185_v10 = vld [vmem:[%s11300_s2 + $0xf8] ss:$24 sps:$4 sm:$0xff]   ;;  %v7199_v38 = vld [vmem:[%s11300_s2 + $0x1bc] ss:$24 sps:$4 sm:$0xff]  }
  0x18   :  { %6967 = vmatprep.subr.bf16.mxu1 %v7140_v12  ;;  %838 = vmatprep.subr.bf16.mxu0 %v7140_v12  ;;  %v7870_v11 = vpack.c.bf16 %v33_v9, %v31_v8  ;;  %v30_v12 = vld [vmem:[%s11301_s0 + $0x20] sm:$0xff]  ;;  %v32_v13 = vld [vmem:[%s11301_s0 + $0x30] sm:$0xff]  ;;  %v99_v14 = vld [vmem:[%s11301_s0 + $0x248] sm:$0xff] }
  0x19   :  { %858 = vmatprep.mubr.bf16.mxu0 %v7837_v0  ;;  %v7194_v37 = vld [vmem:[%s11300_s2 + $0x188] ss:$24 sps:$4 sm:$0xff]   ;;  %v41_v44 = vld [vmem:[%s11301_s0 + $0x78] sm:$0xff]  ;;  %v108_v60 = vld [vmem:[%s11301_s0 + $0x290] sm:$0xff] }
  0x1a   :  { %v7197_v45 = vld [vmem:[%s11300_s2 + $0x1b8] ss:$24 sps:$4 sm:$0xff]   ;;  %v38_v47 = vld [vmem:[%s11301_s0 + $0x60] sm:$0xff]  ;;  %v43_v61 = vld [vmem:[%s11301_s0 + $0x88] sm:$0xff] }
  0x1b   :  { %6983 = vmatpush1.bf16.msra.mxu1 %v7142_v16  ;;  %839 = vmatpush1.bf16.msra.mxu0 %v7142_v16  ;;  %v101_v16 = vld [vmem:[%s11301_s0 + $0x258] sm:$0xff]  ;;  %v7200_v57 = vld [vmem:[%s11300_s2 + $0x1e8] ss:$24 sps:$4 sm:$0xff]   ;;  %v7208_v9 = vld [vmem:[%s11300_s2 + $0x24c] ss:$24 sps:$4 sm:$0xff]  }
  0x1c   :  { %6968 = vmatprep.subr.bf16.mxu1 %v7143_v17  ;;  %840 = vmatprep.subr.bf16.mxu0 %v7143_v17  ;;  %v7190_v17 = vld [vmem:[%s11300_s2 + $0x12c] ss:$24 sps:$4 sm:$0xff]   ;;  %v45_v62 = vld [vmem:[%s11301_s0 + $0x98] sm:$0xff]  ;;  %vm10296_vm3 = vmor %vm4679_vm2, %vm4678_vm1 }
  0x1d   :  { %v7203_v63 = vld [vmem:[%s11300_s2 + $0x218] ss:$24 sps:$4 sm:$0xff]  }
  0x1e   :  { %v113_v8 = vld [vmem:[%s11301_s0 + $0x2b8] sm:$0xff] }
  0x1f   :  { %6984 = vmatpush1.bf16.msra.mxu1 %v7145_v18  ;;  %841 = vmatpush1.bf16.msra.mxu0 %v7145_v18  ;;  %v7887_v18 = vpack.c.bf16 %v32_v13, %v30_v12 }
  0x20   :  { %6969 = vmatprep.subr.bf16.mxu1 %v7146_v19  ;;  %842 = vmatprep.subr.bf16.mxu0 %v7146_v19  ;;  %v7890_v19 = vpack.c.bf16 %v96_v7, %v94_v6  ;;  %v44_v6 = vld [vmem:[%s11301_s0 + $0x90] sm:$0xff]  ;;  %v111_v7 = vld [vmem:[%s11301_s0 + $0x2a8] sm:$0xff] }
  0x21   :  { %v8036_v13 = vpack.c.bf16 %v113_v8, %v111_v7  ;;  %v54_v7 = vld [vmem:[%s11301_s0 + $0xe0] sm:$0xff]  ;;  %v56_v8 = vld [vmem:[%s11301_s0 + $0xf0] sm:$0xff] }
  0x22   :  { %11376 = vst [vmem:[#allocation9_spill] sm:$0xff] %v7890_v19 }
  0x23   :  { %6985 = vmatpush1.bf16.msra.mxu1 %v7148_v20  ;;  %843 = vmatpush1.bf16.msra.mxu0 %v7148_v20  ;;  %v7892_v20 = vpack.c.bf16 %v101_v16, %v99_v14  ;;  %11382 = vst [vmem:[#allocation15_spill] sm:$0xff] %v8036_v13  ;;  %v7206_v14 = vld [vmem:[%s11300_s2 + $0x248] ss:$24 sps:$4 sm:$0xff]   ;;  %v7211_v16 = vld [vmem:[%s11300_s2 + $0x27c] ss:$24 sps:$4 sm:$0xff]  }
  0x24   :  { %6970 = vmatprep.subr.bf16.mxu1 %v7149_v21  ;;  %844 = vmatprep.subr.bf16.mxu0 %v7149_v21  ;;  %v7188_v21 = vld [vmem:[%s11300_s2 + $0x128] ss:$24 sps:$4 sm:$0xff]  }
  0x25   :  { %11377 = vst [vmem:[#allocation10_spill] sm:$0xff] %v7892_v20 }
  0x27   :  { %6986 = vmatpush1.bf16.msra.mxu1 %v7151_v22  ;;  %845 = vmatpush1.bf16.msra.mxu0 %v7151_v22  ;;  %v7193_v22 = vld [vmem:[%s11300_s2 + $0x15c] ss:$24 sps:$4 sm:$0xff]  }
  0x28   :  { %6971 = vmatprep.subr.bf16.mxu1 %v7152_v23  ;;  %846 = vmatprep.subr.bf16.mxu0 %v7152_v23  ;;  %v98_v23 = vld [vmem:[%s11301_s0 + $0x240] sm:$0xff] }
  0x2b   :  { %6987 = vmatpush1.bf16.msra.mxu1 %v7154_v24  ;;  %847 = vmatpush1.bf16.msra.mxu0 %v7154_v24  ;;  %v100_v24 = vld [vmem:[%s11301_s0 + $0x250] sm:$0xff] }
  0x2c   :  { %6972 = vmatprep.subr.bf16.mxu1 %v7155_v25  ;;  %848 = vmatprep.subr.bf16.mxu0 %v7155_v25  ;;  %v35_v25 = vld [vmem:[%s11301_s0 + $0x48] sm:$0xff]  ;;  %v7938_v35 = vpack.c.bf16 %v100_v24, %v98_v23  ;;  %v49_v23 = vld [vmem:[%s11301_s0 + $0xb8] sm:$0xff] }
  0x2d   :  { %v7209_v24 = vld [vmem:[%s11300_s2 + $0x278] ss:$24 sps:$4 sm:$0xff]  }
  0x2e   :  { %11378 = vst [vmem:[#allocation11_spill] sm:$0xff] %v7938_v35 }
  0x2f   :  { %6988 = vmatpush1.bf16.msra.mxu1 %v7157_v26  ;;  %849 = vmatpush1.bf16.msra.mxu0 %v7157_v26  ;;  %v37_v26 = vld [vmem:[%s11301_s0 + $0x58] sm:$0xff] }
  0x30   :  { %6973 = vmatprep.subr.bf16.mxu1 %v7158_v27  ;;  %850 = vmatprep.subr.bf16.mxu0 %v7158_v27  ;;  %v7191_v27 = vld [vmem:[%s11300_s2 + $0x158] ss:$24 sps:$4 sm:$0xff]  }
  0x33   :  { %6989 = vmatpush1.bf16.msra.mxu1 %v7160_v28  ;;  %851 = vmatpush1.bf16.msra.mxu0 %v7160_v28  ;;  %v7918_v28 = vpack.c.bf16 %v37_v26, %v35_v25  ;;  %v46_v26 = vld [vmem:[%s11301_s0 + $0xa0] sm:$0xff] }
  0x34   :  { %6974 = vmatprep.subr.bf16.mxu1 %v7161_v29  ;;  %852 = vmatprep.subr.bf16.mxu0 %v7161_v29  ;;  %v34_v29 = vld [vmem:[%s11301_s0 + $0x40] sm:$0xff] }
  0x37   :  { %6990 = vmatpush1.bf16.msra.mxu1 %v7163_v30  ;;  %853 = vmatpush1.bf16.msra.mxu0 %v7163_v30  ;;  %v36_v30 = vld [vmem:[%s11301_s0 + $0x50] sm:$0xff] }
  0x38   :  { %6975 = vmatprep.subr.bf16.mxu1 %v7164_v31  ;;  %854 = vmatprep.subr.bf16.mxu0 %v7164_v31  ;;  %v103_v31 = vld [vmem:[%s11301_s0 + $0x268] sm:$0xff] }
  0x3b   :  { %6991 = vmatpush1.bf16.msra.mxu1 %v7166_v32  ;;  %855 = vmatpush1.bf16.msra.mxu0 %v7166_v32  ;;  %v105_v32 = vld [vmem:[%s11301_s0 + $0x278] sm:$0xff] }
  0x3c   :  { %6976 = vmatprep.subr.bf16.mxu1 %v7167_v33  ;;  %856 = vmatprep.subr.bf16.mxu0 %v7167_v33  ;;  %v7196_v33 = vld [vmem:[%s11300_s2 + $0x18c] ss:$24 sps:$4 sm:$0xff]   ;;  %v7940_v36 = vpack.c.bf16 %v105_v32, %v103_v31 }
  0x3d   :  { %v7214_v31 = vld [vmem:[%s11300_s2 + $0x2ac] ss:$24 sps:$4 sm:$0xff]  }
  0x3e   :  { %11379 = vst [vmem:[#allocation12_spill] sm:$0xff] %v7940_v36 }
  0x3f   :  { %6992 = vmatpush1.bf16.msra.mxu1 %v7169_v34  ;;  %857 = vmatpush1.bf16.msra.mxu0 %v7169_v34  ;;  %v7935_v34 = vpack.c.bf16 %v36_v30, %v34_v29  ;;  %v115_v29 = vld [vmem:[%s11301_s0 + $0x2c8] sm:$0xff]  ;;  %v117_v30 = vld [vmem:[%s11301_s0 + $0x2d8] sm:$0xff] }
  0x40   :  { %1179 = vmatprep.subr.bf16.mxu1 %v7172_v39  ;;  %v102_v39 = vld [vmem:[%s11301_s0 + $0x260] sm:$0xff] }
  0x42   :  { %999 = vmatmul.mubr.bf16.vlgmr.msra.gmra.mrb[0].mxu1 %v7768_v41  ;;  %859 = vmatmul.mubr.bf16.vlgmr.msra.gmra.mrb[0].mxu0 %v7839_v1 }
  0x43   :  { %1008 = vmatprep.mubr.bf16.mxu1 %v7770_v42  ;;  %1180 = vmatpush1.bf16.msra.mxu1 %v7170_v40  ;;  %v104_v40 = vld [vmem:[%s11301_s0 + $0x270] sm:$0xff] }
  0x44   :  { %1181 = vmatprep.subr.bf16.mxu1 %v7175_v43  ;;  %868 = vmatprep.mubr.bf16.mxu0 %v7870_v11  ;;  %v39_v43 = vld [vmem:[%s11301_s0 + $0x68] sm:$0xff]  ;;  %v7986_v55 = vpack.c.bf16 %v104_v40, %v102_v39  ;;  %v7217_v39 = vld [vmem:[%s11300_s2 + $0x2dc] ss:$24 sps:$4 sm:$0xff]   ;;  %v114_v40 = vld [vmem:[%s11301_s0 + $0x2c0] sm:$0xff] }
  0x45   :  { %v7966_v46 = vpack.c.bf16 %v41_v44, %v39_v43  ;;  %v116_v43 = vld [vmem:[%s11301_s0 + $0x2d0] sm:$0xff]  ;;  %v51_v44 = vld [vmem:[%s11301_s0 + $0xc8] sm:$0xff] }
  0x47   :  { %1182 = vmatpush1.bf16.msra.mxu1 %v7173_v48  ;;  %v40_v48 = vld [vmem:[%s11301_s0 + $0x70] sm:$0xff] }
  0x48   :  { %1183 = vmatprep.subr.bf16.mxu1 %v7178_v49  ;;  %v107_v49 = vld [vmem:[%s11301_s0 + $0x288] sm:$0xff]  ;;  %v7983_v54 = vpack.c.bf16 %v40_v48, %v38_v47  ;;  %v7215_v47 = vld [vmem:[%s11300_s2 + $0x2d8] ss:$24 sps:$4 sm:$0xff]  }
  0x4a   :  { %1009 = vmatmul.mubr.bf16.gmra.mrb[4].mxu1 %v7798_v51  ;;  %869 = vmatmul.mubr.bf16.gmra.mrb[4].mxu0 %v7887_v18 }
  0x4b   :  { %1018 = vmatprep.mubr.bf16.mxu1 %v7800_v52  ;;  %1184 = vmatpush1.bf16.msra.mxu1 %v7176_v50  ;;  %v109_v50 = vld [vmem:[%s11301_s0 + $0x298] sm:$0xff] }
  0x4c   :  { %1185 = vmatprep.subr.bf16.mxu1 %v7181_v53  ;;  %878 = vmatprep.mubr.bf16.mxu0 %v7918_v28  ;;  %v7202_v53 = vld [vmem:[%s11300_s2 + $0x1ec] ss:$24 sps:$4 sm:$0xff]   ;;  %v7988_v56 = vpack.c.bf16 %v109_v50, %v107_v49  ;;  %v52_v50 = vld [vmem:[%s11301_s0 + $0xd0] sm:$0xff] }
  0x4d   :  { %v50_v49 = vld [vmem:[%s11301_s0 + $0xc0] sm:$0xff] }
  0x4e   :  { %11380 = vst [vmem:[#allocation13_spill] sm:$0xff] %v7988_v56 }
  0x4f   :  { %1186 = vmatpush1.bf16.msra.mxu1 %v7179_v58  ;;  %v7205_v58 = vld [vmem:[%s11300_s2 + $0x21c] ss:$24 sps:$4 sm:$0xff]  }
  0x50   :  { %1187 = vmatprep.subr.bf16.mxu1 %v7184_v59  ;;  %v106_v59 = vld [vmem:[%s11301_s0 + $0x280] sm:$0xff] }
  0x51   :  { %v8034_v12 = vpack.c.bf16 %v108_v60, %v106_v59  ;;  %v8127_v59 = vpack.c.bf16 %v116_v43, %v114_v40 }
  0x52   :  { %1019 = vmatmul.mubr.bf16.gmra.mrb[8].mxu1 %v7841_v2  ;;  %879 = vmatmul.mubr.bf16.gmra.mrb[8].mxu0 %v7935_v34 }
  0x53   :  { %1028 = vmatprep.mubr.bf16.mxu1 %v7844_v3  ;;  %1188 = vmatpush1.bf16.msra.mxu1 %v7182_v4  ;;  %v8014_v4 = vpack.c.bf16 %v45_v62, %v43_v61  ;;  %11381 = vst [vmem:[#allocation14_spill] sm:$0xff] %v8034_v12  ;;  %v118_v61 = vld [vmem:[%s11301_s0 + $0x2e0] sm:$0xff]  ;;  %v55_v62 = vld [vmem:[%s11301_s0 + $0xe8] sm:$0xff] }
  0x54   :  { %1189 = vmatprep.subr.bf16.mxu1 %v7187_v5  ;;  %888 = vmatprep.mubr.bf16.mxu0 %v7966_v46  ;;  %v42_v5 = vld [vmem:[%s11301_s0 + $0x80] sm:$0xff] }
  0x57   :  { %1190 = vmatpush1.bf16.msra.mxu1 %v7185_v10  ;;  %v8031_v10 = vpack.c.bf16 %v44_v6, %v42_v5  ;;  %v120_v5 = vld [vmem:[%s11301_s0 + $0x2f0] sm:$0xff] }
  0x58   :  { %1191 = vmatprep.subr.bf16.mxu1 %v7190_v17  ;;  %v110_v17 = vld [vmem:[%s11301_s0 + $0x2a0] sm:$0xff] }
  0x5a   :  { %1029 = vmatmul.mubr.bf16.gmra.mrb[12].mxu1 %v7890_v19  ;;  %889 = vmatmul.mubr.bf16.gmra.mrb[12].mxu0 %v7983_v54 }
  0x5b   :  { %1038 = vmatprep.mubr.bf16.mxu1 %v7892_v20  ;;  %1192 = vmatpush1.bf16.msra.mxu1 %v7188_v21  ;;  %v112_v21 = vld [vmem:[%s11301_s0 + $0x2b0] sm:$0xff] }
  0x5c   :  { %1193 = vmatprep.subr.bf16.mxu1 %v7193_v22  ;;  %898 = vmatprep.mubr.bf16.mxu0 %v8014_v4  ;;  %v47_v22 = vld [vmem:[%s11301_s0 + $0xa8] sm:$0xff] }
  0x5d   :  { %v8062_v25 = vpack.c.bf16 %v49_v23, %v47_v22  ;;  %v122_v22 = vld [vmem:[%s11301_s0 + $0x300] sm:$0xff]  ;;  %v59_v23 = vld [vmem:[%s11301_s0 + $0x108] sm:$0xff] }
  0x5f   :  { %1194 = vmatpush1.bf16.msra.mxu1 %v7191_v27  ;;  %11383 = vst [vmem:[#allocation16_spill] sm:$0xff] %v8062_v25  ;;  %v48_v27 = vld [vmem:[%s11301_s0 + $0xb0] sm:$0xff] }
  0x60   :  { %1195 = vmatprep.subr.bf16.mxu1 %v7196_v33  ;;  %v8079_v32 = vpack.c.bf16 %v48_v27, %v46_v26  ;;  %v8082_v33 = vpack.c.bf16 %v112_v21, %v110_v17  ;;  %v8163_v17 = vpack.c.bf16 %v120_v5, %v118_v61  ;;  %v124_v26 = vld [vmem:[%s11301_s0 + $0x310] sm:$0xff] }
  0x61   :  { %v8199_v40 = vpack.c.bf16 %v124_v26, %v122_v22  ;;  %v64_v5 = vld [vmem:[%s11301_s0 + $0x130] sm:$0xff]  ;;  %v137_v22 = vld [vmem:[%s11301_s0 + $0x378] sm:$0xff] }
  0x62   :  { %1039 = vmatmul.mubr.bf16.gmra.mrb[16].mxu1 %v7938_v35  ;;  %899 = vmatmul.mubr.bf16.gmra.mrb[16].mxu0 %v8031_v10  ;;  %11384 = vst [vmem:[#allocation17_spill] sm:$0xff] %v8079_v32  ;;  %11385 = vst [vmem:[#allocation18_spill] sm:$0xff] %v8082_v33  ;;  %v69_v26 = vld [vmem:[%s11301_s0 + $0x158] sm:$0xff] }
  0x63   :  { %1048 = vmatprep.mubr.bf16.mxu1 %v7940_v36  ;;  %1196 = vmatpush1.bf16.msra.mxu1 %v7194_v37  ;;  %v8084_v37 = vpack.c.bf16 %v117_v30, %v115_v29  ;;  %v58_v29 = vld [vmem:[%s11301_s0 + $0x100] sm:$0xff]  ;;  %v60_v30 = vld [vmem:[%s11301_s0 + $0x110] sm:$0xff] }
  0x64   :  { %1197 = vmatprep.subr.bf16.mxu1 %v7199_v38  ;;  %908 = vmatprep.mubr.bf16.mxu0 %v8062_v25  ;;  %v7212_v38 = vld [vmem:[%s11300_s2 + $0x2a8] ss:$24 sps:$4 sm:$0xff]  }
  0x65   :  { %11386 = vst [vmem:[#allocation19_spill] sm:$0xff] %v8084_v37 }
  0x67   :  { %1198 = vmatpush1.bf16.msra.mxu1 %v7197_v45  ;;  %v53_v45 = vld [vmem:[%s11301_s0 + $0xd8] sm:$0xff] }
  0x68   :  { %1199 = vmatprep.subr.bf16.mxu1 %v7202_v53  ;;  %v8110_v48 = vpack.c.bf16 %v53_v45, %v51_v44  ;;  %v119_v53 = vld [vmem:[%s11301_s0 + $0x2e8] sm:$0xff]  ;;  %v126_v44 = vld [vmem:[%s11301_s0 + $0x320] sm:$0xff]  ;;  %v128_v45 = vld [vmem:[%s11301_s0 + $0x330] sm:$0xff] }
  0x6a   :  { %1049 = vmatmul.mubr.bf16.gmra.mrb[20].mxu1 %v7986_v55  ;;  %909 = vmatmul.mubr.bf16.gmra.mrb[20].mxu0 %v8079_v32  ;;  %11387 = vst [vmem:[#allocation20_spill] sm:$0xff] %v8110_v48 }
  0x6b   :  { %1058 = vmatprep.mubr.bf16.mxu1 %v7988_v56  ;;  %1200 = vmatpush1.bf16.msra.mxu1 %v7200_v57  ;;  %v121_v57 = vld [vmem:[%s11301_s0 + $0x2f8] sm:$0xff] }
  0x6c   :  { %1201 = vmatprep.subr.bf16.mxu1 %v7205_v58  ;;  %v8124_v58 = vpack.c.bf16 %v52_v50, %v50_v49  ;;  %918 = vmatprep.mubr.bf16.mxu0 %v8110_v48  ;;  %v8129_v60 = vpack.c.bf16 %v121_v57, %v119_v53  ;;  %v133_v49 = vld [vmem:[%s11301_s0 + $0x358] sm:$0xff]  ;;  %v8218_v50 = vpack.c.bf16 %v128_v45, %v126_v44  ;;  %v63_v53 = vld [vmem:[%s11301_s0 + $0x128] sm:$0xff]  ;;  %v134_v45 = vld [vmem:[%s11301_s0 + $0x360] sm:$0xff] }
  0x6d   :  { %v65_v57 = vld [vmem:[%s11301_s0 + $0x138] sm:$0xff] }
  0x6e   :  { %11388 = vst [vmem:[#allocation21_spill] sm:$0xff] %v8124_v58  ;;  %11389 = vst [vmem:[#allocation22_spill] sm:$0xff] %v8129_v60 }
  0x6f   :  { %1202 = vmatpush1.bf16.msra.mxu1 %v7203_v63  ;;  %v57_v63 = vld [vmem:[%s11301_s0 + $0xf8] sm:$0xff]  ;;  %11395 = vst [vmem:[#allocation28_spill] sm:$0xff] %v8218_v50 }
  0x70   :  { %1203 = vmatprep.subr.bf16.mxu1 %v7208_v9  ;;  %v8146_v6 = vpack.c.bf16 %v57_v63, %v55_v62  ;;  %v123_v9 = vld [vmem:[%s11301_s0 + $0x308] sm:$0xff]  ;;  %v8228_v62 = vpack.c.bf16 %v65_v57, %v63_v53  ;;  %v62_v63 = vld [vmem:[%s11301_s0 + $0x120] sm:$0xff]  ;;  %v141_v53 = vld [vmem:[%s11301_s0 + $0x398] sm:$0xff] }
  0x72   :  { %1059 = vmatmul.mubr.bf16.gmra.mrb[24].mxu1 %v8034_v12  ;;  %919 = vmatmul.mubr.bf16.gmra.mrb[24].mxu0 %v8124_v58  ;;  %11390 = vst [vmem:[#allocation23_spill] sm:$0xff] %v8146_v6  ;;  %11397 = vst [vmem:[#allocation30_spill] sm:$0xff] %v8228_v62 }
  0x73   :  { %1068 = vmatprep.mubr.bf16.mxu1 %v8036_v13  ;;  %1204 = vmatpush1.bf16.msra.mxu1 %v7206_v14  ;;  %v125_v14 = vld [vmem:[%s11301_s0 + $0x318] sm:$0xff] }
  0x74   :  { %1205 = vmatprep.subr.bf16.mxu1 %v7211_v16  ;;  %v8160_v16 = vpack.c.bf16 %v56_v8, %v54_v7  ;;  %928 = vmatprep.mubr.bf16.mxu0 %v8146_v6  ;;  %v8165_v21 = vpack.c.bf16 %v125_v14, %v123_v9  ;;  %v8236_v7 = vpack.c.bf16 %v64_v5, %v62_v63  ;;  %v130_v8 = vld [vmem:[%s11301_s0 + $0x340] sm:$0xff]  ;;  %v132_v9 = vld [vmem:[%s11301_s0 + $0x350] sm:$0xff]  ;;  %v135_v14 = vld [vmem:[%s11301_s0 + $0x368] sm:$0xff] }
  0x75   :  { %v71_v63 = vld [vmem:[%s11301_s0 + $0x168] sm:$0xff]  ;;  %v73_v5 = vld [vmem:[%s11301_s0 + $0x178] sm:$0xff] }
  0x76   :  { %11391 = vst [vmem:[#allocation24_spill] sm:$0xff] %v8160_v16 }
  0x77   :  { %1206 = vmatpush1.bf16.msra.mxu1 %v7209_v24  ;;  %v61_v24 = vld [vmem:[%s11301_s0 + $0x118] sm:$0xff] }
  0x78   :  { %1207 = vmatprep.subr.bf16.mxu1 %v7214_v31  ;;  %v8182_v27 = vpack.c.bf16 %v61_v24, %v59_v23  ;;  %v127_v31 = vld [vmem:[%s11301_s0 + $0x328] sm:$0xff]  ;;  %v8254_v23 = vpack.c.bf16 %v132_v9, %v130_v8  ;;  %v8300_v9 = vpack.c.bf16 %v73_v5, %v71_v63 }
  0x79   :  { %v67_v24 = vld [vmem:[%s11301_s0 + $0x148] sm:$0xff] }
  0x7a   :  { %1069 = vmatmul.mubr.bf16.gmra.mrb[28].mxu1 %v8082_v33  ;;  %929 = vmatmul.mubr.bf16.gmra.mrb[28].mxu0 %v8160_v16  ;;  %11392 = vst [vmem:[#allocation25_spill] sm:$0xff] %v8182_v27  ;;  %11398 = vst [vmem:[#allocation31_spill] sm:$0xff] %v8254_v23 }
  0x7b   :  { %1078 = vmatprep.mubr.bf16.mxu1 %v8084_v37  ;;  %1208 = vmatpush1.bf16.msra.mxu1 %v7212_v38  ;;  %v129_v38 = vld [vmem:[%s11301_s0 + $0x338] sm:$0xff] }
  0x7c   :  { %1209 = vmatprep.subr.bf16.mxu1 %v7217_v39  ;;  %v8196_v39 = vpack.c.bf16 %v60_v30, %v58_v29  ;;  %938 = vmatprep.mubr.bf16.mxu0 %v8182_v27  ;;  %v8201_v43 = vpack.c.bf16 %v129_v38, %v127_v31  ;;  %v8262_v29 = vpack.c.bf16 %v137_v22, %v135_v14  ;;  %v66_v31 = vld [vmem:[%s11301_s0 + $0x140] sm:$0xff]  ;;  %v68_v38 = vld [vmem:[%s11301_s0 + $0x150] sm:$0xff] }
  0x7d   :  { %v8264_v30 = vpack.c.bf16 %v69_v26, %v67_v24  ;;  %v8272_v44 = vpack.c.bf16 %v68_v38, %v66_v31  ;;  %v70_v14 = vld [vmem:[%s11301_s0 + $0x160] sm:$0xff]  ;;  %v72_v22 = vld [vmem:[%s11301_s0 + $0x170] sm:$0xff]  ;;  %v143_v38 = vld [vmem:[%s11301_s0 + $0x3a8] sm:$0xff] }
  0x7e   :  { %11393 = vst [vmem:[#allocation26_spill] sm:$0xff] %v8196_v39  ;;  %11394 = vst [vmem:[#allocation27_spill] sm:$0xff] %v8201_v43  ;;  %v8308_v24 = vpack.c.bf16 %v72_v22, %v70_v14  ;;  %v138_v26 = vld [vmem:[%s11301_s0 + $0x380] sm:$0xff]  ;;  %v140_v31 = vld [vmem:[%s11301_s0 + $0x390] sm:$0xff] }
  0x7f   :  { %1210 = vmatpush1.bf16.msra.mxu1 %v7215_v47  ;;  %v131_v47 = vld [vmem:[%s11301_s0 + $0x348] sm:$0xff]  ;;  %11399 = vst [vmem:[#allocation32_spill] sm:$0xff] %v8262_v29  ;;  %v74_v14 = vld [vmem:[%s11301_s0 + $0x180] sm:$0xff]  ;;  %v76_v22 = vld [vmem:[%s11301_s0 + $0x190] sm:$0xff] }
  0x80   :  { %v8226_v61 = vpack.c.bf16 %v133_v49, %v131_v47  ;;  %v136_v47 = vld [vmem:[%s11301_s0 + $0x370] sm:$0xff]  ;;  %v139_v49 = vld [vmem:[%s11301_s0 + $0x388] sm:$0xff] }
  0x81   :  { %v8290_v57 = vpack.c.bf16 %v136_v47, %v134_v45  ;;  %v8298_v8 = vpack.c.bf16 %v141_v53, %v139_v49  ;;  %v145_v45 = vld [vmem:[%s11301_s0 + $0x3b8] sm:$0xff]  ;;  %v8326_v47 = vpack.c.bf16 %v140_v31, %v138_v26  ;;  %v75_v49 = vld [vmem:[%s11301_s0 + $0x188] sm:$0xff]  ;;  %v8344_v26 = vpack.c.bf16 %v76_v22, %v74_v14  ;;  %v142_v31 = vld [vmem:[%s11301_s0 + $0x3a0] sm:$0xff] }
  0x82   :  { %1079 = vmatmul.mubr.bf16.gmra.mrb[32].mxu1 %v8127_v59  ;;  %939 = vmatmul.mubr.bf16.gmra.mrb[32].mxu0 %v8196_v39  ;;  %11396 = vst [vmem:[#allocation29_spill] sm:$0xff] %v8226_v61  ;;  %v77_v53 = vld [vmem:[%s11301_s0 + $0x198] sm:$0xff]  ;;  %v8334_v63 = vpack.c.bf16 %v145_v45, %v143_v38  ;;  %v144_v38 = vld [vmem:[%s11301_s0 + $0x3b0] sm:$0xff]  ;;  %v147_v45 = vld [vmem:[%s11301_s0 + $0x3c8] sm:$0xff] }
  0x83   :  { %1088 = vmatprep.mubr.bf16.mxu1 %v8129_v60  ;;  %948 = vmatprep.mubr.bf16.mxu0 %v8228_v62  ;;  %11400 = vst [vmem:[#allocation33_spill] sm:$0xff] %v8290_v57  ;;  %11401 = vst [vmem:[#allocation34_spill] sm:$0xff] %v8298_v8  ;;  %v8336_v5 = vpack.c.bf16 %v77_v53, %v75_v49  ;;  %v149_v49 = vld [vmem:[%s11301_s0 + $0x3d8] sm:$0xff]  ;;  %v8362_v53 = vpack.c.bf16 %v144_v38, %v142_v31  ;;  %v79_v14 = vld [vmem:[%s11301_s0 + $0x1a8] sm:$0xff] }
  0x84   :  { %11402 = vst [vmem:[#allocation35_spill] sm:$0xff] %v8326_v47  ;;  %11403 = vst [vmem:[#allocation36_spill] sm:$0xff] %v8334_v63  ;;  %v81_v22 = vld [vmem:[%s11301_s0 + $0x1b8] sm:$0xff]  ;;  %v80_v31 = vld [vmem:[%s11301_s0 + $0x1b0] sm:$0xff] }
  0x85   :  { %11404 = vst [vmem:[#allocation37_spill] sm:$0xff] %v8362_v53 }
  0x8a   :  { %1089 = vmatmul.mubr.bf16.gmra.mrb[36].mxu1 %v8163_v17  ;;  %949 = vmatmul.mubr.bf16.gmra.mrb[36].mxu0 %v8236_v7 }
  0x8b   :  { %1098 = vmatprep.mubr.bf16.mxu1 %v8165_v21  ;;  %958 = vmatprep.mubr.bf16.mxu0 %v8264_v30 }
  0x92   :  { %1099 = vmatmul.mubr.bf16.gmra.mrb[40].mxu1 %v8199_v40  ;;  %959 = vmatmul.mubr.bf16.gmra.mrb[40].mxu0 %v8272_v44 }
  0x93   :  { %1108 = vmatprep.mubr.bf16.mxu1 %v8201_v43  ;;  %968 = vmatprep.mubr.bf16.mxu0 %v8300_v9 }
  0x9a   :  { %1109 = vmatmul.mubr.bf16.gmra.mrb[44].mxu1 %v8218_v50  ;;  %969 = vmatmul.mubr.bf16.gmra.mrb[44].mxu0 %v8308_v24 }
  0x9b   :  { %1118 = vmatprep.mubr.bf16.mxu1 %v8226_v61  ;;  %978 = vmatprep.mubr.bf16.mxu0 %v8336_v5 }
  0xa2   :  { %1119 = vmatmul.mubr.bf16.gmra.mrb[48].mxu1 %v8254_v23  ;;  %979 = vmatmul.mubr.bf16.gmra.mrb[48].mxu0 %v8344_v26 }
  0xa3   :  { %1128 = vmatprep.mubr.bf16.mxu1 %v8262_v29 }
  0xaa   :  { %1129 = vmatmul.mubr.bf16.gmra.mrb[52].mxu1 %v8290_v57 }
  0xab   :  { %1138 = vmatprep.mubr.bf16.mxu1 %v8298_v8  ;;  %v78_v8 = vld [vmem:[%s11301_s0 + $0x1a0] sm:$0xff] }
  0xac   :  { %v8380_v38 = vpack.c.bf16 %v80_v31, %v78_v8  ;;  %v151_v8 = vld [vmem:[%s11301_s0 + $0x3e8] sm:$0xff] }
  0xae   :  { %11407 = vst [vmem:[#allocation40_spill] sm:$0xff] %v8380_v38 }
  0xb2   :  { %1139 = vmatmul.mubr.bf16.gmra.mrb[56].mxu1 %v8326_v47  ;;  %v8372_v47 = vpack.c.bf16 %v81_v22, %v79_v14  ;;  %v153_v14 = vld [vmem:[%s11301_s0 + $0x3f8] sm:$0xff] }
  0xb3   :  { %1148 = vmatprep.mubr.bf16.mxu1 %v8334_v63  ;;  %v8370_v63 = vpack.c.bf16 %v149_v49, %v147_v45  ;;  %v146_v45 = vld [vmem:[%s11301_s0 + $0x3c0] sm:$0xff]  ;;  %v148_v49 = vld [vmem:[%s11301_s0 + $0x3d0] sm:$0xff]  ;;  %v8401_v31 = vpack.c.bf16 %v153_v14, %v151_v8 }
  0xb4   :  { %11406 = vst [vmem:[#allocation39_spill] sm:$0xff] %v8372_v47  ;;  %988 = vmatprep.mubr.bf16.mxu0 %v8372_v47  ;;  %v8399_v22 = vpack.c.bf16 %v148_v49, %v146_v45  ;;  %v314_v45 = vld [vmem:[%s11302_s3] sm:$0x3f] }
  0xb5   :  { %11405 = vst [vmem:[#allocation38_spill] sm:$0xff] %v8370_v63  ;;  %989 = vmatmul.mubr.bf16.gmra.mrb[52].mxu0 %v8380_v38  ;;  %11409 = vst [vmem:[#allocation42_spill] sm:$0xff] %v8401_v31 }
  0xb6   :  { %1564 = vmatprep.mubr.bf16.mxu0 %v7837_v0  ;;  %11408 = vst [vmem:[#allocation41_spill] sm:$0xff] %v8399_v22 }
  0xba   :  { %1149 = vmatmul.mubr.bf16.gmra.mrb[60].mxu1 %v8362_v53  ;;  %v152_v53 = vld [vmem:[%s11301_s0 + $0x3f0] sm:$0xff] }
  0xbb   :  { %1158 = vmatprep.mubr.bf16.mxu1 %v8370_v63  ;;  %v150_v63 = vld [vmem:[%s11301_s0 + $0x3e0] sm:$0xff] }
  0xbc   :  { %v8411_v57 = vpack.c.bf16 %v152_v53, %v150_v63 }
  0xbe   :  { %11410 = vst [vmem:[#allocation43_spill] sm:$0xff] %v8411_v57 }
  0xc2   :  { %1159 = vmatmul.mubr.bf16.gmra.mrb[64].mxu1 %v8399_v22 }
  0xc3   :  { %1168 = vmatprep.mubr.bf16.mxu1 %v8401_v31 }
  0xca   :  { %1169 = vmatmul.mubr.bf16.gmra.mrb[68].mxu1 %v8411_v57 }
  0xcb   :  { %1211 = vmatprep.mubr.bf16.mxu1 %v7837_v0  ;;  %v316_v0 = vlaneseq }
  0xcd   :  { %v8430_v63 = vshrl.u32 %v316_v0, 7 }
  0xcf   :  { %11411 = vst [vmem:[#allocation44_spill] sm:$0xff] %v8430_v63  ;;  %v11330_v53 = vsub.s32 0, %v8430_v63  ;;  %v11332_v49 = vsub.s32 1, %v8430_v63 }
  0xd1   :  { %v8441_v8 = vrot.slane %v314_v45, %v11330_v53  ;;  %v8445_v14 = vrot.slane %v314_v45, %v11332_v49 }
  0xd2   :  { %1212 = vmatmul.mubr.bf16.vlgmr.msra.gmra.mrb[72].mxu1 %v7839_v1 }
  0xd3   :  { %1221 = vmatprep.mubr.bf16.mxu1 %v7870_v11 }
  0xda   :  { %1222 = vmatmul.mubr.bf16.gmra.mrb[76].mxu1 %v7887_v18 }
  0xdb   :  { %1231 = vmatprep.mubr.bf16.mxu1 %v7918_v28 }
  0xe2   :  { %1232 = vmatmul.mubr.bf16.gmra.mrb[80].mxu1 %v7935_v34 }
  0xe3   :  { %1241 = vmatprep.mubr.bf16.mxu1 %v7966_v46 }
  0xea   :  { %1242 = vmatmul.mubr.bf16.gmra.mrb[84].mxu1 %v7983_v54 }
  0xeb   :  { %1251 = vmatprep.mubr.bf16.mxu1 %v8014_v4 }
  0xf2   :  { %1252 = vmatmul.mubr.bf16.gmra.mrb[88].mxu1 %v8031_v10 }
  0xf3   :  { %1261 = vmatprep.mubr.bf16.mxu1 %v8062_v25 }
  0xfa   :  { %1262 = vmatmul.mubr.bf16.gmra.mrb[92].mxu1 %v8079_v32 }
  0xfb   :  { %1271 = vmatprep.mubr.bf16.mxu1 %v8110_v48 }
 0x102   :  { %1272 = vmatmul.mubr.bf16.gmra.mrb[96].mxu1 %v8124_v58 }
 0x103   :  { %1281 = vmatprep.mubr.bf16.mxu1 %v8146_v6 }
 0x10a   :  { %1282 = vmatmul.mubr.bf16.gmra.mrb[100].mxu1 %v8160_v16 }
 0x10b   :  { %1291 = vmatprep.mubr.bf16.mxu1 %v8182_v27 }
 0x112   :  { %1292 = vmatmul.mubr.bf16.gmra.mrb[104].mxu1 %v8196_v39 }
 0x113   :  { %1301 = vmatprep.mubr.bf16.mxu1 %v8228_v62 }
 0x115   :  { %v1000_v0 = vpop.f32.mrb[0].mxu1 }
 0x116   :  { %v1001_v57 = vadd.f32 %v1000_v0, %v8441_v8  ;;  %v1002_v31 = vpop.f32.mrb[1].mxu1 }
 0x117   :  { %v1003_v27 = vadd.f32 %v1002_v31, %v8445_v14  ;;  %v1004_v22 = vpop.f32.mrb[2].mxu1 }
 0x118   :  { %v1005_v16 = vadd.f32 %v1004_v22, %v8441_v8  ;;  %v1006_v39 = vpop.f32.mrb[3].mxu1  ;;  %v2053_v53 = vmax.f32 %v1001_v57, 0.0 }
 0x119   :  { %v1007_v6 = vadd.f32 %v1006_v39, %v8445_v14  ;;  %v2054_v45 = vmax.f32 %v1003_v27, 0.0 }
 0x11a   :  { %v2059_v58 = vmax.f32 %v1005_v16, 0.0  ;;  %1302 = vmatmul.mubr.bf16.gmra.mrb[108].mxu1 %v8236_v7 }
 0x11b   :  { %v2060_v49 = vmax.f32 %v1007_v6, 0.0  ;;  %1311 = vmatprep.mubr.bf16.mxu1 %v8264_v30 }
 0x11c   :  { %v8454_v62 = vpack.c.bf16 %v2059_v58, %v2053_v53 }
 0x11d   :  { %v1010_v0 = vpop.f32.mrb[4].mxu1  ;;  %v8456_v48 = vpack.c.bf16 %v2060_v49, %v2054_v45 }
 0x11e   :  { %11412 = vst [vmem:[#allocation45_spill] sm:$0xff] %v8454_v62  ;;  %v1011_v31 = vadd.f32 %v1010_v0, %v8441_v8  ;;  %v1012_v32 = vpop.f32.mrb[5].mxu1 }
 0x11f   :  { %11413 = vst [vmem:[#allocation46_spill] sm:$0xff] %v8456_v48  ;;  %v1013_v22 = vadd.f32 %v1012_v32, %v8445_v14  ;;  %v1014_v25 = vpop.f32.mrb[6].mxu1 }
 0x120   :  { %v1015_v39 = vadd.f32 %v1014_v25, %v8441_v8  ;;  %v1016_v16 = vpop.f32.mrb[7].mxu1  ;;  %v2065_v27 = vmax.f32 %v1011_v31, 0.0 }
 0x121   :  { %v1017_v57 = vadd.f32 %v1016_v16, %v8445_v14  ;;  %v2066_v58 = vmax.f32 %v1013_v22, 0.0 }
 0x122   :  { %v2071_v6 = vmax.f32 %v1015_v39, 0.0  ;;  %1312 = vmatmul.mubr.bf16.gmra.mrb[112].mxu1 %v8272_v44 }
 0x123   :  { %v2072_v53 = vmax.f32 %v1017_v57, 0.0  ;;  %1321 = vmatprep.mubr.bf16.mxu1 %v8300_v9 }
 0x124   :  { %v8464_v49 = vpack.c.bf16 %v2071_v6, %v2065_v27 }
 0x125   :  { %v1020_v45 = vpop.f32.mrb[8].mxu1  ;;  %v8466_v0 = vpack.c.bf16 %v2072_v53, %v2066_v58 }
 0x126   :  { %11414 = vst [vmem:[#allocation47_spill] sm:$0xff] %v8464_v49  ;;  %v1021_v32 = vadd.f32 %v1020_v45, %v8441_v8  ;;  %v1022_v62 = vpop.f32.mrb[9].mxu1 }
 0x127   :  { %11415 = vst [vmem:[#allocation48_spill] sm:$0xff] %v8466_v0  ;;  %v1023_v25 = vadd.f32 %v1022_v62, %v8445_v14  ;;  %v1024_v48 = vpop.f32.mrb[10].mxu1 }
 0x128   :  { %v1025_v31 = vadd.f32 %v1024_v48, %v8441_v8  ;;  %v1026_v39 = vpop.f32.mrb[11].mxu1  ;;  %v2077_v22 = vmax.f32 %v1021_v32, 0.0 }
 0x129   :  { %v1027_v16 = vadd.f32 %v1026_v39, %v8445_v14  ;;  %v2078_v27 = vmax.f32 %v1023_v25, 0.0 }
 0x12a   :  { %v2083_v57 = vmax.f32 %v1025_v31, 0.0  ;;  %1322 = vmatmul.mubr.bf16.gmra.mrb[116].mxu1 %v8308_v24 }
 0x12b   :  { %v2084_v6 = vmax.f32 %v1027_v16, 0.0  ;;  %1331 = vmatprep.mubr.bf16.mxu1 %v8336_v5 }
 0x12c   :  { %v8474_v58 = vpack.c.bf16 %v2083_v57, %v2077_v22 }
 0x12d   :  { %v1030_v53 = vpop.f32.mrb[12].mxu1  ;;  %v8476_v45 = vpack.c.bf16 %v2084_v6, %v2078_v27 }
 0x12e   :  { %11416 = vst [vmem:[#allocation49_spill] sm:$0xff] %v8474_v58  ;;  %v1031_v62 = vadd.f32 %v1030_v53, %v8441_v8  ;;  %v1032_v49 = vpop.f32.mrb[13].mxu1 }
 0x12f   :  { %11417 = vst [vmem:[#allocation50_spill] sm:$0xff] %v8476_v45  ;;  %v1033_v48 = vadd.f32 %v1032_v49, %v8445_v14  ;;  %v1034_v0 = vpop.f32.mrb[14].mxu1 }
 0x130   :  { %v1035_v32 = vadd.f32 %v1034_v0, %v8441_v8  ;;  %v1036_v31 = vpop.f32.mrb[15].mxu1  ;;  %v2089_v25 = vmax.f32 %v1031_v62, 0.0 }
 0x131   :  { %v1037_v39 = vadd.f32 %v1036_v31, %v8445_v14  ;;  %v2090_v22 = vmax.f32 %v1033_v48, 0.0 }
 0x132   :  { %v2095_v16 = vmax.f32 %v1035_v32, 0.0  ;;  %1332 = vmatmul.mubr.bf16.gmra.mrb[120].mxu1 %v8344_v26 }
 0x133   :  { %v2096_v57 = vmax.f32 %v1037_v39, 0.0  ;;  %1341 = vmatprep.mubr.bf16.mxu1 %v8372_v47 }
 0x134   :  { %v8484_v27 = vpack.c.bf16 %v2095_v16, %v2089_v25 }
 0x135   :  { %v1040_v6 = vpop.f32.mrb[16].mxu1  ;;  %v8486_v53 = vpack.c.bf16 %v2096_v57, %v2090_v22 }
 0x136   :  { %11418 = vst [vmem:[#allocation51_spill] sm:$0xff] %v8484_v27  ;;  %v1041_v49 = vadd.f32 %v1040_v6, %v8441_v8  ;;  %v1042_v58 = vpop.f32.mrb[17].mxu1 }
 0x137   :  { %11419 = vst [vmem:[#allocation52_spill] sm:$0xff] %v8486_v53  ;;  %v1043_v0 = vadd.f32 %v1042_v58, %v8445_v14  ;;  %v1044_v45 = vpop.f32.mrb[18].mxu1 }
 0x138   :  { %v1045_v62 = vadd.f32 %v1044_v45, %v8441_v8  ;;  %v1046_v32 = vpop.f32.mrb[19].mxu1  ;;  %v2101_v48 = vmax.f32 %v1041_v49, 0.0 }
 0x139   :  { %v1047_v31 = vadd.f32 %v1046_v32, %v8445_v14  ;;  %v2102_v25 = vmax.f32 %v1043_v0, 0.0 }
 0x13a   :  { %v2107_v39 = vmax.f32 %v1045_v62, 0.0  ;;  %1342 = vmatmul.mubr.bf16.gmra.mrb[124].mxu1 %v8380_v38 }
 0x13b   :  { %v2108_v16 = vmax.f32 %v1047_v31, 0.0  ;;  %1351 = vmatprep.mubr.bf16.mxu1 %v7690_v15 }
 0x13c   :  { %v8494_v22 = vpack.c.bf16 %v2107_v39, %v2101_v48 }
 0x13d   :  { %v1050_v57 = vpop.f32.mrb[20].mxu1  ;;  %v8496_v6 = vpack.c.bf16 %v2108_v16, %v2102_v25  ;;  %v860_v16 = vpop.f32.mrb[0].mxu0 }
 0x13e   :  { %11420 = vst [vmem:[#allocation53_spill] sm:$0xff] %v8494_v22  ;;  %v1051_v58 = vadd.f32 %v1050_v57, %v8441_v8  ;;  %v1052_v27 = vpop.f32.mrb[21].mxu1  ;;  %v862_v22 = vpop.f32.mrb[1].mxu0 }
 0x13f   :  { %11421 = vst [vmem:[#allocation54_spill] sm:$0xff] %v8496_v6  ;;  %v1053_v45 = vadd.f32 %v1052_v27, %v8445_v14  ;;  %v1054_v53 = vpop.f32.mrb[22].mxu1  ;;  %v861_v27 = vadd.f32 %v860_v16, %v8441_v8 }
 0x140   :  { %v1055_v49 = vadd.f32 %v1054_v53, %v8441_v8  ;;  %v1056_v62 = vpop.f32.mrb[23].mxu1  ;;  %v2113_v0 = vmax.f32 %v1051_v58, 0.0  ;;  %v864_v58 = vpop.f32.mrb[2].mxu0 }
 0x141   :  { %v1057_v32 = vadd.f32 %v1056_v62, %v8445_v14  ;;  %v2114_v48 = vmax.f32 %v1053_v45, 0.0  ;;  %v7220_v45 = vld [vmem:[%s11300_s2 + $0x14] ss:$24 sps:$4 sm:$0xff]  }
 0x142   :  { %v2119_v31 = vmax.f32 %v1055_v49, 0.0  ;;  %1352 = vmatmul.mubr.bf16.gmra.mrb[128].mxu1 %v7768_v41  ;;  %1532 = vmatprep.subr.bf16.mxu0 %v7220_v45  ;;  %v7221_v45 = vld [vmem:[%s11300_s2 + $0x40] ss:$24 sps:$4 sm:$0xff]  }
 0x143   :  { %v2120_v39 = vmax.f32 %v1057_v32, 0.0  ;;  %1361 = vmatprep.mubr.bf16.mxu1 %v7770_v42 }
 0x144   :  { %v8504_v25 = vpack.c.bf16 %v2119_v31, %v2113_v0  ;;  %v866_v0 = vpop.f32.mrb[3].mxu0  ;;  %v7218_v31 = vld [vmem:[%s11300_s2 + $0x10] ss:$24 sps:$4 sm:$0xff]  }
 0x145   :  { %v1060_v57 = vpop.f32.mrb[24].mxu1  ;;  %v8507_v6 = vpack.c.bf16 %v2120_v39, %v2114_v48  ;;  %v1885_v39 = vmax.f32 %v861_v27, 0.0  ;;  %1533 = vmatpush1.bf16.msra.mxu0 %v7218_v31  ;;  %v7223_v27 = vld [vmem:[%s11300_s2 + $0x44] ss:$24 sps:$4 sm:$0xff]  }
 0x146   :  { %11422 = vst [vmem:[#allocation55_spill] sm:$0xff] %v8504_v25  ;;  %v1061_v53 = vadd.f32 %v1060_v57, %v8441_v8  ;;  %v1062_v62 = vpop.f32.mrb[25].mxu1  ;;  %v865_v57 = vadd.f32 %v864_v58, %v8441_v8  ;;  %v863_v25 = vadd.f32 %v862_v22, %v8445_v14  ;;  %1534 = vmatprep.subr.bf16.mxu0 %v7223_v27 }
 0x147   :  { %11423 = vst [vmem:[#allocation56_spill] sm:$0xff] %v8507_v6  ;;  %v1063_v49 = vadd.f32 %v1062_v62, %v8445_v14  ;;  %v1064_v32 = vpop.f32.mrb[26].mxu1  ;;  %v867_v62 = vadd.f32 %v866_v0, %v8445_v14 }
 0x148   :  { %v1065_v16 = vadd.f32 %v1064_v32, %v8441_v8  ;;  %v1066_v48 = vpop.f32.mrb[27].mxu1  ;;  %v2125_v42 = vmax.f32 %v1061_v53, 0.0  ;;  %v1891_v15 = vmax.f32 %v865_v57, 0.0  ;;  %v1886_v38 = vmax.f32 %v863_v25, 0.0  ;;  %v870_v53 = vpop.f32.mrb[4].mxu0 }
 0x149   :  { %v1067_v6 = vadd.f32 %v1066_v48, %v8445_v14  ;;  %v2126_v32 = vmax.f32 %v1063_v49, 0.0  ;;  %v1892_v22 = vmax.f32 %v867_v62, 0.0  ;;  %1535 = vmatpush1.bf16.msra.mxu0 %v7221_v45 }
 0x14a   :  { %v2131_v41 = vmax.f32 %v1065_v16, 0.0  ;;  %1362 = vmatmul.mubr.bf16.gmra.mrb[132].mxu1 %v7798_v51  ;;  %v8532_v31 = vpack.c.bf16 %v1891_v15, %v1885_v39  ;;  %v872_v16 = vpop.f32.mrb[5].mxu0  ;;  %v7226_v15 = vld [vmem:[%s11300_s2 + $0x74] ss:$24 sps:$4 sm:$0xff]  }
 0x14b   :  { %v2132_v58 = vmax.f32 %v1067_v6, 0.0  ;;  %1371 = vmatprep.mubr.bf16.mxu1 %v7800_v52  ;;  %v8534_v48 = vpack.c.bf16 %v1892_v22, %v1886_v38  ;;  %v874_v62 = vpop.f32.mrb[6].mxu0  ;;  %v7224_v38 = vld [vmem:[%s11300_s2 + $0x70] ss:$24 sps:$4 sm:$0xff]   ;;  %1536 = vmatprep.subr.bf16.mxu0 %v7226_v15 }
 0x14c   :  { %v8530_v0 = vpack.c.bf16 %v2131_v41, %v2125_v42  ;;  %v876_v41 = vpop.f32.mrb[7].mxu0 }
 0x14d   :  { %v1070_v25 = vpop.f32.mrb[28].mxu1  ;;  %v8536_v49 = vpack.c.bf16 %v2132_v58, %v2126_v32  ;;  %v873_v32 = vadd.f32 %v872_v16, %v8445_v14  ;;  %v877_v58 = vadd.f32 %v876_v41, %v8445_v14  ;;  %1537 = vmatpush1.bf16.msra.mxu0 %v7224_v38  ;;  %v7229_v16 = vld [vmem:[%s11300_s2 + $0xa4] ss:$24 sps:$4 sm:$0xff]  }
 0x14e   :  { %11424 = vst [vmem:[#allocation57_spill] sm:$0xff] %v8530_v0  ;;  %v1071_v6 = vadd.f32 %v1070_v25, %v8441_v8  ;;  %v1072_v57 = vpop.f32.mrb[29].mxu1  ;;  %v871_v25 = vadd.f32 %v870_v53, %v8441_v8  ;;  %v7227_v53 = vld [vmem:[%s11300_s2 + $0xa0] ss:$24 sps:$4 sm:$0xff]   ;;  %1538 = vmatprep.subr.bf16.mxu0 %v7229_v16 }
 0x14f   :  { %11425 = vst [vmem:[#allocation58_spill] sm:$0xff] %v8536_v49  ;;  %v1073_v52 = vadd.f32 %v1072_v57, %v8445_v14  ;;  %v1074_v51 = vpop.f32.mrb[30].mxu1  ;;  %v1898_v49 = vmax.f32 %v873_v32, 0.0 }
 0x150   :  { %v1075_v42 = vadd.f32 %v1074_v51, %v8441_v8  ;;  %v1076_v39 = vpop.f32.mrb[31].mxu1  ;;  %v2137_v22 = vmax.f32 %v1071_v6, 0.0  ;;  %v875_v51 = vadd.f32 %v874_v62, %v8441_v8  ;;  %v880_v6 = vpop.f32.mrb[8].mxu0  ;;  %v1897_v15 = vmax.f32 %v871_v25, 0.0 }
 0x151   :  { %v1077_v27 = vadd.f32 %v1076_v39, %v8445_v14  ;;  %v2138_v57 = vmax.f32 %v1073_v52, 0.0  ;;  %v1904_v39 = vmax.f32 %v877_v58, 0.0  ;;  %v882_v52 = vpop.f32.mrb[9].mxu0  ;;  %1539 = vmatpush1.bf16.msra.mxu0 %v7227_v53 }
 0x152   :  { %v2143_v45 = vmax.f32 %v1075_v42, 0.0  ;;  %1372 = vmatmul.mubr.bf16.gmra.mrb[136].mxu1 %v7841_v2  ;;  %v1903_v42 = vmax.f32 %v875_v51, 0.0  ;;  %v884_v25 = vpop.f32.mrb[10].mxu0  ;;  %v7232_v51 = vld [vmem:[%s11300_s2 + $0xd4] ss:$24 sps:$4 sm:$0xff]  }
 0x153   :  { %v2144_v0 = vmax.f32 %v1077_v27, 0.0  ;;  %1381 = vmatprep.mubr.bf16.mxu1 %v7844_v3  ;;  %v8562_v38 = vpack.c.bf16 %v1904_v39, %v1898_v49  ;;  %v886_v16 = vpop.f32.mrb[11].mxu0  ;;  %1540 = vmatprep.subr.bf16.mxu0 %v7232_v51 }
 0x154   :  { %v8557_v41 = vpack.c.bf16 %v2143_v45, %v2137_v22  ;;  %v8567_v3 = vpack.c.bf16 %v1903_v42, %v1897_v15  ;;  %v883_v15 = vadd.f32 %v882_v52, %v8445_v14  ;;  %v887_v42 = vadd.f32 %v886_v16, %v8445_v14  ;;  %v7235_v52 = vld [vmem:[%s11300_s2 + $0x104] ss:$24 sps:$4 sm:$0xff]  }
 0x155   :  { %v1080_v62 = vpop.f32.mrb[32].mxu1  ;;  %v8564_v27 = vpack.c.bf16 %v2144_v0, %v2138_v57  ;;  %v7230_v0 = vld [vmem:[%s11300_s2 + $0xd0] ss:$24 sps:$4 sm:$0xff]  }
 0x156   :  { %11426 = vst [vmem:[#allocation59_spill] sm:$0xff] %v8557_v41  ;;  %v1081_v32 = vadd.f32 %v1080_v62, %v8441_v8  ;;  %v1082_v58 = vpop.f32.mrb[33].mxu1  ;;  %1541 = vmatpush1.bf16.msra.mxu0 %v7230_v0  ;;  %v1910_v2 = vmax.f32 %v883_v15, 0.0 }
 0x157   :  { %11427 = vst [vmem:[#allocation60_spill] sm:$0xff] %v8564_v27  ;;  %v1083_v22 = vadd.f32 %v1082_v58, %v8445_v14  ;;  %v1084_v45 = vpop.f32.mrb[34].mxu1  ;;  %v881_v58 = vadd.f32 %v880_v6, %v8441_v8  ;;  %v7233_v6 = vld [vmem:[%s11300_s2 + $0x100] ss:$24 sps:$4 sm:$0xff]   ;;  %1542 = vmatprep.subr.bf16.mxu0 %v7235_v52 }
 0x158   :  { %v1085_v49 = vadd.f32 %v1084_v45, %v8441_v8  ;;  %v1086_v39 = vpop.f32.mrb[35].mxu1  ;;  %v2149_v53 = vmax.f32 %v1081_v32, 0.0  ;;  %v885_v45 = vadd.f32 %v884_v25, %v8441_v8  ;;  %v890_v32 = vpop.f32.mrb[12].mxu0 }
 0x159   :  { %v1087_v57 = vadd.f32 %v1086_v39, %v8445_v14  ;;  %v2150_v41 = vmax.f32 %v1083_v22, 0.0  ;;  %v1916_v39 = vmax.f32 %v887_v42, 0.0  ;;  %v892_v22 = vpop.f32.mrb[13].mxu0 }
 0x15a   :  { %v2155_v62 = vmax.f32 %v1085_v49, 0.0  ;;  %1382 = vmatmul.mubr.bf16.gmra.mrb[140].mxu1 %v7890_v19  ;;  %v1909_v49 = vmax.f32 %v881_v58, 0.0  ;;  %v1915_v16 = vmax.f32 %v885_v45, 0.0  ;;  %1543 = vmatpush1.bf16.msra.mxu0 %v7233_v6  ;;  %v894_v58 = vpop.f32.mrb[14].mxu0  ;;  %v7238_v45 = vld [vmem:[%s11300_s2 + $0x134] ss:$24 sps:$4 sm:$0xff]  }
 0x15b   :  { %v2156_v27 = vmax.f32 %v1087_v57, 0.0  ;;  %1391 = vmatprep.mubr.bf16.mxu1 %v7892_v20  ;;  %v8592_v0 = vpack.c.bf16 %v1916_v39, %v1910_v2  ;;  %v896_v52 = vpop.f32.mrb[15].mxu0  ;;  %1544 = vmatprep.subr.bf16.mxu0 %v7238_v45 }
 0x15c   :  { %v8587_v51 = vpack.c.bf16 %v2155_v62, %v2149_v53  ;;  %v8597_v20 = vpack.c.bf16 %v1915_v16, %v1909_v49  ;;  %v893_v49 = vadd.f32 %v892_v22, %v8445_v14  ;;  %v897_v16 = vadd.f32 %v896_v52, %v8445_v14  ;;  %v7241_v22 = vld [vmem:[%s11300_s2 + $0x164] ss:$24 sps:$4 sm:$0xff]  }
 0x15d   :  { %v1090_v25 = vpop.f32.mrb[36].mxu1  ;;  %v8594_v57 = vpack.c.bf16 %v2156_v27, %v2150_v41  ;;  %v7236_v41 = vld [vmem:[%s11300_s2 + $0x130] ss:$24 sps:$4 sm:$0xff]  }
 0x15e   :  { %11428 = vst [vmem:[#allocation61_spill] sm:$0xff] %v8587_v51  ;;  %v1091_v15 = vadd.f32 %v1090_v25, %v8441_v8  ;;  %v1092_v42 = vpop.f32.mrb[37].mxu1  ;;  %1545 = vmatpush1.bf16.msra.mxu0 %v7236_v41  ;;  %v1922_v19 = vmax.f32 %v893_v49, 0.0 }
 0x15f   :  { %11429 = vst [vmem:[#allocation62_spill] sm:$0xff] %v8594_v57  ;;  %v1093_v53 = vadd.f32 %v1092_v42, %v8445_v14  ;;  %v1094_v62 = vpop.f32.mrb[38].mxu1  ;;  %v891_v42 = vadd.f32 %v890_v32, %v8441_v8  ;;  %v7239_v32 = vld [vmem:[%s11300_s2 + $0x160] ss:$24 sps:$4 sm:$0xff]   ;;  %1546 = vmatprep.subr.bf16.mxu0 %v7241_v22  ;;  %v7242_v22 = vld [vmem:[%s11300_s2 + $0x190] ss:$24 sps:$4 sm:$0xff]  }
 0x160   :  { %v1095_v2 = vadd.f32 %v1094_v62, %v8441_v8  ;;  %v1096_v39 = vpop.f32.mrb[39].mxu1  ;;  %v2161_v6 = vmax.f32 %v1091_v15, 0.0  ;;  %v895_v62 = vadd.f32 %v894_v58, %v8441_v8  ;;  %v900_v15 = vpop.f32.mrb[16].mxu0 }
 0x161   :  { %v1097_v27 = vadd.f32 %v1096_v39, %v8445_v14  ;;  %v2162_v51 = vmax.f32 %v1093_v53, 0.0  ;;  %v1928_v39 = vmax.f32 %v897_v16, 0.0  ;;  %v901_v53 = vadd.f32 %v900_v15, %v8441_v8  ;;  %v902_v41 = vpop.f32.mrb[17].mxu0  ;;  %v7244_v15 = vld [vmem:[%s11300_s2 + $0x194] ss:$24 sps:$4 sm:$0xff]  }
 0x162   :  { %v2167_v25 = vmax.f32 %v1095_v2, 0.0  ;;  %1392 = vmatmul.mubr.bf16.gmra.mrb[144].mxu1 %v7938_v35  ;;  %v1921_v2 = vmax.f32 %v891_v42, 0.0  ;;  %v1927_v52 = vmax.f32 %v895_v62, 0.0  ;;  %1547 = vmatpush1.bf16.msra.mxu0 %v7239_v32  ;;  %v903_v32 = vadd.f32 %v902_v41, %v8445_v14 }
 0x163   :  { %v2168_v57 = vmax.f32 %v1097_v27, 0.0  ;;  %1401 = vmatprep.mubr.bf16.mxu1 %v7940_v36  ;;  %v8623_v27 = vpack.c.bf16 %v1928_v39, %v1922_v19  ;;  %1548 = vmatprep.subr.bf16.mxu0 %v7244_v15 }
 0x164   :  { %v8617_v45 = vpack.c.bf16 %v2167_v25, %v2161_v6  ;;  %v8628_v25 = vpack.c.bf16 %v1927_v52, %v1921_v2  ;;  %v1933_v52 = vmax.f32 %v901_v53, 0.0  ;;  %v1934_v35 = vmax.f32 %v903_v32, 0.0  ;;  %v7247_v53 = vld [vmem:[%s11300_s2 + $0x1c4] ss:$24 sps:$4 sm:$0xff]  }
 0x165   :  { %v1100_v58 = vpop.f32.mrb[40].mxu1  ;;  %v8625_v49 = vpack.c.bf16 %v2168_v57, %v2162_v51 }
 0x166   :  { %11430 = vst [vmem:[#allocation63_spill] sm:$0xff] %v8617_v45  ;;  %v1101_v16 = vadd.f32 %v1100_v58, %v8441_v8  ;;  %v1102_v6 = vpop.f32.mrb[41].mxu1  ;;  %v904_v45 = vpop.f32.mrb[18].mxu0  ;;  %1549 = vmatpush1.bf16.msra.mxu0 %v7242_v22 }
 0x167   :  { %11431 = vst [vmem:[#allocation64_spill] sm:$0xff] %v8625_v49  ;;  %v1103_v42 = vadd.f32 %v1102_v6, %v8445_v14  ;;  %v1104_v62 = vpop.f32.mrb[42].mxu1  ;;  %v905_v51 = vadd.f32 %v904_v45, %v8441_v8  ;;  %v906_v57 = vpop.f32.mrb[19].mxu0  ;;  %1550 = vmatprep.subr.bf16.mxu0 %v7247_v53 }
 0x168   :  { %v1105_v19 = vadd.f32 %v1104_v62, %v8441_v8  ;;  %v1106_v39 = vpop.f32.mrb[43].mxu1  ;;  %v907_v58 = vadd.f32 %v906_v57, %v8445_v14  ;;  %v2173_v6 = vmax.f32 %v1101_v16, 0.0  ;;  %v910_v41 = vpop.f32.mrb[20].mxu0  ;;  %v7245_v16 = vld [vmem:[%s11300_s2 + $0x1c0] ss:$24 sps:$4 sm:$0xff]  }
 0x169   :  { %v1107_v2 = vadd.f32 %v1106_v39, %v8445_v14  ;;  %v1939_v62 = vmax.f32 %v905_v51, 0.0  ;;  %v2174_v45 = vmax.f32 %v1103_v42, 0.0  ;;  %v912_v39 = vpop.f32.mrb[21].mxu0 }
 0x16a   :  { %v2179_v49 = vmax.f32 %v1105_v19, 0.0  ;;  %1402 = vmatmul.mubr.bf16.gmra.mrb[148].mxu1 %v7986_v55  ;;  %v1940_v47 = vmax.f32 %v907_v58, 0.0  ;;  %1551 = vmatpush1.bf16.msra.mxu0 %v7245_v16  ;;  %v914_v58 = vpop.f32.mrb[22].mxu0 }
 0x16b   :  { %v2180_v36 = vmax.f32 %v1107_v2, 0.0  ;;  %1411 = vmatprep.mubr.bf16.mxu1 %v7988_v56  ;;  %v8654_v42 = vpack.c.bf16 %v1939_v62, %v1933_v52  ;;  %v916_v52 = vpop.f32.mrb[23].mxu0 }
 0x16c   :  { %v8647_v15 = vpack.c.bf16 %v2179_v49, %v2173_v6  ;;  %v8652_v51 = vpack.c.bf16 %v1940_v47, %v1934_v35  ;;  %v7250_v6 = vld [vmem:[%s11300_s2 + $0x1f4] ss:$24 sps:$4 sm:$0xff]   ;;  %v917_v53 = vadd.f32 %v916_v52, %v8445_v14 }
 0x16d   :  { %v1110_v19 = vpop.f32.mrb[44].mxu1  ;;  %v8656_v57 = vpack.c.bf16 %v2180_v36, %v2174_v45  ;;  %v7248_v36 = vld [vmem:[%s11300_s2 + $0x1f0] ss:$24 sps:$4 sm:$0xff]   ;;  %1552 = vmatprep.subr.bf16.mxu0 %v7250_v6  ;;  %v913_v45 = vadd.f32 %v912_v39, %v8445_v14  ;;  %v7253_v39 = vld [vmem:[%s11300_s2 + $0x224] ss:$24 sps:$4 sm:$0xff]  }
 0x16e   :  { %11432 = vst [vmem:[#allocation65_spill] sm:$0xff] %v8647_v15  ;;  %v1111_v22 = vadd.f32 %v1110_v19, %v8441_v8  ;;  %v1112_v2 = vpop.f32.mrb[45].mxu1  ;;  %1553 = vmatpush1.bf16.msra.mxu0 %v7248_v36 }
 0x16f   :  { %11433 = vst [vmem:[#allocation66_spill] sm:$0xff] %v8656_v57  ;;  %v1113_v49 = vadd.f32 %v1112_v2, %v8445_v14  ;;  %v1114_v32 = vpop.f32.mrb[46].mxu1  ;;  %v911_v2 = vadd.f32 %v910_v41, %v8441_v8  ;;  %v1946_v56 = vmax.f32 %v913_v45, 0.0  ;;  %v7251_v41 = vld [vmem:[%s11300_s2 + $0x220] ss:$24 sps:$4 sm:$0xff]   ;;  %1554 = vmatprep.subr.bf16.mxu0 %v7253_v39 }
 0x170   :  { %v1115_v35 = vadd.f32 %v1114_v32, %v8441_v8  ;;  %v1116_v47 = vpop.f32.mrb[47].mxu1  ;;  %v2185_v16 = vmax.f32 %v1111_v22, 0.0  ;;  %v915_v32 = vadd.f32 %v914_v58, %v8441_v8  ;;  %v920_v22 = vpop.f32.mrb[24].mxu0 }
 0x171   :  { %v1117_v62 = vadd.f32 %v1116_v47, %v8445_v14  ;;  %v2186_v15 = vmax.f32 %v1113_v49, 0.0  ;;  %v1952_v47 = vmax.f32 %v917_v53, 0.0  ;;  %v921_v49 = vadd.f32 %v920_v22, %v8441_v8  ;;  %v922_v36 = vpop.f32.mrb[25].mxu0 }
 0x172   :  { %v2191_v19 = vmax.f32 %v1115_v35, 0.0  ;;  %1412 = vmatmul.mubr.bf16.gmra.mrb[152].mxu1 %v8034_v12  ;;  %v1945_v35 = vmax.f32 %v911_v2, 0.0  ;;  %v1951_v52 = vmax.f32 %v915_v32, 0.0  ;;  %1555 = vmatpush1.bf16.msra.mxu0 %v7251_v41  ;;  %v7259_v12 = vld [vmem:[%s11300_s2 + $0x284] ss:$24 sps:$4 sm:$0xff]  }
 0x173   :  { %v2192_v57 = vmax.f32 %v1117_v62, 0.0  ;;  %1421 = vmatprep.mubr.bf16.mxu1 %v8036_v13  ;;  %v8683_v62 = vpack.c.bf16 %v1952_v47, %v1946_v56  ;;  %v924_v13 = vpop.f32.mrb[26].mxu0  ;;  %v7256_v56 = vld [vmem:[%s11300_s2 + $0x254] ss:$24 sps:$4 sm:$0xff]  }
 0x174   :  { %v8677_v6 = vpack.c.bf16 %v2191_v19, %v2185_v16  ;;  %v923_v19 = vadd.f32 %v922_v36, %v8445_v14  ;;  %v8689_v2 = vpack.c.bf16 %v1951_v52, %v1945_v35  ;;  %v925_v39 = vadd.f32 %v924_v13, %v8441_v8  ;;  %v926_v22 = vpop.f32.mrb[27].mxu0  ;;  %v7254_v35 = vld [vmem:[%s11300_s2 + $0x250] ss:$24 sps:$4 sm:$0xff]   ;;  %1556 = vmatprep.subr.bf16.mxu0 %v7256_v56 }
 0x175   :  { %v1120_v58 = vpop.f32.mrb[48].mxu1  ;;  %v8685_v45 = vpack.c.bf16 %v2192_v57, %v2186_v15  ;;  %v1957_v57 = vmax.f32 %v921_v49, 0.0  ;;  %v930_v56 = vpop.f32.mrb[28].mxu0 }
 0x176   :  { %11434 = vst [vmem:[#allocation67_spill] sm:$0xff] %v8677_v6  ;;  %v1121_v53 = vadd.f32 %v1120_v58, %v8441_v8  ;;  %v1122_v16 = vpop.f32.mrb[49].mxu1  ;;  %v1958_v41 = vmax.f32 %v923_v19, 0.0  ;;  %v927_v58 = vadd.f32 %v926_v22, %v8445_v14  ;;  %1557 = vmatpush1.bf16.msra.mxu0 %v7254_v35  ;;  %v932_v22 = vpop.f32.mrb[29].mxu0 }
 0x177   :  { %11435 = vst [vmem:[#allocation68_spill] sm:$0xff] %v8685_v45  ;;  %v1123_v32 = vadd.f32 %v1122_v16, %v8445_v14  ;;  %v1124_v6 = vpop.f32.mrb[50].mxu1  ;;  %1558 = vmatprep.subr.bf16.mxu0 %v7259_v12 }
 0x178   :  { %v1125_v47 = vadd.f32 %v1124_v6, %v8441_v8  ;;  %v1126_v15 = vpop.f32.mrb[51].mxu1  ;;  %v2197_v36 = vmax.f32 %v1121_v53, 0.0  ;;  %v1963_v6 = vmax.f32 %v925_v39, 0.0  ;;  %v1964_v13 = vmax.f32 %v927_v58, 0.0  ;;  %v7257_v53 = vld [vmem:[%s11300_s2 + $0x280] ss:$24 sps:$4 sm:$0xff]  }
 0x179   :  { %v1127_v52 = vadd.f32 %v1126_v15, %v8445_v14  ;;  %v2198_v49 = vmax.f32 %v1123_v32, 0.0  ;;  %v931_v32 = vadd.f32 %v930_v56, %v8441_v8 }
 0x17a   :  { %v2203_v16 = vmax.f32 %v1125_v47, 0.0  ;;  %1422 = vmatmul.mubr.bf16.gmra.mrb[156].mxu1 %v8082_v33  ;;  %v8709_v19 = vpack.c.bf16 %v1963_v6, %v1957_v57  ;;  %v8714_v39 = vpack.c.bf16 %v1964_v13, %v1958_v41  ;;  %v933_v57 = vadd.f32 %v932_v22, %v8445_v14  ;;  %1559 = vmatpush1.bf16.msra.mxu0 %v7257_v53  ;;  %v934_v6 = vpop.f32.mrb[30].mxu0  ;;  %v7262_v41 = vld [vmem:[%s11300_s2 + $0x2b4] ss:$24 sps:$4 sm:$0xff]   ;;  %v7265_v33 = vld [vmem:[%s11300_s2 + $0x2e4] ss:$24 sps:$4 sm:$0xff]  }
 0x17b   :  { %v2204_v45 = vmax.f32 %v1127_v52, 0.0  ;;  %1431 = vmatprep.mubr.bf16.mxu1 %v8084_v37  ;;  %v1969_v12 = vmax.f32 %v931_v32, 0.0  ;;  %1560 = vmatprep.subr.bf16.mxu0 %v7262_v41 }
 0x17c   :  { %v8707_v15 = vpack.c.bf16 %v2203_v16, %v2197_v36  ;;  %v1970_v22 = vmax.f32 %v933_v57, 0.0 }
 0x17d   :  { %v1130_v47 = vpop.f32.mrb[52].mxu1  ;;  %v8717_v35 = vpack.c.bf16 %v2204_v45, %v2198_v49  ;;  %v935_v45 = vadd.f32 %v934_v6, %v8441_v8  ;;  %v936_v49 = vpop.f32.mrb[31].mxu0 }
 0x17e   :  { %11436 = vst [vmem:[#allocation69_spill] sm:$0xff] %v8707_v15  ;;  %v1131_v52 = vadd.f32 %v1130_v47, %v8441_v8  ;;  %v1132_v58 = vpop.f32.mrb[53].mxu1  ;;  %v7260_v47 = vld [vmem:[%s11300_s2 + $0x2b0] ss:$24 sps:$4 sm:$0xff]   ;;  %v940_v41 = vpop.f32.mrb[32].mxu0 }
 0x17f   :  { %11437 = vst [vmem:[#allocation70_spill] sm:$0xff] %v8717_v35  ;;  %v1133_v36 = vadd.f32 %v1132_v58, %v8445_v14  ;;  %v1134_v16 = vpop.f32.mrb[54].mxu1  ;;  %v937_v58 = vadd.f32 %v936_v49, %v8445_v14  ;;  %1561 = vmatpush1.bf16.msra.mxu0 %v7260_v47  ;;  %v942_v49 = vpop.f32.mrb[33].mxu0 }
 0x180   :  { %v1135_v13 = vadd.f32 %v1134_v16, %v8441_v8  ;;  %v1136_v56 = vpop.f32.mrb[55].mxu1  ;;  %v2209_v15 = vmax.f32 %v1131_v52, 0.0  ;;  %v1975_v16 = vmax.f32 %v935_v45, 0.0  ;;  %v7263_v52 = vld [vmem:[%s11300_s2 + $0x2e0] ss:$24 sps:$4 sm:$0xff]   ;;  %1562 = vmatprep.subr.bf16.mxu0 %v7265_v33 }
 0x181   :  { %v1137_v53 = vadd.f32 %v1136_v56, %v8445_v14  ;;  %v2210_v32 = vmax.f32 %v1133_v36, 0.0  ;;  %v1976_v6 = vmax.f32 %v937_v58, 0.0  ;;  %v941_v36 = vadd.f32 %v940_v41, %v8441_v8 }
 0x182   :  { %v2215_v35 = vmax.f32 %v1135_v13, 0.0  ;;  %1432 = vmatmul.mubr.bf16.gmra.mrb[160].mxu1 %v8127_v59  ;;  %v8739_v57 = vpack.c.bf16 %v1975_v16, %v1969_v12  ;;  %v944_v16 = vpop.f32.mrb[34].mxu0 }
 0x183   :  { %v2216_v37 = vmax.f32 %v1137_v53, 0.0  ;;  %1441 = vmatprep.mubr.bf16.mxu1 %v8129_v60  ;;  %v8744_v45 = vpack.c.bf16 %v1976_v6, %v1970_v22  ;;  %1563 = vmatpush1.bf16.msra.mxu0 %v7263_v52  ;;  %v1981_v6 = vmax.f32 %v941_v36, 0.0  ;;  %v945_v41 = vadd.f32 %v944_v16, %v8441_v8  ;;  %v946_v60 = vpop.f32.mrb[35].mxu0 }
 0x184   :  { %v8737_v56 = vpack.c.bf16 %v2215_v35, %v2209_v15  ;;  %v943_v35 = vadd.f32 %v942_v49, %v8445_v14 }
 0x185   :  { %v1140_v13 = vpop.f32.mrb[56].mxu1  ;;  %v8747_v47 = vpack.c.bf16 %v2216_v37, %v2210_v32  ;;  %v947_v32 = vadd.f32 %v946_v60, %v8445_v14  ;;  %v1987_v49 = vmax.f32 %v945_v41, 0.0 }
 0x186   :  { %11438 = vst [vmem:[#allocation71_spill] sm:$0xff] %v8737_v56  ;;  %v1141_v53 = vadd.f32 %v1140_v13, %v8441_v8  ;;  %v1142_v15 = vpop.f32.mrb[57].mxu1  ;;  %v1982_v37 = vmax.f32 %v943_v35, 0.0  ;;  %1565 = vmatmul.mubr.bf16.vlgmr.msra.gmra.mrb[56].mxu0 %v7839_v1  ;;  %v950_v35 = vpop.f32.mrb[36].mxu0 }
 0x187   :  { %11439 = vst [vmem:[#allocation72_spill] sm:$0xff] %v8747_v47  ;;  %v1143_v12 = vadd.f32 %v1142_v15, %v8445_v14  ;;  %v1144_v58 = vpop.f32.mrb[58].mxu1  ;;  %1574 = vmatprep.mubr.bf16.mxu0 %v7870_v11  ;;  %v1988_v36 = vmax.f32 %v947_v32, 0.0  ;;  %v951_v1 = vadd.f32 %v950_v35, %v8441_v8 }
 0x188   :  { %v1145_v56 = vadd.f32 %v1144_v58, %v8441_v8  ;;  %v1146_v22 = vpop.f32.mrb[59].mxu1  ;;  %v2221_v13 = vmax.f32 %v1141_v53, 0.0 }
 0x189   :  { %v1147_v33 = vadd.f32 %v1146_v22, %v8445_v14  ;;  %v2222_v15 = vmax.f32 %v1143_v12, 0.0  ;;  %v8762_v22 = vpack.c.bf16 %v1987_v49, %v1981_v6  ;;  %v8764_v47 = vpack.c.bf16 %v1988_v36, %v1982_v37 }
 0x18a   :  { %v2227_v52 = vmax.f32 %v1145_v56, 0.0  ;;  %1442 = vmatmul.mubr.bf16.gmra.mrb[164].mxu1 %v8163_v17  ;;  %v952_v56 = vpop.f32.mrb[37].mxu0  ;;  %v1993_v49 = vmax.f32 %v951_v1, 0.0 }
 0x18b   :  { %v2228_v58 = vmax.f32 %v1147_v33, 0.0  ;;  %1451 = vmatprep.mubr.bf16.mxu1 %v8165_v21  ;;  %v953_v41 = vadd.f32 %v952_v56, %v8445_v14 }
 0x18c   :  { %v8760_v16 = vpack.c.bf16 %v2227_v52, %v2221_v13  ;;  %v954_v13 = vpop.f32.mrb[38].mxu0 }
 0x18d   :  { %v1150_v60 = vpop.f32.mrb[60].mxu1  ;;  %v8767_v53 = vpack.c.bf16 %v2228_v58, %v2222_v15  ;;  %v955_v37 = vadd.f32 %v954_v13, %v8441_v8  ;;  %v956_v36 = vpop.f32.mrb[39].mxu0  ;;  %v1994_v15 = vmax.f32 %v953_v41, 0.0 }
 0x18e   :  { %11440 = vst [vmem:[#allocation73_spill] sm:$0xff] %v8760_v16  ;;  %v1151_v11 = vadd.f32 %v1150_v60, %v8441_v8  ;;  %v1152_v12 = vpop.f32.mrb[61].mxu1  ;;  %v957_v58 = vadd.f32 %v956_v36, %v8445_v14  ;;  %1575 = vmatmul.mubr.bf16.gmra.mrb[60].mxu0 %v7887_v18  ;;  %v960_v41 = vpop.f32.mrb[40].mxu0 }
 0x18f   :  { %11441 = vst [vmem:[#allocation74_spill] sm:$0xff] %v8767_v53  ;;  %v1153_v33 = vadd.f32 %v1152_v12, %v8445_v14  ;;  %v1154_v32 = vpop.f32.mrb[62].mxu1  ;;  %v1999_v12 = vmax.f32 %v955_v37, 0.0  ;;  %1584 = vmatprep.mubr.bf16.mxu0 %v7918_v28  ;;  %v961_v18 = vadd.f32 %v960_v41, %v8441_v8 }
 0x190   :  { %v1155_v6 = vadd.f32 %v1154_v32, %v8441_v8  ;;  %v1156_v52 = vpop.f32.mrb[63].mxu1  ;;  %v2233_v60 = vmax.f32 %v1151_v11, 0.0  ;;  %v2000_v1 = vmax.f32 %v957_v58, 0.0  ;;  %v962_v11 = vpop.f32.mrb[41].mxu0 }
 0x191   :  { %v1157_v35 = vadd.f32 %v1156_v52, %v8445_v14  ;;  %v2234_v32 = vmax.f32 %v1153_v33, 0.0  ;;  %v8782_v52 = vpack.c.bf16 %v1999_v12, %v1993_v49  ;;  %v963_v37 = vadd.f32 %v962_v11, %v8445_v14 }
 0x192   :  { %v2239_v56 = vmax.f32 %v1155_v6, 0.0  ;;  %1452 = vmatmul.mubr.bf16.gmra.mrb[168].mxu1 %v8199_v40  ;;  %v8784_v53 = vpack.c.bf16 %v2000_v1, %v1994_v15  ;;  %v2005_v12 = vmax.f32 %v961_v18, 0.0 }
 0x193   :  { %v2240_v16 = vmax.f32 %v1157_v35, 0.0  ;;  %1461 = vmatprep.mubr.bf16.mxu1 %v8201_v43 }
 0x194   :  { %v8780_v13 = vpack.c.bf16 %v2239_v56, %v2233_v60  ;;  %v964_v60 = vpop.f32.mrb[42].mxu0 }
 0x195   :  { %v1160_v36 = vpop.f32.mrb[64].mxu1  ;;  %v8787_v6 = vpack.c.bf16 %v2240_v16, %v2234_v32  ;;  %v965_v15 = vadd.f32 %v964_v60, %v8441_v8  ;;  %v966_v1 = vpop.f32.mrb[43].mxu0  ;;  %v2006_v16 = vmax.f32 %v963_v37, 0.0 }
 0x196   :  { %11442 = vst [vmem:[#allocation75_spill] sm:$0xff] %v8780_v13  ;;  %v1161_v28 = vadd.f32 %v1160_v36, %v8441_v8  ;;  %v1162_v33 = vpop.f32.mrb[65].mxu1  ;;  %v967_v32 = vadd.f32 %v966_v1, %v8445_v14  ;;  %1585 = vmatmul.mubr.bf16.gmra.mrb[64].mxu0 %v7935_v34  ;;  %v970_v37 = vpop.f32.mrb[44].mxu0 }
 0x197   :  { %11443 = vst [vmem:[#allocation76_spill] sm:$0xff] %v8787_v6  ;;  %v1163_v35 = vadd.f32 %v1162_v33, %v8445_v14  ;;  %v1164_v58 = vpop.f32.mrb[66].mxu1  ;;  %v2011_v33 = vmax.f32 %v965_v15, 0.0  ;;  %1594 = vmatprep.mubr.bf16.mxu0 %v7966_v46  ;;  %v971_v34 = vadd.f32 %v970_v37, %v8441_v8  ;;  %v326_v15 = vsub.s32 2, %v8430_v63 }
 0x198   :  { %v1165_v49 = vadd.f32 %v1164_v58, %v8441_v8  ;;  %v1166_v56 = vpop.f32.mrb[67].mxu1  ;;  %v2245_v36 = vmax.f32 %v1161_v28, 0.0  ;;  %v2012_v18 = vmax.f32 %v967_v32, 0.0  ;;  %v972_v28 = vpop.f32.mrb[45].mxu0 }
 0x199   :  { %v1167_v41 = vadd.f32 %v1166_v56, %v8445_v14  ;;  %v2246_v58 = vmax.f32 %v1163_v35, 0.0  ;;  %v8802_v56 = vpack.c.bf16 %v2011_v33, %v2005_v12 }
 0x19a   :  { %v2251_v11 = vmax.f32 %v1165_v49, 0.0  ;;  %1462 = vmatmul.mubr.bf16.gmra.mrb[172].mxu1 %v8218_v50  ;;  %v8804_v6 = vpack.c.bf16 %v2012_v18, %v2006_v16  ;;  %v2017_v18 = vmax.f32 %v971_v34, 0.0 }
 0x19b   :  { %v2252_v13 = vmax.f32 %v1167_v41, 0.0  ;;  %1471 = vmatprep.mubr.bf16.mxu1 %v8226_v61  ;;  %v973_v41 = vadd.f32 %v972_v28, %v8445_v14 }
 0x19c   :  { %v8800_v60 = vpack.c.bf16 %v2251_v11, %v2245_v36  ;;  %v330_v36 = vsub.s32 3, %v8430_v63  ;;  %v974_v11 = vpop.f32.mrb[46].mxu0 }
 0x19d   :  { %v1170_v1 = vpop.f32.mrb[68].mxu1  ;;  %v8807_v49 = vpack.c.bf16 %v2252_v13, %v2246_v58  ;;  %v975_v13 = vadd.f32 %v974_v11, %v8441_v8  ;;  %v976_v58 = vpop.f32.mrb[47].mxu0 }
 0x19e   :  { %11444 = vst [vmem:[#allocation77_spill] sm:$0xff] %v8800_v60  ;;  %v1171_v46 = vadd.f32 %v1170_v1, %v8441_v8  ;;  %v1172_v35 = vpop.f32.mrb[69].mxu1  ;;  %v2018_v1 = vmax.f32 %v973_v41, 0.0  ;;  %v977_v60 = vadd.f32 %v976_v58, %v8445_v14  ;;  %1595 = vmatmul.mubr.bf16.gmra.mrb[68].mxu0 %v7983_v54  ;;  %v980_v58 = vpop.f32.mrb[48].mxu0 }
 0x19f   :  { %11445 = vst [vmem:[#allocation78_spill] sm:$0xff] %v8807_v49  ;;  %v1173_v32 = vadd.f32 %v1172_v35, %v8445_v14  ;;  %v1174_v12 = vpop.f32.mrb[70].mxu1  ;;  %v2023_v34 = vmax.f32 %v975_v13, 0.0  ;;  %1604 = vmatprep.mubr.bf16.mxu0 %v8014_v4  ;;  %v982_v13 = vpop.f32.mrb[49].mxu0 }
 0x1a0   :  { %v1175_v16 = vadd.f32 %v1174_v12, %v8441_v8  ;;  %v1176_v33 = vpop.f32.mrb[71].mxu1  ;;  %v2257_v28 = vmax.f32 %v1171_v46, 0.0  ;;  %v7602_v12 = vld [vmem:[%s11302_s3] sm:$0x3f]  ;;  %v2024_v54 = vmax.f32 %v977_v60, 0.0 }
 0x1a1   :  { %v1177_v37 = vadd.f32 %v1176_v33, %v8445_v14  ;;  %v8823_v49 = vrot.slane %v7602_v12, %v326_v15  ;;  %v2258_v11 = vmax.f32 %v1173_v32, 0.0  ;;  %v8826_v41 = vrot.slane %v7602_v12, %v330_v36 }
 0x1a2   :  { %v2263_v35 = vmax.f32 %v1175_v16, 0.0  ;;  %1472 = vmatmul.mubr.bf16.gmra.mrb[176].mxu1 %v8254_v23  ;;  %v8831_v16 = vpack.c.bf16 %v2023_v34, %v2017_v18  ;;  %v8833_v23 = vpack.c.bf16 %v2024_v54, %v2018_v1  ;;  %v981_v15 = vadd.f32 %v980_v58, %v8441_v8 }
 0x1a3   :  { %v2264_v33 = vmax.f32 %v1177_v37, 0.0  ;;  %1481 = vmatprep.mubr.bf16.mxu1 %v8262_v29  ;;  %v983_v36 = vadd.f32 %v982_v13, %v8445_v14  ;;  %v11448_v13 = vld [vmem:[#allocation33_spill] sm:$0xff] }
 0x1a4   :  { %v8829_v46 = vpack.c.bf16 %v2263_v35, %v2257_v28  ;;  %v984_v28 = vpop.f32.mrb[50].mxu0  ;;  %v2029_v12 = vmax.f32 %v981_v15, 0.0  ;;  %v11450_v15 = vld [vmem:[#allocation34_spill] sm:$0xff] }
 0x1a5   :  { %v1213_v63 = vpop.f32.mrb[72].mxu1  ;;  %v8836_v61 = vpack.c.bf16 %v2264_v33, %v2258_v11  ;;  %v985_v1 = vadd.f32 %v984_v28, %v8441_v8  ;;  %v986_v34 = vpop.f32.mrb[51].mxu0  ;;  %v2030_v11 = vmax.f32 %v983_v36, 0.0 }
 0x1a6   :  { %11446 = vst [vmem:[#allocation79_spill] sm:$0xff] %v8829_v46  ;;  %v1214_v4 = vadd.f32 %v1213_v63, %v8823_v49  ;;  %v1215_v32 = vpop.f32.mrb[73].mxu1  ;;  %v987_v33 = vadd.f32 %v986_v34, %v8445_v14  ;;  %1605 = vmatmul.mubr.bf16.gmra.mrb[72].mxu0 %v8031_v10  ;;  %v11449_v46 = vld [vmem:[#allocation16_spill] sm:$0xff]  ;;  %v990_v10 = vpop.f32.mrb[52].mxu0 }
 0x1a7   :  { %11447 = vst [vmem:[#allocation80_spill] sm:$0xff] %v8836_v61  ;;  %v1216_v60 = vadd.f32 %v1215_v32, %v8826_v41  ;;  %v1217_v37 = vpop.f32.mrb[74].mxu1  ;;  %v2035_v32 = vmax.f32 %v985_v1, 0.0  ;;  %1614 = vmatprep.mubr.bf16.mxu0 %v11449_v46  ;;  %v991_v1 = vadd.f32 %v990_v10, %v8441_v8 }
 0x1a8   :  { %v1218_v18 = vadd.f32 %v1217_v37, %v8823_v49  ;;  %v1219_v35 = vpop.f32.mrb[75].mxu1  ;;  %v1887_v63 = vmax.f32 %v1214_v4, 0.0  ;;  %v2036_v28 = vmax.f32 %v987_v33, 0.0 }
 0x1a9   :  { %v1220_v54 = vadd.f32 %v1219_v35, %v8826_v41  ;;  %v1888_v37 = vmax.f32 %v1216_v60, 0.0  ;;  %v8849_v50 = vpack.c.bf16 %v2035_v32, %v2029_v12 }
 0x1aa   :  { %v1893_v58 = vmax.f32 %v1218_v18, 0.0  ;;  %1482 = vmatmul.mubr.bf16.gmra.mrb[180].mxu1 %v11448_v13  ;;  %v8851_v34 = vpack.c.bf16 %v2036_v28, %v2030_v11  ;;  %v992_v13 = vpop.f32.mrb[53].mxu0  ;;  %v2041_v11 = vmax.f32 %v991_v1, 0.0  ;;  %v11454_v1 = vld [vmem:[#allocation36_spill] sm:$0xff] }
 0x1ab   :  { %v1894_v61 = vmax.f32 %v1220_v54, 0.0  ;;  %1491 = vmatprep.mubr.bf16.mxu1 %v11450_v15  ;;  %v993_v54 = vadd.f32 %v992_v13, %v8445_v14  ;;  %v994_v33 = vpop.f32.mrb[54].mxu0 }
 0x1ac   :  { %v2271_v29 = vpack.c.bf16 %v1893_v58, %v1887_v63  ;;  %v995_v63 = vadd.f32 %v994_v33, %v8441_v8  ;;  %v996_v58 = vpop.f32.mrb[55].mxu0 }
 0x1ad   :  { %v2272_v36 = vpack.c.bf16 %v1894_v61, %v1888_v37  ;;  %v1223_v35 = vpop.f32.mrb[76].mxu1  ;;  %v2042_v37 = vmax.f32 %v993_v54, 0.0  ;;  %v997_v28 = vadd.f32 %v996_v58, %v8445_v14 }
 0x1ae   :  { %v1224_v4 = vadd.f32 %v1223_v35, %v8823_v49  ;;  %v1225_v18 = vpop.f32.mrb[77].mxu1  ;;  %v2047_v13 = vmax.f32 %v995_v63, 0.0 }
 0x1af   :  { %2461 = vmatprep.subr.bf16.mxu1 %v2272_v36  ;;  %v1226_v46 = vadd.f32 %v1225_v18, %v8826_v41  ;;  %v1227_v60 = vpop.f32.mrb[78].mxu1  ;;  %v11451_v36 = vld [vmem:[#allocation17_spill] sm:$0xff]  ;;  %v11452_v18 = vld [vmem:[#allocation35_spill] sm:$0xff]  ;;  %v2048_v8 = vmax.f32 %v997_v28, 0.0 }
 0x1b0   :  { %2462 = vmatpush1.bf16.xpose.msra.mxu1 %v2271_v29  ;;  %v1228_v61 = vadd.f32 %v1227_v60, %v8823_v49  ;;  %v1229_v12 = vpop.f32.mrb[79].mxu1  ;;  %1615 = vmatmul.mubr.bf16.gmra.mrb[76].mxu0 %v11451_v36  ;;  %v1899_v35 = vmax.f32 %v1224_v4, 0.0  ;;  %v11453_v29 = vld [vmem:[#allocation20_spill] sm:$0xff]  ;;  %v8865_v43 = vpack.c.bf16 %v2047_v13, %v2041_v11  ;;  %v11455_v36 = vld [vmem:[#allocation21_spill] sm:$0xff] }
 0x1b1   :  { %v1230_v32 = vadd.f32 %v1229_v12, %v8826_v41  ;;  %1624 = vmatprep.mubr.bf16.mxu0 %v11453_v29  ;;  %v1900_v60 = vmax.f32 %v1226_v46, 0.0  ;;  %v8867_v14 = vpack.c.bf16 %v2048_v8, %v2042_v37  ;;  %v11457_v37 = vld [vmem:[#allocation23_spill] sm:$0xff]  ;;  %v11458_v29 = vld [vmem:[#allocation38_spill] sm:$0xff] }
 0x1b2   :  { %v1905_v10 = vmax.f32 %v1228_v61, 0.0  ;;  %1492 = vmatmul.mubr.bf16.gmra.mrb[184].mxu1 %v11452_v18 }
 0x1b3   :  { %v1906_v15 = vmax.f32 %v1230_v32, 0.0  ;;  %1501 = vmatprep.mubr.bf16.mxu1 %v11454_v1 }
 0x1b4   :  { %v2277_v33 = vpack.c.bf16 %v1905_v10, %v1899_v35 }
 0x1b5   :  { %v1233_v54 = vpop.f32.mrb[80].mxu1  ;;  %v2278_v12 = vpack.c.bf16 %v1906_v15, %v1900_v60  ;;  %v11456_v15 = vld [vmem:[#allocation37_spill] sm:$0xff] }
 0x1b6   :  { %v1234_v4 = vadd.f32 %v1233_v54, %v8823_v49  ;;  %v1235_v61 = vpop.f32.mrb[81].mxu1 }
 0x1b7   :  { %v1236_v58 = vadd.f32 %v1235_v61, %v8826_v41  ;;  %v1237_v63 = vpop.f32.mrb[82].mxu1  ;;  %2463 = vmatprep.subr.bf16.mxu1 %v2278_v12 }
 0x1b8   :  { %v1238_v46 = vadd.f32 %v1237_v63, %v8823_v49  ;;  %v1239_v32 = vpop.f32.mrb[83].mxu1  ;;  %2464 = vmatpush1.bf16.xpose.msra.mxu1 %v2277_v33  ;;  %1625 = vmatmul.mubr.bf16.gmra.mrb[80].mxu0 %v11455_v36  ;;  %v1911_v11 = vmax.f32 %v1234_v4, 0.0 }
 0x1b9   :  { %v1240_v28 = vadd.f32 %v1239_v32, %v8826_v41  ;;  %1634 = vmatprep.mubr.bf16.mxu0 %v11457_v37  ;;  %v1912_v10 = vmax.f32 %v1236_v58, 0.0  ;;  %v11459_v58 = vld [vmem:[#allocation24_spill] sm:$0xff] }
 0x1ba   :  { %v1917_v35 = vmax.f32 %v1238_v46, 0.0  ;;  %1502 = vmatmul.mubr.bf16.gmra.mrb[188].mxu1 %v11456_v15 }
 0x1bb   :  { %v1918_v13 = vmax.f32 %v1240_v28, 0.0  ;;  %1511 = vmatprep.mubr.bf16.mxu1 %v11458_v29 }
 0x1bc   :  { %v2283_v60 = vpack.c.bf16 %v1917_v35, %v1911_v11  ;;  %v11460_v11 = vld [vmem:[#allocation41_spill] sm:$0xff] }
 0x1bd   :  { %v1243_v8 = vpop.f32.mrb[84].mxu1  ;;  %v2284_v54 = vpack.c.bf16 %v1918_v13, %v1912_v10  ;;  %v11461_v35 = vld [vmem:[#allocation25_spill] sm:$0xff]  ;;  %v11462_v13 = vld [vmem:[#allocation42_spill] sm:$0xff] }
 0x1be   :  { %v1244_v12 = vadd.f32 %v1243_v8, %v8823_v49  ;;  %v1245_v33 = vpop.f32.mrb[85].mxu1 }
 0x1bf   :  { %v1246_v61 = vadd.f32 %v1245_v33, %v8826_v41  ;;  %v1247_v63 = vpop.f32.mrb[86].mxu1  ;;  %2465 = vmatprep.subr.bf16.mxu1 %v2284_v54 }
 0x1c0   :  { %v1248_v4 = vadd.f32 %v1247_v63, %v8823_v49  ;;  %v1249_v46 = vpop.f32.mrb[87].mxu1  ;;  %2466 = vmatpush1.bf16.xpose.msra.mxu1 %v2283_v60  ;;  %1635 = vmatmul.mubr.bf16.gmra.mrb[84].mxu0 %v11459_v58  ;;  %v1923_v28 = vmax.f32 %v1244_v12, 0.0 }
 0x1c1   :  { %v1250_v32 = vadd.f32 %v1249_v46, %v8826_v41  ;;  %1644 = vmatprep.mubr.bf16.mxu0 %v11461_v35  ;;  %v1924_v37 = vmax.f32 %v1246_v61, 0.0  ;;  %v11463_v61 = vld [vmem:[#allocation26_spill] sm:$0xff] }
 0x1c2   :  { %v1929_v36 = vmax.f32 %v1248_v4, 0.0  ;;  %1512 = vmatmul.mubr.bf16.gmra.mrb[192].mxu1 %v11460_v11 }
 0x1c3   :  { %v1930_v10 = vmax.f32 %v1250_v32, 0.0  ;;  %1521 = vmatprep.mubr.bf16.mxu1 %v11462_v13 }
 0x1c4   :  { %v2289_v8 = vpack.c.bf16 %v1929_v36, %v1923_v28  ;;  %v11464_v28 = vld [vmem:[#allocation43_spill] sm:$0xff]  ;;  %v11465_v36 = vld [vmem:[#allocation30_spill] sm:$0xff] }
 0x1c5   :  { %v1253_v54 = vpop.f32.mrb[88].mxu1  ;;  %v2290_v33 = vpack.c.bf16 %v1930_v10, %v1924_v37 }
 0x1c6   :  { %v1254_v63 = vadd.f32 %v1253_v54, %v8823_v49  ;;  %v1255_v60 = vpop.f32.mrb[89].mxu1 }
 0x1c7   :  { %v1256_v46 = vadd.f32 %v1255_v60, %v8826_v41  ;;  %v1257_v29 = vpop.f32.mrb[90].mxu1  ;;  %2467 = vmatprep.subr.bf16.mxu1 %v2290_v33 }
 0x1c8   :  { %v1258_v12 = vadd.f32 %v1257_v29, %v8823_v49  ;;  %v1259_v4 = vpop.f32.mrb[91].mxu1  ;;  %2468 = vmatpush1.bf16.xpose.msra.mxu1 %v2289_v8  ;;  %1645 = vmatmul.mubr.bf16.gmra.mrb[88].mxu0 %v11463_v61  ;;  %v1935_v32 = vmax.f32 %v1254_v63, 0.0 }
 0x1c9   :  { %v1260_v58 = vadd.f32 %v1259_v4, %v8826_v41  ;;  %1654 = vmatprep.mubr.bf16.mxu0 %v11465_v36  ;;  %v1936_v37 = vmax.f32 %v1256_v46, 0.0 }
 0x1ca   :  { %v1941_v35 = vmax.f32 %v1258_v12, 0.0  ;;  %1522 = vmatmul.mubr.bf16.gmra.mrb[196].mxu1 %v11464_v28 }
 0x1cb   :  { %v1942_v10 = vmax.f32 %v1260_v58, 0.0  ;;  %2493 = vmatprep.mubr.bf16.mxu1 %v8534_v48 }
 0x1cc   :  { %v2295_v54 = vpack.c.bf16 %v1941_v35, %v1935_v32 }
 0x1cd   :  { %v1263_v33 = vpop.f32.mrb[92].mxu1  ;;  %v2296_v60 = vpack.c.bf16 %v1942_v10, %v1936_v37 }
 0x1ce   :  { %v1264_v29 = vadd.f32 %v1263_v33, %v8823_v49  ;;  %v1265_v8 = vpop.f32.mrb[93].mxu1 }
 0x1cf   :  { %v1266_v4 = vadd.f32 %v1265_v8, %v8826_v41  ;;  %v1267_v13 = vpop.f32.mrb[94].mxu1  ;;  %2526 = vmatprep.subr.bf16.mxu1 %v2296_v60 }
 0x1d0   :  { %v1268_v63 = vadd.f32 %v1267_v13, %v8823_v49  ;;  %v1269_v12 = vpop.f32.mrb[95].mxu1  ;;  %1655 = vmatmul.mubr.bf16.gmra.mrb[92].mxu0 %v8236_v7  ;;  %v1947_v46 = vmax.f32 %v1264_v29, 0.0 }
 0x1d1   :  { %v1270_v61 = vadd.f32 %v1269_v12, %v8826_v41  ;;  %1664 = vmatprep.mubr.bf16.mxu0 %v8264_v30  ;;  %v1948_v48 = vmax.f32 %v1266_v4, 0.0 }
 0x1d2   :  { %v1953_v58 = vmax.f32 %v1268_v63, 0.0  ;;  %2494 = vmatmul.mubr.bf16.vlgmr.msra.gmra.mrb[200].mxu1 %v8532_v31 }
 0x1d3   :  { %v1954_v32 = vmax.f32 %v1270_v61, 0.0  ;;  %2527 = vmatpush1.bf16.xpose.msra.mxu1 %v2295_v54  ;;  %2501 = vmatprep.mubr.bf16.mxu1 %v8562_v38 }
 0x1d4   :  { %v2301_v35 = vpack.c.bf16 %v1953_v58, %v1947_v46 }
 0x1d5   :  { %v1273_v36 = vpop.f32.mrb[96].mxu1  ;;  %v2302_v37 = vpack.c.bf16 %v1954_v32, %v1948_v48 }
 0x1d6   :  { %v1274_v13 = vadd.f32 %v1273_v36, %v8823_v49  ;;  %v1275_v10 = vpop.f32.mrb[97].mxu1 }
 0x1d7   :  { %v1276_v33 = vadd.f32 %v1275_v10, %v8826_v41  ;;  %v1277_v7 = vpop.f32.mrb[98].mxu1  ;;  %2528 = vmatprep.subr.bf16.mxu1 %v2302_v37 }
 0x1d8   :  { %v1278_v60 = vadd.f32 %v1277_v7, %v8823_v49  ;;  %v1279_v31 = vpop.f32.mrb[99].mxu1  ;;  %1665 = vmatmul.mubr.bf16.gmra.mrb[96].mxu0 %v8272_v44  ;;  %v1959_v54 = vmax.f32 %v1274_v13, 0.0 }
 0x1d9   :  { %v1280_v30 = vadd.f32 %v1279_v31, %v8826_v41  ;;  %1674 = vmatprep.mubr.bf16.mxu0 %v8300_v9  ;;  %v1960_v38 = vmax.f32 %v1276_v33, 0.0 }
 0x1da   :  { %v1965_v29 = vmax.f32 %v1278_v60, 0.0  ;;  %2502 = vmatmul.mubr.bf16.gmra.mrb[204].mxu1 %v8567_v3 }
 0x1db   :  { %v1966_v8 = vmax.f32 %v1280_v30, 0.0  ;;  %2529 = vmatpush1.bf16.xpose.msra.mxu1 %v2301_v35  ;;  %2509 = vmatprep.mubr.bf16.mxu1 %v8592_v0 }
 0x1dc   :  { %v2307_v4 = vpack.c.bf16 %v1965_v29, %v1959_v54 }
 0x1dd   :  { %v1283_v63 = vpop.f32.mrb[100].mxu1  ;;  %v2308_v12 = vpack.c.bf16 %v1966_v8, %v1960_v38 }
 0x1de   :  { %v1284_v61 = vadd.f32 %v1283_v63, %v8823_v49  ;;  %v1285_v46 = vpop.f32.mrb[101].mxu1 }
 0x1df   :  { %v1286_v58 = vadd.f32 %v1285_v46, %v8826_v41  ;;  %v1287_v44 = vpop.f32.mrb[102].mxu1  ;;  %2530 = vmatprep.subr.bf16.mxu1 %v2308_v12 }
 0x1e0   :  { %v1288_v48 = vadd.f32 %v1287_v44, %v8823_v49  ;;  %v1289_v3 = vpop.f32.mrb[103].mxu1  ;;  %1675 = vmatmul.mubr.bf16.gmra.mrb[100].mxu0 %v8308_v24  ;;  %v1971_v32 = vmax.f32 %v1284_v61, 0.0 }
 0x1e1   :  { %v1290_v9 = vadd.f32 %v1289_v3, %v8826_v41  ;;  %1684 = vmatprep.mubr.bf16.mxu0 %v8336_v5  ;;  %v1972_v0 = vmax.f32 %v1286_v58, 0.0 }
 0x1e2   :  { %v1977_v35 = vmax.f32 %v1288_v48, 0.0  ;;  %2510 = vmatmul.mubr.bf16.gmra.mrb[208].mxu1 %v8597_v20  ;;  %v11467_v48 = vld [vmem:[#allocation40_spill] sm:$0xff] }
 0x1e3   :  { %v1978_v36 = vmax.f32 %v1290_v9, 0.0  ;;  %2531 = vmatpush1.bf16.xpose.msra.mxu1 %v2307_v4  ;;  %2517 = vmatprep.mubr.bf16.mxu1 %v8623_v27  ;;  %v11466_v27 = vld [vmem:[#allocation39_spill] sm:$0xff] }
 0x1e4   :  { %v2313_v37 = vpack.c.bf16 %v1977_v35, %v1971_v32 }
 0x1e5   :  { %v1293_v13 = vpop.f32.mrb[104].mxu1  ;;  %v2314_v10 = vpack.c.bf16 %v1978_v36, %v1972_v0 }
 0x1e6   :  { %v1294_v33 = vadd.f32 %v1293_v13, %v8823_v49  ;;  %v1295_v7 = vpop.f32.mrb[105].mxu1 }
 0x1e7   :  { %v1296_v60 = vadd.f32 %v1295_v7, %v8826_v41  ;;  %v1297_v24 = vpop.f32.mrb[106].mxu1  ;;  %2532 = vmatprep.subr.bf16.mxu1 %v2314_v10 }
 0x1e8   :  { %v1298_v31 = vadd.f32 %v1297_v24, %v8823_v49  ;;  %v1299_v20 = vpop.f32.mrb[107].mxu1  ;;  %1685 = vmatmul.mubr.bf16.gmra.mrb[104].mxu0 %v8344_v26  ;;  %v1983_v30 = vmax.f32 %v1294_v33, 0.0 }
 0x1e9   :  { %v1300_v5 = vadd.f32 %v1299_v20, %v8826_v41  ;;  %1694 = vmatprep.mubr.bf16.mxu0 %v11466_v27  ;;  %v1984_v29 = vmax.f32 %v1296_v60, 0.0 }
 0x1ea   :  { %v1989_v54 = vmax.f32 %v1298_v31, 0.0  ;;  %2518 = vmatmul.mubr.bf16.gmra.mrb[212].mxu1 %v8628_v25  ;;  %v11469_v31 = vld [vmem:[#allocation3_spill] sm:$0xff] }
 0x1eb   :  { %v1990_v38 = vmax.f32 %v1300_v5, 0.0  ;;  %2533 = vmatpush1.bf16.xpose.msra.mxu1 %v2313_v37  ;;  %2558 = vmatprep.mubr.bf16.mxu1 %v8652_v51  ;;  %v11468_v51 = vld [vmem:[#allocation2_spill] sm:$0xff] }
 0x1ec   :  { %v2319_v8 = vpack.c.bf16 %v1989_v54, %v1983_v30 }
 0x1ed   :  { %v1303_v4 = vpop.f32.mrb[108].mxu1  ;;  %v2320_v63 = vpack.c.bf16 %v1990_v38, %v1984_v29 }
 0x1ee   :  { %v1304_v12 = vadd.f32 %v1303_v4, %v8823_v49  ;;  %v1305_v61 = vpop.f32.mrb[109].mxu1 }
 0x1ef   :  { %v1306_v46 = vadd.f32 %v1305_v61, %v8826_v41  ;;  %v1307_v26 = vpop.f32.mrb[110].mxu1  ;;  %2591 = vmatprep.subr.bf16.mxu1 %v2320_v63 }
 0x1f0   :  { %v1308_v58 = vadd.f32 %v1307_v26, %v8823_v49  ;;  %v1309_v25 = vpop.f32.mrb[111].mxu1  ;;  %1695 = vmatmul.mubr.bf16.gmra.mrb[108].mxu0 %v11467_v48  ;;  %v1995_v3 = vmax.f32 %v1304_v12, 0.0  ;;  %v11471_v26 = vld [vmem:[#allocation5_spill] sm:$0xff] }
 0x1f1   :  { %v1310_v44 = vadd.f32 %v1309_v25, %v8826_v41  ;;  %1704 = vmatprep.mubr.bf16.mxu0 %v11468_v51  ;;  %v1996_v32 = vmax.f32 %v1306_v46, 0.0 }
 0x1f2   :  { %v2001_v9 = vmax.f32 %v1308_v58, 0.0  ;;  %2559 = vmatmul.mubr.bf16.vlgmr.msra.gmra.mrb[216].mxu1 %v8654_v42 }
 0x1f3   :  { %v2002_v35 = vmax.f32 %v1310_v44, 0.0  ;;  %2592 = vmatpush1.bf16.xpose.msra.mxu1 %v2319_v8  ;;  %2566 = vmatprep.mubr.bf16.mxu1 %v8683_v62  ;;  %v11470_v62 = vld [vmem:[#allocation4_spill] sm:$0xff] }
 0x1f4   :  { %v2325_v0 = vpack.c.bf16 %v2001_v9, %v1995_v3 }
 0x1f5   :  { %v1313_v36 = vpop.f32.mrb[112].mxu1  ;;  %v2326_v37 = vpack.c.bf16 %v2002_v35, %v1996_v32 }
 0x1f6   :  { %v1314_v13 = vadd.f32 %v1313_v36, %v8823_v49  ;;  %v1315_v10 = vpop.f32.mrb[113].mxu1 }
 0x1f7   :  { %v1316_v33 = vadd.f32 %v1315_v10, %v8826_v41  ;;  %v1317_v7 = vpop.f32.mrb[114].mxu1  ;;  %2593 = vmatprep.subr.bf16.mxu1 %v2326_v37  ;;  %v11473_v10 = vld [vmem:[#allocation7_spill] sm:$0xff] }
 0x1f8   :  { %v1318_v60 = vadd.f32 %v1317_v7, %v8823_v49  ;;  %v1319_v42 = vpop.f32.mrb[115].mxu1  ;;  %1705 = vmatmul.mubr.bf16.gmra.mrb[112].mxu0 %v11469_v31  ;;  %v2007_v20 = vmax.f32 %v1314_v13, 0.0 }
 0x1f9   :  { %v1320_v24 = vadd.f32 %v1319_v42, %v8826_v41  ;;  %1714 = vmatprep.mubr.bf16.mxu0 %v11470_v62  ;;  %v2008_v30 = vmax.f32 %v1316_v33, 0.0 }
 0x1fa   :  { %v2013_v5 = vmax.f32 %v1318_v60, 0.0  ;;  %2567 = vmatmul.mubr.bf16.gmra.mrb[220].mxu1 %v8689_v2 }
 0x1fb   :  { %v2014_v54 = vmax.f32 %v1320_v24, 0.0  ;;  %2594 = vmatpush1.bf16.xpose.msra.mxu1 %v2325_v0  ;;  %2574 = vmatprep.mubr.bf16.mxu1 %v8714_v39  ;;  %v11472_v39 = vld [vmem:[#allocation6_spill] sm:$0xff] }
 0x1fc   :  { %v2331_v27 = vpack.c.bf16 %v2013_v5, %v2007_v20 }
 0x1fd   :  { %v1323_v29 = vpop.f32.mrb[116].mxu1  ;;  %v2332_v38 = vpack.c.bf16 %v2014_v54, %v2008_v30 }
 0x1fe   :  { %v1324_v8 = vadd.f32 %v1323_v29, %v8823_v49  ;;  %v1325_v4 = vpop.f32.mrb[117].mxu1 }
 0x1ff   :  { %v1326_v63 = vadd.f32 %v1325_v4, %v8826_v41  ;;  %v1327_v12 = vpop.f32.mrb[118].mxu1  ;;  %2595 = vmatprep.subr.bf16.mxu1 %v2332_v38  ;;  %v11475_v38 = vld [vmem:[#allocation9_spill] sm:$0xff] }
 0x200   :  { %v1328_v61 = vadd.f32 %v1327_v12, %v8823_v49  ;;  %v1329_v2 = vpop.f32.mrb[119].mxu1  ;;  %1715 = vmatmul.mubr.bf16.gmra.mrb[116].mxu0 %v11471_v26  ;;  %v2019_v58 = vmax.f32 %v1324_v8, 0.0 }
 0x201   :  { %v1330_v46 = vadd.f32 %v1329_v2, %v8826_v41  ;;  %1724 = vmatprep.mubr.bf16.mxu0 %v11472_v39  ;;  %v2020_v44 = vmax.f32 %v1326_v63, 0.0 }
 0x202   :  { %v2025_v25 = vmax.f32 %v1328_v61, 0.0  ;;  %2575 = vmatmul.mubr.bf16.gmra.mrb[224].mxu1 %v8709_v19 }
 0x203   :  { %v2026_v48 = vmax.f32 %v1330_v46, 0.0  ;;  %2596 = vmatpush1.bf16.xpose.msra.mxu1 %v2331_v27  ;;  %2582 = vmatprep.mubr.bf16.mxu1 %v8744_v45  ;;  %v11474_v45 = vld [vmem:[#allocation8_spill] sm:$0xff] }
 0x204   :  { %v2337_v3 = vpack.c.bf16 %v2025_v25, %v2019_v58 }
 0x205   :  { %v1333_v9 = vpop.f32.mrb[120].mxu1  ;;  %v2338_v51 = vpack.c.bf16 %v2026_v48, %v2020_v44 }
 0x206   :  { %v1334_v32 = vadd.f32 %v1333_v9, %v8823_v49  ;;  %v1335_v35 = vpop.f32.mrb[121].mxu1 }
 0x207   :  { %v1336_v0 = vadd.f32 %v1335_v35, %v8826_v41  ;;  %v1337_v36 = vpop.f32.mrb[122].mxu1  ;;  %2597 = vmatprep.subr.bf16.mxu1 %v2338_v51 }
 0x208   :  { %v1338_v37 = vadd.f32 %v1337_v36, %v8823_v49  ;;  %v1339_v19 = vpop.f32.mrb[123].mxu1  ;;  %1725 = vmatmul.mubr.bf16.gmra.mrb[120].mxu0 %v11473_v10  ;;  %v2031_v33 = vmax.f32 %v1334_v32, 0.0 }
 0x209   :  { %v1340_v13 = vadd.f32 %v1339_v19, %v8826_v41  ;;  %1734 = vmatprep.mubr.bf16.mxu0 %v11474_v45  ;;  %v2032_v60 = vmax.f32 %v1336_v0, 0.0 }
 0x20a   :  { %v2037_v7 = vmax.f32 %v1338_v37, 0.0  ;;  %2583 = vmatmul.mubr.bf16.gmra.mrb[228].mxu1 %v8739_v57 }
 0x20b   :  { %v2038_v42 = vmax.f32 %v1340_v13, 0.0  ;;  %2598 = vmatpush1.bf16.xpose.msra.mxu1 %v2337_v3  ;;  %2623 = vmatprep.mubr.bf16.mxu1 %v8764_v47  ;;  %v11476_v47 = vld [vmem:[#allocation10_spill] sm:$0xff]  ;;  %v11477_v3 = vld [vmem:[#allocation11_spill] sm:$0xff] }
 0x20c   :  { %v2343_v24 = vpack.c.bf16 %v2037_v7, %v2031_v33 }
 0x20d   :  { %v1343_v31 = vpop.f32.mrb[124].mxu1  ;;  %v2344_v20 = vpack.c.bf16 %v2038_v42, %v2032_v60 }
 0x20e   :  { %v1344_v5 = vadd.f32 %v1343_v31, %v8823_v49  ;;  %v1345_v62 = vpop.f32.mrb[125].mxu1 }
 0x20f   :  { %v1346_v30 = vadd.f32 %v1345_v62, %v8826_v41  ;;  %v1347_v54 = vpop.f32.mrb[126].mxu1  ;;  %2656 = vmatprep.subr.bf16.mxu1 %v2344_v20 }
 0x210   :  { %v1348_v27 = vadd.f32 %v1347_v54, %v8823_v49  ;;  %v1349_v57 = vpop.f32.mrb[127].mxu1  ;;  %1735 = vmatmul.mubr.bf16.gmra.mrb[124].mxu0 %v11475_v38  ;;  %v2043_v8 = vmax.f32 %v1344_v5, 0.0  ;;  %v11480_v38 = vld [vmem:[#allocation14_spill] sm:$0xff] }
 0x211   :  { %v1350_v29 = vadd.f32 %v1349_v57, %v8826_v41  ;;  %1744 = vmatprep.mubr.bf16.mxu0 %v11476_v47  ;;  %v2044_v63 = vmax.f32 %v1346_v30, 0.0 }
 0x212   :  { %v2049_v4 = vmax.f32 %v1348_v27, 0.0  ;;  %2624 = vmatmul.mubr.bf16.vlgmr.msra.gmra.mrb[232].mxu1 %v8762_v22 }
 0x213   :  { %v2050_v12 = vmax.f32 %v1350_v29, 0.0  ;;  %2657 = vmatpush1.bf16.xpose.msra.mxu1 %v2343_v24  ;;  %2631 = vmatprep.mubr.bf16.mxu1 %v8784_v53  ;;  %v11478_v53 = vld [vmem:[#allocation12_spill] sm:$0xff] }
 0x214   :  { %v2349_v61 = vpack.c.bf16 %v2049_v4, %v2043_v8 }
 0x215   :  { %v1353_v2 = vpop.f32.mrb[128].mxu1  ;;  %v2350_v46 = vpack.c.bf16 %v2050_v12, %v2044_v63 }
 0x216   :  { %v1354_v26 = vadd.f32 %v1353_v2, %v8823_v49  ;;  %v1355_v58 = vpop.f32.mrb[129].mxu1 }
 0x217   :  { %v1356_v25 = vadd.f32 %v1355_v58, %v8826_v41  ;;  %v1357_v39 = vpop.f32.mrb[130].mxu1  ;;  %2658 = vmatprep.subr.bf16.mxu1 %v2350_v46 }
 0x218   :  { %v1358_v44 = vadd.f32 %v1357_v39, %v8823_v49  ;;  %v1359_v22 = vpop.f32.mrb[131].mxu1  ;;  %1745 = vmatmul.mubr.bf16.gmra.mrb[128].mxu0 %v11477_v3  ;;  %v2055_v9 = vmax.f32 %v1354_v26, 0.0 }
 0x219   :  { %v1360_v48 = vadd.f32 %v1359_v22, %v8826_v41  ;;  %1754 = vmatprep.mubr.bf16.mxu0 %v11478_v53  ;;  %v2056_v32 = vmax.f32 %v1356_v25, 0.0  ;;  %v11482_v22 = vld [vmem:[#allocation18_spill] sm:$0xff] }
 0x21a   :  { %v2061_v51 = vmax.f32 %v1358_v44, 0.0  ;;  %2632 = vmatmul.mubr.bf16.gmra.mrb[236].mxu1 %v8782_v52 }
 0x21b   :  { %v2062_v35 = vmax.f32 %v1360_v48, 0.0  ;;  %2659 = vmatpush1.bf16.xpose.msra.mxu1 %v2349_v61  ;;  %2639 = vmatprep.mubr.bf16.mxu1 %v8804_v6  ;;  %v11479_v6 = vld [vmem:[#allocation13_spill] sm:$0xff] }
 0x21c   :  { %v2355_v0 = vpack.c.bf16 %v2061_v51, %v2055_v9 }
 0x21d   :  { %v1363_v36 = vpop.f32.mrb[132].mxu1  ;;  %v2356_v37 = vpack.c.bf16 %v2062_v35, %v2056_v32 }
 0x21e   :  { %v1364_v19 = vadd.f32 %v1363_v36, %v8823_v49  ;;  %v1365_v13 = vpop.f32.mrb[133].mxu1 }
 0x21f   :  { %v1366_v10 = vadd.f32 %v1365_v13, %v8826_v41  ;;  %v1367_v33 = vpop.f32.mrb[134].mxu1  ;;  %2660 = vmatprep.subr.bf16.mxu1 %v2356_v37 }
 0x220   :  { %v1368_v7 = vadd.f32 %v1367_v33, %v8823_v49  ;;  %v1369_v52 = vpop.f32.mrb[135].mxu1  ;;  %1755 = vmatmul.mubr.bf16.gmra.mrb[132].mxu0 %v7986_v55  ;;  %v2067_v60 = vmax.f32 %v1364_v19, 0.0 }
 0x221   :  { %v1370_v45 = vadd.f32 %v1369_v52, %v8826_v41  ;;  %1764 = vmatprep.mubr.bf16.mxu0 %v11479_v6  ;;  %v2068_v24 = vmax.f32 %v1366_v10, 0.0 }
 0x222   :  { %v2073_v42 = vmax.f32 %v1368_v7, 0.0  ;;  %2640 = vmatmul.mubr.bf16.gmra.mrb[240].mxu1 %v8802_v56 }
 0x223   :  { %v2074_v31 = vmax.f32 %v1370_v45, 0.0  ;;  %2661 = vmatpush1.bf16.xpose.msra.mxu1 %v2355_v0  ;;  %2647 = vmatprep.mubr.bf16.mxu1 %v8833_v23  ;;  %v11481_v23 = vld [vmem:[#allocation15_spill] sm:$0xff] }
 0x224   :  { %v2361_v20 = vpack.c.bf16 %v2073_v42, %v2067_v60  ;;  %v11485_v60 = vld [vmem:[#allocation46_spill] sm:$0xff] }
 0x225   :  { %v1373_v5 = vpop.f32.mrb[136].mxu1  ;;  %v2362_v62 = vpack.c.bf16 %v2074_v31, %v2068_v24 }
 0x226   :  { %v1374_v30 = vadd.f32 %v1373_v5, %v8823_v49  ;;  %v1375_v54 = vpop.f32.mrb[137].mxu1 }
 0x227   :  { %v1376_v27 = vadd.f32 %v1375_v54, %v8826_v41  ;;  %v1377_v55 = vpop.f32.mrb[138].mxu1  ;;  %2662 = vmatprep.subr.bf16.mxu1 %v2362_v62 }
 0x228   :  { %v1378_v57 = vadd.f32 %v1377_v55, %v8823_v49  ;;  %v1379_v56 = vpop.f32.mrb[139].mxu1  ;;  %1765 = vmatmul.mubr.bf16.gmra.mrb[136].mxu0 %v11480_v38  ;;  %v2079_v8 = vmax.f32 %v1374_v30, 0.0  ;;  %v11486_v55 = vld [vmem:[#allocation45_spill] sm:$0xff] }
 0x229   :  { %v1380_v29 = vadd.f32 %v1379_v56, %v8826_v41  ;;  %1774 = vmatprep.mubr.bf16.mxu0 %v11481_v23  ;;  %v2080_v47 = vmax.f32 %v1376_v27, 0.0 }
 0x22a   :  { %v2085_v4 = vmax.f32 %v1378_v57, 0.0  ;;  %2648 = vmatmul.mubr.bf16.gmra.mrb[244].mxu1 %v8831_v16 }
 0x22b   :  { %v2086_v63 = vmax.f32 %v1380_v29, 0.0  ;;  %2663 = vmatpush1.bf16.xpose.msra.mxu1 %v2361_v20  ;;  %2688 = vmatprep.mubr.bf16.mxu1 %v8851_v34  ;;  %v11483_v34 = vld [vmem:[#allocation19_spill] sm:$0xff]  ;;  %v11487_v29 = vld [vmem:[#allocation48_spill] sm:$0xff] }
 0x22c   :  { %v2367_v12 = vpack.c.bf16 %v2085_v4, %v2079_v8 }
 0x22d   :  { %v2368_v61 = vpack.c.bf16 %v2086_v63, %v2080_v47  ;;  %v1383_v2 = vpop.f32.mrb[140].mxu1 }
 0x22e   :  { %v1384_v46 = vadd.f32 %v1383_v2, %v8823_v49  ;;  %v1385_v26 = vpop.f32.mrb[141].mxu1 }
 0x22f   :  { %v1386_v58 = vadd.f32 %v1385_v26, %v8826_v41  ;;  %v1387_v25 = vpop.f32.mrb[142].mxu1  ;;  %2721 = vmatprep.subr.bf16.mxu1 %v2368_v61  ;;  %v11488_v26 = vld [vmem:[#allocation47_spill] sm:$0xff] }
 0x230   :  { %v1388_v39 = vadd.f32 %v1387_v25, %v8823_v49  ;;  %v1389_v16 = vpop.f32.mrb[143].mxu1  ;;  %1775 = vmatmul.mubr.bf16.gmra.mrb[140].mxu0 %v11482_v22  ;;  %v2091_v48 = vmax.f32 %v1384_v46, 0.0 }
 0x231   :  { %v1390_v44 = vadd.f32 %v1389_v16, %v8826_v41  ;;  %1784 = vmatprep.mubr.bf16.mxu0 %v11483_v34  ;;  %v2092_v9 = vmax.f32 %v1386_v58, 0.0  ;;  %v11489_v58 = vld [vmem:[#allocation27_spill] sm:$0xff]  ;;  %v11490_v16 = vld [vmem:[#allocation50_spill] sm:$0xff] }
 0x232   :  { %v2097_v3 = vmax.f32 %v1388_v39, 0.0  ;;  %2689 = vmatmul.mubr.bf16.vlgmr.msra.gmra.mrb[248].mxu1 %v8849_v50 }
 0x233   :  { %v2098_v51 = vmax.f32 %v1390_v44, 0.0  ;;  %2722 = vmatpush1.bf16.xpose.msra.mxu1 %v2367_v12  ;;  %2696 = vmatprep.mubr.bf16.mxu1 %v8867_v14  ;;  %v11484_v14 = vld [vmem:[#allocation22_spill] sm:$0xff] }
 0x234   :  { %v2373_v53 = vpack.c.bf16 %v2097_v3, %v2091_v48 }
 0x235   :  { %v2374_v32 = vpack.c.bf16 %v2098_v51, %v2092_v9  ;;  %v1393_v35 = vpop.f32.mrb[144].mxu1 }
 0x236   :  { %v1394_v0 = vadd.f32 %v1393_v35, %v8823_v49  ;;  %v1395_v36 = vpop.f32.mrb[145].mxu1  ;;  %v11491_v35 = vld [vmem:[#allocation28_spill] sm:$0xff] }
 0x237   :  { %v1396_v37 = vadd.f32 %v1395_v36, %v8826_v41  ;;  %v1397_v19 = vpop.f32.mrb[146].mxu1  ;;  %2723 = vmatprep.subr.bf16.mxu1 %v2374_v32 }
 0x238   :  { %v1398_v13 = vadd.f32 %v1397_v19, %v8823_v49  ;;  %v1399_v50 = vpop.f32.mrb[147].mxu1  ;;  %1785 = vmatmul.mubr.bf16.gmra.mrb[144].mxu0 %v8127_v59  ;;  %v2103_v33 = vmax.f32 %v1394_v0, 0.0  ;;  %v11493_v19 = vld [vmem:[#allocation29_spill] sm:$0xff] }
 0x239   :  { %v1400_v10 = vadd.f32 %v1399_v50, %v8826_v41  ;;  %1794 = vmatprep.mubr.bf16.mxu0 %v11484_v14  ;;  %v2104_v52 = vmax.f32 %v1396_v37, 0.0  ;;  %v11492_v37 = vld [vmem:[#allocation49_spill] sm:$0xff] }
 0x23a   :  { %v2109_v7 = vmax.f32 %v1398_v13, 0.0  ;;  %2697 = vmatmul.mubr.bf16.gmra.mrb[252].mxu1 %v8865_v43 }
 0x23b   :  { %v2110_v45 = vmax.f32 %v1400_v10, 0.0  ;;  %2704 = vmatprep.mubr.bf16.mxu1 %v11485_v60  ;;  %2724 = vmatpush1.bf16.xpose.msra.mxu1 %v2373_v53  ;;  %v11494_v10 = vld [vmem:[#allocation52_spill] sm:$0xff] }
 0x23c   :  { %v2379_v42 = vpack.c.bf16 %v2109_v7, %v2103_v33 }
 0x23d   :  { %v2380_v6 = vpack.c.bf16 %v2110_v45, %v2104_v52  ;;  %v1403_v24 = vpop.f32.mrb[148].mxu1 }
 0x23e   :  { %v1404_v31 = vadd.f32 %v1403_v24, %v8823_v49  ;;  %v1405_v20 = vpop.f32.mrb[149].mxu1 }
 0x23f   :  { %v1406_v5 = vadd.f32 %v1405_v20, %v8826_v41  ;;  %v1407_v59 = vpop.f32.mrb[150].mxu1  ;;  %2725 = vmatprep.subr.bf16.mxu1 %v2380_v6  ;;  %v11495_v20 = vld [vmem:[#allocation31_spill] sm:$0xff] }
 0x240   :  { %v1408_v62 = vadd.f32 %v1407_v59, %v8823_v49  ;;  %v1409_v43 = vpop.f32.mrb[151].mxu1  ;;  %1795 = vmatmul.mubr.bf16.gmra.mrb[148].mxu0 %v8163_v17  ;;  %v2115_v54 = vmax.f32 %v1404_v31, 0.0 }
 0x241   :  { %v1410_v30 = vadd.f32 %v1409_v43, %v8826_v41  ;;  %1804 = vmatprep.mubr.bf16.mxu0 %v8165_v21  ;;  %v2116_v57 = vmax.f32 %v1406_v5, 0.0  ;;  %v11497_v43 = vld [vmem:[#allocation32_spill] sm:$0xff] }
 0x242   :  { %v2121_v27 = vmax.f32 %v1408_v62, 0.0  ;;  %2705 = vmatmul.mubr.bf16.gmra.mrb[0].mxu1 %v11486_v55  ;;  %v11496_v62 = vld [vmem:[#allocation51_spill] sm:$0xff] }
 0x243   :  { %v2122_v56 = vmax.f32 %v1410_v30, 0.0  ;;  %2712 = vmatprep.mubr.bf16.mxu1 %v11487_v29  ;;  %2726 = vmatpush1.bf16.xpose.msra.mxu1 %v2379_v42 }
 0x244   :  { %v2385_v38 = vpack.c.bf16 %v2121_v27, %v2115_v54  ;;  %v11498_v27 = vld [vmem:[#allocation54_spill] sm:$0xff] }
 0x245   :  { %v2386_v8 = vpack.c.bf16 %v2122_v56, %v2116_v57  ;;  %v1413_v4 = vpop.f32.mrb[152].mxu1 }
 0x246   :  { %v1414_v23 = vadd.f32 %v1413_v4, %v8823_v49  ;;  %v1415_v47 = vpop.f32.mrb[153].mxu1 }
 0x247   :  { %v1416_v63 = vadd.f32 %v1415_v47, %v8826_v41  ;;  %v1417_v17 = vpop.f32.mrb[154].mxu1  ;;  %2727 = vmatprep.subr.bf16.mxu1 %v2386_v8 }
 0x248   :  { %v1418_v12 = vadd.f32 %v1417_v17, %v8823_v49  ;;  %v1419_v61 = vpop.f32.mrb[155].mxu1  ;;  %1805 = vmatmul.mubr.bf16.gmra.mrb[152].mxu0 %v8199_v40  ;;  %v2127_v2 = vmax.f32 %v1414_v23, 0.0  ;;  %v11499_v17 = vld [vmem:[#allocation33_spill] sm:$0xff] }
 0x249   :  { %v1420_v21 = vadd.f32 %v1419_v61, %v8826_v41  ;;  %1814 = vmatprep.mubr.bf16.mxu0 %v11489_v58  ;;  %v2128_v25 = vmax.f32 %v1416_v63, 0.0  ;;  %v11502_v58 = vld [vmem:[#allocation56_spill] sm:$0xff] }
 0x24a   :  { %v2133_v46 = vmax.f32 %v1418_v12, 0.0  ;;  %2713 = vmatmul.mubr.bf16.gmra.mrb[4].mxu1 %v11488_v26 }
 0x24b   :  { %v2134_v39 = vmax.f32 %v1420_v21, 0.0  ;;  %2728 = vmatpush1.bf16.xpose.msra.mxu1 %v2385_v38  ;;  %2753 = vmatprep.mubr.bf16.mxu1 %v11490_v16  ;;  %v11500_v21 = vld [vmem:[#allocation53_spill] sm:$0xff] }
 0x24c   :  { %v2391_v44 = vpack.c.bf16 %v2133_v46, %v2127_v2  ;;  %v11501_v2 = vld [vmem:[#allocation34_spill] sm:$0xff] }
 0x24d   :  { %v2392_v22 = vpack.c.bf16 %v2134_v39, %v2128_v25  ;;  %v1423_v48 = vpop.f32.mrb[156].mxu1 }
 0x24e   :  { %v1424_v3 = vadd.f32 %v1423_v48, %v8823_v49  ;;  %v1425_v34 = vpop.f32.mrb[157].mxu1 }
 0x24f   :  { %v1426_v9 = vadd.f32 %v1425_v34, %v8826_v41  ;;  %v1427_v40 = vpop.f32.mrb[158].mxu1  ;;  %2786 = vmatprep.subr.bf16.mxu1 %v2392_v22  ;;  %v11503_v22 = vld [vmem:[#allocation44_spill] sm:$0xff] }
 0x250   :  { %v1428_v51 = vadd.f32 %v1427_v40, %v8823_v49  ;;  %v1429_v53 = vpop.f32.mrb[159].mxu1  ;;  %1815 = vmatmul.mubr.bf16.gmra.mrb[156].mxu0 %v11491_v35  ;;  %v2139_v0 = vmax.f32 %v1424_v3, 0.0  ;;  %v338_v48 = vsub.s32 5, %v11503_v22 }
 0x251   :  { %v1430_v32 = vadd.f32 %v1429_v53, %v8826_v41  ;;  %1824 = vmatprep.mubr.bf16.mxu0 %v11493_v19  ;;  %v2140_v13 = vmax.f32 %v1426_v9, 0.0  ;;  %v334_v9 = vsub.s32 4, %v11503_v22 }
 0x252   :  { %v2145_v36 = vmax.f32 %v1428_v51, 0.0  ;;  %2754 = vmatmul.mubr.bf16.vlgmr.msra.gmra.mrb[8].mxu1 %v11492_v37 }
 0x253   :  { %v2146_v50 = vmax.f32 %v1430_v32, 0.0  ;;  %2761 = vmatprep.mubr.bf16.mxu1 %v11494_v10  ;;  %2787 = vmatpush1.bf16.xpose.msra.mxu1 %v2391_v44  ;;  %v7603_v32 = vld [vmem:[%s11302_s3] sm:$0x3f] }
 0x254   :  { %v2397_v33 = vpack.c.bf16 %v2145_v36, %v2139_v0  ;;  %v9052_v35 = vrot.slane %v7603_v32, %v338_v48  ;;  %v9055_v37 = vrot.slane %v7603_v32, %v334_v9 }
 0x255   :  { %v2398_v7 = vpack.c.bf16 %v2146_v50, %v2140_v13  ;;  %v1433_v14 = vpop.f32.mrb[160].mxu1 }
 0x256   :  { %v1434_v52 = vadd.f32 %v1433_v14, %v8823_v49  ;;  %v1435_v45 = vpop.f32.mrb[161].mxu1  ;;  %v11504_v14 = vld [vmem:[#allocation55_spill] sm:$0xff] }
 0x257   :  { %v1436_v60 = vadd.f32 %v1435_v45, %v8826_v41  ;;  %v1437_v42 = vpop.f32.mrb[162].mxu1  ;;  %2788 = vmatprep.subr.bf16.mxu1 %v2398_v7 }
 0x258   :  { %v1438_v6 = vadd.f32 %v1437_v42, %v8823_v49  ;;  %v1439_v24 = vpop.f32.mrb[163].mxu1  ;;  %1825 = vmatmul.mubr.bf16.gmra.mrb[160].mxu0 %v11495_v20  ;;  %v2151_v5 = vmax.f32 %v1434_v52, 0.0 }
 0x259   :  { %v1440_v31 = vadd.f32 %v1439_v24, %v8826_v41  ;;  %1834 = vmatprep.mubr.bf16.mxu0 %v11497_v43  ;;  %v2152_v30 = vmax.f32 %v1436_v60, 0.0  ;;  %v1566_v44 = vpop.f32.mrb[56].mxu0 }
 0x25a   :  { %v2157_v59 = vmax.f32 %v1438_v6, 0.0  ;;  %2762 = vmatmul.mubr.bf16.gmra.mrb[12].mxu1 %v11496_v62  ;;  %v1568_v40 = vpop.f32.mrb[57].mxu0  ;;  %v1567_v52 = vadd.f32 %v1566_v44, %v9055_v37  ;;  %v11505_v6 = vld [vmem:[#allocation58_spill] sm:$0xff] }
 0x25b   :  { %v2158_v54 = vmax.f32 %v1440_v31, 0.0  ;;  %2769 = vmatprep.mubr.bf16.mxu1 %v11498_v27  ;;  %2789 = vmatpush1.bf16.xpose.msra.mxu1 %v2397_v33  ;;  %v1570_v19 = vpop.f32.mrb[58].mxu0  ;;  %v1569_v50 = vadd.f32 %v1568_v40, %v9052_v35 }
 0x25c   :  { %v2403_v55 = vpack.c.bf16 %v2157_v59, %v2151_v5  ;;  %v1572_v10 = vpop.f32.mrb[59].mxu0  ;;  %v1889_v20 = vmax.f32 %v1567_v52, 0.0 }
 0x25d   :  { %v2404_v57 = vpack.c.bf16 %v2158_v54, %v2152_v30  ;;  %v1443_v56 = vpop.f32.mrb[164].mxu1  ;;  %v1573_v45 = vadd.f32 %v1572_v10, %v9052_v35  ;;  %v1890_v24 = vmax.f32 %v1569_v50, 0.0 }
 0x25e   :  { %v1444_v29 = vadd.f32 %v1443_v56, %v8823_v49  ;;  %v1445_v38 = vpop.f32.mrb[165].mxu1 }
 0x25f   :  { %v1446_v8 = vadd.f32 %v1445_v38, %v8826_v41  ;;  %v1447_v4 = vpop.f32.mrb[166].mxu1  ;;  %2790 = vmatprep.subr.bf16.mxu1 %v2404_v57  ;;  %v1896_v5 = vmax.f32 %v1573_v45, 0.0 }
 0x260   :  { %v1448_v23 = vadd.f32 %v1447_v4, %v8823_v49  ;;  %v1449_v47 = vpop.f32.mrb[167].mxu1  ;;  %1835 = vmatmul.mubr.bf16.gmra.mrb[164].mxu0 %v11499_v17  ;;  %v2163_v12 = vmax.f32 %v1444_v29, 0.0 }
 0x261   :  { %v1450_v63 = vadd.f32 %v1449_v47, %v8826_v41  ;;  %1844 = vmatprep.mubr.bf16.mxu0 %v11501_v2  ;;  %v2164_v46 = vmax.f32 %v1446_v8, 0.0  ;;  %v2274_v54 = vpack.c.bf16 %v1896_v5, %v1890_v24  ;;  %v1576_v27 = vpop.f32.mrb[60].mxu0 }
 0x262   :  { %v2169_v61 = vmax.f32 %v1448_v23, 0.0  ;;  %2770 = vmatmul.mubr.bf16.gmra.mrb[16].mxu1 %v11500_v21  ;;  %v1578_v29 = vpop.f32.mrb[61].mxu0 }
 0x263   :  { %v2170_v26 = vmax.f32 %v1450_v63, 0.0  ;;  %2777 = vmatprep.mubr.bf16.mxu1 %v11502_v58  ;;  %2791 = vmatpush1.bf16.xpose.msra.mxu1 %v2403_v55  ;;  %v1580_v4 = vpop.f32.mrb[62].mxu0  ;;  %v1579_v21 = vadd.f32 %v1578_v29, %v9052_v35  ;;  %v11508_v58 = vld [vmem:[#allocation60_spill] sm:$0xff] }
 0x264   :  { %v2409_v25 = vpack.c.bf16 %v2169_v61, %v2163_v12  ;;  %3626 = vmatprep.subr.bf16.mxu0 %v2274_v54  ;;  %v1582_v47 = vpop.f32.mrb[63].mxu0  ;;  %v11506_v12 = vld [vmem:[#allocation57_spill] sm:$0xff]  ;;  %v11507_v61 = vld [vmem:[#allocation38_spill] sm:$0xff] }
 0x265   :  { %v2410_v39 = vpack.c.bf16 %v2170_v26, %v2164_v46  ;;  %v1453_v16 = vpop.f32.mrb[168].mxu1  ;;  %v1583_v2 = vadd.f32 %v1582_v47, %v9052_v35 }
 0x266   :  { %v1454_v3 = vadd.f32 %v1453_v16, %v8823_v49  ;;  %v1455_v34 = vpop.f32.mrb[169].mxu1  ;;  %v1902_v16 = vmax.f32 %v1579_v21, 0.0 }
 0x267   :  { %v1456_v51 = vadd.f32 %v1455_v34, %v8826_v41  ;;  %v1457_v53 = vpop.f32.mrb[170].mxu1  ;;  %2792 = vmatprep.subr.bf16.mxu1 %v2410_v39  ;;  %v1908_v44 = vmax.f32 %v1583_v2, 0.0 }
 0x268   :  { %v1458_v0 = vadd.f32 %v1457_v53, %v8823_v49  ;;  %v1459_v36 = vpop.f32.mrb[171].mxu1  ;;  %1845 = vmatmul.mubr.bf16.gmra.mrb[168].mxu0 %v11452_v18  ;;  %v2175_v33 = vmax.f32 %v1454_v3, 0.0  ;;  %v1571_v18 = vadd.f32 %v1570_v19, %v9055_v37 }
 0x269   :  { %v1460_v13 = vadd.f32 %v1459_v36, %v8826_v41  ;;  %1854 = vmatprep.mubr.bf16.mxu0 %v11454_v1  ;;  %v2176_v60 = vmax.f32 %v1456_v51, 0.0  ;;  %v2280_v53 = vpack.c.bf16 %v1908_v44, %v1902_v16  ;;  %v1586_v32 = vpop.f32.mrb[64].mxu0 }
 0x26a   :  { %v2181_v7 = vmax.f32 %v1458_v0, 0.0  ;;  %2778 = vmatmul.mubr.bf16.gmra.mrb[20].mxu1 %v11504_v14  ;;  %v1895_v43 = vmax.f32 %v1571_v18, 0.0  ;;  %v1587_v5 = vadd.f32 %v1586_v32, %v9055_v37 }
 0x26b   :  { %v2182_v42 = vmax.f32 %v1460_v13, 0.0  ;;  %2793 = vmatpush1.bf16.xpose.msra.mxu1 %v2409_v25  ;;  %2818 = vmatprep.mubr.bf16.mxu1 %v11505_v6  ;;  %v1577_v25 = vadd.f32 %v1576_v27, %v9055_v37  ;;  %v1588_v13 = vpop.f32.mrb[65].mxu0 }
 0x26c   :  { %v2415_v31 = vpack.c.bf16 %v2181_v7, %v2175_v33  ;;  %v2273_v56 = vpack.c.bf16 %v1895_v43, %v1889_v20  ;;  %v1590_v33 = vpop.f32.mrb[66].mxu0  ;;  %v1589_v6 = vadd.f32 %v1588_v13, %v9052_v35  ;;  %v11511_v20 = vld [vmem:[#allocation62_spill] sm:$0xff]  ;;  %v1913_v54 = vmax.f32 %v1587_v5, 0.0 }
 0x26d   :  { %v2416_v59 = vpack.c.bf16 %v2182_v42, %v2176_v60  ;;  %v1463_v62 = vpop.f32.mrb[172].mxu1  ;;  %v1901_v34 = vmax.f32 %v1577_v25, 0.0  ;;  %v1592_v14 = vpop.f32.mrb[67].mxu0  ;;  %v11509_v60 = vld [vmem:[#allocation59_spill] sm:$0xff]  ;;  %v11510_v42 = vld [vmem:[#allocation42_spill] sm:$0xff] }
 0x26e   :  { %v1464_v1 = vadd.f32 %v1463_v62, %v8823_v49  ;;  %v1465_v30 = vpop.f32.mrb[173].mxu1  ;;  %3627 = vmatpush1.bf16.msra.mxu0 %v2273_v56  ;;  %v1593_v24 = vadd.f32 %v1592_v14, %v9052_v35  ;;  %v1914_v62 = vmax.f32 %v1589_v6, 0.0  ;;  %v11514_v6 = vld [vmem:[#allocation63_spill] sm:$0xff]  ;;  %v11515_v5 = vld [vmem:[#allocation66_spill] sm:$0xff] }
 0x26f   :  { %v1466_v55 = vadd.f32 %v1465_v30, %v8826_v41  ;;  %v1467_v57 = vpop.f32.mrb[174].mxu1  ;;  %2851 = vmatprep.subr.bf16.mxu1 %v2416_v59  ;;  %3628 = vmatprep.subr.bf16.mxu0 %v2280_v53 }
 0x270   :  { %v1468_v38 = vadd.f32 %v1467_v57, %v8823_v49  ;;  %v1469_v8 = vpop.f32.mrb[175].mxu1  ;;  %1855 = vmatmul.mubr.bf16.gmra.mrb[172].mxu0 %v11456_v15  ;;  %v2187_v63 = vmax.f32 %v1464_v1, 0.0  ;;  %v1581_v15 = vadd.f32 %v1580_v4, %v9055_v37  ;;  %v1920_v43 = vmax.f32 %v1593_v24, 0.0 }
 0x271   :  { %v1470_v23 = vadd.f32 %v1469_v8, %v8826_v41  ;;  %1864 = vmatprep.mubr.bf16.mxu0 %v11507_v61  ;;  %v2188_v46 = vmax.f32 %v1466_v55, 0.0  ;;  %v1596_v29 = vpop.f32.mrb[68].mxu0 }
 0x272   :  { %v2193_v17 = vmax.f32 %v1468_v38, 0.0  ;;  %2819 = vmatmul.mubr.bf16.vlgmr.msra.gmra.mrb[24].mxu1 %v11506_v12  ;;  %v1907_v9 = vmax.f32 %v1581_v15, 0.0  ;;  %v2286_v56 = vpack.c.bf16 %v1920_v43, %v1914_v62  ;;  %v1597_v16 = vadd.f32 %v1596_v29, %v9055_v37 }
 0x273   :  { %v2194_v26 = vmax.f32 %v1470_v23, 0.0  ;;  %2826 = vmatprep.mubr.bf16.mxu1 %v11508_v58  ;;  %2852 = vmatpush1.bf16.xpose.msra.mxu1 %v2415_v31  ;;  %v1598_v23 = vpop.f32.mrb[69].mxu0 }
 0x274   :  { %v2421_v39 = vpack.c.bf16 %v2193_v17, %v2187_v63  ;;  %v2279_v19 = vpack.c.bf16 %v1907_v9, %v1901_v34  ;;  %v1600_v17 = vpop.f32.mrb[70].mxu0 }
 0x275   :  { %v2422_v48 = vpack.c.bf16 %v2194_v26, %v2188_v46  ;;  %v1473_v3 = vpop.f32.mrb[176].mxu1  ;;  %v1602_v61 = vpop.f32.mrb[71].mxu0  ;;  %v11512_v46 = vld [vmem:[#allocation61_spill] sm:$0xff]  ;;  %v1599_v26 = vadd.f32 %v1598_v23, %v9052_v35  ;;  %v1601_v44 = vadd.f32 %v1600_v17, %v9055_v37 }
 0x276   :  { %v1474_v40 = vadd.f32 %v1473_v3, %v8823_v49  ;;  %v1475_v51 = vpop.f32.mrb[177].mxu1  ;;  %3629 = vmatpush1.bf16.msra.mxu0 %v2279_v19  ;;  %v1603_v58 = vadd.f32 %v1602_v61, %v9052_v35  ;;  %v11363_v61 = vmov 0  }
 0x277   :  { %v1476_v0 = vadd.f32 %v1475_v51, %v8826_v41  ;;  %v1477_v36 = vpop.f32.mrb[178].mxu1  ;;  %2853 = vmatprep.subr.bf16.mxu1 %v2422_v48  ;;  %3630 = vmatprep.subr.bf16.mxu0 %v2286_v56  ;;  %v1926_v48 = vmax.f32 %v1599_v26, 0.0  ;;  %v1931_v51 = vmax.f32 %v1601_v44, 0.0  ;;  %v11517_v44 = vld [vmem:[#allocation68_spill] sm:$0xff] }
 0x278   :  { %v1478_v50 = vadd.f32 %v1477_v36, %v8823_v49  ;;  %v1479_v10 = vpop.f32.mrb[179].mxu1  ;;  %1865 = vmatmul.mubr.bf16.gmra.mrb[176].mxu0 %v11460_v11  ;;  %v2199_v52 = vmax.f32 %v1474_v40, 0.0  ;;  %v1591_v11 = vadd.f32 %v1590_v33, %v9055_v37  ;;  %v1932_v3 = vmax.f32 %v1603_v58, 0.0  ;;  %v11516_v58 = vld [vmem:[#allocation65_spill] sm:$0xff] }
 0x279   :  { %v1480_v7 = vadd.f32 %v1479_v10, %v8826_v41  ;;  %1874 = vmatprep.mubr.bf16.mxu0 %v11510_v42  ;;  %v2200_v18 = vmax.f32 %v1476_v0, 0.0  ;;  %v1925_v40 = vmax.f32 %v1597_v16, 0.0  ;;  %v1606_v36 = vpop.f32.mrb[72].mxu0 }
 0x27a   :  { %v2205_v45 = vmax.f32 %v1478_v50, 0.0  ;;  %2827 = vmatmul.mubr.bf16.gmra.mrb[28].mxu1 %v11509_v60  ;;  %v1919_v27 = vmax.f32 %v1591_v11, 0.0  ;;  %v2292_v0 = vpack.c.bf16 %v1932_v3, %v1926_v48  ;;  %v1608_v10 = vpop.f32.mrb[73].mxu0  ;;  %v1607_v11 = vadd.f32 %v1606_v36, %v9055_v37 }
 0x27b   :  { %v2206_v31 = vmax.f32 %v1480_v7, 0.0  ;;  %2834 = vmatprep.mubr.bf16.mxu1 %v11511_v20  ;;  %2854 = vmatpush1.bf16.xpose.msra.mxu1 %v2421_v39  ;;  %v11513_v39 = vld [vmem:[#allocation64_spill] sm:$0xff]  ;;  %v2291_v50 = vpack.c.bf16 %v1931_v51, %v1925_v40  ;;  %v1610_v14 = vpop.f32.mrb[74].mxu0  ;;  %v1609_v24 = vadd.f32 %v1608_v10, %v9052_v35 }
 0x27c   :  { %v2427_v59 = vpack.c.bf16 %v2205_v45, %v2199_v52  ;;  %v2285_v4 = vpack.c.bf16 %v1919_v27, %v1913_v54  ;;  %v1612_v45 = vpop.f32.mrb[75].mxu0  ;;  %v1937_v27 = vmax.f32 %v1607_v11, 0.0 }
 0x27d   :  { %v2428_v1 = vpack.c.bf16 %v2206_v31, %v2200_v18  ;;  %v1483_v30 = vpop.f32.mrb[180].mxu1  ;;  %v1613_v18 = vadd.f32 %v1612_v45, %v9052_v35  ;;  %v1938_v43 = vmax.f32 %v1609_v24, 0.0 }
 0x27e   :  { %v1484_v55 = vadd.f32 %v1483_v30, %v8823_v49  ;;  %v1485_v57 = vpop.f32.mrb[181].mxu1  ;;  %3631 = vmatpush1.bf16.msra.mxu0 %v2285_v4 }
 0x27f   :  { %v1486_v38 = vadd.f32 %v1485_v57, %v8826_v41  ;;  %v1487_v8 = vpop.f32.mrb[182].mxu1  ;;  %2855 = vmatprep.subr.bf16.mxu1 %v2428_v1  ;;  %3632 = vmatprep.subr.bf16.mxu0 %v2292_v0  ;;  %v1944_v1 = vmax.f32 %v1613_v18, 0.0  ;;  %v11518_v18 = vld [vmem:[#allocation67_spill] sm:$0xff] }
 0x280   :  { %v1488_v47 = vadd.f32 %v1487_v8, %v8823_v49  ;;  %v1489_v63 = vpop.f32.mrb[183].mxu1  ;;  %1875 = vmatmul.mubr.bf16.gmra.mrb[180].mxu0 %v11464_v28  ;;  %v2211_v21 = vmax.f32 %v1484_v55, 0.0 }
 0x281   :  { %v1490_v12 = vadd.f32 %v1489_v63, %v8826_v41  ;;  %v2212_v25 = vmax.f32 %v1486_v38, 0.0  ;;  %v9112_v29 = vpack.c.bf16 %v1944_v1, %v1938_v43  ;;  %3658 = vmatprep.mubr.bf16.mxu0 %v11363_v61 }
 0x282   :  { %v2217_v2 = vmax.f32 %v1488_v47, 0.0  ;;  %2835 = vmatmul.mubr.bf16.gmra.mrb[32].mxu1 %v11512_v46  ;;  %3633 = vmatpush1.bf16.msra.mxu0 %v2291_v50 }
 0x283   :  { %v2218_v15 = vmax.f32 %v1490_v12, 0.0  ;;  %2842 = vmatprep.mubr.bf16.mxu1 %v11513_v39  ;;  %2856 = vmatpush1.bf16.xpose.msra.mxu1 %v2427_v59  ;;  %v1611_v59 = vadd.f32 %v1610_v14, %v9055_v37  ;;  %v1616_v38 = vpop.f32.mrb[76].mxu0 }
 0x284   :  { %v2433_v28 = vpack.c.bf16 %v2217_v2, %v2211_v21  ;;  %v1618_v47 = vpop.f32.mrb[77].mxu0 }
 0x285   :  { %v2434_v34 = vpack.c.bf16 %v2218_v15, %v2212_v25  ;;  %v1493_v9 = vpop.f32.mrb[184].mxu1  ;;  %v1943_v55 = vmax.f32 %v1611_v59, 0.0  ;;  %v1620_v12 = vpop.f32.mrb[78].mxu0  ;;  %v1619_v25 = vadd.f32 %v1618_v47, %v9052_v35  ;;  %v11519_v59 = vld [vmem:[#allocation70_spill] sm:$0xff] }
 0x286   :  { %v1494_v53 = vadd.f32 %v1493_v9, %v8823_v49  ;;  %v1495_v32 = vpop.f32.mrb[185].mxu1  ;;  %v1622_v2 = vpop.f32.mrb[79].mxu0  ;;  %v1621_v48 = vadd.f32 %v1620_v12, %v9055_v37 }
 0x287   :  { %v1496_v19 = vadd.f32 %v1495_v32, %v8826_v41  ;;  %v1497_v13 = vpop.f32.mrb[186].mxu1  ;;  %2857 = vmatprep.subr.bf16.mxu1 %v2434_v34  ;;  %v9115_v23 = vpack.c.bf16 %v1943_v55, %v1937_v27  ;;  %v1623_v15 = vadd.f32 %v1622_v2, %v9052_v35  ;;  %v1950_v34 = vmax.f32 %v1619_v25, 0.0 }
 0x288   :  { %v1498_v33 = vadd.f32 %v1497_v13, %v8823_v49  ;;  %v1499_v7 = vpop.f32.mrb[187].mxu1  ;;  %v2223_v60 = vmax.f32 %v1494_v53, 0.0  ;;  %v1955_v32 = vmax.f32 %v1621_v48, 0.0 }
 0x289   :  { %v1500_v52 = vadd.f32 %v1499_v7, %v8826_v41  ;;  %v2224_v31 = vmax.f32 %v1496_v19, 0.0  ;;  %v1956_v9 = vmax.f32 %v1623_v15, 0.0 }
 0x28a   :  { %v2229_v42 = vmax.f32 %v1498_v33, 0.0  ;;  %2843 = vmatmul.mubr.bf16.gmra.mrb[36].mxu1 %v11514_v6 }
 0x28b   :  { %v2230_v20 = vmax.f32 %v1500_v52, 0.0  ;;  %2858 = vmatpush1.bf16.xpose.msra.mxu1 %v2433_v28  ;;  %2883 = vmatprep.mubr.bf16.mxu1 %v11515_v5  ;;  %v1617_v28 = vadd.f32 %v1616_v38, %v9055_v37  ;;  %v9127_v19 = vpack.c.bf16 %v1956_v9, %v1950_v34  ;;  %v1626_v13 = vpop.f32.mrb[80].mxu0  ;;  %v11521_v34 = vld [vmem:[#allocation72_spill] sm:$0xff] }
 0x28c   :  { %v2439_v62 = vpack.c.bf16 %v2229_v42, %v2223_v60  ;;  %v1628_v7 = vpop.f32.mrb[81].mxu0 }
 0x28d   :  { %v2440_v30 = vpack.c.bf16 %v2230_v20, %v2224_v31  ;;  %v1503_v54 = vpop.f32.mrb[188].mxu1  ;;  %v1949_v53 = vmax.f32 %v1617_v28, 0.0  ;;  %v1630_v45 = vpop.f32.mrb[82].mxu0  ;;  %v1629_v31 = vadd.f32 %v1628_v7, %v9052_v35 }
 0x28e   :  { %v1504_v57 = vadd.f32 %v1503_v54, %v8823_v49  ;;  %v1505_v56 = vpop.f32.mrb[189].mxu1  ;;  %v1632_v42 = vpop.f32.mrb[83].mxu0  ;;  %v1631_v43 = vadd.f32 %v1630_v45, %v9055_v37 }
 0x28f   :  { %v1506_v8 = vadd.f32 %v1505_v56, %v8826_v41  ;;  %v1507_v4 = vpop.f32.mrb[190].mxu1  ;;  %2916 = vmatprep.subr.bf16.mxu1 %v2440_v30  ;;  %v9130_v33 = vpack.c.bf16 %v1955_v32, %v1949_v53  ;;  %v1633_v20 = vadd.f32 %v1632_v42, %v9052_v35  ;;  %v1962_v30 = vmax.f32 %v1629_v31, 0.0  ;;  %v11522_v31 = vld [vmem:[#allocation71_spill] sm:$0xff] }
 0x290   :  { %v1508_v63 = vadd.f32 %v1507_v4, %v8823_v49  ;;  %v1509_v17 = vpop.f32.mrb[191].mxu1  ;;  %v2235_v46 = vmax.f32 %v1504_v57, 0.0  ;;  %v1967_v56 = vmax.f32 %v1631_v43, 0.0 }
 0x291   :  { %v1510_v21 = vadd.f32 %v1509_v17, %v8826_v41  ;;  %v2236_v39 = vmax.f32 %v1506_v8, 0.0  ;;  %v1968_v54 = vmax.f32 %v1633_v20, 0.0 }
 0x292   :  { %v2241_v26 = vmax.f32 %v1508_v63, 0.0  ;;  %2884 = vmatmul.mubr.bf16.vlgmr.msra.gmra.mrb[40].mxu1 %v11516_v58 }
 0x293   :  { %v2242_v16 = vmax.f32 %v1510_v21, 0.0  ;;  %2891 = vmatprep.mubr.bf16.mxu1 %v11517_v44  ;;  %2917 = vmatpush1.bf16.xpose.msra.mxu1 %v2439_v62  ;;  %v1627_v62 = vadd.f32 %v1626_v13, %v9055_v37  ;;  %v9141_v4 = vpack.c.bf16 %v1968_v54, %v1962_v30  ;;  %v1636_v47 = vpop.f32.mrb[84].mxu0 }
 0x294   :  { %v2445_v3 = vpack.c.bf16 %v2241_v26, %v2235_v46  ;;  %v1638_v21 = vpop.f32.mrb[85].mxu0 }
 0x295   :  { %v2446_v40 = vpack.c.bf16 %v2242_v16, %v2236_v39  ;;  %v1513_v51 = vpop.f32.mrb[192].mxu1  ;;  %v1961_v57 = vmax.f32 %v1627_v62, 0.0  ;;  %v1640_v26 = vpop.f32.mrb[86].mxu0  ;;  %v11520_v16 = vld [vmem:[#allocation69_spill] sm:$0xff]  ;;  %v1639_v44 = vadd.f32 %v1638_v21, %v9052_v35 }
 0x296   :  { %v1514_v0 = vadd.f32 %v1513_v51, %v8823_v49  ;;  %v1515_v36 = vpop.f32.mrb[193].mxu1  ;;  %v1642_v25 = vpop.f32.mrb[87].mxu0  ;;  %v1641_v9 = vadd.f32 %v1640_v26, %v9055_v37 }
 0x297   :  { %v1516_v50 = vadd.f32 %v1515_v36, %v8826_v41  ;;  %v1517_v10 = vpop.f32.mrb[194].mxu1  ;;  %2918 = vmatprep.subr.bf16.mxu1 %v2446_v40  ;;  %v9144_v12 = vpack.c.bf16 %v1967_v56, %v1961_v57  ;;  %v1643_v28 = vadd.f32 %v1642_v25, %v9052_v35 }
 0x298   :  { %v1518_v14 = vadd.f32 %v1517_v10, %v8823_v49  ;;  %v1519_v52 = vpop.f32.mrb[195].mxu1  ;;  %v2247_v6 = vmax.f32 %v1514_v0, 0.0  ;;  %v1979_v36 = vmax.f32 %v1641_v9, 0.0 }
 0x299   :  { %v1520_v60 = vadd.f32 %v1519_v52, %v8826_v41  ;;  %v2248_v5 = vmax.f32 %v1516_v50, 0.0  ;;  %v1980_v51 = vmax.f32 %v1643_v28, 0.0 }
 0x29a   :  { %v2253_v24 = vmax.f32 %v1518_v14, 0.0  ;;  %2892 = vmatmul.mubr.bf16.gmra.mrb[44].mxu1 %v11518_v18 }
 0x29b   :  { %v2254_v11 = vmax.f32 %v1520_v60, 0.0  ;;  %2899 = vmatprep.mubr.bf16.mxu1 %v11519_v59  ;;  %2919 = vmatpush1.bf16.xpose.msra.mxu1 %v2445_v3  ;;  %v1646_v10 = vpop.f32.mrb[88].mxu0 }
 0x29c   :  { %v2451_v1 = vpack.c.bf16 %v2253_v24, %v2247_v6  ;;  %v1648_v52 = vpop.f32.mrb[89].mxu0  ;;  %v1647_v59 = vadd.f32 %v1646_v10, %v9055_v37 }
 0x29d   :  { %v2452_v27 = vpack.c.bf16 %v2254_v11, %v2248_v5  ;;  %v1523_v55 = vpop.f32.mrb[196].mxu1  ;;  %v1650_v6 = vpop.f32.mrb[90].mxu0  ;;  %v1649_v20 = vadd.f32 %v1648_v52, %v9052_v35  ;;  %v11523_v11 = vld [vmem:[#allocation74_spill] sm:$0xff] }
 0x29e   :  { %v1524_v38 = vadd.f32 %v1523_v55, %v8823_v49  ;;  %v1525_v8 = vpop.f32.mrb[197].mxu1  ;;  %v1652_v18 = vpop.f32.mrb[91].mxu0  ;;  %v1651_v62 = vadd.f32 %v1650_v6, %v9055_v37  ;;  %v1985_v54 = vmax.f32 %v1647_v59, 0.0 }
 0x29f   :  { %v1526_v63 = vadd.f32 %v1525_v8, %v8826_v41  ;;  %v1527_v17 = vpop.f32.mrb[198].mxu1  ;;  %2920 = vmatprep.subr.bf16.mxu1 %v2452_v27  ;;  %v1653_v5 = vadd.f32 %v1652_v18, %v9052_v35  ;;  %v1986_v43 = vmax.f32 %v1649_v20, 0.0 }
 0x2a0   :  { %v1528_v2 = vadd.f32 %v1527_v17, %v8823_v49  ;;  %v1529_v46 = vpop.f32.mrb[199].mxu1  ;;  %v2259_v15 = vmax.f32 %v1524_v38, 0.0  ;;  %v1637_v49 = vadd.f32 %v1636_v47, %v9055_v37  ;;  %v1991_v27 = vmax.f32 %v1651_v62, 0.0 }
 0x2a1   :  { %v1530_v58 = vadd.f32 %v1529_v46, %v8826_v41  ;;  %v2260_v48 = vmax.f32 %v1526_v63, 0.0  ;;  %v1974_v41 = vmax.f32 %v1639_v44, 0.0 }
 0x2a2   :  { %v2265_v39 = vmax.f32 %v1528_v2, 0.0  ;;  %2900 = vmatmul.mubr.bf16.gmra.mrb[48].mxu1 %v11520_v16  ;;  %v1973_v0 = vmax.f32 %v1637_v49, 0.0  ;;  %v9179_v63 = vpack.c.bf16 %v1991_v27, %v1985_v54 }
 0x2a3   :  { %v2266_v3 = vmax.f32 %v1530_v58, 0.0  ;;  %2907 = vmatprep.mubr.bf16.mxu1 %v11521_v34  ;;  %2921 = vmatpush1.bf16.xpose.msra.mxu1 %v2451_v1  ;;  %v9156_v50 = vpack.c.bf16 %v1980_v51, %v1974_v41  ;;  %v1992_v1 = vmax.f32 %v1653_v5, 0.0  ;;  %v1656_v38 = vpop.f32.mrb[92].mxu0  ;;  %v11524_v58 = vld [vmem:[#allocation73_spill] sm:$0xff] }
 0x2a4   :  { %v2457_v40 = vpack.c.bf16 %v2265_v39, %v2259_v15  ;;  %v9160_v14 = vpack.c.bf16 %v1979_v36, %v1973_v0  ;;  %v1658_v17 = vpop.f32.mrb[93].mxu0  ;;  %v11525_v39 = vld [vmem:[#allocation76_spill] sm:$0xff]  ;;  %v1657_v16 = vadd.f32 %v1656_v38, %v9055_v37 }
 0x2a5   :  { %v2458_v53 = vpack.c.bf16 %v2266_v3, %v2260_v48  ;;  %v9154_v32 = vpop.f32.mrb[200].mxu1  ;;  %v2322_v56 = vpack.c.bf16 %v1992_v1, %v1986_v43  ;;  %v1660_v2 = vpop.f32.mrb[94].mxu0  ;;  %v1659_v25 = vadd.f32 %v1658_v17, %v9052_v35  ;;  %v11528_v17 = vld [vmem:[#allocation77_spill] sm:$0xff] }
 0x2a6   :  { %v2497_v13 = vpop.f32.mrb[201].mxu1  ;;  %v2982_v45 = vsel %vm2981_vm0, %v9154_v32, -inf  ;;  %v1662_v26 = vpop.f32.mrb[95].mxu0  ;;  %v1661_v44 = vadd.f32 %v1660_v2, %v9055_v37  ;;  %v1997_v34 = vmax.f32 %v1657_v16, 0.0  ;;  %v11529_v2 = vld [vmem:[#allocation80_spill] sm:$0xff] }
 0x2a7   :  { %2922 = vmatprep.subr.bf16.mxu1 %v2458_v53  ;;  %v9158_v7 = vpop.f32.mrb[202].mxu1  ;;  %3796 = vmatprep.subr.bf16.mxu0 %v2322_v56  ;;  %v1663_v15 = vadd.f32 %v1662_v26, %v9052_v35  ;;  %v1998_v28 = vmax.f32 %v1659_v25, 0.0 }
 0x2a8   :  { %v2983_v60 = vsel %vm2981_vm0, %v9158_v7, -inf  ;;  %v2500_v42 = vpop.f32.mrb[203].mxu1  ;;  %v2003_v49 = vmax.f32 %v1661_v44, 0.0 }
 0x2a9   :  { %v2984_v24 = vmax.f32 %v2982_v45, %v2983_v60  ;;  %v2004_v48 = vmax.f32 %v1663_v15, 0.0  ;;  %v11526_v60 = vld [vmem:[#allocation75_spill] sm:$0xff] }
 0x2aa   :  { %2908 = vmatmul.mubr.bf16.gmra.mrb[52].mxu1 %v11522_v31  ;;  %v9200_v0 = vpack.c.bf16 %v2003_v49, %v1997_v34 }
 0x2ab   :  { %2923 = vmatpush1.bf16.xpose.msra.mxu1 %v2457_v40  ;;  %2948 = vmatprep.mubr.bf16.mxu1 %v11523_v11  ;;  %v9195_v41 = vpack.c.bf16 %v2004_v48, %v1998_v28  ;;  %v1666_v51 = vpop.f32.mrb[96].mxu0 }
 0x2ac   :  { %3711 = vmatprep.subr.bf16.mxu1 %v9112_v29 }
 0x2ad   :  { %v9173_v30 = vpop.f32.mrb[204].mxu1 }
 0x2ae   :  { %v2985_v55 = vsel %vm2981_vm0, %v9173_v30, -inf  ;;  %v2505_v57 = vpop.f32.mrb[205].mxu1 }
 0x2af   :  { %v2986_v8 = vmax.f32 %v2984_v24, %v2985_v55  ;;  %v9177_v47 = vpop.f32.mrb[206].mxu1  ;;  %v11527_v24 = vld [vmem:[#allocation78_spill] sm:$0xff] }
 0x2b0   :  { %v2987_v29 = vsel %vm2981_vm0, %v9177_v47, -inf  ;;  %v2508_v21 = vpop.f32.mrb[207].mxu1 }
 0x2b1   :  { %v2988_v46 = vmax.f32 %v2986_v8, %v2987_v29 }
 0x2b2   :  { %2949 = vmatmul.mubr.bf16.vlgmr.msra.gmra.mrb[56].mxu1 %v11524_v58 }
 0x2b3   :  { %2956 = vmatprep.mubr.bf16.mxu1 %v11525_v39  ;;  %3712 = vmatpush1.bf16.msra.mxu1 %v9115_v23 }
 0x2b4   :  { %3713 = vmatprep.subr.bf16.mxu1 %v9127_v19  ;;  %v1668_v19 = vpop.f32.mrb[97].mxu0 }
 0x2b5   :  { %v9191_v3 = vpop.f32.mrb[208].mxu1  ;;  %v1670_v10 = vpop.f32.mrb[98].mxu0  ;;  %v1669_v42 = vadd.f32 %v1668_v19, %v9052_v35 }
 0x2b6   :  { %v2989_v9 = vsel %vm2981_vm0, %v9191_v3, -inf  ;;  %v2513_v40 = vpop.f32.mrb[209].mxu1  ;;  %v1672_v45 = vpop.f32.mrb[99].mxu0  ;;  %v1671_v18 = vadd.f32 %v1670_v10, %v9055_v37 }
 0x2b7   :  { %v2990_v23 = vmax.f32 %v2988_v46, %v2989_v9  ;;  %v9197_v53 = vpop.f32.mrb[210].mxu1  ;;  %3714 = vmatpush1.bf16.msra.mxu1 %v9130_v33  ;;  %v1673_v6 = vadd.f32 %v1672_v45, %v9052_v35  ;;  %v1667_v33 = vadd.f32 %v1666_v51, %v9055_v37  ;;  %v1676_v1 = vpop.f32.mrb[100].mxu0 }
 0x2b8   :  { %v2991_v36 = vsel %vm2981_vm0, %v9197_v53, -inf  ;;  %v2516_v13 = vpop.f32.mrb[211].mxu1  ;;  %3715 = vmatprep.subr.bf16.mxu1 %v9141_v4  ;;  %v2010_v4 = vmax.f32 %v1669_v42, 0.0  ;;  %v2015_v11 = vmax.f32 %v1671_v18, 0.0 }
 0x2b9   :  { %v2992_v52 = vmax.f32 %v2990_v23, %v2991_v36  ;;  %v2016_v31 = vmax.f32 %v1673_v6, 0.0  ;;  %v2009_v5 = vmax.f32 %v1667_v33, 0.0 }
 0x2ba   :  { %2957 = vmatmul.mubr.bf16.gmra.mrb[60].mxu1 %v11526_v60  ;;  %v11530_v60 = vld [vmem:[#allocation79_spill] sm:$0xff] }
 0x2bb   :  { %2964 = vmatprep.mubr.bf16.mxu1 %v11527_v24  ;;  %3716 = vmatpush1.bf16.msra.mxu1 %v9144_v12  ;;  %v9217_v43 = vpack.c.bf16 %v2016_v31, %v2010_v4  ;;  %v9222_v27 = vpack.c.bf16 %v2015_v11, %v2009_v5 }
 0x2bc   :  { %3717 = vmatprep.subr.bf16.mxu1 %v9156_v50  ;;  %v1678_v50 = vpop.f32.mrb[101].mxu0 }
 0x2bd   :  { %v9213_v20 = vpop.f32.mrb[212].mxu1  ;;  %v1680_v56 = vpop.f32.mrb[102].mxu0  ;;  %v1679_v29 = vadd.f32 %v1678_v50, %v9052_v35 }
 0x2be   :  { %v2993_v59 = vsel %vm2981_vm0, %v9213_v20, -inf  ;;  %v2521_v62 = vpop.f32.mrb[213].mxu1  ;;  %v1682_v8 = vpop.f32.mrb[103].mxu0  ;;  %v1681_v26 = vadd.f32 %v1680_v56, %v9055_v37 }
 0x2bf   :  { %v2994_v12 = vmax.f32 %v2992_v52, %v2993_v59  ;;  %v9219_v54 = vpop.f32.mrb[214].mxu1  ;;  %3718 = vmatpush1.bf16.msra.mxu1 %v9160_v14  ;;  %v1683_v21 = vadd.f32 %v1682_v8, %v9052_v35  ;;  %v1677_v14 = vadd.f32 %v1676_v1, %v9055_v37  ;;  %v2022_v58 = vmax.f32 %v1679_v29, 0.0  ;;  %v1686_v34 = vpop.f32.mrb[104].mxu0 }
 0x2c0   :  { %v2995_v55 = vsel %vm2981_vm0, %v9219_v54, -inf  ;;  %v2524_v57 = vpop.f32.mrb[215].mxu1  ;;  %v2027_v44 = vmax.f32 %v1681_v26, 0.0  ;;  %v1688_v51 = vpop.f32.mrb[105].mxu0  ;;  %v1687_v33 = vadd.f32 %v1686_v34, %v9055_v37 }
 0x2c1   :  { %v2996_v38 = vmax.f32 %v2994_v12, %v2995_v55  ;;  %v2028_v25 = vmax.f32 %v1683_v21, 0.0  ;;  %v2021_v16 = vmax.f32 %v1677_v14, 0.0  ;;  %v1690_v13 = vpop.f32.mrb[106].mxu0  ;;  %v1689_v42 = vadd.f32 %v1688_v51, %v9052_v35 }
 0x2c2   :  { %2965 = vmatmul.mubr.bf16.gmra.mrb[64].mxu1 %v11528_v17  ;;  %v1692_v45 = vpop.f32.mrb[107].mxu0  ;;  %v1691_v18 = vadd.f32 %v1690_v13, %v9055_v37  ;;  %v2033_v1 = vmax.f32 %v1687_v33, 0.0 }
 0x2c3   :  { %2972 = vmatprep.mubr.bf16.mxu1 %v11529_v2  ;;  %v2997_v46 = vrot.slane %v2996_v38, 4  ;;  %v9234_v48 = vpack.c.bf16 %v2028_v25, %v2022_v58  ;;  %v9238_v40 = vpack.c.bf16 %v2027_v44, %v2021_v16  ;;  %v1693_v6 = vadd.f32 %v1692_v45, %v9052_v35  ;;  %v1696_v55 = vpop.f32.mrb[108].mxu0 }
 0x2c4   :  { %v2034_v4 = vmax.f32 %v1689_v42, 0.0  ;;  %v2039_v12 = vmax.f32 %v1691_v18, 0.0  ;;  %v1698_v29 = vpop.f32.mrb[109].mxu0 }
 0x2c5   :  { %v2998_v15 = vmax.f32 %v2996_v38, %v2997_v46  ;;  %v9232_v39 = vpop.f32.mrb[216].mxu1  ;;  %v2040_v31 = vmax.f32 %v1693_v6, 0.0  ;;  %v1700_v58 = vpop.f32.mrb[110].mxu0  ;;  %v1699_v44 = vadd.f32 %v1698_v29, %v9052_v35 }
 0x2c6   :  { %v2562_v28 = vpop.f32.mrb[217].mxu1  ;;  %v3003_v23 = vsel %vm2981_vm0, %v9232_v39, -inf }
 0x2c7   :  { %v2999_v49 = vrot.slane %v2998_v15, 2  ;;  %v9236_v9 = vpop.f32.mrb[218].mxu1  ;;  %v2346_v50 = vpack.c.bf16 %v2040_v31, %v2034_v4  ;;  %v2046_v13 = vmax.f32 %v1699_v44, 0.0 }
 0x2c8   :  { %v3004_v19 = vsel %vm2981_vm0, %v9236_v9, -inf  ;;  %v2565_v36 = vpop.f32.mrb[219].mxu1 }
 0x2c9   :  { %v3000_v10 = vmax.f32 %v2998_v15, %v2999_v49  ;;  %v3005_v52 = vmax.f32 %v3003_v23, %v3004_v19  ;;  %3881 = vmatprep.subr.bf16.mxu1 %v2346_v50  ;;  %v1701_v49 = vadd.f32 %v1700_v58, %v9055_v37 }
 0x2ca   :  { %2973 = vmatmul.mubr.bf16.gmra.mrb[68].mxu1 %v11530_v60 }
 0x2cb   :  { %v3001_v24 = vrot.slane %v3000_v10, 1  ;;  %3743 = vmatprep.mubr.bf16.mxu1 %v11363_v61  ;;  %v2051_v60 = vmax.f32 %v1701_v49, 0.0 }
 0x2cd   :  { %v3002_v5 = vmax.f32 %v3000_v10, %v3001_v24  ;;  %v9250_v11 = vpop.f32.mrb[220].mxu1 }
 0x2ce   :  { %v3006_v59 = vsel %vm2981_vm0, %v9250_v11, -inf  ;;  %v2570_v62 = vpop.f32.mrb[221].mxu1 }
 0x2cf   :  { %v3150_v57 = vsub.f32 %v9154_v32, %v3002_v5  ;;  %v3151_v56 = vsub.f32 %v9158_v7, %v3002_v5  ;;  %v3152_v38 = vsub.f32 %v9173_v30, %v3002_v5  ;;  %v3153_v8 = vsub.f32 %v9177_v47, %v3002_v5  ;;  %v9258_v17 = vpop.f32.mrb[222].mxu1 }
 0x2d0   :  { %v3154_v21 = vsub.f32 %v9191_v3, %v3002_v5  ;;  %v3155_v2 = vsub.f32 %v9197_v53, %v3002_v5  ;;  %v3156_v46 = vsub.f32 %v9213_v20, %v3002_v5  ;;  %v3157_v14 = vsub.f32 %v9219_v54, %v3002_v5  ;;  %v2573_v26 = vpop.f32.mrb[223].mxu1  ;;  %v1702_v53 = vpop.f32.mrb[111].mxu0 }
 0x2d1   :  { %v3214_v32 = vmul.f32 1.442695, %v3150_v57  ;;  %v3216_v7 = vmul.f32 1.442695, %v3151_v56  ;;  %v3218_v25 = vmul.f32 1.442695, %v3152_v38  ;;  %v3007_v30 = vmax.f32 %v3005_v52, %v3006_v59 }
 0x2d2   :  { %v3220_v15 = vmul.f32 1.442695, %v3153_v8  ;;  %v9264_v47 = vpack.c.bf16 %v2039_v12, %v2033_v1  ;;  %v3222_v16 = vmul.f32 1.442695, %v3154_v21  ;;  %v3008_v3 = vsel %vm2981_vm0, %v9258_v17, -inf  ;;  %v1706_v10 = vpop.f32.mrb[112].mxu0 }
 0x2d3   :  { %7458 = vpow2.f32 %v3214_v32  ;;  %v3009_v20 = vmax.f32 %v3007_v30, %v3008_v3  ;;  %v1697_v54 = vadd.f32 %v1696_v55, %v9055_v37  ;;  %v3224_v28 = vmul.f32 1.442695, %v3155_v2  ;;  %v1708_v6 = vpop.f32.mrb[113].mxu0 }
 0x2d4   :  { %7460 = vpow2.f32 %v3216_v7  ;;  %v1703_v51 = vadd.f32 %v1702_v53, %v9052_v35  ;;  %v3226_v24 = vmul.f32 1.442695, %v3156_v46  ;;  %v1710_v4 = vpop.f32.mrb[114].mxu0  ;;  %v3228_v1 = vmul.f32 1.442695, %v3157_v14 }
 0x2d5   :  { %7462 = vpow2.f32 %v3218_v25  ;;  %v9270_v34 = vpop.f32.mrb[224].mxu1  ;;  %v2045_v36 = vmax.f32 %v1697_v54, 0.0  ;;  %v1712_v62 = vpop.f32.mrb[115].mxu0  ;;  %v1709_v12 = vadd.f32 %v1708_v6, %v9052_v35  ;;  %v1707_v55 = vadd.f32 %v1706_v10, %v9055_v37 }
 0x2d6   :  { %7464 = vpow2.f32 %v3220_v15  ;;  %v3010_v23 = vsel %vm2981_vm0, %v9270_v34, -inf  ;;  %v2578_v19 = vpop.f32.mrb[225].mxu1  ;;  %v2052_v42 = vmax.f32 %v1703_v51, 0.0  ;;  %v1713_v50 = vadd.f32 %v1712_v62, %v9052_v35  ;;  %v1716_v7 = vpop.f32.mrb[116].mxu0 }
 0x2d7   :  { %v3011_v52 = vmax.f32 %v3009_v20, %v3010_v23  ;;  %v9276_v45 = vpop.f32.mrb[226].mxu1  ;;  %7466 = vpow2.f32 %v3222_v16  ;;  %v9280_v5 = vpack.c.bf16 %v2051_v60, %v2045_v36  ;;  %v1711_v57 = vadd.f32 %v1710_v4, %v9055_v37  ;;  %v1718_v53 = vpop.f32.mrb[117].mxu0 }
 0x2d8   :  { %v3012_v33 = vsel %vm2981_vm0, %v9276_v45, -inf  ;;  %v2581_v18 = vpop.f32.mrb[227].mxu1  ;;  %v9282_v59 = vpack.c.bf16 %v2052_v42, %v2046_v13  ;;  %7468 = vpow2.f32 %v3224_v28  ;;  %v2058_v56 = vmax.f32 %v1709_v12, 0.0  ;;  %v1720_v49 = vpop.f32.mrb[118].mxu0 }
 0x2d9   :  { %v3013_v31 = vmax.f32 %v3011_v52, %v3012_v33  ;;  %7470 = vpow2.f32 %v3226_v24  ;;  %v2064_v38 = vmax.f32 %v1713_v50, 0.0  ;;  %v2057_v21 = vmax.f32 %v1707_v55, 0.0  ;;  %v1722_v19 = vpop.f32.mrb[119].mxu0 }
 0x2da   :  { %v2063_v2 = vmax.f32 %v1711_v57, 0.0  ;;  %7472 = vpow2.f32 %v3228_v1  ;;  %v1719_v10 = vadd.f32 %v1718_v53, %v9052_v35  ;;  %v1723_v52 = vadd.f32 %v1722_v19, %v9052_v35 }
 0x2db   :  { %v9298_v32 = vpack.c.bf16 %v2064_v38, %v2058_v56  ;;  %v1717_v6 = vadd.f32 %v1716_v7, %v9055_v37  ;;  %v1721_v24 = vadd.f32 %v1720_v49, %v9055_v37 }
 0x2dc   :  { %v9306_v3 = vpack.c.bf16 %v2063_v2, %v2057_v21  ;;  %v2070_v4 = vmax.f32 %v1719_v10, 0.0  ;;  %v1726_v2 = vpop.f32.mrb[120].mxu0 }
 0x2dd   :  { %v9288_v8 = vpop.eup %7458  ;;  %v9290_v29 = vpop.f32.mrb[228].mxu1  ;;  %v2069_v50 = vmax.f32 %v1717_v6, 0.0  ;;  %v2075_v55 = vmax.f32 %v1721_v24, 0.0  ;;  %v1727_v24 = vadd.f32 %v1726_v2, %v9055_v37 }
 0x2de   :  { %v9292_v46 = vpop.eup %7460  ;;  %v3342_v14 = vsel %vm2981_vm0, %v9288_v8, 0.0  ;;  %v3014_v26 = vsel %vm2981_vm0, %v9290_v29, -inf  ;;  %v2586_v58 = vpop.f32.mrb[229].mxu1 }
 0x2df   :  { %v9300_v25 = vpop.eup %7462  ;;  %v3343_v30 = vsel %vm2981_vm0, %v9292_v46, 0.0  ;;  %v3015_v15 = vmax.f32 %v3013_v31, %v3014_v26  ;;  %v9304_v16 = vpop.f32.mrb[230].mxu1  ;;  %v2076_v31 = vmax.f32 %v1723_v52, 0.0  ;;  %v9336_v7 = vpack.c.bf16 %v2075_v55, %v2069_v50 }
 0x2e0   :  { %v9308_v20 = vpop.eup %7464  ;;  %v3344_v54 = vadd.f32 %v3343_v30, %v3342_v14  ;;  %v3016_v44 = vsel %vm2981_vm0, %v9304_v16, -inf  ;;  %v2589_v28 = vpop.f32.mrb[231].mxu1  ;;  %v3345_v51 = vsel %vm2981_vm0, %v9300_v25, 0.0  ;;  %v2081_v55 = vmax.f32 %v1727_v24, 0.0 }
 0x2e1   :  { %v3017_v23 = vmax.f32 %v3015_v15, %v3016_v44  ;;  %v9314_v36 = vpop.eup %7466  ;;  %v3347_v60 = vsel %vm2981_vm0, %v9308_v20, 0.0  ;;  %v9330_v21 = vpack.c.bf16 %v2076_v31, %v2070_v4  ;;  %11532 = vst [vmem:[#allocation17_spill] sm:$0xff] %v9336_v7  ;;  %v1728_v30 = vpop.f32.mrb[121].mxu0 }
 0x2e2   :  { %v3346_v13 = vadd.f32 %v3345_v51, %v3344_v54  ;;  %v9322_v33 = vpop.eup %7468  ;;  %v3349_v62 = vsel %vm2981_vm0, %v9314_v36, 0.0  ;;  %v1730_v49 = vpop.f32.mrb[122].mxu0  ;;  %v1729_v52 = vadd.f32 %v1728_v30, %v9052_v35 }
 0x2e3   :  { %v3018_v42 = vrot.slane %v3017_v23, 4  ;;  %v9328_v57 = vpop.eup %7470  ;;  %11531 = vst [vmem:[#allocation16_spill] sm:$0xff] %v9330_v21  ;;  %v3351_v14 = vsel %vm2981_vm0, %v9322_v33, 0.0 }
 0x2e4   :  { %v3348_v18 = vadd.f32 %v3347_v60, %v3346_v13  ;;  %v9338_v15 = vpop.eup %7472  ;;  %v3353_v51 = vsel %vm2981_vm0, %v9328_v57, 0.0  ;;  %v1732_v13 = vpop.f32.mrb[123].mxu0  ;;  %v2082_v31 = vmax.f32 %v1729_v52, 0.0 }
 0x2e5   :  { %v3019_v1 = vmax.f32 %v3017_v23, %v3018_v42  ;;  %v9326_v12 = vpop.f32.mrb[232].mxu1  ;;  %v1733_v60 = vadd.f32 %v1732_v13, %v9052_v35  ;;  %v3355_v42 = vsel %vm2981_vm0, %v9338_v15, 0.0 }
 0x2e6   :  { %v3350_v56 = vadd.f32 %v3349_v62, %v3348_v18  ;;  %v2627_v38 = vpop.f32.mrb[233].mxu1  ;;  %v3024_v54 = vsel %vm2981_vm0, %v9326_v12, -inf  ;;  %v1731_v18 = vadd.f32 %v1730_v49, %v9055_v37 }
 0x2e7   :  { %v3020_v26 = vrot.slane %v3019_v1, 2  ;;  %v9334_v58 = vpop.f32.mrb[234].mxu1  ;;  %v2088_v62 = vmax.f32 %v1733_v60, 0.0 }
 0x2e8   :  { %v3352_v53 = vadd.f32 %v3351_v14, %v3350_v56  ;;  %v3025_v44 = vsel %vm2981_vm0, %v9334_v58, -inf  ;;  %v2630_v28 = vpop.f32.mrb[235].mxu1 }
 0x2e9   :  { %v3021_v23 = vmax.f32 %v3019_v1, %v3020_v26  ;;  %v3026_v19 = vmax.f32 %v3024_v54, %v3025_v44  ;;  %v2087_v26 = vmax.f32 %v1731_v18, 0.0  ;;  %v9356_v30 = vpack.c.bf16 %v2088_v62, %v2082_v31 }
 0x2ea   :  { %v3354_v10 = vadd.f32 %v3353_v51, %v3352_v53  ;;  %v1736_v53 = vpop.f32.mrb[124].mxu0 }
 0x2eb   :  { %v3022_v6 = vrot.slane %v3021_v23, 1  ;;  %v1738_v51 = vpop.f32.mrb[125].mxu0 }
 0x2ec   :  { %v3356_v4 = vadd.f32 %v3355_v42, %v3354_v10  ;;  %v1740_v42 = vpop.f32.mrb[126].mxu0 }
 0x2ed   :  { %v3023_v50 = vmax.f32 %v3021_v23, %v3022_v6  ;;  %v9352_v1 = vpop.f32.mrb[236].mxu1  ;;  %v1742_v31 = vpop.f32.mrb[127].mxu0 }
 0x2ee   :  { %v3357_v56 = vrot.slane %v3356_v4, 4  ;;  %v3027_v38 = vsel %vm2981_vm0, %v9352_v1, -inf  ;;  %v2635_v14 = vpop.f32.mrb[237].mxu1 }
 0x2ef   :  { %v3158_v2 = vsub.f32 %v9232_v39, %v3023_v50  ;;  %v3159_v54 = vsub.f32 %v9236_v9, %v3023_v50  ;;  %v3160_v44 = vsub.f32 %v9250_v11, %v3023_v50  ;;  %v3161_v28 = vsub.f32 %v9258_v17, %v3023_v50  ;;  %v9362_v49 = vpop.f32.mrb[238].mxu1 }
 0x2f0   :  { %v3358_v23 = vadd.f32 %v3357_v56, %v3356_v4  ;;  %v3162_v13 = vsub.f32 %v9270_v34, %v3023_v50  ;;  %v3163_v10 = vsub.f32 %v9276_v45, %v3023_v50  ;;  %v3164_v52 = vsub.f32 %v9290_v29, %v3023_v50  ;;  %v2638_v60 = vpop.f32.mrb[239].mxu1 }
 0x2f1   :  { %v3165_v39 = vsub.f32 %v9304_v16, %v3023_v50  ;;  %v3230_v6 = vmul.f32 1.442695, %v3158_v2  ;;  %v3232_v9 = vmul.f32 1.442695, %v3159_v54  ;;  %v3234_v24 = vmul.f32 1.442695, %v3160_v44 }
 0x2f2   :  { %v3359_v11 = vrot.slane %v3358_v23, 2  ;;  %v3236_v18 = vmul.f32 1.442695, %v3161_v28  ;;  %v3028_v17 = vmax.f32 %v3026_v19, %v3027_v38  ;;  %v3238_v62 = vmul.f32 1.442695, %v3162_v13  ;;  %v1746_v28 = vpop.f32.mrb[128].mxu0 }
 0x2f3   :  { %7474 = vpow2.f32 %v3230_v6  ;;  %v3240_v4 = vmul.f32 1.442695, %v3163_v10  ;;  %v3242_v56 = vmul.f32 1.442695, %v3164_v52  ;;  %v3029_v45 = vsel %vm2981_vm0, %v9362_v49, -inf  ;;  %v1748_v10 = vpop.f32.mrb[129].mxu0 }
 0x2f4   :  { %v3360_v34 = vadd.f32 %v3359_v11, %v3358_v23  ;;  %7476 = vpow2.f32 %v3232_v9  ;;  %v9370_v29 = vpack.c.bf16 %v2087_v26, %v2081_v55  ;;  %v3030_v16 = vmax.f32 %v3028_v17, %v3029_v45  ;;  %v1750_v6 = vpop.f32.mrb[130].mxu0 }
 0x2f5   :  { %7478 = vpow2.f32 %v3234_v24  ;;  %v9372_v50 = vpop.f32.mrb[240].mxu1  ;;  %v1737_v14 = vadd.f32 %v1736_v53, %v9055_v37  ;;  %v1739_v19 = vadd.f32 %v1738_v51, %v9052_v35  ;;  %v1741_v44 = vadd.f32 %v1740_v42, %v9055_v37  ;;  %v1752_v11 = vpop.f32.mrb[131].mxu0 }
 0x2f6   :  { %11533 = vst [vmem:[#allocation35_spill] sm:$0xff] %v9370_v29  ;;  %v3361_v38 = vrot.slane %v3360_v34, 1  ;;  %7480 = vpow2.f32 %v3236_v18  ;;  %v3031_v2 = vsel %vm2981_vm0, %v9372_v50, -inf  ;;  %v2643_v54 = vpop.f32.mrb[241].mxu1  ;;  %v3244_v55 = vmul.f32 1.442695, %v3165_v39 }
 0x2f7   :  { %7482 = vpow2.f32 %v3238_v62  ;;  %v3032_v26 = vmax.f32 %v3030_v16, %v3031_v2  ;;  %v9379_v23 = vpop.f32.mrb[242].mxu1  ;;  %v2093_v13 = vmax.f32 %v1737_v14, 0.0  ;;  %v2099_v60 = vmax.f32 %v1741_v44, 0.0 }
 0x2f8   :  { %v3362_v52 = vadd.f32 %v3361_v38, %v3360_v34  ;;  %7484 = vpow2.f32 %v3240_v4  ;;  %v3033_v53 = vsel %vm2981_vm0, %v9379_v23, -inf  ;;  %v2646_v51 = vpop.f32.mrb[243].mxu1  ;;  %v2094_v24 = vmax.f32 %v1739_v19, 0.0 }
 0x2f9   :  { %7486 = vpow2.f32 %v3242_v56  ;;  %v3034_v9 = vmax.f32 %v3032_v26, %v3033_v53  ;;  %v1743_v42 = vadd.f32 %v1742_v31, %v9052_v35  ;;  %v9384_v39 = vpack.c.bf16 %v2099_v60, %v2093_v13  ;;  %v1756_v26 = vpop.f32.mrb[132].mxu0 }
 0x2fa   :  { %7488 = vrcp.f32 %v3362_v52  ;;  %v1749_v18 = vadd.f32 %v1748_v10, %v9052_v35  ;;  %v1753_v17 = vadd.f32 %v1752_v11, %v9052_v35  ;;  %v1747_v4 = vadd.f32 %v1746_v28, %v9055_v37  ;;  %v1758_v60 = vpop.f32.mrb[133].mxu0 }
 0x2fb   :  { %11534 = vst [vmem:[#allocation20_spill] sm:$0xff] %v9384_v39  ;;  %7490 = vpow2.f32 %v3244_v55  ;;  %v2100_v62 = vmax.f32 %v1743_v42, 0.0  ;;  %v1751_v34 = vadd.f32 %v1750_v6, %v9055_v37 }
 0x2fc   :  { %v2106_v45 = vmax.f32 %v1749_v18, 0.0  ;;  %v2112_v56 = vmax.f32 %v1753_v17, 0.0  ;;  %v2105_v19 = vmax.f32 %v1747_v4, 0.0  ;;  %v1760_v18 = vpop.f32.mrb[134].mxu0 }
 0x2fd   :  { %v9390_v16 = vpop.eup %7474  ;;  %v9392_v14 = vpop.f32.mrb[244].mxu1  ;;  %v9394_v31 = vpack.c.bf16 %v2100_v62, %v2094_v24  ;;  %v2111_v38 = vmax.f32 %v1751_v34, 0.0 }
 0x2fe   :  { %v9396_v2 = vpop.eup %7476  ;;  %v3363_v54 = vsel %vm2981_vm0, %v9390_v16, 0.0  ;;  %v3035_v44 = vsel %vm2981_vm0, %v9392_v14, -inf  ;;  %v2651_v28 = vpop.f32.mrb[245].mxu1  ;;  %v9402_v55 = vpack.c.bf16 %v2112_v56, %v2106_v45 }
 0x2ff   :  { %11535 = vst [vmem:[#allocation36_spill] sm:$0xff] %v9394_v31  ;;  %v9404_v13 = vpop.eup %7478  ;;  %v3364_v10 = vsel %vm2981_vm0, %v9396_v2, 0.0  ;;  %v3036_v52 = vmax.f32 %v3034_v9, %v3035_v44  ;;  %v9408_v53 = vpop.f32.mrb[246].mxu1  ;;  %v9410_v51 = vpack.c.bf16 %v2111_v38, %v2105_v19  ;;  %v1759_v38 = vadd.f32 %v1758_v60, %v9052_v35 }
 0x300   :  { %11536 = vst [vmem:[#allocation21_spill] sm:$0xff] %v9402_v55  ;;  %v9412_v6 = vpop.eup %7480  ;;  %v3365_v24 = vadd.f32 %v3364_v10, %v3363_v54  ;;  %v3037_v42 = vsel %vm2981_vm0, %v9408_v53, -inf  ;;  %v2654_v11 = vpop.f32.mrb[247].mxu1  ;;  %v3366_v62 = vsel %vm2981_vm0, %v9404_v13, 0.0 }
 0x301   :  { %11537 = vst [vmem:[#allocation37_spill] sm:$0xff] %v9410_v51  ;;  %v9416_v17 = vpop.eup %7482  ;;  %v3368_v9 = vsel %vm2981_vm0, %v9412_v6, 0.0  ;;  %v3038_v4 = vmax.f32 %v3036_v52, %v3037_v42  ;;  %v1762_v34 = vpop.f32.mrb[135].mxu0  ;;  %v1757_v11 = vadd.f32 %v1756_v26, %v9055_v37  ;;  %v1761_v52 = vadd.f32 %v1760_v18, %v9055_v37 }
 0x302   :  { %v9422_v45 = vpop.eup %7484  ;;  %v3367_v56 = vadd.f32 %v3366_v62, %v3365_v24  ;;  %v3370_v19 = vsel %vm2981_vm0, %v9416_v17, 0.0  ;;  %v1763_v54 = vadd.f32 %v1762_v34, %v9052_v35  ;;  %v2118_v62 = vmax.f32 %v1759_v38, 0.0 }
 0x303   :  { %v9428_v44 = vpop.eup %7486  ;;  %v3372_v28 = vsel %vm2981_vm0, %v9422_v45, 0.0  ;;  %v3039_v10 = vrot.slane %v3038_v4, 4 }
 0x304   :  { %v7489_v42 = vpop.eup %7488  ;;  %v3369_v61 = vadd.f32 %v3368_v9, %v3367_v56  ;;  %v3374_v24 = vsel %vm2981_vm0, %v9428_v44, 0.0  ;;  %v2124_v22 = vmax.f32 %v1763_v54, 0.0  ;;  %v1766_v54 = vpop.f32.mrb[136].mxu0 }
 0x305   :  { %v9436_v60 = vpop.eup %7490  ;;  %v3040_v34 = vmax.f32 %v3038_v4, %v3039_v10  ;;  %v9438_v51 = vpop.f32.mrb[248].mxu1  ;;  %v3518_v55 = vmul.f32 %v7489_v42, %v9288_v8  ;;  %v3519_v39 = vmul.f32 %v7489_v42, %v9292_v46  ;;  %v9443_v26 = vmul.f32 %v7489_v42, %v9300_v25 }
 0x306   :  { %v3371_v18 = vadd.f32 %v3370_v19, %v3369_v61  ;;  %v3376_v9 = vsel %vm2981_vm0, %v9436_v60, 0.0  ;;  %v9449_v56 = vsel %vm2981_vm0, %v9438_v51, -inf  ;;  %v2692_v38 = vpop.f32.mrb[249].mxu1  ;;  %v9452_v4 = vmul.f32 %v7489_v42, %v9308_v20  ;;  %v1768_v19 = vpop.f32.mrb[137].mxu0 }
 0x307   :  { %v3041_v10 = vrot.slane %v3040_v34, 2  ;;  %v9454_v8 = vpop.f32.mrb[250].mxu1  ;;  %v3582_v46 = vpack.c.bf16 %v3519_v39, %v3518_v55  ;;  %v9457_v25 = vmul.f32 %v7489_v42, %v9314_v36  ;;  %v9460_v61 = vmul.f32 %v7489_v42, %v9322_v33  ;;  %v1770_v21 = vpop.f32.mrb[138].mxu0 }
 0x308   :  { %v3373_v31 = vadd.f32 %v3372_v28, %v3371_v18  ;;  %v3046_v29 = vsel %vm2981_vm0, %v9454_v8, -inf  ;;  %v2695_v38 = vpop.f32.mrb[251].mxu1  ;;  %v3583_v20 = vpack.c.bf16 %v9452_v4, %v9443_v26  ;;  %v9467_v7 = vmul.f32 %v7489_v42, %v9328_v57  ;;  %v1772_v28 = vpop.f32.mrb[139].mxu0 }
 0x309   :  { %v3042_v39 = vmax.f32 %v3040_v34, %v3041_v10  ;;  %v3047_v36 = vmax.f32 %v9449_v56, %v3046_v29  ;;  %6577 = vmatmul.mubr.msk.bf16.vlgmr.msra.gmra.mrb[184].mxu0 %vm2981_vm0, %v3582_v46  ;;  %v9474_v55 = vmul.f32 %v7489_v42, %v9338_v15  ;;  %v11538_v38 = vmov 0  }
 0x30a   :  { %v3375_v18 = vadd.f32 %v3374_v24, %v3373_v31  ;;  %3668 = vmatprep.mubr.bf16.mxu0 %v11538_v38  ;;  %3797 = vmatpush1.bf16.msra.mxu0 %v9179_v63  ;;  %v2117_v57 = vmax.f32 %v1757_v11, 0.0  ;;  %v2123_v26 = vmax.f32 %v1761_v52, 0.0  ;;  %v9478_v4 = vpack.c.bf16 %v2124_v22, %v2118_v62 }
 0x30b   :  { %v3043_v34 = vrot.slane %v3042_v39, 1  ;;  %3798 = vmatprep.subr.bf16.mxu0 %v9195_v41  ;;  %v1767_v56 = vadd.f32 %v1766_v54, %v9055_v37  ;;  %v1769_v15 = vadd.f32 %v1768_v19, %v9052_v35  ;;  %v1771_v24 = vadd.f32 %v1770_v21, %v9055_v37  ;;  %v1776_v19 = vpop.f32.mrb[140].mxu0 }
 0x30c   :  { %v3377_v42 = vadd.f32 %v3376_v9, %v3375_v18  ;;  %v9485_v31 = vpack.c.bf16 %v2123_v26, %v2117_v57  ;;  %v1773_v63 = vadd.f32 %v1772_v28, %v9052_v35  ;;  %v1778_v26 = vpop.f32.mrb[141].mxu0 }
 0x30d   :  { %v3044_v11 = vmax.f32 %v3042_v39, %v3043_v34  ;;  %v9489_v22 = vpop.f32.mrb[252].mxu1  ;;  %v2129_v52 = vmax.f32 %v1767_v56, 0.0  ;;  %v2130_v62 = vmax.f32 %v1769_v15, 0.0  ;;  %v2135_v54 = vmax.f32 %v1771_v24, 0.0 }
 0x30e   :  { %v3378_v41 = vrot.slane %v3377_v42, 4  ;;  %v3048_v10 = vsel %vm2981_vm0, %v9489_v22, -inf  ;;  %v2700_v46 = vpop.f32.mrb[253].mxu1  ;;  %3799 = vmatpush1.bf16.msra.mxu0 %v9200_v0  ;;  %v2136_v9 = vmax.f32 %v1773_v63, 0.0 }
 0x30f   :  { %v3166_v18 = vsub.f32 %v9326_v12, %v3044_v11  ;;  %v3167_v21 = vsub.f32 %v9334_v58, %v3044_v11  ;;  %v3168_v39 = vsub.f32 %v9352_v1, %v3044_v11  ;;  %v3169_v28 = vsub.f32 %v9362_v49, %v3044_v11  ;;  %v9498_v57 = vpop.f32.mrb[254].mxu1  ;;  %3800 = vmatprep.subr.bf16.mxu0 %v9217_v43  ;;  %v1780_v12 = vpop.f32.mrb[142].mxu0 }
 0x310   :  { %v3379_v34 = vadd.f32 %v3378_v41, %v3377_v42  ;;  %v3170_v56 = vsub.f32 %v9372_v50, %v3044_v11  ;;  %v3171_v0 = vsub.f32 %v9379_v23, %v3044_v11  ;;  %v3172_v15 = vsub.f32 %v9392_v14, %v3044_v11  ;;  %v2703_v24 = vpop.f32.mrb[255].mxu1  ;;  %v1782_v50 = vpop.f32.mrb[143].mxu0 }
 0x311   :  { %v3173_v58 = vsub.f32 %v9408_v53, %v3044_v11  ;;  %v3246_v63 = vmul.f32 1.442695, %v3166_v18  ;;  %v3248_v1 = vmul.f32 1.442695, %v3167_v21  ;;  %v3250_v46 = vmul.f32 1.442695, %v3168_v39  ;;  %6578 = vmatmul.mubr.msk.bf16.gmra.mrb[188].mxu0 %vm2981_vm0, %v3583_v20 }
 0x312   :  { %v3380_v49 = vrot.slane %v3379_v34, 2  ;;  %v3252_v29 = vmul.f32 1.442695, %v3169_v28  ;;  %v3254_v43 = vmul.f32 1.442695, %v3170_v56  ;;  %v3049_v33 = vmax.f32 %v3047_v36, %v3048_v10  ;;  %3678 = vmatprep.mubr.bf16.mxu0 %v11538_v38  ;;  %3801 = vmatpush1.bf16.msra.mxu0 %v9222_v27 }
 0x313   :  { %7492 = vpow2.f32 %v3246_v63  ;;  %v3256_v23 = vmul.f32 1.442695, %v3171_v0  ;;  %v3258_v14 = vmul.f32 1.442695, %v3172_v15  ;;  %v3260_v42 = vmul.f32 1.442695, %v3173_v58  ;;  %3802 = vmatprep.subr.bf16.mxu0 %v9234_v48 }
 0x314   :  { %v3381_v53 = vadd.f32 %v3380_v49, %v3379_v34  ;;  %7494 = vpow2.f32 %v3248_v1  ;;  %v3050_v20 = vsel %vm2981_vm0, %v9498_v57, -inf  ;;  %v9511_v11 = vpack.c.bf16 %v2135_v54, %v2129_v52  ;;  %v1786_v52 = vpop.f32.mrb[144].mxu0 }
 0x315   :  { %7496 = vpow2.f32 %v3250_v46  ;;  %v3051_v36 = vmax.f32 %v3049_v33, %v3050_v20  ;;  %v9513_v41 = vpop.f32.mrb[0].mxu1  ;;  %v9515_v10 = vpack.c.bf16 %v2136_v9, %v2130_v62  ;;  %v1777_v27 = vadd.f32 %v1776_v19, %v9055_v37  ;;  %v1788_v19 = vpop.f32.mrb[145].mxu0 }
 0x316   :  { %v3382_v18 = vrot.slane %v3381_v53, 1  ;;  %7498 = vpow2.f32 %v3252_v29  ;;  %v3052_v48 = vsel %vm2981_vm0, %v9513_v41, -inf  ;;  %v2708_v21 = vpop.f32.mrb[1].mxu1  ;;  %3803 = vmatpush1.bf16.msra.mxu0 %v9238_v40  ;;  %v1779_v39 = vadd.f32 %v1778_v26, %v9052_v35  ;;  %v1790_v56 = vpop.f32.mrb[146].mxu0 }
 0x317   :  { %7500 = vpow2.f32 %v3254_v43  ;;  %v3053_v54 = vmax.f32 %v3051_v36, %v3052_v48  ;;  %v9522_v33 = vpop.f32.mrb[2].mxu1  ;;  %3966 = vmatprep.subr.bf16.mxu0 %v9356_v30  ;;  %v2141_v62 = vmax.f32 %v1777_v27, 0.0  ;;  %v1781_v9 = vadd.f32 %v1780_v12, %v9055_v37  ;;  %v1792_v24 = vpop.f32.mrb[147].mxu0 }
 0x318   :  { %v3383_v29 = vadd.f32 %v3382_v18, %v3381_v53  ;;  %7502 = vpow2.f32 %v3256_v23  ;;  %v3054_v28 = vsel %vm2981_vm0, %v9522_v33, -inf  ;;  %v2711_v34 = vpop.f32.mrb[3].mxu1  ;;  %v2142_v40 = vmax.f32 %v1779_v39, 0.0  ;;  %v1796_v48 = vpop.f32.mrb[148].mxu0 }
 0x319   :  { %7504 = vpow2.f32 %v3258_v14  ;;  %v3055_v26 = vmax.f32 %v3053_v54, %v3054_v28  ;;  %v11539_v0 = vpack.c.bf16 %v9460_v61, %v9457_v25  ;;  %v2147_v30 = vmax.f32 %v1781_v9, 0.0 }
 0x31a   :  { %v1783_v15 = vadd.f32 %v1782_v50, %v9052_v35  ;;  %7506 = vrcp.f32 %v3383_v29  ;;  %v1789_v12 = vadd.f32 %v1788_v19, %v9052_v35  ;;  %v1793_v58 = vadd.f32 %v1792_v24, %v9052_v35 }
 0x31b   :  { %6579 = vmatmul.mubr.msk.bf16.gmra.mrb[192].mxu0 %vm2981_vm0, %v11539_v0  ;;  %7508 = vpow2.f32 %v3260_v42  ;;  %v9536_v63 = vpack.c.bf16 %v2147_v30, %v2141_v62  ;;  %v1787_v46 = vadd.f32 %v1786_v52, %v9055_v37  ;;  %v1791_v61 = vadd.f32 %v1790_v56, %v9055_v37  ;;  %v1798_v62 = vpop.f32.mrb[149].mxu0 }
 0x31c   :  { %3688 = vmatprep.mubr.bf16.mxu0 %v11538_v38  ;;  %v2148_v1 = vmax.f32 %v1783_v15, 0.0  ;;  %v2154_v25 = vmax.f32 %v1789_v12, 0.0  ;;  %v2160_v49 = vmax.f32 %v1793_v58, 0.0  ;;  %v11542_v15 = vpack.c.bf16 %v9474_v55, %v9467_v7 }
 0x31d   :  { %v9540_v43 = vpop.eup %7492  ;;  %v9542_v50 = vpop.f32.mrb[4].mxu1  ;;  %v2153_v14 = vmax.f32 %v1787_v46, 0.0  ;;  %v2159_v27 = vmax.f32 %v1791_v61, 0.0  ;;  %v1799_v46 = vadd.f32 %v1798_v62, %v9052_v35 }
 0x31e   :  { %v9544_v23 = vpack.c.bf16 %v2148_v1, %v2142_v40  ;;  %v9546_v53 = vpop.eup %7494  ;;  %v3384_v42 = vsel %vm2981_vm0, %v9540_v43, 0.0  ;;  %v3056_v20 = vsel %vm2981_vm0, %v9542_v50, -inf  ;;  %v2716_v36 = vpop.f32.mrb[5].mxu1  ;;  %v9552_v18 = vpack.c.bf16 %v2160_v49, %v2154_v25 }
 0x31f   :  { %v9554_v21 = vpop.eup %7496  ;;  %v3385_v39 = vsel %vm2981_vm0, %v9546_v53, 0.0  ;;  %v3057_v52 = vmax.f32 %v3055_v26, %v3056_v20  ;;  %v9558_v54 = vpop.f32.mrb[6].mxu1  ;;  %v9564_v34 = vpack.c.bf16 %v2159_v27, %v2153_v14  ;;  %v1797_v49 = vadd.f32 %v1796_v48, %v9055_v37 }
 0x320   :  { %11540 = vst [vmem:[#allocation23_spill] sm:$0xff] %v9552_v18  ;;  %v9560_v9 = vpop.eup %7498  ;;  %v3386_v19 = vadd.f32 %v3385_v39, %v3384_v42  ;;  %v3058_v29 = vsel %vm2981_vm0, %v9558_v54, -inf  ;;  %v2719_v28 = vpop.f32.mrb[7].mxu1  ;;  %v3387_v0 = vsel %vm2981_vm0, %v9554_v21, 0.0  ;;  %v2166_v27 = vmax.f32 %v1799_v46, 0.0 }
 0x321   :  { %11541 = vst [vmem:[#allocation24_spill] sm:$0xff] %v9564_v34  ;;  %v1800_v40 = vpop.f32.mrb[150].mxu0  ;;  %v9566_v56 = vpop.eup %7500  ;;  %v3389_v26 = vsel %vm2981_vm0, %v9560_v9, 0.0  ;;  %v3059_v30 = vmax.f32 %v3057_v52, %v3058_v29 }
 0x322   :  { %v1802_v24 = vpop.f32.mrb[151].mxu0  ;;  %v9576_v12 = vpop.eup %7502  ;;  %v3388_v58 = vadd.f32 %v3387_v0, %v3386_v19  ;;  %v3391_v1 = vsel %vm2981_vm0, %v9566_v56, 0.0  ;;  %v1801_v14 = vadd.f32 %v1800_v40, %v9055_v37 }
 0x323   :  { %6580 = vmatmul.mubr.msk.bf16.gmra.mrb[196].mxu0 %vm2981_vm0, %v11542_v15  ;;  %v1803_v25 = vadd.f32 %v1802_v24, %v9052_v35  ;;  %v9583_v61 = vpop.eup %7504  ;;  %v3393_v7 = vsel %vm2981_vm0, %v9576_v12, 0.0  ;;  %v3060_v55 = vrot.slane %v3059_v30, 4 }
 0x324   :  { %3828 = vmatprep.mubr.bf16.mxu0 %v11538_v38  ;;  %v7507_v42 = vpop.eup %7506  ;;  %v3390_v20 = vadd.f32 %v3389_v26, %v3388_v58  ;;  %v3395_v36 = vsel %vm2981_vm0, %v9583_v61, 0.0 }
 0x325   :  { %v2172_v39 = vmax.f32 %v1803_v25, 0.0  ;;  %v9591_v52 = vpop.eup %7508  ;;  %v3526_v62 = vmul.f32 %v7507_v42, %v9390_v16  ;;  %v3527_v19 = vmul.f32 %v7507_v42, %v9396_v2  ;;  %v9596_v29 = vmul.f32 %v7507_v42, %v9428_v44  ;;  %v9601_v28 = vpop.f32.mrb[8].mxu1 }
 0x326   :  { %v9599_v48 = vmul.f32 %v7507_v42, %v9436_v60  ;;  %v3392_v40 = vadd.f32 %v3391_v1, %v3390_v20  ;;  %v3397_v0 = vsel %vm2981_vm0, %v9591_v52, 0.0  ;;  %v3061_v26 = vmax.f32 %v3059_v30, %v3060_v55  ;;  %v2757_v24 = vpop.f32.mrb[9].mxu1  ;;  %v1806_v16 = vpop.f32.mrb[152].mxu0 }
 0x327   :  { %v3066_v15 = vsel %vm2981_vm0, %v9601_v28, -inf  ;;  %v9609_v44 = vpop.f32.mrb[10].mxu1  ;;  %v3586_v58 = vpack.c.bf16 %v3527_v19, %v3526_v62  ;;  %v3528_v60 = vmul.f32 %v7507_v42, %v9404_v13  ;;  %v3529_v46 = vmul.f32 %v7507_v42, %v9412_v6  ;;  %v1808_v1 = vpop.f32.mrb[153].mxu0 }
 0x328   :  { %v3394_v25 = vadd.f32 %v3393_v7, %v3392_v40  ;;  %v3062_v20 = vrot.slane %v3061_v26, 2  ;;  %v3067_v30 = vsel %vm2981_vm0, %v9609_v44, -inf  ;;  %v2760_v55 = vpop.f32.mrb[11].mxu1  ;;  %v9616_v24 = vmul.f32 %v7507_v42, %v9416_v17  ;;  %v1810_v34 = vpop.f32.mrb[154].mxu0 }
 0x329   :  { %v3068_v18 = vmax.f32 %v3066_v15, %v3067_v30  ;;  %6581 = vmatmul.mubr.msk.bf16.vlgmr.msra.gmra.mrb[72].mxu1 %vm2981_vm0, %v3586_v58  ;;  %v3587_v2 = vpack.c.bf16 %v3529_v46, %v3528_v60  ;;  %v9620_v62 = vmul.f32 %v7507_v42, %v9422_v45  ;;  %v2165_v13 = vmax.f32 %v1797_v49, 0.0  ;;  %v1812_v6 = vpop.f32.mrb[155].mxu0 }
 0x32a   :  { %v3396_v19 = vadd.f32 %v3395_v36, %v3394_v25  ;;  %v3063_v7 = vmax.f32 %v3061_v26, %v3062_v20  ;;  %3753 = vmatprep.mubr.bf16.mxu1 %v11538_v38  ;;  %3882 = vmatpush1.bf16.msra.mxu1 %v9264_v47  ;;  %v2171_v40 = vmax.f32 %v1801_v14, 0.0  ;;  %v9624_v55 = vpack.c.bf16 %v2172_v39, %v2166_v27  ;;  %v1816_v46 = vpop.f32.mrb[156].mxu0 }
 0x32b   :  { %v3588_v17 = vpack.c.bf16 %v9620_v62, %v9616_v24  ;;  %3883 = vmatprep.subr.bf16.mxu1 %v9282_v59  ;;  %v1807_v15 = vadd.f32 %v1806_v16, %v9055_v37  ;;  %v1809_v45 = vadd.f32 %v1808_v1, %v9052_v35  ;;  %v1811_v49 = vadd.f32 %v1810_v34, %v9055_v37  ;;  %v1818_v30 = vpop.f32.mrb[157].mxu0 }
 0x32c   :  { %v3398_v42 = vadd.f32 %v3397_v0, %v3396_v19  ;;  %v3064_v36 = vrot.slane %v3063_v7, 1  ;;  %v9632_v26 = vpack.c.bf16 %v2171_v40, %v2165_v13  ;;  %v1813_v47 = vadd.f32 %v1812_v6, %v9052_v35 }
 0x32d   :  { %v9635_v14 = vpop.f32.mrb[12].mxu1  ;;  %v2177_v27 = vmax.f32 %v1807_v15, 0.0  ;;  %v2183_v39 = vmax.f32 %v1811_v49, 0.0  ;;  %v2178_v1 = vmax.f32 %v1809_v45, 0.0 }
 0x32e   :  { %v3399_v58 = vrot.slane %v3398_v42, 4  ;;  %v3065_v60 = vmax.f32 %v3063_v7, %v3064_v36  ;;  %v3069_v59 = vsel %vm2981_vm0, %v9635_v14, -inf  ;;  %v2765_v16 = vpop.f32.mrb[13].mxu1  ;;  %3884 = vmatpush1.bf16.msra.mxu1 %v9280_v5  ;;  %v2184_v20 = vmax.f32 %v1813_v47, 0.0  ;;  %v1820_v5 = vpop.f32.mrb[158].mxu0 }
 0x32f   :  { %v3070_v34 = vmax.f32 %v3068_v18, %v3069_v59  ;;  %v9640_v0 = vpop.f32.mrb[14].mxu1  ;;  %3885 = vmatprep.subr.bf16.mxu1 %v9298_v32  ;;  %v9643_v25 = vpack.c.bf16 %v2183_v39, %v2177_v27  ;;  %v1822_v49 = vpop.f32.mrb[159].mxu0 }
 0x330   :  { %v3400_v13 = vadd.f32 %v3399_v58, %v3398_v42  ;;  %v3174_v6 = vsub.f32 %v9438_v51, %v3065_v60  ;;  %v3175_v19 = vsub.f32 %v9454_v8, %v3065_v60  ;;  %v3176_v7 = vsub.f32 %v9489_v22, %v3065_v60  ;;  %v2768_v40 = vpop.f32.mrb[15].mxu1 }
 0x331   :  { %11543 = vst [vmem:[#allocation41_spill] sm:$0xff] %v9643_v25  ;;  %v3177_v18 = vsub.f32 %v9498_v57, %v3065_v60  ;;  %v3178_v15 = vsub.f32 %v9513_v41, %v3065_v60  ;;  %v3179_v32 = vsub.f32 %v9522_v33, %v3065_v60  ;;  %v3180_v45 = vsub.f32 %v9542_v50, %v3065_v60  ;;  %v11544_v41 = vld [vmem:[#allocation16_spill] sm:$0xff] }
 0x332   :  { %6582 = vmatmul.mubr.msk.bf16.gmra.mrb[76].mxu1 %vm2981_vm0, %v3587_v2  ;;  %v3401_v42 = vrot.slane %v3400_v13, 2  ;;  %v3181_v51 = vsub.f32 %v9558_v54, %v3065_v60  ;;  %v3262_v36 = vmul.f32 1.442695, %v3174_v6  ;;  %v3264_v8 = vmul.f32 1.442695, %v3175_v19 }
 0x333   :  { %3763 = vmatprep.mubr.bf16.mxu1 %v11538_v38  ;;  %3886 = vmatpush1.bf16.msra.mxu1 %v9306_v3  ;;  %v3266_v22 = vmul.f32 1.442695, %v3176_v7  ;;  %v3268_v57 = vmul.f32 1.442695, %v3177_v18  ;;  %v3270_v47 = vmul.f32 1.442695, %v3178_v15  ;;  %v9657_v33 = vpack.c.bf16 %v2184_v20, %v2178_v1 }
 0x334   :  { %3887 = vmatprep.subr.bf16.mxu1 %v11544_v41  ;;  %v3402_v50 = vadd.f32 %v3401_v42, %v3400_v13  ;;  %7510 = vpow2.f32 %v3262_v36  ;;  %v3272_v2 = vmul.f32 1.442695, %v3179_v32  ;;  %v3274_v27 = vmul.f32 1.442695, %v3180_v45  ;;  %v11545_v20 = vld [vmem:[#allocation17_spill] sm:$0xff]  ;;  %v1826_v13 = vpop.f32.mrb[160].mxu0 }
 0x335   :  { %7512 = vpow2.f32 %v3264_v8  ;;  %v3276_v39 = vmul.f32 1.442695, %v3181_v51  ;;  %v3071_v54 = vsel %vm2981_vm0, %v9640_v0, -inf  ;;  %v9661_v58 = vpop.f32.mrb[16].mxu1  ;;  %v1817_v3 = vadd.f32 %v1816_v46, %v9055_v37  ;;  %v1828_v40 = vpop.f32.mrb[161].mxu0 }
 0x336   :  { %v3403_v60 = vrot.slane %v3402_v50, 1  ;;  %7514 = vpow2.f32 %v3266_v22  ;;  %v3072_v59 = vmax.f32 %v3070_v34, %v3071_v54  ;;  %v3073_v16 = vsel %vm2981_vm0, %v9661_v58, -inf  ;;  %v2773_v1 = vpop.f32.mrb[17].mxu1  ;;  %v1830_v45 = vpop.f32.mrb[162].mxu0 }
 0x337   :  { %3888 = vmatpush1.bf16.msra.mxu1 %v11545_v20  ;;  %7516 = vpow2.f32 %v3268_v57  ;;  %v9667_v6 = vpop.f32.mrb[18].mxu1  ;;  %v2189_v19 = vmax.f32 %v1817_v3, 0.0  ;;  %v1819_v7 = vadd.f32 %v1818_v30, %v9052_v35  ;;  %v1821_v46 = vadd.f32 %v1820_v5, %v9055_v37  ;;  %v1832_v5 = vpop.f32.mrb[163].mxu0 }
 0x338   :  { %4051 = vmatprep.subr.bf16.mxu1 %v9515_v10  ;;  %v3404_v18 = vadd.f32 %v3403_v60, %v3402_v50  ;;  %7518 = vpow2.f32 %v3270_v47  ;;  %v3074_v34 = vmax.f32 %v3072_v59, %v3073_v16  ;;  %v3075_v15 = vsel %vm2981_vm0, %v9667_v6, -inf  ;;  %v2776_v32 = vpop.f32.mrb[19].mxu1  ;;  %v1836_v59 = vpop.f32.mrb[164].mxu0 }
 0x339   :  { %7520 = vpow2.f32 %v3272_v2  ;;  %v2190_v10 = vmax.f32 %v1819_v7, 0.0  ;;  %v2195_v42 = vmax.f32 %v1821_v46, 0.0  ;;  %v1823_v30 = vadd.f32 %v1822_v49, %v9052_v35 }
 0x33a   :  { %6583 = vmatmul.mubr.msk.bf16.gmra.mrb[80].mxu1 %vm2981_vm0, %v3588_v17  ;;  %7522 = vrcp.f32 %v3404_v18  ;;  %v3076_v51 = vmax.f32 %v3074_v34, %v3075_v15  ;;  %v1829_v36 = vadd.f32 %v1828_v40, %v9052_v35  ;;  %v1833_v8 = vadd.f32 %v1832_v5, %v9052_v35 }
 0x33b   :  { %3773 = vmatprep.mubr.bf16.mxu1 %v11538_v38  ;;  %7524 = vpow2.f32 %v3274_v27  ;;  %v9682_v22 = vpack.c.bf16 %v2195_v42, %v2189_v19  ;;  %v2196_v57 = vmax.f32 %v1823_v30, 0.0  ;;  %v1827_v24 = vadd.f32 %v1826_v13, %v9055_v37  ;;  %v1838_v19 = vpop.f32.mrb[165].mxu0 }
 0x33c   :  { %v2202_v62 = vmax.f32 %v1829_v36, 0.0  ;;  %v1831_v17 = vadd.f32 %v1830_v45, %v9055_v37  ;;  %v2208_v47 = vmax.f32 %v1833_v8, 0.0  ;;  %7526 = vpow2.f32 %v3276_v39  ;;  %v1840_v15 = vpop.f32.mrb[166].mxu0 }
 0x33d   :  { %11546 = vst [vmem:[#allocation25_spill] sm:$0xff] %v9682_v22  ;;  %v9686_v49 = vpop.f32.mrb[20].mxu1  ;;  %v9688_v41 = vpack.c.bf16 %v2196_v57, %v2190_v10  ;;  %v2201_v50 = vmax.f32 %v1827_v24, 0.0  ;;  %v11550_v10 = vpack.c.bf16 %v9599_v48, %v9596_v29  ;;  %v1842_v42 = vpop.f32.mrb[167].mxu0 }
 0x33e   :  { %v9690_v2 = vpop.eup %7510  ;;  %v3077_v54 = vsel %vm2981_vm0, %v9686_v49, -inf  ;;  %v2781_v27 = vpop.f32.mrb[21].mxu1  ;;  %v2207_v3 = vmax.f32 %v1831_v17, 0.0  ;;  %v9694_v60 = vpack.c.bf16 %v2208_v47, %v2202_v62  ;;  %v1843_v36 = vadd.f32 %v1842_v42, %v9052_v35 }
 0x33f   :  { %11547 = vst [vmem:[#allocation26_spill] sm:$0xff] %v9688_v41  ;;  %v9696_v16 = vpop.eup %7512  ;;  %v3405_v1 = vsel %vm2981_vm0, %v9690_v2, 0.0  ;;  %v3078_v20 = vmax.f32 %v3076_v51, %v3077_v54  ;;  %v9700_v13 = vpop.f32.mrb[22].mxu1  ;;  %v1839_v51 = vadd.f32 %v1838_v19, %v9052_v35  ;;  %v1837_v47 = vadd.f32 %v1836_v59, %v9055_v37 }
 0x340   :  { %11548 = vst [vmem:[#allocation43_spill] sm:$0xff] %v9694_v60  ;;  %v9702_v7 = vpop.eup %7514  ;;  %v3406_v46 = vsel %vm2981_vm0, %v9696_v16, 0.0  ;;  %v3079_v40 = vsel %vm2981_vm0, %v9700_v13, -inf  ;;  %v2784_v18 = vpop.f32.mrb[23].mxu1  ;;  %v9708_v34 = vpack.c.bf16 %v2207_v3, %v2201_v50  ;;  %v1841_v54 = vadd.f32 %v1840_v15, %v9055_v37 }
 0x341   :  { %v9710_v39 = vpop.eup %7516  ;;  %v3407_v32 = vadd.f32 %v3406_v46, %v3405_v1  ;;  %v3080_v45 = vmax.f32 %v3078_v20, %v3079_v40  ;;  %v3408_v5 = vsel %vm2981_vm0, %v9702_v7, 0.0  ;;  %v2214_v50 = vmax.f32 %v1839_v51, 0.0 }
 0x342   :  { %11549 = vst [vmem:[#allocation30_spill] sm:$0xff] %v9708_v34  ;;  %6584 = vmatmul.mubr.msk.bf16.gmra.mrb[84].mxu1 %vm2981_vm0, %v11550_v10  ;;  %v9716_v30 = vpop.eup %7518  ;;  %v3410_v29 = vsel %vm2981_vm0, %v9710_v39, 0.0  ;;  %v2220_v10 = vmax.f32 %v1843_v36, 0.0 }
 0x343   :  { %3913 = vmatprep.mubr.bf16.mxu1 %v11538_v38  ;;  %v9723_v8 = vpop.eup %7520  ;;  %v3409_v57 = vadd.f32 %v3408_v5, %v3407_v32  ;;  %v3412_v48 = vsel %vm2981_vm0, %v9716_v30, 0.0  ;;  %v3081_v24 = vrot.slane %v3080_v45, 4 }
 0x344   :  { %v7523_v62 = vpop.eup %7522  ;;  %v3414_v17 = vsel %vm2981_vm0, %v9723_v8, 0.0 }
 0x345   :  { %v9733_v27 = vpop.eup %7524  ;;  %v3411_v3 = vadd.f32 %v3410_v29, %v3409_v57  ;;  %v3082_v1 = vmax.f32 %v3080_v45, %v3081_v24  ;;  %v9735_v20 = vpop.f32.mrb[24].mxu1  ;;  %v3534_v19 = vmul.f32 %v7523_v62, %v9540_v43  ;;  %v3535_v46 = vmul.f32 %v7523_v62, %v9546_v53 }
 0x346   :  { %v3416_v40 = vsel %vm2981_vm0, %v9733_v27, 0.0  ;;  %v2822_v18 = vpop.f32.mrb[25].mxu1  ;;  %v3536_v32 = vmul.f32 %v7523_v62, %v9554_v21  ;;  %v3537_v59 = vmul.f32 %v7523_v62, %v9560_v9  ;;  %v3087_v45 = vsel %vm2981_vm0, %v9735_v20, -inf  ;;  %v9755_v9 = vpop.eup %7526 }
 0x347   :  { %v3413_v15 = vadd.f32 %v3412_v48, %v3411_v3  ;;  %v3083_v42 = vrot.slane %v3082_v1, 2  ;;  %v9745_v5 = vpop.f32.mrb[26].mxu1  ;;  %v3590_v51 = vpack.c.bf16 %v3535_v46, %v3534_v19  ;;  %v9750_v29 = vmul.f32 %v7523_v62, %v9566_v56  ;;  %v11551_v56 = vld [vmem:[#allocation35_spill] sm:$0xff] }
 0x348   :  { %v3088_v43 = vsel %vm2981_vm0, %v9745_v5, -inf  ;;  %v2825_v53 = vpop.f32.mrb[27].mxu1  ;;  %v3591_v57 = vpack.c.bf16 %v3537_v59, %v3536_v32  ;;  %v9753_v21 = vmul.f32 %v7523_v62, %v9576_v12  ;;  %v9759_v3 = vmul.f32 %v7523_v62, %v9583_v61  ;;  %v11552_v32 = vld [vmem:[#allocation36_spill] sm:$0xff] }
 0x349   :  { %v3415_v36 = vadd.f32 %v3414_v17, %v3413_v15  ;;  %v3084_v48 = vmax.f32 %v3082_v1, %v3083_v42  ;;  %v3089_v24 = vmax.f32 %v3087_v45, %v3088_v43  ;;  %6585 = vmatmul.mubr.msk.bf16.vlgmr.msra.gmra.mrb[200].mxu0 %vm2981_vm0, %v3590_v51  ;;  %v9766_v12 = vmul.f32 %v7523_v62, %v9591_v52 }
 0x34a   :  { %3838 = vmatprep.mubr.bf16.mxu0 %v11538_v38  ;;  %v3592_v19 = vpack.c.bf16 %v9753_v21, %v9750_v29  ;;  %3967 = vmatpush1.bf16.msra.mxu0 %v11551_v56  ;;  %v2213_v46 = vmax.f32 %v1837_v47, 0.0  ;;  %v2219_v18 = vmax.f32 %v1841_v54, 0.0  ;;  %v9769_v59 = vpack.c.bf16 %v2220_v10, %v2214_v50  ;;  %v11555_v54 = vld [vmem:[#allocation20_spill] sm:$0xff] }
 0x34b   :  { %v3417_v17 = vadd.f32 %v3416_v40, %v3415_v36  ;;  %v3085_v1 = vrot.slane %v3084_v48, 1  ;;  %3968 = vmatprep.subr.bf16.mxu0 %v11552_v32  ;;  %v3418_v61 = vsel %vm2981_vm0, %v9755_v9, 0.0  ;;  %v3593_v15 = vpack.c.bf16 %v9766_v12, %v9759_v3  ;;  %v11556_v36 = vld [vmem:[#allocation21_spill] sm:$0xff] }
 0x34c   :  { %11553 = vst [vmem:[#allocation39_spill] sm:$0xff] %v9769_v59  ;;  %v9775_v42 = vpack.c.bf16 %v2219_v18, %v2213_v46 }
 0x34d   :  { %v3419_v45 = vadd.f32 %v3418_v61, %v3417_v17  ;;  %v3086_v51 = vmax.f32 %v3084_v48, %v3085_v1  ;;  %v9777_v52 = vpop.f32.mrb[28].mxu1 }
 0x34e   :  { %11554 = vst [vmem:[#allocation40_spill] sm:$0xff] %v9775_v42  ;;  %v3090_v62 = vsel %vm2981_vm0, %v9777_v52, -inf  ;;  %v2830_v47 = vpop.f32.mrb[29].mxu1  ;;  %3969 = vmatpush1.bf16.msra.mxu0 %v11555_v54 }
 0x34f   :  { %v3420_v50 = vrot.slane %v3419_v45, 4  ;;  %v3182_v40 = vsub.f32 %v9601_v28, %v3086_v51  ;;  %v3183_v10 = vsub.f32 %v9609_v44, %v3086_v51  ;;  %v3184_v43 = vsub.f32 %v9635_v14, %v3086_v51  ;;  %v9785_v53 = vpop.f32.mrb[30].mxu1  ;;  %3970 = vmatprep.subr.bf16.mxu0 %v11556_v36 }
 0x350   :  { %v3185_v48 = vsub.f32 %v9640_v0, %v3086_v51  ;;  %v3186_v56 = vsub.f32 %v9661_v58, %v3086_v51  ;;  %v3187_v46 = vsub.f32 %v9667_v6, %v3086_v51  ;;  %v3188_v18 = vsub.f32 %v9686_v49, %v3086_v51  ;;  %v2833_v17 = vpop.f32.mrb[31].mxu1  ;;  %v11557_v0 = vld [vmem:[#allocation37_spill] sm:$0xff] }
 0x351   :  { %v3421_v1 = vadd.f32 %v3420_v50, %v3419_v45  ;;  %v3189_v28 = vsub.f32 %v9700_v13, %v3086_v51  ;;  %v3278_v32 = vmul.f32 1.442695, %v3182_v40  ;;  %v3280_v44 = vmul.f32 1.442695, %v3183_v10  ;;  %6586 = vmatmul.mubr.msk.bf16.gmra.mrb[204].mxu0 %vm2981_vm0, %v3591_v57  ;;  %v1846_v45 = vpop.f32.mrb[168].mxu0 }
 0x352   :  { %v3282_v14 = vmul.f32 1.442695, %v3184_v43  ;;  %v3284_v61 = vmul.f32 1.442695, %v3185_v48  ;;  %v3091_v47 = vmax.f32 %v3089_v24, %v3090_v62  ;;  %3848 = vmatprep.mubr.bf16.mxu0 %v11538_v38  ;;  %3971 = vmatpush1.bf16.msra.mxu0 %v11557_v0  ;;  %v3286_v6 = vmul.f32 1.442695, %v3186_v56 }
 0x353   :  { %v3422_v58 = vrot.slane %v3421_v1, 2  ;;  %7528 = vpow2.f32 %v3278_v32  ;;  %3972 = vmatprep.subr.bf16.mxu0 %v9478_v4  ;;  %v3288_v49 = vmul.f32 1.442695, %v3187_v46  ;;  %v3092_v13 = vsel %vm2981_vm0, %v9785_v53, -inf  ;;  %v1848_v62 = vpop.f32.mrb[169].mxu0 }
 0x354   :  { %7530 = vpow2.f32 %v3280_v44  ;;  %v3290_v57 = vmul.f32 1.442695, %v3188_v18  ;;  %v3093_v54 = vmax.f32 %v3091_v47, %v3092_v13  ;;  %v3292_v50 = vmul.f32 1.442695, %v3189_v28  ;;  %v1850_v4 = vpop.f32.mrb[170].mxu0 }
 0x355   :  { %v3423_v51 = vadd.f32 %v3422_v58, %v3421_v1  ;;  %7532 = vpow2.f32 %v3282_v14  ;;  %v9799_v24 = vpop.f32.mrb[32].mxu1  ;;  %v1852_v56 = vpop.f32.mrb[171].mxu0  ;;  %v1849_v32 = vadd.f32 %v1848_v62, %v9052_v35  ;;  %v1851_v47 = vadd.f32 %v1850_v4, %v9055_v37 }
 0x356   :  { %7534 = vpow2.f32 %v3284_v61  ;;  %v3094_v40 = vsel %vm2981_vm0, %v9799_v24, -inf  ;;  %v2838_v10 = vpop.f32.mrb[33].mxu1  ;;  %3973 = vmatpush1.bf16.msra.mxu0 %v9485_v31  ;;  %v1856_v17 = vpop.f32.mrb[172].mxu0  ;;  %v1853_v44 = vadd.f32 %v1852_v56, %v9052_v35  ;;  %v1847_v61 = vadd.f32 %v1846_v45, %v9055_v37 }
 0x357   :  { %v3424_v43 = vrot.slane %v3423_v51, 1  ;;  %7536 = vpow2.f32 %v3286_v6  ;;  %v3095_v36 = vmax.f32 %v3093_v54, %v3094_v40  ;;  %v9804_v48 = vpop.f32.mrb[34].mxu1  ;;  %4136 = vmatprep.subr.bf16.mxu0 %v9657_v33  ;;  %v1858_v31 = vpop.f32.mrb[173].mxu0  ;;  %v2226_v21 = vmax.f32 %v1849_v32, 0.0 }
 0x358   :  { %7538 = vpow2.f32 %v3288_v49  ;;  %v3096_v46 = vsel %vm2981_vm0, %v9804_v48, -inf  ;;  %v2841_v18 = vpop.f32.mrb[35].mxu1  ;;  %v1860_v33 = vpop.f32.mrb[174].mxu0  ;;  %v2225_v45 = vmax.f32 %v1847_v61, 0.0  ;;  %v2231_v54 = vmax.f32 %v1851_v47, 0.0 }
 0x359   :  { %v3425_v1 = vadd.f32 %v3424_v43, %v3423_v51  ;;  %7540 = vpow2.f32 %v3290_v57  ;;  %v3097_v28 = vmax.f32 %v3095_v36, %v3096_v46  ;;  %6587 = vmatmul.mubr.msk.bf16.gmra.mrb[208].mxu0 %vm2981_vm0, %v3592_v19  ;;  %v1862_v14 = vpop.f32.mrb[175].mxu0  ;;  %v2232_v19 = vmax.f32 %v1853_v44, 0.0 }
 0x35a   :  { %7542 = vpow2.f32 %v3292_v50  ;;  %3858 = vmatprep.mubr.bf16.mxu0 %v11538_v38  ;;  %v1866_v0 = vpop.f32.mrb[176].mxu0  ;;  %v9839_v36 = vadd.f32 %v1858_v31, %v9052_v35  ;;  %v9847_v44 = vpack.c.bf16 %v2231_v54, %v2225_v45  ;;  %v1861_v54 = vadd.f32 %v1860_v33, %v9055_v37 }
 0x35b   :  { %7544 = vrcp.f32 %v3425_v1  ;;  %v1868_v6 = vpop.f32.mrb[177].mxu0  ;;  %v9836_v43 = vpack.c.bf16 %v2232_v19, %v2226_v21  ;;  %v1857_v19 = vadd.f32 %v1856_v17, %v9055_v37  ;;  %v9890_v60 = vadd.f32 %v1866_v0, %v9055_v37 }
 0x35c   :  { %v9828_v62 = vpop.f32.mrb[178].mxu0  ;;  %11558 = vst [vmem:[#allocation2_spill] sm:$0xff] %v9847_v44  ;;  %v2238_v45 = vmax.f32 %v9839_v36, 0.0 }
 0x35d   :  { %v9818_v58 = vpop.eup %7528  ;;  %v9820_v29 = vpop.f32.mrb[36].mxu1  ;;  %v2237_v17 = vmax.f32 %v1857_v19, 0.0 }
 0x35e   :  { %v9822_v49 = vpop.eup %7530  ;;  %v3426_v13 = vsel %vm2981_vm0, %v9818_v58, 0.0  ;;  %v3098_v51 = vsel %vm2981_vm0, %v9820_v29, -inf  ;;  %v2846_v57 = vpop.f32.mrb[37].mxu1 }
 0x35f   :  { %v9830_v50 = vpop.eup %7532  ;;  %v3427_v40 = vsel %vm2981_vm0, %v9822_v49, 0.0  ;;  %v3099_v10 = vmax.f32 %v3097_v28, %v3098_v51  ;;  %v9834_v4 = vpop.f32.mrb[38].mxu1 }
 0x360   :  { %v9841_v56 = vpop.f32.mrb[179].mxu0  ;;  %v9843_v46 = vpop.eup %7534  ;;  %v3428_v18 = vadd.f32 %v3427_v40, %v3426_v13  ;;  %v3100_v1 = vsel %vm2981_vm0, %v9834_v4, -inf  ;;  %v3429_v47 = vsel %vm2981_vm0, %v9830_v50, 0.0  ;;  %v1863_v40 = vadd.f32 %v1862_v14, %v9052_v35 }
 0x361   :  { %v2849_v32 = vpop.f32.mrb[39].mxu1  ;;  %v9849_v61 = vpop.f32.mrb[180].mxu0  ;;  %v3431_v31 = vsel %vm2981_vm0, %v9843_v46, 0.0  ;;  %v3101_v21 = vmax.f32 %v3099_v10, %v3100_v1  ;;  %6588 = vmatmul.mubr.msk.bf16.gmra.mrb[212].mxu0 %vm2981_vm0, %v3593_v15  ;;  %v2243_v14 = vmax.f32 %v1861_v54, 0.0 }
 0x362   :  { %v9851_v28 = vpop.eup %7536  ;;  %v9862_v13 = vpop.f32.mrb[181].mxu0  ;;  %v3430_v57 = vadd.f32 %v3429_v47, %v3428_v18  ;;  %3998 = vmatprep.mubr.bf16.mxu0 %v11538_v38  ;;  %v9883_v47 = vadd.f32 %v1868_v6, %v9052_v35  ;;  %v2244_v19 = vmax.f32 %v1863_v40, 0.0 }
 0x363   :  { %v9864_v51 = vpop.eup %7538  ;;  %v1880_v10 = vpop.f32.mrb[182].mxu0  ;;  %v3433_v3 = vsel %vm2981_vm0, %v9851_v28, 0.0  ;;  %v3102_v15 = vrot.slane %v3101_v21, 4 }
 0x364   :  { %v9870_v1 = vpop.eup %7540  ;;  %v3435_v12 = vsel %vm2981_vm0, %v9864_v51, 0.0  ;;  %v9876_v18 = vpop.f32.mrb[183].mxu0  ;;  %v3432_v36 = vadd.f32 %v3431_v31, %v3430_v57 }
 0x365   :  { %11559 = vst [vmem:[#allocation3_spill] sm:$0xff] %v9870_v1  ;;  %v9878_v32 = vpop.eup %7542  ;;  %v3437_v33 = vsel %vm2981_vm0, %v9870_v1, 0.0  ;;  %v3103_v59 = vmax.f32 %v3101_v21, %v3102_v15  ;;  %v9887_v34 = vpop.f32.mrb[40].mxu1  ;;  %v9919_v1 = vpack.c.bf16 %v2244_v19, %v2238_v45 }
 0x366   :  { %11560 = vst [vmem:[#allocation4_spill] sm:$0xff] %v9878_v32  ;;  %v7545_v44 = vpop.eup %7544  ;;  %v3439_v42 = vsel %vm2981_vm0, %v9878_v32, 0.0  ;;  %11561 = vst [vmem:[#allocation5_spill] sm:$0xff] %v9887_v34  ;;  %v2887_v22 = vpop.f32.mrb[41].mxu1  ;;  %v3434_v41 = vadd.f32 %v3433_v3, %v3432_v36  ;;  %v3108_v21 = vsel %vm2981_vm0, %v9887_v34, -inf }
 0x367   :  { %v3542_v31 = vmul.f32 %v7545_v44, %v9690_v2  ;;  %v3543_v57 = vmul.f32 %v7545_v44, %v9696_v16  ;;  %v9895_v54 = vmul.f32 %v7545_v44, %v9733_v27  ;;  %v9898_v6 = vmul.f32 %v7545_v44, %v9755_v9  ;;  %v9902_v40 = vpop.f32.mrb[42].mxu1 }
 0x368   :  { %v3104_v25 = vrot.slane %v3103_v59, 2  ;;  %v3544_v0 = vmul.f32 %v7545_v44, %v9702_v7  ;;  %v3109_v16 = vsel %vm2981_vm0, %v9902_v40, -inf  ;;  %v2890_v27 = vpop.f32.mrb[43].mxu1  ;;  %v3545_v9 = vmul.f32 %v7545_v44, %v9710_v39 }
 0x369   :  { %v3594_v15 = vpack.c.bf16 %v3543_v57, %v3542_v31  ;;  %v3436_v22 = vadd.f32 %v3435_v12, %v3434_v41  ;;  %v3110_v36 = vmax.f32 %v3108_v21, %v3109_v16  ;;  %v9911_v32 = vmul.f32 %v7545_v44, %v9716_v30  ;;  %v11562_v57 = vld [vmem:[#allocation23_spill] sm:$0xff] }
 0x36a   :  { %v3105_v3 = vmax.f32 %v3103_v59, %v3104_v25  ;;  %v3595_v34 = vpack.c.bf16 %v3545_v9, %v3544_v0  ;;  %v9915_v7 = vmul.f32 %v7545_v44, %v9723_v8  ;;  %v9917_v2 = vpack.c.bf16 %v2243_v14, %v2237_v17 }
 0x36b   :  { %6589 = vmatmul.mubr.msk.bf16.vlgmr.msra.gmra.mrb[88].mxu1 %vm2981_vm0, %v3594_v15  ;;  %v3438_v27 = vadd.f32 %v3437_v33, %v3436_v22  ;;  %v2250_v25 = vmax.f32 %v9883_v47, 0.0  ;;  %v1871_v41 = vadd.f32 %v9828_v62, %v9055_v37  ;;  %v2249_v30 = vmax.f32 %v9890_v60, 0.0  ;;  %v11563_v22 = vld [vmem:[#allocation24_spill] sm:$0xff] }
 0x36c   :  { %v3106_v31 = vrot.slane %v3105_v3, 1  ;;  %3923 = vmatprep.mubr.bf16.mxu1 %v11538_v38  ;;  %4052 = vmatpush1.bf16.msra.mxu1 %v9511_v11  ;;  %v3596_v39 = vpack.c.bf16 %v9915_v7, %v9911_v32  ;;  %v1873_v8 = vadd.f32 %v9841_v56, %v9052_v35  ;;  %v9934_v59 = vadd.f32 %v9849_v61, %v9055_v37 }
 0x36d   :  { %4053 = vmatprep.subr.bf16.mxu1 %v9544_v23  ;;  %v3440_v11 = vadd.f32 %v3439_v42, %v3438_v27  ;;  %v9938_v45 = vpop.f32.mrb[44].mxu1  ;;  %v2255_v62 = vmax.f32 %v1871_v41, 0.0  ;;  %v9942_v12 = vadd.f32 %v9862_v13, %v9052_v35  ;;  %v1881_v61 = vadd.f32 %v1880_v10, %v9055_v37 }
 0x36e   :  { %v9936_v44 = vmax.f32 %v3105_v3, %v3106_v31  ;;  %v3111_v23 = vsel %vm2981_vm0, %v9938_v45, -inf  ;;  %v2895_v60 = vpop.f32.mrb[45].mxu1  ;;  %v2256_v17 = vmax.f32 %v1873_v8, 0.0  ;;  %v2261_v56 = vmax.f32 %v9934_v59, 0.0 }
 0x36f   :  { %v3441_v33 = vrot.slane %v3440_v11, 4  ;;  %v9954_v47 = vpop.f32.mrb[46].mxu1  ;;  %v3112_v15 = vmax.f32 %v3110_v36, %v3111_v23  ;;  %v9975_v36 = vpack.c.bf16 %v2255_v62, %v2249_v30 }
 0x370   :  { %v3190_v42 = vsub.f32 %v9735_v20, %v9936_v44  ;;  %v3191_v14 = vsub.f32 %v9745_v5, %v9936_v44  ;;  %v3192_v13 = vsub.f32 %v9777_v52, %v9936_v44  ;;  %4054 = vmatpush1.bf16.msra.mxu1 %v9536_v63  ;;  %v3193_v19 = vsub.f32 %v9785_v53, %v9936_v44  ;;  %v2898_v5 = vpop.f32.mrb[47].mxu1 }
 0x371   :  { %v3194_v37 = vsub.f32 %v9799_v24, %v9936_v44  ;;  %v3195_v10 = vsub.f32 %v9804_v48, %v9936_v44  ;;  %v3196_v20 = vsub.f32 %v9820_v29, %v9936_v44  ;;  %4055 = vmatprep.subr.bf16.mxu1 %v11562_v57  ;;  %v3442_v52 = vadd.f32 %v3441_v33, %v3440_v11 }
 0x372   :  { %v3197_v21 = vsub.f32 %v9834_v4, %v9936_v44  ;;  %v3294_v63 = vmul.f32 1.442695, %v3190_v42  ;;  %v3296_v0 = vmul.f32 1.442695, %v3191_v14  ;;  %v3298_v16 = vmul.f32 1.442695, %v3192_v13 }
 0x373   :  { %v3300_v53 = vmul.f32 1.442695, %v3193_v19  ;;  %6590 = vmatmul.mubr.msk.bf16.gmra.mrb[92].mxu1 %vm2981_vm0, %v3595_v34  ;;  %v2262_v24 = vmax.f32 %v9942_v12, 0.0  ;;  %v3443_v48 = vrot.slane %v3442_v52, 2  ;;  %v3302_v9 = vmul.f32 1.442695, %v3194_v37 }
 0x374   :  { %7546 = vpow2.f32 %v3294_v63  ;;  %v3304_v29 = vmul.f32 1.442695, %v3195_v10  ;;  %3933 = vmatprep.mubr.bf16.mxu1 %v11538_v38  ;;  %4056 = vmatpush1.bf16.msra.mxu1 %v11563_v22  ;;  %v3306_v3 = vmul.f32 1.442695, %v3196_v20  ;;  %v3113_v4 = vsel %vm2981_vm0, %v9954_v47, -inf }
 0x375   :  { %7548 = vpow2.f32 %v3296_v0  ;;  %4057 = vmatprep.subr.bf16.mxu1 %v9624_v55  ;;  %v3444_v34 = vadd.f32 %v3443_v48, %v3442_v52  ;;  %v3114_v27 = vmax.f32 %v3112_v15, %v3113_v4  ;;  %v9977_v31 = vpop.f32.mrb[48].mxu1  ;;  %v9979_v41 = vpack.c.bf16 %v2256_v17, %v2250_v25 }
 0x376   :  { %7550 = vpow2.f32 %v3298_v16  ;;  %v3115_v8 = vsel %vm2981_vm0, %v9977_v31, -inf  ;;  %v2903_v59 = vpop.f32.mrb[49].mxu1  ;;  %v2267_v11 = vmax.f32 %v1881_v61, 0.0  ;;  %v1883_v44 = vadd.f32 %v9876_v18, %v9052_v35 }
 0x377   :  { %7552 = vpow2.f32 %v3300_v53  ;;  %v3445_v12 = vrot.slane %v3444_v34, 1  ;;  %v3116_v55 = vmax.f32 %v3114_v27, %v3115_v8  ;;  %v9985_v30 = vpop.f32.mrb[50].mxu1  ;;  %v3308_v18 = vmul.f32 1.442695, %v3197_v21 }
 0x378   :  { %7554 = vpow2.f32 %v3302_v9  ;;  %4058 = vmatpush1.bf16.msra.mxu1 %v9632_v26  ;;  %v3117_v25 = vsel %vm2981_vm0, %v9985_v30, -inf  ;;  %v2906_v62 = vpop.f32.mrb[51].mxu1  ;;  %v9991_v23 = vpack.c.bf16 %v2267_v11, %v2261_v56  ;;  %v2268_v60 = vmax.f32 %v1883_v44, 0.0 }
 0x379   :  { %7556 = vpow2.f32 %v3304_v29  ;;  %4221 = vmatprep.subr.bf16.mxu1 %v9836_v43  ;;  %v3446_v17 = vadd.f32 %v3445_v12, %v3444_v34  ;;  %v3118_v35 = vmax.f32 %v3116_v55, %v3117_v25  ;;  %v11564_v0 = vpack.c.bf16 %v9898_v6, %v9895_v54 }
 0x37a   :  { %7558 = vpow2.f32 %v3306_v3  ;;  %v9997_v26 = vpack.c.bf16 %v2268_v60, %v2262_v24 }
 0x37b   :  { %6591 = vmatmul.mubr.msk.bf16.gmra.mrb[96].mxu1 %vm2981_vm0, %v3596_v39  ;;  %7560 = vrcp.f32 %v3446_v17 }
 0x37c   :  { %3943 = vmatprep.mubr.bf16.mxu1 %v11538_v38  ;;  %7562 = vpow2.f32 %v3308_v18 }
 0x37d   :  { %v10002_v43 = vpop.f32.mrb[52].mxu1 }
 0x37e   :  { %v10000_v61 = vpop.eup %7546  ;;  %v3119_v32 = vsel %vm2981_vm0, %v10002_v43, -inf  ;;  %v2911_v7 = vpop.f32.mrb[53].mxu1 }
 0x37f   :  { %v10004_v56 = vpop.eup %7548  ;;  %v3447_v33 = vsel %vm2981_vm0, %v10000_v61, 0.0  ;;  %v3120_v14 = vmax.f32 %v3118_v35, %v3119_v32  ;;  %v10014_v13 = vpop.f32.mrb[54].mxu1  ;;  %v11566_v7 = vld [vmem:[#allocation4_spill] sm:$0xff] }
 0x380   :  { %v10010_v39 = vpop.eup %7550  ;;  %v3448_v42 = vsel %vm2981_vm0, %v10004_v56, 0.0  ;;  %v3121_v10 = vsel %vm2981_vm0, %v10014_v13, -inf  ;;  %v2914_v20 = vpop.f32.mrb[55].mxu1 }
 0x381   :  { %v10016_v19 = vpop.eup %7552  ;;  %v3449_v37 = vadd.f32 %v3448_v42, %v3447_v33  ;;  %v3450_v57 = vsel %vm2981_vm0, %v10010_v39, 0.0  ;;  %v3122_v52 = vmax.f32 %v3120_v14, %v3121_v10 }
 0x382   :  { %v10020_v5 = vpop.eup %7554  ;;  %v3452_v53 = vsel %vm2981_vm0, %v10016_v19, 0.0 }
 0x383   :  { %v10024_v21 = vpop.eup %7556  ;;  %v3451_v63 = vadd.f32 %v3450_v57, %v3449_v37  ;;  %6592 = vmatmul.mubr.msk.bf16.gmra.mrb[100].mxu1 %vm2981_vm0, %v11564_v0  ;;  %v3123_v15 = vrot.slane %v3122_v52, 4  ;;  %v3454_v48 = vsel %vm2981_vm0, %v10020_v5, 0.0  ;;  %v11567_v37 = vld [vmem:[#allocation41_spill] sm:$0xff]  ;;  %v11568_v57 = vld [vmem:[#allocation26_spill] sm:$0xff] }
 0x384   :  { %v10030_v16 = vpop.eup %7558  ;;  %4083 = vmatprep.mubr.bf16.mxu1 %v11538_v38  ;;  %v3456_v29 = vsel %vm2981_vm0, %v10024_v21, 0.0 }
 0x385   :  { %v3453_v24 = vadd.f32 %v3452_v53, %v3451_v63  ;;  %v7561_v9 = vpop.eup %7560  ;;  %v3458_v54 = vsel %vm2981_vm0, %v10030_v16, 0.0  ;;  %v3124_v6 = vmax.f32 %v3122_v52, %v3123_v15  ;;  %v10041_v22 = vpop.f32.mrb[56].mxu1 }
 0x386   :  { %v3129_v4 = vsel %vm2981_vm0, %v10041_v22, -inf  ;;  %v2952_v34 = vpop.f32.mrb[57].mxu1  ;;  %v3550_v27 = vmul.f32 %v7561_v9, %v9818_v58  ;;  %v3551_v8 = vmul.f32 %v7561_v9, %v9822_v49  ;;  %v3552_v44 = vmul.f32 %v7561_v9, %v9830_v50  ;;  %v10054_v25 = vpop.eup %7562  ;;  %v11565_v50 = vld [vmem:[#allocation3_spill] sm:$0xff] }
 0x387   :  { %v3455_v3 = vadd.f32 %v3454_v48, %v3453_v24  ;;  %v3125_v59 = vrot.slane %v3124_v6, 2  ;;  %v10047_v11 = vpop.f32.mrb[58].mxu1  ;;  %v3553_v12 = vmul.f32 %v7561_v9, %v9843_v46  ;;  %v10052_v55 = vmul.f32 %v7561_v9, %v9851_v28  ;;  %v11569_v24 = vld [vmem:[#allocation5_spill] sm:$0xff] }
 0x388   :  { %v3130_v60 = vsel %vm2981_vm0, %v10047_v11, -inf  ;;  %v2955_v17 = vpop.f32.mrb[59].mxu1  ;;  %v3598_v58 = vpack.c.bf16 %v3551_v8, %v3550_v27  ;;  %v10059_v49 = vmul.f32 %v7561_v9, %v9864_v51  ;;  %v10062_v32 = vmul.f32 %v7561_v9, %v11565_v50 }
 0x389   :  { %v3457_v62 = vadd.f32 %v3456_v29, %v3455_v3  ;;  %v3126_v35 = vmax.f32 %v3124_v6, %v3125_v59  ;;  %v3131_v18 = vmax.f32 %v3129_v4, %v3130_v60  ;;  %v3599_v33 = vpack.c.bf16 %v3553_v12, %v3552_v44  ;;  %v11570_v3 = vld [vmem:[#allocation25_spill] sm:$0xff]  ;;  %v11571_v44 = vld [vmem:[#allocation43_spill] sm:$0xff] }
 0x38a   :  { %6593 = vmatmul.mubr.msk.bf16.vlgmr.msra.gmra.mrb[216].mxu0 %vm2981_vm0, %v3598_v58  ;;  %v3600_v28 = vpack.c.bf16 %v10059_v49, %v10052_v55  ;;  %v10068_v42 = vmul.f32 %v7561_v9, %v11566_v7  ;;  %v3460_v14 = vsel %vm2981_vm0, %v10054_v25, 0.0 }
 0x38b   :  { %v3459_v46 = vadd.f32 %v3458_v54, %v3457_v62  ;;  %v3127_v51 = vrot.slane %v3126_v35, 1  ;;  %4008 = vmatprep.mubr.bf16.mxu0 %v11538_v38  ;;  %4137 = vmatpush1.bf16.msra.mxu0 %v11567_v37 }
 0x38c   :  { %v3601_v20 = vpack.c.bf16 %v10068_v42, %v10062_v32  ;;  %4138 = vmatprep.subr.bf16.mxu0 %v11568_v57 }
 0x38d   :  { %v3461_v10 = vadd.f32 %v3460_v14, %v3459_v46  ;;  %v3128_v52 = vmax.f32 %v3126_v35, %v3127_v51  ;;  %v10077_v63 = vpop.f32.mrb[60].mxu1  ;;  %v7268_v35 = vld [vmem:[%s11303_s4 + $0x4] ss:$8 sps:$4 sm:$0xff]  }
 0x38e   :  { %v3132_v53 = vsel %vm2981_vm0, %v10077_v63, -inf  ;;  %v2960_v15 = vpop.f32.mrb[61].mxu1 }
 0x38f   :  { %v3462_v0 = vrot.slane %v3461_v10, 4  ;;  %v3198_v48 = vsub.f32 %v11569_v24, %v3128_v52  ;;  %v3199_v9 = vsub.f32 %v9902_v40, %v3128_v52  ;;  %v3200_v29 = vsub.f32 %v9938_v45, %v3128_v52  ;;  %v10085_v6 = vpop.f32.mrb[62].mxu1  ;;  %4139 = vmatpush1.bf16.msra.mxu0 %v11570_v3 }
 0x390   :  { %v3201_v54 = vsub.f32 %v9954_v47, %v3128_v52  ;;  %v3202_v34 = vsub.f32 %v9977_v31, %v3128_v52  ;;  %v3203_v27 = vsub.f32 %v9985_v30, %v3128_v52  ;;  %v3204_v8 = vsub.f32 %v10002_v43, %v3128_v52  ;;  %v2963_v59 = vpop.f32.mrb[63].mxu1  ;;  %4140 = vmatprep.subr.bf16.mxu0 %v11571_v44  ;;  %v11572_v31 = vld [vmem:[#allocation30_spill] sm:$0xff] }
 0x391   :  { %v3463_v4 = vadd.f32 %v3462_v0, %v3461_v10  ;;  %v3205_v40 = vsub.f32 %v10014_v13, %v3128_v52  ;;  %v3310_v12 = vmul.f32 1.442695, %v3198_v48  ;;  %v3312_v45 = vmul.f32 1.442695, %v3199_v9  ;;  %v11573_v13 = vld [vmem:[#allocation39_spill] sm:$0xff]  ;;  %v11574_v10 = vld [vmem:[#allocation40_spill] sm:$0xff] }
 0x392   :  { %v3314_v62 = vmul.f32 1.442695, %v3200_v29  ;;  %v3316_v60 = vmul.f32 1.442695, %v3201_v54  ;;  %v3133_v17 = vmax.f32 %v3131_v18, %v3132_v53  ;;  %6594 = vmatmul.mubr.msk.bf16.gmra.mrb[220].mxu0 %vm2981_vm0, %v3599_v33  ;;  %v3318_v58 = vmul.f32 1.442695, %v3202_v34 }
 0x393   :  { %v3464_v47 = vrot.slane %v3463_v4, 2  ;;  %7564 = vpow2.f32 %v3310_v12  ;;  %4018 = vmatprep.mubr.bf16.mxu0 %v11538_v38  ;;  %4141 = vmatpush1.bf16.msra.mxu0 %v11572_v31  ;;  %v3134_v43 = vsel %vm2981_vm0, %v10085_v6, -inf  ;;  %v3320_v18 = vmul.f32 1.442695, %v3203_v27 }
 0x394   :  { %7566 = vpow2.f32 %v3312_v45  ;;  %4142 = vmatprep.subr.bf16.mxu0 %v11573_v13  ;;  %v3135_v33 = vmax.f32 %v3133_v17, %v3134_v43  ;;  %v3322_v52 = vmul.f32 1.442695, %v3204_v8  ;;  %v3324_v24 = vmul.f32 1.442695, %v3205_v40 }
 0x395   :  { %v3465_v30 = vadd.f32 %v3464_v47, %v3463_v4  ;;  %7568 = vpow2.f32 %v3314_v62  ;;  %v10102_v50 = vpop.f32.mrb[64].mxu1 }
 0x396   :  { %7570 = vpow2.f32 %v3316_v60  ;;  %v3136_v7 = vsel %vm2981_vm0, %v10102_v50, -inf  ;;  %v2968_v14 = vpop.f32.mrb[65].mxu1 }
 0x397   :  { %v3466_v46 = vrot.slane %v3465_v30, 1  ;;  %7572 = vpow2.f32 %v3318_v58  ;;  %v3137_v51 = vmax.f32 %v3135_v33, %v3136_v7  ;;  %v10106_v37 = vpop.f32.mrb[66].mxu1  ;;  %4143 = vmatpush1.bf16.msra.mxu0 %v11574_v10 }
 0x398   :  { %v3138_v0 = vsel %vm2981_vm0, %v10106_v37, -inf  ;;  %v2971_v53 = vpop.f32.mrb[67].mxu1  ;;  %5909 = vmatprep.subr.bf16.mxu0 %v7268_v35  ;;  %7574 = vpow2.f32 %v3320_v18 }
 0x399   :  { %v3467_v57 = vadd.f32 %v3466_v46, %v3465_v30  ;;  %v3139_v15 = vmax.f32 %v3137_v51, %v3138_v0 }
 0x39a   :  { %6595 = vmatmul.mubr.msk.bf16.gmra.mrb[224].mxu0 %vm2981_vm0, %v3600_v28 }
 0x39b   :  { %7576 = vrcp.f32 %v3467_v57  ;;  %4028 = vmatprep.mubr.bf16.mxu0 %v11538_v38 }
 0x39c   :  { %7578 = vpow2.f32 %v3322_v52 }
 0x39d   :  { %v10116_v48 = vpop.eup %7564  ;;  %v10118_v9 = vpop.f32.mrb[68].mxu1  ;;  %7580 = vpow2.f32 %v3324_v24 }
 0x39e   :  { %v10120_v29 = vpop.eup %7566  ;;  %v3468_v54 = vsel %vm2981_vm0, %v10116_v48, 0.0  ;;  %v3140_v3 = vsel %vm2981_vm0, %v10118_v9, -inf  ;;  %v2976_v4 = vpop.f32.mrb[69].mxu1 }
 0x39f   :  { %v10126_v55 = vpop.eup %7568  ;;  %v3469_v49 = vsel %vm2981_vm0, %v10120_v29, 0.0  ;;  %v3141_v28 = vmax.f32 %v3139_v15, %v3140_v3  ;;  %v10130_v34 = vpop.f32.mrb[70].mxu1 }
 0x3a0   :  { %v10132_v27 = vpop.eup %7570  ;;  %v3470_v8 = vadd.f32 %v3469_v49, %v3468_v54  ;;  %v3142_v59 = vsel %vm2981_vm0, %v10130_v34, -inf  ;;  %v2979_v44 = vpop.f32.mrb[71].mxu1  ;;  %v3471_v12 = vsel %vm2981_vm0, %v10126_v55, 0.0 }
 0x3a1   :  { %v10136_v40 = vpop.eup %7572  ;;  %v3143_v45 = vmax.f32 %v3141_v28, %v3142_v59  ;;  %v3473_v60 = vsel %vm2981_vm0, %v10132_v27, 0.0 }
 0x3a2   :  { %v3472_v62 = vadd.f32 %v3471_v12, %v3470_v8  ;;  %6596 = vmatmul.mubr.msk.bf16.gmra.mrb[228].mxu0 %vm2981_vm0, %v3601_v20  ;;  %v10144_v47 = vpop.eup %7574  ;;  %v3475_v30 = vsel %vm2981_vm0, %v10136_v40, 0.0 }
 0x3a3   :  { %v3144_v17 = vrot.slane %v3143_v45, 4  ;;  %4168 = vmatprep.mubr.bf16.mxu0 %v11538_v38  ;;  %v3477_v18 = vsel %vm2981_vm0, %v10144_v47, 0.0 }
 0x3a4   :  { %v3474_v31 = vadd.f32 %v3473_v60, %v3472_v62 }
 0x3a5   :  { %v7577_v58 = vpop.eup %7576  ;;  %v3145_v33 = vmax.f32 %v3143_v45, %v3144_v17 }
 0x3a6   :  { %v3558_v43 = vmul.f32 %v7577_v58, %v10000_v61  ;;  %v3559_v13 = vmul.f32 %v7577_v58, %v10004_v56  ;;  %v10154_v32 = vmul.f32 %v7577_v58, %v10030_v16  ;;  %v10157_v42 = vmul.f32 %v7577_v58, %v10054_v25  ;;  %v10159_v20 = vpop.eup %7578 }
 0x3a7   :  { %v3476_v35 = vadd.f32 %v3475_v30, %v3474_v31  ;;  %v3560_v46 = vmul.f32 %v7577_v58, %v10010_v39  ;;  %v3561_v56 = vmul.f32 %v7577_v58, %v10016_v19  ;;  %v3562_v16 = vmul.f32 %v7577_v58, %v10020_v5  ;;  %v10168_v14 = vpop.eup %7580  ;;  %v11575_v19 = vld [vmem:[#allocation2_spill] sm:$0xff] }
 0x3a8   :  { %v3605_v61 = vpack.c.bf16 %v10157_v42, %v10154_v32  ;;  %v3602_v7 = vpack.c.bf16 %v3559_v13, %v3558_v43  ;;  %v3146_v51 = vrot.slane %v3145_v33, 2  ;;  %v3563_v10 = vmul.f32 %v7577_v58, %v10024_v21 }
 0x3a9   :  { %v3478_v25 = vadd.f32 %v3477_v18, %v3476_v35  ;;  %v3479_v57 = vsel %vm2981_vm0, %v10159_v20, 0.0  ;;  %v3603_v39 = vpack.c.bf16 %v3561_v56, %v3560_v46  ;;  %v3481_v5 = vsel %vm2981_vm0, %v10168_v14, 0.0 }
 0x3aa   :  { %6597 = vmatmul.mubr.msk.bf16.vlgmr.msra.gmra.mrb[104].mxu1 %vm2981_vm0, %v3602_v7  ;;  %v3147_v0 = vmax.f32 %v3145_v33, %v3146_v51  ;;  %v3604_v53 = vpack.c.bf16 %v3563_v10, %v3562_v16  ;;  %v7266_v51 = vld [vmem:[%s11303_s4] ss:$8 sps:$4 sm:$0xff]  }
 0x3ab   :  { %v3480_v52 = vadd.f32 %v3479_v57, %v3478_v25  ;;  %4093 = vmatprep.mubr.bf16.mxu1 %v11538_v38  ;;  %4222 = vmatpush1.bf16.msra.mxu1 %v11575_v19  ;;  %v7269_v19 = vld [vmem:[%s11303_s4 + $0x10] ss:$8 sps:$4 sm:$0xff]  }
 0x3ac   :  { %4223 = vmatprep.subr.bf16.mxu1 %v9919_v1  ;;  %v3148_v21 = vrot.slane %v3147_v0, 1 }
 0x3ad   :  { %v3482_v15 = vadd.f32 %v3481_v5, %v3480_v52 }
 0x3ae   :  { %v3149_v54 = vmax.f32 %v3147_v0, %v3148_v21 }
 0x3af   :  { %v3483_v24 = vrot.slane %v3482_v15, 4  ;;  %4224 = vmatpush1.bf16.msra.mxu1 %v9917_v2 }
 0x3b0   :  { %4225 = vmatprep.subr.bf16.mxu1 %v9979_v41  ;;  %v3206_v4 = vsub.f32 %v10041_v22, %v3149_v54  ;;  %v3207_v49 = vsub.f32 %v10047_v11, %v3149_v54  ;;  %v3208_v28 = vsub.f32 %v10077_v63, %v3149_v54  ;;  %v3209_v8 = vsub.f32 %v10085_v6, %v3149_v54 }
 0x3b1   :  { %v3484_v3 = vadd.f32 %v3483_v24, %v3482_v15  ;;  %v3210_v59 = vsub.f32 %v10102_v50, %v3149_v54  ;;  %v3211_v1 = vsub.f32 %v10106_v37, %v3149_v54  ;;  %v3212_v44 = vsub.f32 %v10118_v9, %v3149_v54  ;;  %v7272_v24 = vld [vmem:[%s11303_s4 + $0x20] ss:$8 sps:$4 sm:$0xff]  }
 0x3b2   :  { %6598 = vmatmul.mubr.msk.bf16.gmra.mrb[108].mxu1 %vm2981_vm0, %v3603_v39  ;;  %v3213_v41 = vsub.f32 %v10130_v34, %v3149_v54  ;;  %v3326_v12 = vmul.f32 1.442695, %v3206_v4  ;;  %v3328_v45 = vmul.f32 1.442695, %v3207_v49  ;;  %v3330_v22 = vmul.f32 1.442695, %v3208_v28 }
 0x3b3   :  { %v3485_v2 = vrot.slane %v3484_v3, 2  ;;  %4103 = vmatprep.mubr.bf16.mxu1 %v11538_v38  ;;  %4226 = vmatpush1.bf16.msra.mxu1 %v9975_v36  ;;  %v3332_v11 = vmul.f32 1.442695, %v3209_v8  ;;  %v3334_v6 = vmul.f32 1.442695, %v3210_v59 }
 0x3b4   :  { %4227 = vmatprep.subr.bf16.mxu1 %v9997_v26  ;;  %7582 = vpow2.f32 %v3326_v12  ;;  %v3336_v37 = vmul.f32 1.442695, %v3211_v1  ;;  %v3338_v34 = vmul.f32 1.442695, %v3212_v44  ;;  %v3340_v36 = vmul.f32 1.442695, %v3213_v41 }
 0x3b5   :  { %v3486_v63 = vadd.f32 %v3485_v2, %v3484_v3  ;;  %7584 = vpow2.f32 %v3328_v45  ;;  %v7277_v3 = vld [vmem:[%s11303_s4 + $0x34] ss:$8 sps:$4 sm:$0xff]   ;;  %v7275_v49 = vld [vmem:[%s11303_s4 + $0x30] ss:$8 sps:$4 sm:$0xff]   ;;  %v7280_v8 = vld [vmem:[%s11303_s4 + $0x44] ss:$8 sps:$4 sm:$0xff]  }
 0x3b6   :  { %7586 = vpow2.f32 %v3330_v22  ;;  %v7278_v1 = vld [vmem:[%s11303_s4 + $0x40] ss:$8 sps:$4 sm:$0xff]   ;;  %v7283_v2 = vld [vmem:[%s11303_s4 + $0x54] ss:$8 sps:$4 sm:$0xff]   ;;  %v7281_v12 = vld [vmem:[%s11303_s4 + $0x50] ss:$8 sps:$4 sm:$0xff]  }
 0x3b7   :  { %v3487_v50 = vrot.slane %v3486_v63, 1  ;;  %4228 = vmatpush1.bf16.msra.mxu1 %v9991_v23  ;;  %7588 = vpow2.f32 %v3332_v11  ;;  %v7286_v45 = vld [vmem:[%s11303_s4 + $0x64] ss:$8 sps:$4 sm:$0xff]  }
 0x3b8   :  { %7590 = vpow2.f32 %v3334_v6  ;;  %v10289_v22 = vld [vmem:[%s11304_s1] sm:$0xff] }
 0x3b9   :  { %v3488_v9 = vadd.f32 %v3487_v50, %v3486_v63  ;;  %v10294_v11 = vld [vmem:[%s11304_s1 + $0x20] sm:$0xff] }
 0x3ba   :  { %6599 = vmatmul.mubr.msk.bf16.gmra.mrb[112].mxu1 %vm2981_vm0, %v3604_v53 }
 0x3bb   :  { %7592 = vrcp.f32 %v3488_v9  ;;  %4113 = vmatprep.mubr.bf16.mxu1 %v11538_v38  ;;  %v6674_v9 = vcombine.high %v10289_v22, %v10294_v11 }
 0x3bc   :  { %7594 = vpow2.f32 %v3336_v37  ;;  %v7284_v37 = vld [vmem:[%s11303_s4 + $0x60] ss:$8 sps:$4 sm:$0xff]  }
 0x3bd   :  { %7596 = vpow2.f32 %v3338_v34 }
 0x3be   :  { %v10196_v26 = vpop.eup %7582  ;;  %7598 = vpow2.f32 %v3340_v36 }
 0x3bf   :  { %v10198_v62 = vpop.eup %7584  ;;  %v3489_v23 = vsel %vm2981_vm0, %v10196_v26, 0.0 }
 0x3c0   :  { %v10202_v60 = vpop.eup %7586  ;;  %v3490_v17 = vsel %vm2981_vm0, %v10198_v62, 0.0 }
 0x3c1   :  { %v10206_v58 = vpop.eup %7588  ;;  %v3491_v31 = vadd.f32 %v3490_v17, %v3489_v23  ;;  %v3492_v30 = vsel %vm2981_vm0, %v10202_v60, 0.0  ;;  %v7289_v23 = vld [vmem:[%s11303_s4 + $0x74] ss:$8 sps:$4 sm:$0xff]  }
 0x3c2   :  { %6600 = vmatmul.mubr.msk.bf16.gmra.mrb[116].mxu1 %vm2981_vm0, %v3605_v61  ;;  %v10215_v43 = vpop.eup %7590  ;;  %v3494_v18 = vsel %vm2981_vm0, %v10206_v58, 0.0 }
 0x3c3   :  { %4253 = vmatprep.mubr.bf16.mxu1 %v11538_v38  ;;  %v3493_v13 = vadd.f32 %v3492_v30, %v3491_v31  ;;  %v3496_v61 = vsel %vm2981_vm0, %v10215_v43, 0.0  ;;  %v7287_v30 = vld [vmem:[%s11303_s4 + $0x70] ss:$8 sps:$4 sm:$0xff]  }
 0x3c5   :  { %v7593_v35 = vpop.eup %7592  ;;  %v3495_v46 = vadd.f32 %v3494_v18, %v3493_v13  ;;  %v7292_v13 = vld [vmem:[%s11303_s4 + $0x84] ss:$8 sps:$4 sm:$0xff]  }
 0x3c6   :  { %v10219_v33 = vpop.eup %7594  ;;  %v3566_v7 = vmul.f32 %v7593_v35, %v10116_v48  ;;  %v3567_v32 = vmul.f32 %v7593_v35, %v10120_v29  ;;  %v3568_v42 = vmul.f32 %v7593_v35, %v10126_v55  ;;  %v3569_v56 = vmul.f32 %v7593_v35, %v10132_v27  ;;  %v7271_v55 = vld [vmem:[%s11303_s4 + $0x14] ss:$8 sps:$4 sm:$0xff]  }
 0x3c7   :  { %v3570_v16 = vmul.f32 %v7593_v35, %v10136_v40  ;;  %v3571_v25 = vmul.f32 %v7593_v35, %v10144_v47  ;;  %v10232_v10 = vpop.eup %7596  ;;  %v3497_v48 = vadd.f32 %v3496_v61, %v3495_v46  ;;  %v10235_v29 = vmul.f32 %v7593_v35, %v10159_v20 }
 0x3c8   :  { %v3606_v57 = vpack.c.bf16 %v3567_v32, %v3566_v7  ;;  %v3498_v27 = vsel %vm2981_vm0, %v10219_v33, 0.0  ;;  %v3607_v40 = vpack.c.bf16 %v3569_v56, %v3568_v42  ;;  %v3573_v39 = vmul.f32 %v7593_v35, %v10168_v14  ;;  %v10243_v52 = vpop.eup %7598  ;;  %v7274_v14 = vld [vmem:[%s11303_s4 + $0x24] ss:$8 sps:$4 sm:$0xff]   ;;  %v7290_v56 = vld [vmem:[%s11303_s4 + $0x80] ss:$8 sps:$4 sm:$0xff]  }
 0x3c9   :  { %v3608_v47 = vpack.c.bf16 %v3571_v25, %v3570_v16  ;;  %v3499_v0 = vadd.f32 %v3498_v27, %v3497_v48  ;;  %v3500_v20 = vsel %vm2981_vm0, %v10232_v10, 0.0  ;;  %v3502_v15 = vsel %vm2981_vm0, %v10243_v52, 0.0 }
 0x3ca   :  { %6601 = vmatmul.mubr.msk.bf16.vlgmr.msra.gmra.mrb[232].mxu0 %vm2981_vm0, %v3606_v57  ;;  %v3609_v53 = vpack.c.bf16 %v3573_v39, %v10235_v29  ;;  %v7296_v39 = vld [vmem:[%s11303_s4 + $0xa0] ss:$8 sps:$4 sm:$0xff]  }
 0x3cb   :  { %4178 = vmatprep.mubr.bf16.mxu0 %v11538_v38  ;;  %5910 = vmatpush1.bf16.msra.mxu0 %v7266_v51  ;;  %v3501_v5 = vadd.f32 %v3500_v20, %v3499_v0  ;;  %v7301_v20 = vld [vmem:[%s11303_s4 + $0xb4] ss:$8 sps:$4 sm:$0xff]  }
 0x3cc   :  { %5911 = vmatprep.subr.bf16.mxu0 %v7271_v55 }
 0x3cd   :  { %v3503_v21 = vadd.f32 %v3502_v15, %v3501_v5  ;;  %v7299_v5 = vld [vmem:[%s11303_s4 + $0xb0] ss:$8 sps:$4 sm:$0xff]  }
 0x3cf   :  { %5912 = vmatpush1.bf16.msra.mxu0 %v7269_v19  ;;  %v3504_v54 = vrot.slane %v3503_v21, 4 }
 0x3d0   :  { %5913 = vmatprep.subr.bf16.mxu0 %v7274_v14  ;;  %v7304_v14 = vld [vmem:[%s11303_s4 + $0xc4] ss:$8 sps:$4 sm:$0xff]  }
 0x3d1   :  { %v3505_v4 = vadd.f32 %v3504_v54, %v3503_v21 }
 0x3d2   :  { %6602 = vmatmul.mubr.msk.bf16.gmra.mrb[236].mxu0 %vm2981_vm0, %v3607_v40 }
 0x3d3   :  { %4188 = vmatprep.mubr.bf16.mxu0 %v11538_v38  ;;  %5914 = vmatpush1.bf16.msra.mxu0 %v7272_v24  ;;  %v3506_v28 = vrot.slane %v3505_v4, 2  ;;  %v7302_v24 = vld [vmem:[%s11303_s4 + $0xc0] ss:$8 sps:$4 sm:$0xff]  }
 0x3d4   :  { %5915 = vmatprep.subr.bf16.mxu0 %v7277_v3 }
 0x3d5   :  { %v3507_v59 = vadd.f32 %v3506_v28, %v3505_v4  ;;  %v7307_v4 = vld [vmem:[%s11303_s4 + $0xd4] ss:$8 sps:$4 sm:$0xff]  }
 0x3d7   :  { %5916 = vmatpush1.bf16.msra.mxu0 %v7275_v49  ;;  %v3508_v44 = vrot.slane %v3507_v59, 1 }
 0x3d8   :  { %5917 = vmatprep.subr.bf16.mxu0 %v7280_v8  ;;  %v7305_v8 = vld [vmem:[%s11303_s4 + $0xd0] ss:$8 sps:$4 sm:$0xff]  }
 0x3d9   :  { %v3509_v41 = vadd.f32 %v3508_v44, %v3507_v59  ;;  %v7310_v59 = vld [vmem:[%s11303_s4 + $0xe4] ss:$8 sps:$4 sm:$0xff]  }
 0x3da   :  { %6603 = vmatmul.mubr.msk.bf16.gmra.mrb[240].mxu0 %vm2981_vm0, %v3608_v47 }
 0x3db   :  { %4198 = vmatprep.mubr.bf16.mxu0 %v11538_v38  ;;  %5918 = vmatpush1.bf16.msra.mxu0 %v7278_v1  ;;  %7600 = vrcp.f32 %v3509_v41 }
 0x3dc   :  { %5919 = vmatprep.subr.bf16.mxu0 %v7283_v2  ;;  %v3660_v63 = vpop.f32.mrb[184].mxu0  ;;  %v7308_v2 = vld [vmem:[%s11303_s4 + $0xe0] ss:$8 sps:$4 sm:$0xff]  }
 0x3dd   :  { %v3662_v50 = vpop.f32.mrb[185].mxu0 }
 0x3de   :  { %v6881_v34 = vpack.c.bf16 %v3662_v50, %v3660_v63  ;;  %v3664_v36 = vpop.f32.mrb[186].mxu0  ;;  %v7311_v50 = vld [vmem:[%s11303_s4 + $0xf0] ss:$8 sps:$4 sm:$0xff]  }
 0x3df   :  { %5920 = vmatpush1.bf16.msra.mxu0 %v7281_v12  ;;  %v3666_v17 = vpop.f32.mrb[187].mxu0 }
 0x3e0   :  { %5921 = vmatprep.subr.bf16.mxu0 %v7286_v45  ;;  %4681 = vst.msk [vmem:[%s11305_s6] sm:$0xff] %vm10296_vm3, %v6881_v34  ;;  %v6882_v31 = vpack.c.bf16 %v3666_v17, %v3664_v36  ;;  %v7313_v45 = vld [vmem:[%s11303_s4 + $0xf4] ss:$8 sps:$4 sm:$0xff]   ;;  %v4757_v34 = vld [vmem:[%s11304_s1 + $0x60] sm:$0xff] }
 0x3e2   :  { %6604 = vmatmul.mubr.msk.bf16.gmra.mrb[244].mxu0 %vm2981_vm0, %v3609_v53  ;;  %4682 = vst.msk [vmem:[%s11305_s6 + $0x8] sm:$0xff] %vm10296_vm3, %v6882_v31  ;;  %v7314_v31 = vld [vmem:[%s11303_s4 + $0x100] ss:$8 sps:$4 sm:$0xff]  }
 0x3e3   :  { %5922 = vmatpush1.bf16.msra.mxu0 %v7284_v37  ;;  %5941 = vmatprep.mubr.bf16.mxu0 %v6674_v9  ;;  %v7316_v37 = vld [vmem:[%s11303_s4 + $0x104] ss:$8 sps:$4 sm:$0xff]  }
 0x3e4   :  { %5923 = vmatprep.subr.bf16.mxu0 %v7289_v23  ;;  %v3670_v35 = vpop.f32.mrb[188].mxu0  ;;  %v4753_v9 = vld [vmem:[%s11304_s1 + $0x40] sm:$0xff]  ;;  %v6673_v23 = vcombine.low %v10289_v22, %v10294_v11  ;;  %v7317_v11 = vld [vmem:[%s11303_s4 + $0x110] ss:$8 sps:$4 sm:$0xff]  }
 0x3e5   :  { %v7601_v18 = vpop.eup %7600  ;;  %v3672_v46 = vpop.f32.mrb[189].mxu0 }
 0x3e6   :  { %v3574_v7 = vmul.f32 %v7601_v18, %v10196_v26  ;;  %v3575_v32 = vmul.f32 %v7601_v18, %v10198_v62  ;;  %v10328_v42 = vmul.f32 %v7601_v18, %v10232_v10  ;;  %v10331_v61 = vmul.f32 %v7601_v18, %v10243_v52  ;;  %v3674_v16 = vpop.f32.mrb[190].mxu0  ;;  %v7295_v10 = vld [vmem:[%s11303_s4 + $0x94] ss:$8 sps:$4 sm:$0xff]  }
 0x3e7   :  { %5924 = vmatpush1.bf16.msra.mxu0 %v7287_v30  ;;  %v3576_v25 = vmul.f32 %v7601_v18, %v10202_v60  ;;  %v3577_v51 = vmul.f32 %v7601_v18, %v10206_v58  ;;  %v3578_v26 = vmul.f32 %v7601_v18, %v10215_v43  ;;  %v3579_v62 = vmul.f32 %v7601_v18, %v10219_v33  ;;  %v3676_v48 = vpop.f32.mrb[191].mxu0  ;;  %v7293_v58 = vld [vmem:[%s11303_s4 + $0x90] ss:$8 sps:$4 sm:$0xff]   ;;  %v7298_v43 = vld [vmem:[%s11303_s4 + $0xa4] ss:$8 sps:$4 sm:$0xff]  }
 0x3e8   :  { %5925 = vmatprep.subr.bf16.mxu0 %v7292_v13  ;;  %v3613_v57 = vpack.c.bf16 %v10331_v61, %v10328_v42  ;;  %v3610_v29 = vpack.c.bf16 %v3575_v32, %v3574_v7  ;;  %v6883_v55 = vpack.c.bf16 %v3672_v46, %v3670_v35  ;;  %v6884_v27 = vpack.c.bf16 %v3676_v48, %v3674_v16  ;;  %v7319_v18 = vld [vmem:[%s11303_s4 + $0x114] ss:$8 sps:$4 sm:$0xff]   ;;  %v7322_v7 = vld [vmem:[%s11303_s4 + $0x124] ss:$8 sps:$4 sm:$0xff]  }
 0x3e9   :  { %v3611_v40 = vpack.c.bf16 %v3577_v51, %v3576_v25  ;;  %v3612_v60 = vpack.c.bf16 %v3579_v62, %v3578_v26  ;;  %v6682_v30 = vcombine.high %v4753_v9, %v4757_v34  ;;  %v4761_v32 = vld [vmem:[%s11304_s1 + $0x80] sm:$0xff] }
 0x3ea   :  { %6605 = vmatmul.mubr.msk.bf16.vlgmr.msra.gmra.mrb[120].mxu1 %vm2981_vm0, %v3610_v29  ;;  %4683 = vst.msk [vmem:[%s11305_s6 + $0x10] sm:$0xff] %vm10296_vm3, %v6883_v55  ;;  %4684 = vst.msk [vmem:[%s11305_s6 + $0x18] sm:$0xff] %vm10296_vm3, %v6884_v27  ;;  %v4765_v42 = vld [vmem:[%s11304_s1 + $0xa0] sm:$0xff]  ;;  %v7323_v29 = vld [vmem:[%s11303_s4 + $0x130] ss:$8 sps:$4 sm:$0xff]  }
 0x3eb   :  { %5926 = vmatpush1.bf16.msra.mxu0 %v7290_v56  ;;  %4263 = vmatprep.mubr.bf16.mxu1 %v11538_v38  ;;  %v6681_v56 = vcombine.low %v4753_v9, %v4757_v34  ;;  %v7320_v25 = vld [vmem:[%s11303_s4 + $0x120] ss:$8 sps:$4 sm:$0xff]   ;;  %v6690_v51 = vcombine.high %v4761_v32, %v4765_v42  ;;  %v7328_v55 = vld [vmem:[%s11303_s4 + $0x144] ss:$8 sps:$4 sm:$0xff]  }
 0x3ec   :  { %5927 = vmatprep.subr.bf16.mxu0 %v7295_v10  ;;  %v7325_v10 = vld [vmem:[%s11303_s4 + $0x134] ss:$8 sps:$4 sm:$0xff]   ;;  %v4769_v27 = vld [vmem:[%s11304_s1 + $0xc0] sm:$0xff] }
 0x3ee   :  { %v3680_v33 = vpop.f32.mrb[192].mxu0 }
 0x3ef   :  { %v3682_v47 = vpop.f32.mrb[193].mxu0  ;;  %5928 = vmatpush1.bf16.msra.mxu0 %v7293_v58  ;;  %v6689_v58 = vcombine.low %v4761_v32, %v4765_v42 }
 0x3f0   :  { %v6885_v52 = vpack.c.bf16 %v3682_v47, %v3680_v33  ;;  %v3684_v0 = vpop.f32.mrb[194].mxu0  ;;  %5929 = vmatprep.subr.bf16.mxu0 %v7298_v43  ;;  %v7326_v33 = vld [vmem:[%s11303_s4 + $0x140] ss:$8 sps:$4 sm:$0xff]  }
 0x3f1   :  { %v3686_v53 = vpop.f32.mrb[195].mxu0 }
 0x3f2   :  { %4685 = vst.msk [vmem:[%s11305_s6 + $0x20] sm:$0xff] %vm10296_vm3, %v6885_v52  ;;  %v6886_v19 = vpack.c.bf16 %v3686_v53, %v3684_v0  ;;  %6606 = vmatmul.mubr.msk.bf16.gmra.mrb[124].mxu1 %vm2981_vm0, %v3611_v40  ;;  %v4773_v40 = vld [vmem:[%s11304_s1 + $0xe0] sm:$0xff]  ;;  %v7331_v0 = vld [vmem:[%s11303_s4 + $0x154] ss:$8 sps:$4 sm:$0xff]  }
 0x3f3   :  { %5930 = vmatpush1.bf16.msra.mxu0 %v7296_v39  ;;  %4273 = vmatprep.mubr.bf16.mxu1 %v11538_v38  ;;  %v6698_v52 = vcombine.high %v4769_v27, %v4773_v40 }
 0x3f4   :  { %4686 = vst.msk [vmem:[%s11305_s6 + $0x28] sm:$0xff] %vm10296_vm3, %v6886_v19  ;;  %5931 = vmatprep.subr.bf16.mxu0 %v7301_v20  ;;  %v7329_v19 = vld [vmem:[%s11303_s4 + $0x150] ss:$8 sps:$4 sm:$0xff]  }
 0x3f6   :  { %v3690_v15 = vpop.f32.mrb[196].mxu0 }
 0x3f7   :  { %v3692_v21 = vpop.f32.mrb[197].mxu0  ;;  %5932 = vmatpush1.bf16.msra.mxu0 %v7299_v5  ;;  %v7334_v5 = vld [vmem:[%s11303_s4 + $0x164] ss:$8 sps:$4 sm:$0xff]  }
 0x3f8   :  { %v6887_v54 = vpack.c.bf16 %v3692_v21, %v3690_v15  ;;  %v3694_v3 = vpop.f32.mrb[198].mxu0  ;;  %5933 = vmatprep.subr.bf16.mxu0 %v7304_v14  ;;  %v4777_v14 = vld [vmem:[%s11304_s1 + $0x100] sm:$0xff] }
 0x3f9   :  { %v3696_v49 = vpop.f32.mrb[199].mxu0  ;;  %v4781_v15 = vld [vmem:[%s11304_s1 + $0x120] sm:$0xff] }
 0x3fa   :  { %4687 = vst.msk [vmem:[%s11305_s6 + $0x30] sm:$0xff] %vm10296_vm3, %v6887_v54  ;;  %v6888_v28 = vpack.c.bf16 %v3696_v49, %v3694_v3  ;;  %6607 = vmatmul.mubr.msk.bf16.gmra.mrb[128].mxu1 %vm2981_vm0, %v3612_v60  ;;  %v7332_v3 = vld [vmem:[%s11303_s4 + $0x160] ss:$8 sps:$4 sm:$0xff]  }
 0x3fb   :  { %5934 = vmatpush1.bf16.msra.mxu0 %v7302_v24  ;;  %4283 = vmatprep.mubr.bf16.mxu1 %v11538_v38  ;;  %v6697_v24 = vcombine.low %v4769_v27, %v4773_v40 }
 0x3fc   :  { %4688 = vst.msk [vmem:[%s11305_s6 + $0x38] sm:$0xff] %vm10296_vm3, %v6888_v28  ;;  %5935 = vmatprep.subr.bf16.mxu0 %v7307_v4  ;;  %v3745_v1 = vpop.f32.mrb[72].mxu1  ;;  %v6706_v4 = vcombine.high %v4777_v14, %v4781_v15 }
 0x3fd   :  { %v3747_v44 = vpop.f32.mrb[73].mxu1 }
 0x3fe   :  { %v6889_v41 = vpack.c.bf16 %v3747_v44, %v3745_v1  ;;  %v3749_v12 = vpop.f32.mrb[74].mxu1  ;;  %v7335_v44 = vld [vmem:[%s11303_s4 + $0x170] ss:$8 sps:$4 sm:$0xff]  }
 0x3ff   :  { %5936 = vmatpush1.bf16.msra.mxu0 %v7305_v8  ;;  %v3751_v38 = vpop.f32.mrb[75].mxu1  ;;  %v7337_v8 = vld [vmem:[%s11303_s4 + $0x174] ss:$8 sps:$4 sm:$0xff]  }
 0x400   :  { %5937 = vmatprep.subr.bf16.mxu0 %v7310_v59  ;;  %4689 = vst.msk [vmem:[%s11305_s6 + $0x40] sm:$0xff] %vm10296_vm3, %v6889_v41  ;;  %v6890_v63 = vpack.c.bf16 %v3751_v38, %v3749_v12  ;;  %v4785_v41 = vld [vmem:[%s11304_s1 + $0x140] sm:$0xff]  ;;  %v6705_v38 = vcombine.low %v4777_v14, %v4781_v15 }
 0x401   :  { %v4789_v12 = vld [vmem:[%s11304_s1 + $0x160] sm:$0xff] }
 0x402   :  { %6608 = vmatmul.mubr.msk.bf16.gmra.mrb[132].mxu1 %vm2981_vm0, %v3613_v57  ;;  %4690 = vst.msk [vmem:[%s11305_s6 + $0x48] sm:$0xff] %vm10296_vm3, %v6890_v63 }
 0x403   :  { %5938 = vmatpush1.bf16.msra.mxu0 %v7308_v2  ;;  %v7340_v2 = vld [vmem:[%s11303_s4 + $0x184] ss:$8 sps:$4 sm:$0xff]  }
 0x404   :  { %5939 = vmatprep.subr.bf16.mxu0 %v7313_v45 }
 0x405   :  { %v3755_v36 = vpop.f32.mrb[76].mxu1 }
 0x406   :  { %v3757_v17 = vpop.f32.mrb[77].mxu1 }
 0x407   :  { %5940 = vmatpush1.bf16.msra.mxu0 %v7311_v50  ;;  %v6891_v13 = vpack.c.bf16 %v3757_v17, %v3755_v36  ;;  %v3759_v35 = vpop.f32.mrb[78].mxu1  ;;  %v7338_v50 = vld [vmem:[%s11303_s4 + $0x180] ss:$8 sps:$4 sm:$0xff]   ;;  %v7343_v36 = vld [vmem:[%s11303_s4 + $0x194] ss:$8 sps:$4 sm:$0xff]  }
 0x408   :  { %6022 = vmatprep.subr.bf16.mxu0 %v7316_v37  ;;  %v3761_v46 = vpop.f32.mrb[79].mxu1  ;;  %v6714_v37 = vcombine.high %v4785_v41, %v4789_v12 }
 0x409   :  { %4691 = vst.msk [vmem:[%s11305_s6 + $0x50] sm:$0xff] %vm10296_vm3, %v6891_v13  ;;  %v6892_v22 = vpack.c.bf16 %v3761_v46, %v3759_v35  ;;  %v4793_v13 = vld [vmem:[%s11304_s1 + $0x180] sm:$0xff]  ;;  %v6713_v46 = vcombine.low %v4785_v41, %v4789_v12 }
 0x40a   :  { %5942 = vmatmul.mubr.bf16.vlgmr.msra.gmra.mrb[248].mxu0 %v6673_v23  ;;  %v4797_v35 = vld [vmem:[%s11304_s1 + $0x1a0] sm:$0xff] }
 0x40b   :  { %6023 = vmatpush1.bf16.msra.mxu0 %v7314_v31  ;;  %5951 = vmatprep.mubr.bf16.mxu0 %v6682_v30  ;;  %4692 = vst.msk [vmem:[%s11305_s6 + $0x58] sm:$0xff] %vm10296_vm3, %v6892_v22  ;;  %v7341_v31 = vld [vmem:[%s11303_s4 + $0x190] ss:$8 sps:$4 sm:$0xff]   ;;  %v7346_v30 = vld [vmem:[%s11303_s4 + $0x1a4] ss:$8 sps:$4 sm:$0xff]  }
 0x40c   :  { %6024 = vmatprep.subr.bf16.mxu0 %v7319_v18 }
 0x40d   :  { %v3765_v61 = vpop.f32.mrb[80].mxu1 }
 0x40e   :  { %v3767_v16 = vpop.f32.mrb[81].mxu1 }
 0x40f   :  { %6025 = vmatpush1.bf16.msra.mxu0 %v7317_v11  ;;  %v6893_v26 = vpack.c.bf16 %v3767_v16, %v3765_v61  ;;  %v3769_v62 = vpop.f32.mrb[82].mxu1  ;;  %v7344_v11 = vld [vmem:[%s11303_s4 + $0x1a0] ss:$8 sps:$4 sm:$0xff]   ;;  %v7349_v61 = vld [vmem:[%s11303_s4 + $0x1b4] ss:$8 sps:$4 sm:$0xff]  }
 0x410   :  { %6026 = vmatprep.subr.bf16.mxu0 %v7322_v7  ;;  %v3771_v48 = vpop.f32.mrb[83].mxu1  ;;  %v6722_v7 = vcombine.high %v4793_v13, %v4797_v35 }
 0x411   :  { %4693 = vst.msk [vmem:[%s11305_s6 + $0x60] sm:$0xff] %vm10296_vm3, %v6893_v26  ;;  %v6894_v57 = vpack.c.bf16 %v3771_v48, %v3769_v62  ;;  %v4801_v26 = vld [vmem:[%s11304_s1 + $0x1c0] sm:$0xff]  ;;  %v6721_v48 = vcombine.low %v4793_v13, %v4797_v35 }
 0x412   :  { %5952 = vmatmul.mubr.bf16.gmra.mrb[252].mxu0 %v6681_v56  ;;  %v4805_v62 = vld [vmem:[%s11304_s1 + $0x1e0] sm:$0xff] }
 0x413   :  { %6027 = vmatpush1.bf16.msra.mxu0 %v7320_v25  ;;  %5961 = vmatprep.mubr.bf16.mxu0 %v6690_v51  ;;  %4694 = vst.msk [vmem:[%s11305_s6 + $0x68] sm:$0xff] %vm10296_vm3, %v6894_v57  ;;  %v7347_v25 = vld [vmem:[%s11303_s4 + $0x1b0] ss:$8 sps:$4 sm:$0xff]   ;;  %v7352_v51 = vld [vmem:[%s11303_s4 + $0x1c4] ss:$8 sps:$4 sm:$0xff]   ;;  %v6730_v40 = vcombine.high %v4801_v26, %v4805_v62 }
 0x414   :  { %6028 = vmatprep.subr.bf16.mxu0 %v7325_v10 }
 0x415   :  { %v3775_v60 = vpop.f32.mrb[84].mxu1 }
 0x416   :  { %v3777_v43 = vpop.f32.mrb[85].mxu1 }
 0x417   :  { %6029 = vmatpush1.bf16.msra.mxu0 %v7323_v29  ;;  %v6895_v47 = vpack.c.bf16 %v3777_v43, %v3775_v60  ;;  %v3779_v39 = vpop.f32.mrb[86].mxu1  ;;  %v7350_v29 = vld [vmem:[%s11303_s4 + $0x1c0] ss:$8 sps:$4 sm:$0xff]   ;;  %v7355_v60 = vld [vmem:[%s11303_s4 + $0x1d4] ss:$8 sps:$4 sm:$0xff]  }
 0x418   :  { %6030 = vmatprep.subr.bf16.mxu0 %v7328_v55  ;;  %v3781_v20 = vpop.f32.mrb[87].mxu1 }
 0x419   :  { %4695 = vst.msk [vmem:[%s11305_s6 + $0x70] sm:$0xff] %vm10296_vm3, %v6895_v47  ;;  %v6896_v53 = vpack.c.bf16 %v3781_v20, %v3779_v39  ;;  %v7358_v47 = vld [vmem:[%s11303_s4 + $0x1e4] ss:$8 sps:$4 sm:$0xff]   ;;  %v6729_v20 = vcombine.low %v4801_v26, %v4805_v62 }
 0x41a   :  { %5962 = vmatmul.mubr.bf16.gmra.mrb[0].mxu0 %v6689_v58  ;;  %v4746_v39 = vld [vmem:[%s11304_s1 + $0x8] sm:$0xff] }
 0x41b   :  { %6031 = vmatpush1.bf16.msra.mxu0 %v7326_v33  ;;  %5971 = vmatprep.mubr.bf16.mxu0 %v6698_v52  ;;  %4696 = vst.msk [vmem:[%s11305_s6 + $0x78] sm:$0xff] %vm10296_vm3, %v6896_v53  ;;  %v7353_v33 = vld [vmem:[%s11303_s4 + $0x1d0] ss:$8 sps:$4 sm:$0xff]   ;;  %v4750_v52 = vld [vmem:[%s11304_s1 + $0x28] sm:$0xff] }
 0x41c   :  { %6032 = vmatprep.subr.bf16.mxu0 %v7331_v0  ;;  %v3830_v21 = vpop.f32.mrb[200].mxu0 }
 0x41d   :  { %v3832_v54 = vpop.f32.mrb[201].mxu0 }
 0x41e   :  { %v6897_v49 = vpack.c.bf16 %v3832_v54, %v3830_v21  ;;  %v3834_v28 = vpop.f32.mrb[202].mxu0  ;;  %v7361_v21 = vld [vmem:[%s11303_s4 + $0x1f4] ss:$8 sps:$4 sm:$0xff]  }
 0x41f   :  { %6033 = vmatpush1.bf16.msra.mxu0 %v7329_v19  ;;  %v3836_v59 = vpop.f32.mrb[203].mxu0  ;;  %v7356_v19 = vld [vmem:[%s11303_s4 + $0x1e0] ss:$8 sps:$4 sm:$0xff]  }
 0x420   :  { %6034 = vmatprep.subr.bf16.mxu0 %v7334_v5  ;;  %4697 = vst.msk [vmem:[%s11305_s6 + $0x80] sm:$0xff] %vm10296_vm3, %v6897_v49  ;;  %v6898_v1 = vpack.c.bf16 %v3836_v59, %v3834_v28  ;;  %v6676_v5 = vcombine.high %v4746_v39, %v4750_v52  ;;  %v4754_v49 = vld [vmem:[%s11304_s1 + $0x48] sm:$0xff]  ;;  %v6675_v59 = vcombine.low %v4746_v39, %v4750_v52 }
 0x421   :  { %v4758_v28 = vld [vmem:[%s11304_s1 + $0x68] sm:$0xff] }
 0x422   :  { %5972 = vmatmul.mubr.bf16.gmra.mrb[4].mxu0 %v6697_v24  ;;  %4698 = vst.msk [vmem:[%s11305_s6 + $0x88] sm:$0xff] %vm10296_vm3, %v6898_v1 }
 0x423   :  { %6035 = vmatpush1.bf16.msra.mxu0 %v7332_v3  ;;  %5981 = vmatprep.mubr.bf16.mxu0 %v6706_v4  ;;  %v7359_v3 = vld [vmem:[%s11303_s4 + $0x1f0] ss:$8 sps:$4 sm:$0xff]   ;;  %v7364_v4 = vld [vmem:[%s11303_s4 + $0x204] ss:$8 sps:$4 sm:$0xff]  }
 0x424   :  { %6036 = vmatprep.subr.bf16.mxu0 %v7337_v8  ;;  %v3840_v45 = vpop.f32.mrb[204].mxu0 }
 0x425   :  { %v3842_v63 = vpop.f32.mrb[205].mxu0 }
 0x426   :  { %v6899_v9 = vpack.c.bf16 %v3842_v63, %v3840_v45  ;;  %v3844_v34 = vpop.f32.mrb[206].mxu0  ;;  %v7367_v45 = vld [vmem:[%s11303_s4 + $0x214] ss:$8 sps:$4 sm:$0xff]  }
 0x427   :  { %6037 = vmatpush1.bf16.msra.mxu0 %v7335_v44  ;;  %v3846_v23 = vpop.f32.mrb[207].mxu0  ;;  %v7362_v44 = vld [vmem:[%s11303_s4 + $0x200] ss:$8 sps:$4 sm:$0xff]  }
 0x428   :  { %6038 = vmatprep.subr.bf16.mxu0 %v7340_v2  ;;  %4699 = vst.msk [vmem:[%s11305_s6 + $0x90] sm:$0xff] %vm10296_vm3, %v6899_v9  ;;  %v6900_v17 = vpack.c.bf16 %v3846_v23, %v3844_v34  ;;  %v6684_v2 = vcombine.high %v4754_v49, %v4758_v28  ;;  %v4762_v9 = vld [vmem:[%s11304_s1 + $0x88] sm:$0xff]  ;;  %v6683_v23 = vcombine.low %v4754_v49, %v4758_v28 }
 0x429   :  { %v4766_v34 = vld [vmem:[%s11304_s1 + $0xa8] sm:$0xff] }
 0x42a   :  { %5982 = vmatmul.mubr.bf16.gmra.mrb[8].mxu0 %v6705_v38  ;;  %4700 = vst.msk [vmem:[%s11305_s6 + $0x98] sm:$0xff] %vm10296_vm3, %v6900_v17 }
 0x42b   :  { %6039 = vmatpush1.bf16.msra.mxu0 %v7338_v50  ;;  %5991 = vmatprep.mubr.bf16.mxu0 %v6714_v37  ;;  %v7365_v50 = vld [vmem:[%s11303_s4 + $0x210] ss:$8 sps:$4 sm:$0xff]   ;;  %v7370_v37 = vld [vmem:[%s11303_s4 + $0x224] ss:$8 sps:$4 sm:$0xff]  }
 0x42c   :  { %6040 = vmatprep.subr.bf16.mxu0 %v7343_v36  ;;  %v3850_v18 = vpop.f32.mrb[208].mxu0 }
 0x42d   :  { %v3852_v22 = vpop.f32.mrb[209].mxu0 }
 0x42e   :  { %v6901_v32 = vpack.c.bf16 %v3852_v22, %v3850_v18  ;;  %v3854_v42 = vpop.f32.mrb[210].mxu0  ;;  %v7373_v18 = vld [vmem:[%s11303_s4 + $0x234] ss:$8 sps:$4 sm:$0xff]  }
 0x42f   :  { %6041 = vmatpush1.bf16.msra.mxu0 %v7341_v31  ;;  %v3856_v56 = vpop.f32.mrb[211].mxu0  ;;  %v7368_v31 = vld [vmem:[%s11303_s4 + $0x220] ss:$8 sps:$4 sm:$0xff]  }
 0x430   :  { %6042 = vmatprep.subr.bf16.mxu0 %v7346_v30  ;;  %4701 = vst.msk [vmem:[%s11305_s6 + $0xa0] sm:$0xff] %vm10296_vm3, %v6901_v32  ;;  %v6902_v16 = vpack.c.bf16 %v3856_v56, %v3854_v42  ;;  %v6692_v30 = vcombine.high %v4762_v9, %v4766_v34  ;;  %v4770_v32 = vld [vmem:[%s11304_s1 + $0xc8] sm:$0xff]  ;;  %v6691_v56 = vcombine.low %v4762_v9, %v4766_v34 }
 0x431   :  { %v4774_v42 = vld [vmem:[%s11304_s1 + $0xe8] sm:$0xff] }
 0x432   :  { %5992 = vmatmul.mubr.bf16.gmra.mrb[12].mxu0 %v6713_v46  ;;  %4702 = vst.msk [vmem:[%s11305_s6 + $0xa8] sm:$0xff] %vm10296_vm3, %v6902_v16 }
 0x433   :  { %6043 = vmatpush1.bf16.msra.mxu0 %v7344_v11  ;;  %6001 = vmatprep.mubr.bf16.mxu0 %v6722_v7  ;;  %v7371_v11 = vld [vmem:[%s11303_s4 + $0x230] ss:$8 sps:$4 sm:$0xff]   ;;  %v7376_v7 = vld [vmem:[%s11303_s4 + $0x244] ss:$8 sps:$4 sm:$0xff]  }
 0x434   :  { %6044 = vmatprep.subr.bf16.mxu0 %v7349_v61  ;;  %v3860_v10 = vpop.f32.mrb[212].mxu0 }
 0x435   :  { %v3862_v57 = vpop.f32.mrb[213].mxu0 }
 0x436   :  { %v6903_v55 = vpack.c.bf16 %v3862_v57, %v3860_v10  ;;  %v3864_v27 = vpop.f32.mrb[214].mxu0  ;;  %v7379_v10 = vld [vmem:[%s11303_s4 + $0x254] ss:$8 sps:$4 sm:$0xff]  }
 0x437   :  { %6045 = vmatpush1.bf16.msra.mxu0 %v7347_v25  ;;  %v3866_v58 = vpop.f32.mrb[215].mxu0  ;;  %v7374_v25 = vld [vmem:[%s11303_s4 + $0x240] ss:$8 sps:$4 sm:$0xff]  }
 0x438   :  { %6046 = vmatprep.subr.bf16.mxu0 %v7352_v51  ;;  %4703 = vst.msk [vmem:[%s11305_s6 + $0xb0] sm:$0xff] %vm10296_vm3, %v6903_v55  ;;  %v6904_v43 = vpack.c.bf16 %v3866_v58, %v3864_v27  ;;  %v6700_v51 = vcombine.high %v4770_v32, %v4774_v42  ;;  %v7382_v55 = vld [vmem:[%s11303_s4 + $0x264] ss:$8 sps:$4 sm:$0xff]   ;;  %v6699_v58 = vcombine.low %v4770_v32, %v4774_v42 }
 0x439   :  { %v4778_v27 = vld [vmem:[%s11304_s1 + $0x108] sm:$0xff] }
 0x43a   :  { %6002 = vmatmul.mubr.bf16.gmra.mrb[16].mxu0 %v6721_v48  ;;  %4704 = vst.msk [vmem:[%s11305_s6 + $0xb8] sm:$0xff] %vm10296_vm3, %v6904_v43 }
 0x43b   :  { %6047 = vmatpush1.bf16.msra.mxu0 %v7350_v29  ;;  %6011 = vmatprep.mubr.bf16.mxu0 %v6730_v40  ;;  %v7377_v29 = vld [vmem:[%s11303_s4 + $0x250] ss:$8 sps:$4 sm:$0xff]   ;;  %v4782_v40 = vld [vmem:[%s11304_s1 + $0x128] sm:$0xff] }
 0x43c   :  { %6048 = vmatprep.subr.bf16.mxu0 %v7355_v60 }
 0x43e   :  { %v3915_v0 = vpop.f32.mrb[88].mxu1 }
 0x43f   :  { %v3917_v53 = vpop.f32.mrb[89].mxu1  ;;  %6049 = vmatpush1.bf16.msra.mxu0 %v7353_v33  ;;  %v7380_v33 = vld [vmem:[%s11303_s4 + $0x260] ss:$8 sps:$4 sm:$0xff]  }
 0x440   :  { %v6905_v14 = vpack.c.bf16 %v3917_v53, %v3915_v0  ;;  %v3919_v15 = vpop.f32.mrb[90].mxu1  ;;  %6050 = vmatprep.subr.bf16.mxu0 %v7358_v47  ;;  %v6708_v47 = vcombine.high %v4778_v27, %v4782_v40  ;;  %v7385_v0 = vld [vmem:[%s11303_s4 + $0x274] ss:$8 sps:$4 sm:$0xff]  }
 0x441   :  { %v3921_v24 = vpop.f32.mrb[91].mxu1 }
 0x442   :  { %4705 = vst.msk [vmem:[%s11305_s6 + $0xc0] sm:$0xff] %vm10296_vm3, %v6905_v14  ;;  %v6906_v54 = vpack.c.bf16 %v3921_v24, %v3919_v15  ;;  %6012 = vmatmul.mubr.bf16.gmra.mrb[20].mxu0 %v6729_v20  ;;  %v4786_v14 = vld [vmem:[%s11304_s1 + $0x148] sm:$0xff]  ;;  %v6707_v24 = vcombine.low %v4778_v27, %v4782_v40 }
 0x443   :  { %6051 = vmatpush1.bf16.msra.mxu0 %v7356_v19  ;;  %6054 = vmatprep.mubr.bf16.mxu0 %v6676_v5  ;;  %v7383_v19 = vld [vmem:[%s11303_s4 + $0x270] ss:$8 sps:$4 sm:$0xff]   ;;  %v7388_v5 = vld [vmem:[%s11303_s4 + $0x284] ss:$8 sps:$4 sm:$0xff]   ;;  %v7404_v27 = vld [vmem:[%s11303_s4 + $0x2e0] ss:$8 sps:$4 sm:$0xff]  }
 0x444   :  { %4706 = vst.msk [vmem:[%s11305_s6 + $0xc8] sm:$0xff] %vm10296_vm3, %v6906_v54  ;;  %6052 = vmatprep.subr.bf16.mxu0 %v7361_v21  ;;  %v4790_v15 = vld [vmem:[%s11304_s1 + $0x168] sm:$0xff] }
 0x446   :  { %v3925_v8 = vpop.f32.mrb[92].mxu1 }
 0x447   :  { %v3927_v1 = vpop.f32.mrb[93].mxu1  ;;  %6053 = vmatpush1.bf16.msra.mxu0 %v7359_v3  ;;  %v7386_v3 = vld [vmem:[%s11303_s4 + $0x280] ss:$8 sps:$4 sm:$0xff]  }
 0x448   :  { %v6907_v41 = vpack.c.bf16 %v3927_v1, %v3925_v8  ;;  %v3929_v12 = vpop.f32.mrb[94].mxu1  ;;  %6135 = vmatprep.subr.bf16.mxu0 %v7364_v4  ;;  %v6716_v4 = vcombine.high %v4786_v14, %v4790_v15  ;;  %v7391_v8 = vld [vmem:[%s11303_s4 + $0x294] ss:$8 sps:$4 sm:$0xff]  }
 0x449   :  { %v3931_v38 = vpop.f32.mrb[95].mxu1 }
 0x44a   :  { %4707 = vst.msk [vmem:[%s11305_s6 + $0xd0] sm:$0xff] %vm10296_vm3, %v6907_v41  ;;  %v6908_v63 = vpack.c.bf16 %v3931_v38, %v3929_v12  ;;  %6055 = vmatmul.mubr.bf16.vlgmr.msra.gmra.mrb[248].mxu0 %v6675_v59  ;;  %v4794_v41 = vld [vmem:[%s11304_s1 + $0x188] sm:$0xff]  ;;  %v6715_v38 = vcombine.low %v4786_v14, %v4790_v15 }
 0x44b   :  { %6136 = vmatpush1.bf16.msra.mxu0 %v7362_v44  ;;  %6064 = vmatprep.mubr.bf16.mxu0 %v6684_v2  ;;  %v7389_v44 = vld [vmem:[%s11303_s4 + $0x290] ss:$8 sps:$4 sm:$0xff]   ;;  %v7394_v2 = vld [vmem:[%s11303_s4 + $0x2a4] ss:$8 sps:$4 sm:$0xff]   ;;  %v7410_v14 = vld [vmem:[%s11303_s4 + $0x300] ss:$8 sps:$4 sm:$0xff]  }
 0x44c   :  { %4708 = vst.msk [vmem:[%s11305_s6 + $0xd8] sm:$0xff] %vm10296_vm3, %v6908_v63  ;;  %6137 = vmatprep.subr.bf16.mxu0 %v7367_v45  ;;  %v4798_v12 = vld [vmem:[%s11304_s1 + $0x1a8] sm:$0xff] }
 0x44e   :  { %v3935_v36 = vpop.f32.mrb[96].mxu1 }
 0x44f   :  { %v3937_v17 = vpop.f32.mrb[97].mxu1  ;;  %6138 = vmatpush1.bf16.msra.mxu0 %v7365_v50  ;;  %v7392_v50 = vld [vmem:[%s11303_s4 + $0x2a0] ss:$8 sps:$4 sm:$0xff]  }
 0x450   :  { %v6909_v13 = vpack.c.bf16 %v3937_v17, %v3935_v36  ;;  %v3939_v35 = vpop.f32.mrb[98].mxu1  ;;  %6139 = vmatprep.subr.bf16.mxu0 %v7370_v37  ;;  %v6724_v37 = vcombine.high %v4794_v41, %v4798_v12  ;;  %v7397_v36 = vld [vmem:[%s11303_s4 + $0x2b4] ss:$8 sps:$4 sm:$0xff]  }
 0x451   :  { %v3941_v46 = vpop.f32.mrb[99].mxu1 }
 0x452   :  { %4709 = vst.msk [vmem:[%s11305_s6 + $0xe0] sm:$0xff] %vm10296_vm3, %v6909_v13  ;;  %v6910_v22 = vpack.c.bf16 %v3941_v46, %v3939_v35  ;;  %6065 = vmatmul.mubr.bf16.gmra.mrb[252].mxu0 %v6683_v23  ;;  %v4802_v13 = vld [vmem:[%s11304_s1 + $0x1c8] sm:$0xff]  ;;  %v6723_v46 = vcombine.low %v4794_v41, %v4798_v12 }
 0x453   :  { %6140 = vmatpush1.bf16.msra.mxu0 %v7368_v31  ;;  %6074 = vmatprep.mubr.bf16.mxu0 %v6692_v30  ;;  %v7395_v31 = vld [vmem:[%s11303_s4 + $0x2b0] ss:$8 sps:$4 sm:$0xff]   ;;  %v7400_v30 = vld [vmem:[%s11303_s4 + $0x2c4] ss:$8 sps:$4 sm:$0xff]   ;;  %v7416_v41 = vld [vmem:[%s11303_s4 + $0x320] ss:$8 sps:$4 sm:$0xff]  }
 0x454   :  { %4710 = vst.msk [vmem:[%s11305_s6 + $0xe8] sm:$0xff] %vm10296_vm3, %v6910_v22  ;;  %6141 = vmatprep.subr.bf16.mxu0 %v7373_v18  ;;  %v4806_v35 = vld [vmem:[%s11304_s1 + $0x1e8] sm:$0xff] }
 0x456   :  { %v3945_v61 = vpop.f32.mrb[100].mxu1 }
 0x457   :  { %v3947_v16 = vpop.f32.mrb[101].mxu1  ;;  %6142 = vmatpush1.bf16.msra.mxu0 %v7371_v11  ;;  %v7398_v11 = vld [vmem:[%s11303_s4 + $0x2c0] ss:$8 sps:$4 sm:$0xff]  }
 0x458   :  { %v6911_v26 = vpack.c.bf16 %v3947_v16, %v3945_v61  ;;  %v3949_v62 = vpop.f32.mrb[102].mxu1  ;;  %6143 = vmatprep.subr.bf16.mxu0 %v7376_v7  ;;  %v6732_v7 = vcombine.high %v4802_v13, %v4806_v35  ;;  %v7403_v61 = vld [vmem:[%s11303_s4 + $0x2d4] ss:$8 sps:$4 sm:$0xff]  }
 0x459   :  { %v3951_v48 = vpop.f32.mrb[103].mxu1 }
 0x45a   :  { %4711 = vst.msk [vmem:[%s11305_s6 + $0xf0] sm:$0xff] %vm10296_vm3, %v6911_v26  ;;  %v6912_v57 = vpack.c.bf16 %v3951_v48, %v3949_v62  ;;  %6075 = vmatmul.mubr.bf16.gmra.mrb[0].mxu0 %v6691_v56  ;;  %v4747_v26 = vld [vmem:[%s11304_s1 + $0x10] sm:$0xff] }
 0x45b   :  { %6144 = vmatpush1.bf16.msra.mxu0 %v7374_v25  ;;  %6084 = vmatprep.mubr.bf16.mxu0 %v6700_v51  ;;  %v7401_v25 = vld [vmem:[%s11303_s4 + $0x2d0] ss:$8 sps:$4 sm:$0xff]   ;;  %v7406_v51 = vld [vmem:[%s11303_s4 + $0x2e4] ss:$8 sps:$4 sm:$0xff]  }
 0x45c   :  { %4712 = vst.msk [vmem:[%s11305_s6 + $0xf8] sm:$0xff] %vm10296_vm3, %v6912_v57  ;;  %6145 = vmatprep.subr.bf16.mxu0 %v7379_v10  ;;  %v4751_v62 = vld [vmem:[%s11304_s1 + $0x30] sm:$0xff]  ;;  %v6731_v57 = vcombine.low %v4802_v13, %v4806_v35  ;;  %v7422_v13 = vld [vmem:[%s11303_s4 + $0x340] ss:$8 sps:$4 sm:$0xff]  }
 0x45d   :  { %v4000_v60 = vpop.f32.mrb[216].mxu0  ;;  %v6678_v40 = vcombine.high %v4747_v26, %v4751_v62 }
 0x45e   :  { %v4002_v43 = vpop.f32.mrb[217].mxu0 }
 0x45f   :  { %6146 = vmatpush1.bf16.msra.mxu0 %v7377_v29  ;;  %v6913_v39 = vpack.c.bf16 %v4002_v43, %v4000_v60  ;;  %v4004_v52 = vpop.f32.mrb[218].mxu0 }
 0x460   :  { %6147 = vmatprep.subr.bf16.mxu0 %v7382_v55  ;;  %v4006_v20 = vpop.f32.mrb[219].mxu0 }
 0x461   :  { %4713 = vst.msk [vmem:[%s11305_s6 + $0x100] sm:$0xff] %vm10296_vm3, %v6913_v39  ;;  %v6914_v53 = vpack.c.bf16 %v4006_v20, %v4004_v52  ;;  %v4755_v39 = vld [vmem:[%s11304_s1 + $0x50] sm:$0xff] }
 0x462   :  { %6085 = vmatmul.mubr.bf16.gmra.mrb[4].mxu0 %v6699_v58  ;;  %v7409_v58 = vld [vmem:[%s11303_s4 + $0x2f4] ss:$8 sps:$4 sm:$0xff]  }
 0x463   :  { %6148 = vmatpush1.bf16.msra.mxu0 %v7380_v33  ;;  %6094 = vmatprep.mubr.bf16.mxu0 %v6708_v47  ;;  %4714 = vst.msk [vmem:[%s11305_s6 + $0x108] sm:$0xff] %vm10296_vm3, %v6914_v53  ;;  %v7407_v33 = vld [vmem:[%s11303_s4 + $0x2f0] ss:$8 sps:$4 sm:$0xff]   ;;  %v7412_v47 = vld [vmem:[%s11303_s4 + $0x304] ss:$8 sps:$4 sm:$0xff]   ;;  %v6677_v53 = vcombine.low %v4747_v26, %v4751_v62 }
 0x464   :  { %6149 = vmatprep.subr.bf16.mxu0 %v7385_v0  ;;  %v4759_v52 = vld [vmem:[%s11304_s1 + $0x70] sm:$0xff]  ;;  %v7428_v26 = vld [vmem:[%s11303_s4 + $0x360] ss:$8 sps:$4 sm:$0xff]  }
 0x465   :  { %v4010_v21 = vpop.f32.mrb[220].mxu0  ;;  %v6686_v15 = vcombine.high %v4755_v39, %v4759_v52 }
 0x466   :  { %v4012_v54 = vpop.f32.mrb[221].mxu0 }
 0x467   :  { %6150 = vmatpush1.bf16.msra.mxu0 %v7383_v19  ;;  %v6915_v49 = vpack.c.bf16 %v4012_v54, %v4010_v21  ;;  %v4014_v28 = vpop.f32.mrb[222].mxu0 }
 0x468   :  { %6151 = vmatprep.subr.bf16.mxu0 %v7388_v5  ;;  %v4016_v59 = vpop.f32.mrb[223].mxu0 }
 0x469   :  { %4715 = vst.msk [vmem:[%s11305_s6 + $0x110] sm:$0xff] %vm10296_vm3, %v6915_v49  ;;  %v6916_v1 = vpack.c.bf16 %v4016_v59, %v4014_v28  ;;  %v4763_v49 = vld [vmem:[%s11304_s1 + $0x90] sm:$0xff] }
 0x46a   :  { %6095 = vmatmul.mubr.bf16.gmra.mrb[8].mxu0 %v6707_v24  ;;  %v7415_v24 = vld [vmem:[%s11303_s4 + $0x314] ss:$8 sps:$4 sm:$0xff]  }
 0x46b   :  { %6152 = vmatpush1.bf16.msra.mxu0 %v7386_v3  ;;  %6104 = vmatprep.mubr.bf16.mxu0 %v6716_v4  ;;  %4716 = vst.msk [vmem:[%s11305_s6 + $0x118] sm:$0xff] %vm10296_vm3, %v6916_v1  ;;  %v7413_v3 = vld [vmem:[%s11303_s4 + $0x310] ss:$8 sps:$4 sm:$0xff]   ;;  %v7418_v4 = vld [vmem:[%s11303_s4 + $0x324] ss:$8 sps:$4 sm:$0xff]   ;;  %v6685_v1 = vcombine.low %v4755_v39, %v4759_v52 }
 0x46c   :  { %6153 = vmatprep.subr.bf16.mxu0 %v7391_v8  ;;  %v4767_v28 = vld [vmem:[%s11304_s1 + $0xb0] sm:$0xff]  ;;  %v7434_v39 = vld [vmem:[%s11303_s4 + $0x380] ss:$8 sps:$4 sm:$0xff]  }
 0x46d   :  { %v4020_v45 = vpop.f32.mrb[224].mxu0  ;;  %v6694_v12 = vcombine.high %v4763_v49, %v4767_v28 }
 0x46e   :  { %v4022_v63 = vpop.f32.mrb[225].mxu0 }
 0x46f   :  { %6154 = vmatpush1.bf16.msra.mxu0 %v7389_v44  ;;  %v6917_v9 = vpack.c.bf16 %v4022_v63, %v4020_v45  ;;  %v4024_v34 = vpop.f32.mrb[226].mxu0 }
 0x470   :  { %6155 = vmatprep.subr.bf16.mxu0 %v7394_v2  ;;  %v4026_v23 = vpop.f32.mrb[227].mxu0 }
 0x471   :  { %4717 = vst.msk [vmem:[%s11305_s6 + $0x120] sm:$0xff] %vm10296_vm3, %v6917_v9  ;;  %v6918_v17 = vpack.c.bf16 %v4026_v23, %v4024_v34  ;;  %v4771_v9 = vld [vmem:[%s11304_s1 + $0xd0] sm:$0xff] }
 0x472   :  { %6105 = vmatmul.mubr.bf16.gmra.mrb[12].mxu0 %v6715_v38  ;;  %v7421_v38 = vld [vmem:[%s11303_s4 + $0x334] ss:$8 sps:$4 sm:$0xff]  }
 0x473   :  { %6156 = vmatpush1.bf16.msra.mxu0 %v7392_v50  ;;  %6114 = vmatprep.mubr.bf16.mxu0 %v6724_v37  ;;  %4718 = vst.msk [vmem:[%s11305_s6 + $0x128] sm:$0xff] %vm10296_vm3, %v6918_v17  ;;  %v7419_v50 = vld [vmem:[%s11303_s4 + $0x330] ss:$8 sps:$4 sm:$0xff]   ;;  %v7424_v37 = vld [vmem:[%s11303_s4 + $0x344] ss:$8 sps:$4 sm:$0xff]   ;;  %v6693_v17 = vcombine.low %v4763_v49, %v4767_v28 }
 0x474   :  { %6157 = vmatprep.subr.bf16.mxu0 %v7397_v36  ;;  %v4775_v34 = vld [vmem:[%s11304_s1 + $0xf0] sm:$0xff]  ;;  %v7440_v49 = vld [vmem:[%s11303_s4 + $0x3a0] ss:$8 sps:$4 sm:$0xff]  }
 0x475   :  { %v4030_v18 = vpop.f32.mrb[228].mxu0  ;;  %v6702_v35 = vcombine.high %v4771_v9, %v4775_v34 }
 0x476   :  { %v4032_v22 = vpop.f32.mrb[229].mxu0 }
 0x477   :  { %6158 = vmatpush1.bf16.msra.mxu0 %v7395_v31  ;;  %v6919_v32 = vpack.c.bf16 %v4032_v22, %v4030_v18  ;;  %v4034_v42 = vpop.f32.mrb[230].mxu0 }
 0x478   :  { %6159 = vmatprep.subr.bf16.mxu0 %v7400_v30  ;;  %v4036_v56 = vpop.f32.mrb[231].mxu0 }
 0x479   :  { %4719 = vst.msk [vmem:[%s11305_s6 + $0x130] sm:$0xff] %vm10296_vm3, %v6919_v32  ;;  %v6920_v16 = vpack.c.bf16 %v4036_v56, %v4034_v42  ;;  %v4779_v32 = vld [vmem:[%s11304_s1 + $0x110] sm:$0xff] }
 0x47a   :  { %6115 = vmatmul.mubr.bf16.gmra.mrb[16].mxu0 %v6723_v46  ;;  %v7427_v46 = vld [vmem:[%s11303_s4 + $0x354] ss:$8 sps:$4 sm:$0xff]  }
 0x47b   :  { %6160 = vmatpush1.bf16.msra.mxu0 %v7398_v11  ;;  %6124 = vmatprep.mubr.bf16.mxu0 %v6732_v7  ;;  %4720 = vst.msk [vmem:[%s11305_s6 + $0x138] sm:$0xff] %vm10296_vm3, %v6920_v16  ;;  %v7425_v11 = vld [vmem:[%s11303_s4 + $0x350] ss:$8 sps:$4 sm:$0xff]   ;;  %v7430_v7 = vld [vmem:[%s11303_s4 + $0x364] ss:$8 sps:$4 sm:$0xff]   ;;  %v6701_v16 = vcombine.low %v4771_v9, %v4775_v34 }
 0x47c   :  { %6161 = vmatprep.subr.bf16.mxu0 %v7403_v61  ;;  %v4783_v42 = vld [vmem:[%s11304_s1 + $0x130] sm:$0xff]  ;;  %v7446_v9 = vld [vmem:[%s11303_s4 + $0x3c0] ss:$8 sps:$4 sm:$0xff]  }
 0x47d   :  { %v4085_v10 = vpop.f32.mrb[104].mxu1  ;;  %v6710_v62 = vcombine.high %v4779_v32, %v4783_v42 }
 0x47e   :  { %v4087_v48 = vpop.f32.mrb[105].mxu1 }
 0x47f   :  { %v6921_v29 = vpack.c.bf16 %v4087_v48, %v4085_v10  ;;  %v4089_v55 = vpop.f32.mrb[106].mxu1  ;;  %6162 = vmatpush1.bf16.msra.mxu0 %v7401_v25  ;;  %v7433_v48 = vld [vmem:[%s11303_s4 + $0x374] ss:$8 sps:$4 sm:$0xff]  }
 0x480   :  { %v4091_v60 = vpop.f32.mrb[107].mxu1  ;;  %6163 = vmatprep.subr.bf16.mxu0 %v7406_v51 }
 0x481   :  { %4721 = vst.msk [vmem:[%s11305_s6 + $0x140] sm:$0xff] %vm10296_vm3, %v6921_v29  ;;  %v6922_v43 = vpack.c.bf16 %v4091_v60, %v4089_v55  ;;  %v7431_v29 = vld [vmem:[%s11303_s4 + $0x370] ss:$8 sps:$4 sm:$0xff]   ;;  %v7436_v55 = vld [vmem:[%s11303_s4 + $0x384] ss:$8 sps:$4 sm:$0xff]  }
 0x482   :  { %6125 = vmatmul.mubr.bf16.gmra.mrb[20].mxu0 %v6731_v57 }
 0x483   :  { %4722 = vst.msk [vmem:[%s11305_s6 + $0x148] sm:$0xff] %vm10296_vm3, %v6922_v43  ;;  %6164 = vmatpush1.bf16.msra.mxu0 %v7404_v27  ;;  %6167 = vmatprep.mubr.bf16.mxu0 %v6678_v40  ;;  %v4787_v27 = vld [vmem:[%s11304_s1 + $0x150] sm:$0xff]  ;;  %v6709_v43 = vcombine.low %v4779_v32, %v4783_v42 }
 0x484   :  { %6165 = vmatprep.subr.bf16.mxu0 %v7409_v58  ;;  %v4791_v40 = vld [vmem:[%s11304_s1 + $0x170] sm:$0xff] }
 0x485   :  { %v4095_v0 = vpop.f32.mrb[108].mxu1  ;;  %v6718_v52 = vcombine.high %v4787_v27, %v4791_v40 }
 0x486   :  { %v4097_v20 = vpop.f32.mrb[109].mxu1 }
 0x487   :  { %v6923_v19 = vpack.c.bf16 %v4097_v20, %v4095_v0  ;;  %v4099_v5 = vpop.f32.mrb[110].mxu1  ;;  %6166 = vmatpush1.bf16.msra.mxu0 %v7407_v33  ;;  %v7439_v20 = vld [vmem:[%s11303_s4 + $0x394] ss:$8 sps:$4 sm:$0xff]  }
 0x488   :  { %v4101_v21 = vpop.f32.mrb[111].mxu1  ;;  %6248 = vmatprep.subr.bf16.mxu0 %v7412_v47 }
 0x489   :  { %4723 = vst.msk [vmem:[%s11305_s6 + $0x150] sm:$0xff] %vm10296_vm3, %v6923_v19  ;;  %v6924_v54 = vpack.c.bf16 %v4101_v21, %v4099_v5  ;;  %v7437_v19 = vld [vmem:[%s11303_s4 + $0x390] ss:$8 sps:$4 sm:$0xff]   ;;  %v7442_v5 = vld [vmem:[%s11303_s4 + $0x3a4] ss:$8 sps:$4 sm:$0xff]  }
 0x48a   :  { %6168 = vmatmul.mubr.bf16.vlgmr.msra.gmra.mrb[248].mxu0 %v6677_v53 }
 0x48b   :  { %4724 = vst.msk [vmem:[%s11305_s6 + $0x158] sm:$0xff] %vm10296_vm3, %v6924_v54  ;;  %6249 = vmatpush1.bf16.msra.mxu0 %v7410_v14  ;;  %6177 = vmatprep.mubr.bf16.mxu0 %v6686_v15  ;;  %v4795_v14 = vld [vmem:[%s11304_s1 + $0x190] sm:$0xff]  ;;  %v6717_v54 = vcombine.low %v4787_v27, %v4791_v40 }
 0x48c   :  { %6250 = vmatprep.subr.bf16.mxu0 %v7415_v24  ;;  %v4799_v15 = vld [vmem:[%s11304_s1 + $0x1b0] sm:$0xff] }
 0x48d   :  { %v4105_v8 = vpop.f32.mrb[112].mxu1  ;;  %v6726_v28 = vcombine.high %v4795_v14, %v4799_v15 }
 0x48e   :  { %v4107_v59 = vpop.f32.mrb[113].mxu1 }
 0x48f   :  { %v6925_v44 = vpack.c.bf16 %v4107_v59, %v4105_v8  ;;  %v4109_v2 = vpop.f32.mrb[114].mxu1  ;;  %6251 = vmatpush1.bf16.msra.mxu0 %v7413_v3  ;;  %v7445_v59 = vld [vmem:[%s11303_s4 + $0x3b4] ss:$8 sps:$4 sm:$0xff]  }
 0x490   :  { %v4111_v45 = vpop.f32.mrb[115].mxu1  ;;  %6252 = vmatprep.subr.bf16.mxu0 %v7418_v4 }
 0x491   :  { %4725 = vst.msk [vmem:[%s11305_s6 + $0x160] sm:$0xff] %vm10296_vm3, %v6925_v44  ;;  %v6926_v63 = vpack.c.bf16 %v4111_v45, %v4109_v2  ;;  %v7443_v44 = vld [vmem:[%s11303_s4 + $0x3b0] ss:$8 sps:$4 sm:$0xff]   ;;  %v7448_v2 = vld [vmem:[%s11303_s4 + $0x3c4] ss:$8 sps:$4 sm:$0xff]  }
 0x492   :  { %6178 = vmatmul.mubr.bf16.gmra.mrb[252].mxu0 %v6685_v1 }
 0x493   :  { %4726 = vst.msk [vmem:[%s11305_s6 + $0x168] sm:$0xff] %vm10296_vm3, %v6926_v63  ;;  %6253 = vmatpush1.bf16.msra.mxu0 %v7416_v41  ;;  %6187 = vmatprep.mubr.bf16.mxu0 %v6694_v12  ;;  %v4803_v41 = vld [vmem:[%s11304_s1 + $0x1d0] sm:$0xff]  ;;  %v6725_v63 = vcombine.low %v4795_v14, %v4799_v15 }
 0x494   :  { %6254 = vmatprep.subr.bf16.mxu0 %v7421_v38  ;;  %v4807_v12 = vld [vmem:[%s11304_s1 + $0x1f0] sm:$0xff] }
 0x495   :  { %v4115_v36 = vpop.f32.mrb[116].mxu1  ;;  %v6734_v34 = vcombine.high %v4803_v41, %v4807_v12 }
 0x496   :  { %v4117_v23 = vpop.f32.mrb[117].mxu1 }
 0x497   :  { %v6927_v31 = vpack.c.bf16 %v4117_v23, %v4115_v36  ;;  %v4119_v30 = vpop.f32.mrb[118].mxu1  ;;  %6255 = vmatpush1.bf16.msra.mxu0 %v7419_v50  ;;  %v7451_v23 = vld [vmem:[%s11303_s4 + $0x3d4] ss:$8 sps:$4 sm:$0xff]  }
 0x498   :  { %v4121_v18 = vpop.f32.mrb[119].mxu1  ;;  %6256 = vmatprep.subr.bf16.mxu0 %v7424_v37 }
 0x499   :  { %4727 = vst.msk [vmem:[%s11305_s6 + $0x170] sm:$0xff] %vm10296_vm3, %v6927_v31  ;;  %v6928_v22 = vpack.c.bf16 %v4121_v18, %v4119_v30  ;;  %v7449_v31 = vld [vmem:[%s11303_s4 + $0x3d0] ss:$8 sps:$4 sm:$0xff]   ;;  %v7454_v30 = vld [vmem:[%s11303_s4 + $0x3e4] ss:$8 sps:$4 sm:$0xff]  }
 0x49a   :  { %6188 = vmatmul.mubr.bf16.gmra.mrb[0].mxu0 %v6693_v17 }
 0x49b   :  { %4728 = vst.msk [vmem:[%s11305_s6 + $0x178] sm:$0xff] %vm10296_vm3, %v6928_v22  ;;  %6257 = vmatpush1.bf16.msra.mxu0 %v7422_v13  ;;  %6197 = vmatprep.mubr.bf16.mxu0 %v6702_v35  ;;  %v4748_v13 = vld [vmem:[%s11304_s1 + $0x18] sm:$0xff] }
 0x49c   :  { %6258 = vmatprep.subr.bf16.mxu0 %v7427_v46  ;;  %v4752_v35 = vld [vmem:[%s11304_s1 + $0x38] sm:$0xff]  ;;  %v6733_v46 = vcombine.low %v4803_v41, %v4807_v12 }
 0x49d   :  { %v4170_v61 = vpop.f32.mrb[232].mxu0 }
 0x49e   :  { %v4172_v56 = vpop.f32.mrb[233].mxu0 }
 0x49f   :  { %v6929_v25 = vpack.c.bf16 %v4172_v56, %v4170_v61  ;;  %v4174_v51 = vpop.f32.mrb[234].mxu0  ;;  %6259 = vmatpush1.bf16.msra.mxu0 %v7425_v11  ;;  %v7452_v11 = vld [vmem:[%s11303_s4 + $0x3e0] ss:$8 sps:$4 sm:$0xff]   ;;  %v7457_v61 = vld [vmem:[%s11303_s4 + $0x3f4] ss:$8 sps:$4 sm:$0xff]  }
 0x4a0   :  { %v4176_v10 = vpop.f32.mrb[235].mxu0  ;;  %6260 = vmatprep.subr.bf16.mxu0 %v7430_v7  ;;  %v6680_v7 = vcombine.high %v4748_v13, %v4752_v35 }
 0x4a1   :  { %4729 = vst.msk [vmem:[%s11305_s6 + $0x180] sm:$0xff] %vm10296_vm3, %v6929_v25  ;;  %v6930_v57 = vpack.c.bf16 %v4176_v10, %v4174_v51  ;;  %v7455_v25 = vld [vmem:[%s11303_s4 + $0x3f0] ss:$8 sps:$4 sm:$0xff]   ;;  %v6679_v10 = vcombine.low %v4748_v13, %v4752_v35 }
 0x4a2   :  { %6198 = vmatmul.mubr.bf16.gmra.mrb[4].mxu0 %v6701_v16  ;;  %v4756_v51 = vld [vmem:[%s11304_s1 + $0x58] sm:$0xff] }
 0x4a3   :  { %4730 = vst.msk [vmem:[%s11305_s6 + $0x188] sm:$0xff] %vm10296_vm3, %v6930_v57  ;;  %6261 = vmatpush1.bf16.msra.mxu0 %v7428_v26  ;;  %6207 = vmatprep.mubr.bf16.mxu0 %v6710_v62  ;;  %v4760_v26 = vld [vmem:[%s11304_s1 + $0x78] sm:$0xff] }
 0x4a4   :  { %6262 = vmatprep.subr.bf16.mxu0 %v7433_v48  ;;  %v6688_v57 = vcombine.high %v4756_v51, %v4760_v26 }
 0x4a5   :  { %v4180_v60 = vpop.f32.mrb[236].mxu0 }
 0x4a6   :  { %v4182_v58 = vpop.f32.mrb[237].mxu0 }
 0x4a7   :  { %v6931_v33 = vpack.c.bf16 %v4182_v58, %v4180_v60  ;;  %v4184_v47 = vpop.f32.mrb[238].mxu0  ;;  %6263 = vmatpush1.bf16.msra.mxu0 %v7431_v29  ;;  %v4764_v60 = vld [vmem:[%s11304_s1 + $0x98] sm:$0xff] }
 0x4a8   :  { %v4186_v0 = vpop.f32.mrb[239].mxu0  ;;  %6264 = vmatprep.subr.bf16.mxu0 %v7436_v55  ;;  %v4768_v58 = vld [vmem:[%s11304_s1 + $0xb8] sm:$0xff] }
 0x4a9   :  { %4731 = vst.msk [vmem:[%s11305_s6 + $0x190] sm:$0xff] %vm10296_vm3, %v6931_v33  ;;  %v6932_v53 = vpack.c.bf16 %v4186_v0, %v4184_v47  ;;  %v6687_v33 = vcombine.low %v4756_v51, %v4760_v26  ;;  %v6695_v15 = vcombine.low %v4764_v60, %v4768_v58 }
 0x4aa   :  { %6208 = vmatmul.mubr.bf16.gmra.mrb[8].mxu0 %v6709_v43 }
 0x4ab   :  { %4732 = vst.msk [vmem:[%s11305_s6 + $0x198] sm:$0xff] %vm10296_vm3, %v6932_v53  ;;  %6265 = vmatpush1.bf16.msra.mxu0 %v7434_v39  ;;  %6217 = vmatprep.mubr.bf16.mxu0 %v6718_v52  ;;  %v6696_v39 = vcombine.high %v4764_v60, %v4768_v58 }
 0x4ac   :  { %6266 = vmatprep.subr.bf16.mxu0 %v7439_v20 }
 0x4ad   :  { %v4190_v21 = vpop.f32.mrb[240].mxu0 }
 0x4ae   :  { %v4192_v24 = vpop.f32.mrb[241].mxu0 }
 0x4af   :  { %v6933_v3 = vpack.c.bf16 %v4192_v24, %v4190_v21  ;;  %v4194_v4 = vpop.f32.mrb[242].mxu0  ;;  %6267 = vmatpush1.bf16.msra.mxu0 %v7437_v19  ;;  %v4772_v19 = vld [vmem:[%s11304_s1 + $0xd8] sm:$0xff] }
 0x4b0   :  { %v4196_v8 = vpop.f32.mrb[243].mxu0  ;;  %6268 = vmatprep.subr.bf16.mxu0 %v7442_v5  ;;  %v4776_v5 = vld [vmem:[%s11304_s1 + $0xf8] sm:$0xff] }
 0x4b1   :  { %4733 = vst.msk [vmem:[%s11305_s6 + $0x1a0] sm:$0xff] %vm10296_vm3, %v6933_v3  ;;  %v6934_v1 = vpack.c.bf16 %v4196_v8, %v4194_v4  ;;  %v6704_v24 = vcombine.high %v4772_v19, %v4776_v5  ;;  %v4784_v8 = vld [vmem:[%s11304_s1 + $0x138] sm:$0xff] }
 0x4b2   :  { %6218 = vmatmul.mubr.bf16.gmra.mrb[12].mxu0 %v6717_v54 }
 0x4b3   :  { %4734 = vst.msk [vmem:[%s11305_s6 + $0x1a8] sm:$0xff] %vm10296_vm3, %v6934_v1  ;;  %6269 = vmatpush1.bf16.msra.mxu0 %v7440_v49  ;;  %6227 = vmatprep.mubr.bf16.mxu0 %v6726_v28  ;;  %v4780_v28 = vld [vmem:[%s11304_s1 + $0x118] sm:$0xff] }
 0x4b4   :  { %6270 = vmatprep.subr.bf16.mxu0 %v7445_v59  ;;  %v6703_v59 = vcombine.low %v4772_v19, %v4776_v5  ;;  %v6712_v1 = vcombine.high %v4780_v28, %v4784_v8  ;;  %v6711_v41 = vcombine.low %v4780_v28, %v4784_v8 }
 0x4b5   :  { %v4200_v45 = vpop.f32.mrb[244].mxu0 }
 0x4b6   :  { %v4202_v38 = vpop.f32.mrb[245].mxu0 }
 0x4b7   :  { %v6935_v50 = vpack.c.bf16 %v4202_v38, %v4200_v45  ;;  %v4204_v37 = vpop.f32.mrb[246].mxu0  ;;  %6271 = vmatpush1.bf16.msra.mxu0 %v7443_v44  ;;  %v4788_v44 = vld [vmem:[%s11304_s1 + $0x158] sm:$0xff] }
 0x4b8   :  { %v4206_v36 = vpop.f32.mrb[247].mxu0  ;;  %6272 = vmatprep.subr.bf16.mxu0 %v7448_v2  ;;  %v4792_v2 = vld [vmem:[%s11304_s1 + $0x178] sm:$0xff] }
 0x4b9   :  { %4735 = vst.msk [vmem:[%s11305_s6 + $0x1b0] sm:$0xff] %vm10296_vm3, %v6935_v50  ;;  %v6936_v17 = vpack.c.bf16 %v4206_v36, %v4204_v37  ;;  %v6720_v12 = vcombine.high %v4788_v44, %v4792_v2  ;;  %v4796_v45 = vld [vmem:[%s11304_s1 + $0x198] sm:$0xff] }
 0x4ba   :  { %6228 = vmatmul.mubr.bf16.gmra.mrb[16].mxu0 %v6725_v63  ;;  %v4800_v38 = vld [vmem:[%s11304_s1 + $0x1b8] sm:$0xff]  ;;  %v6719_v63 = vcombine.low %v4788_v44, %v4792_v2 }
 0x4bb   :  { %4736 = vst.msk [vmem:[%s11305_s6 + $0x1b8] sm:$0xff] %vm10296_vm3, %v6936_v17  ;;  %6273 = vmatpush1.bf16.msra.mxu0 %v7446_v9  ;;  %6237 = vmatprep.mubr.bf16.mxu0 %v6734_v34  ;;  %v6728_v50 = vcombine.high %v4796_v45, %v4800_v38  ;;  %v4804_v37 = vld [vmem:[%s11304_s1 + $0x1d8] sm:$0xff]  ;;  %v6727_v34 = vcombine.low %v4796_v45, %v4800_v38  ;;  %v4937_v17 = vld [vmem:[%s11306_s5] sm:$0x3] }
 0x4bc   :  { %6274 = vmatprep.subr.bf16.mxu0 %v7451_v23  ;;  %v4808_v9 = vld [vmem:[%s11304_s1 + $0x1f8] sm:$0xff] }
 0x4bd   :  { %v4255_v18 = vpop.f32.mrb[120].mxu1  ;;  %v6736_v36 = vcombine.high %v4804_v37, %v4808_v9  ;;  %v6735_v23 = vcombine.low %v4804_v37, %v4808_v9 }
 0x4be   :  { %v4257_v22 = vpop.f32.mrb[121].mxu1 }
 0x4bf   :  { %6275 = vmatpush1.bf16.msra.mxu0 %v7449_v31  ;;  %v6937_v32 = vpack.c.bf16 %v4257_v22, %v4255_v18  ;;  %v4259_v42 = vpop.f32.mrb[122].mxu1  ;;  %v11578_v31 = vld [vmem:[#allocation44_spill] sm:$0xff] }
 0x4c0   :  { %6276 = vmatprep.subr.bf16.mxu0 %v7454_v30  ;;  %v4261_v56 = vpop.f32.mrb[123].mxu1  ;;  %v11579_v30 = vsub.s32 0, %v11578_v31  ;;  %v11580_v35 = vsub.s32 1, %v11578_v31 }
 0x4c1   :  { %4737 = vst.msk [vmem:[%s11305_s6 + $0x1c0] sm:$0xff] %vm10296_vm3, %v6937_v32  ;;  %v6938_v16 = vpack.c.bf16 %v4261_v56, %v4259_v42 }
 0x4c2   :  { %6238 = vmatmul.mubr.bf16.gmra.mrb[20].mxu0 %v6733_v46  ;;  %v11182_v13 = vrot.slane %v4937_v17, %v11579_v30  ;;  %v11186_v18 = vrot.slane %v4937_v17, %v11580_v35 }
 0x4c3   :  { %6277 = vmatpush1.bf16.msra.mxu0 %v7452_v11  ;;  %6280 = vmatprep.mubr.bf16.mxu0 %v6680_v7  ;;  %4738 = vst.msk [vmem:[%s11305_s6 + $0x1c8] sm:$0xff] %vm10296_vm3, %v6938_v16 }
 0x4c4   :  { %6278 = vmatprep.subr.bf16.mxu0 %v7457_v61 }
 0x4c5   :  { %v4265_v62 = vpop.f32.mrb[124].mxu1 }
 0x4c6   :  { %v4267_v48 = vpop.f32.mrb[125].mxu1 }
 0x4c7   :  { %6279 = vmatpush1.bf16.msra.mxu0 %v7455_v25  ;;  %v6939_v29 = vpack.c.bf16 %v4267_v48, %v4265_v62  ;;  %v4269_v55 = vpop.f32.mrb[126].mxu1 }
 0x4c8   :  { %v4271_v27 = vpop.f32.mrb[127].mxu1 }
 0x4c9   :  { %4739 = vst.msk [vmem:[%s11305_s6 + $0x1d0] sm:$0xff] %vm10296_vm3, %v6939_v29  ;;  %v6940_v40 = vpack.c.bf16 %v4271_v27, %v4269_v55 }
 0x4ca   :  { %6281 = vmatmul.mubr.bf16.vlgmr.msra.gmra.mrb[248].mxu0 %v6679_v10 }
 0x4cb   :  { %6290 = vmatprep.mubr.bf16.mxu0 %v6688_v57  ;;  %4740 = vst.msk [vmem:[%s11305_s6 + $0x1d8] sm:$0xff] %vm10296_vm3, %v6940_v40 }
 0x4cd   :  { %v4275_v43 = vpop.f32.mrb[128].mxu1 }
 0x4ce   :  { %v4277_v47 = vpop.f32.mrb[129].mxu1 }
 0x4cf   :  { %v6941_v52 = vpack.c.bf16 %v4277_v47, %v4275_v43  ;;  %v4279_v0 = vpop.f32.mrb[130].mxu1 }
 0x4d0   :  { %v4281_v20 = vpop.f32.mrb[131].mxu1 }
 0x4d1   :  { %4741 = vst.msk [vmem:[%s11305_s6 + $0x1e0] sm:$0xff] %vm10296_vm3, %v6941_v52  ;;  %v6942_v53 = vpack.c.bf16 %v4281_v20, %v4279_v0 }
 0x4d2   :  { %6291 = vmatmul.mubr.bf16.gmra.mrb[252].mxu0 %v6687_v33 }
 0x4d3   :  { %6300 = vmatprep.mubr.bf16.mxu0 %v6696_v39  ;;  %4742 = vst.msk [vmem:[%s11305_s6 + $0x1e8] sm:$0xff] %vm10296_vm3, %v6942_v53 }
 0x4d5   :  { %v4285_v14 = vpop.f32.mrb[132].mxu1 }
 0x4d6   :  { %v4287_v21 = vpop.f32.mrb[133].mxu1 }
 0x4d7   :  { %v6943_v54 = vpack.c.bf16 %v4287_v21, %v4285_v14  ;;  %v4289_v3 = vpop.f32.mrb[134].mxu1 }
 0x4d8   :  { %v4291_v4 = vpop.f32.mrb[135].mxu1 }
 0x4d9   :  { %4743 = vst.msk [vmem:[%s11305_s6 + $0x1f0] sm:$0xff] %vm10296_vm3, %v6943_v54  ;;  %v6944_v49 = vpack.c.bf16 %v4291_v4, %v4289_v3 }
 0x4da   :  { %6301 = vmatmul.mubr.bf16.gmra.mrb[0].mxu0 %v6695_v15 }
 0x4db   :  { %6310 = vmatprep.mubr.bf16.mxu0 %v6704_v24  ;;  %4744 = vst.msk [vmem:[%s11305_s6 + $0x1f8] sm:$0xff] %vm10296_vm3, %v6944_v49 }
 0x4e2   :  { %6311 = vmatmul.mubr.bf16.gmra.mrb[4].mxu0 %v6703_v59 }
 0x4e3   :  { %6320 = vmatprep.mubr.bf16.mxu0 %v6712_v1 }
 0x4ea   :  { %6321 = vmatmul.mubr.bf16.gmra.mrb[8].mxu0 %v6711_v41 }
 0x4eb   :  { %6330 = vmatprep.mubr.bf16.mxu0 %v6720_v12 }
 0x4f2   :  { %6331 = vmatmul.mubr.bf16.gmra.mrb[12].mxu0 %v6719_v63 }
 0x4f3   :  { %6340 = vmatprep.mubr.bf16.mxu0 %v6728_v50 }
 0x4fa   :  { %6341 = vmatmul.mubr.bf16.gmra.mrb[16].mxu0 %v6727_v34 }
 0x4fb   :  { %6350 = vmatprep.mubr.bf16.mxu0 %v6736_v36 }
 0x502   :  { %6351 = vmatmul.mubr.bf16.gmra.mrb[20].mxu0 %v6735_v23 }
 0x59d   :  { %v6282_v46 = vpop.f32.mrb[248].mxu0 }
 0x59e   :  { %v6993_v22 = vadd.f32 %v6282_v46, %v11182_v13  ;;  %v6284_v11 = vpop.f32.mrb[249].mxu0 }
 0x59f   :  { %v6994_v7 = vadd.f32 %v6284_v11, %v11186_v18  ;;  %v6286_v32 = vpop.f32.mrb[250].mxu0 }
 0x5a0   :  { %v6995_v42 = vadd.f32 %v6286_v32, %v11182_v13  ;;  %v6288_v61 = vpop.f32.mrb[251].mxu0 }
 0x5a1   :  { %v6945_v56 = vpack.c.bf16 %v6994_v7, %v6993_v22  ;;  %v6996_v16 = vadd.f32 %v6288_v61, %v11186_v18 }
 0x5a3   :  { %6457 = vst.msk [vmem:[%s11307_s7] sm:$0xff] %vm10296_vm3, %v6945_v56  ;;  %v6946_v25 = vpack.c.bf16 %v6996_v16, %v6995_v42 }
 0x5a5   :  { %6458 = vst.msk [vmem:[%s11307_s7 + $0x8] sm:$0xff] %vm10296_vm3, %v6946_v25  ;;  %v6292_v51 = vpop.f32.mrb[252].mxu0 }
 0x5a6   :  { %v6997_v26 = vadd.f32 %v6292_v51, %v11182_v13  ;;  %v6294_v62 = vpop.f32.mrb[253].mxu0 }
 0x5a7   :  { %v6998_v10 = vadd.f32 %v6294_v62, %v11186_v18  ;;  %v6296_v48 = vpop.f32.mrb[254].mxu0 }
 0x5a8   :  { %v6999_v57 = vadd.f32 %v6296_v48, %v11182_v13  ;;  %v6298_v29 = vpop.f32.mrb[255].mxu0 }
 0x5a9   :  { %v6947_v55 = vpack.c.bf16 %v6998_v10, %v6997_v26  ;;  %v7000_v27 = vadd.f32 %v6298_v29, %v11186_v18 }
 0x5ab   :  { %6459 = vst.msk [vmem:[%s11307_s7 + $0x10] sm:$0xff] %vm10296_vm3, %v6947_v55  ;;  %v6948_v40 = vpack.c.bf16 %v7000_v27, %v6999_v57 }
 0x5ad   :  { %6460 = vst.msk [vmem:[%s11307_s7 + $0x18] sm:$0xff] %vm10296_vm3, %v6948_v40  ;;  %v6302_v60 = vpop.f32.mrb[0].mxu0 }
 0x5ae   :  { %v7001_v58 = vadd.f32 %v6302_v60, %v11182_v13  ;;  %v6304_v43 = vpop.f32.mrb[1].mxu0 }
 0x5af   :  { %v7002_v33 = vadd.f32 %v6304_v43, %v11186_v18  ;;  %v6306_v47 = vpop.f32.mrb[2].mxu0 }
 0x5b0   :  { %v7003_v39 = vadd.f32 %v6306_v47, %v11182_v13  ;;  %v6308_v52 = vpop.f32.mrb[3].mxu0 }
 0x5b1   :  { %v6949_v0 = vpack.c.bf16 %v7002_v33, %v7001_v58  ;;  %v7004_v20 = vadd.f32 %v6308_v52, %v11186_v18 }
 0x5b3   :  { %6461 = vst.msk [vmem:[%s11307_s7 + $0x20] sm:$0xff] %vm10296_vm3, %v6949_v0  ;;  %v6950_v53 = vpack.c.bf16 %v7004_v20, %v7003_v39 }
 0x5b5   :  { %6462 = vst.msk [vmem:[%s11307_s7 + $0x28] sm:$0xff] %vm10296_vm3, %v6950_v53  ;;  %v6312_v19 = vpop.f32.mrb[4].mxu0 }
 0x5b6   :  { %v7005_v5 = vadd.f32 %v6312_v19, %v11182_v13  ;;  %v6314_v14 = vpop.f32.mrb[5].mxu0 }
 0x5b7   :  { %v7006_v15 = vadd.f32 %v6314_v14, %v11186_v18  ;;  %v6316_v21 = vpop.f32.mrb[6].mxu0 }
 0x5b8   :  { %v7007_v24 = vadd.f32 %v6316_v21, %v11182_v13  ;;  %v6318_v54 = vpop.f32.mrb[7].mxu0 }
 0x5b9   :  { %v6951_v3 = vpack.c.bf16 %v7006_v15, %v7005_v5  ;;  %v7008_v4 = vadd.f32 %v6318_v54, %v11186_v18 }
 0x5bb   :  { %6463 = vst.msk [vmem:[%s11307_s7 + $0x30] sm:$0xff] %vm10296_vm3, %v6951_v3  ;;  %v6952_v49 = vpack.c.bf16 %v7008_v4, %v7007_v24 }
 0x5bd   :  { %6464 = vst.msk [vmem:[%s11307_s7 + $0x38] sm:$0xff] %vm10296_vm3, %v6952_v49  ;;  %v6322_v28 = vpop.f32.mrb[8].mxu0 }
 0x5be   :  { %v7009_v8 = vadd.f32 %v6322_v28, %v11182_v13  ;;  %v6324_v59 = vpop.f32.mrb[9].mxu0 }
 0x5bf   :  { %v7010_v1 = vadd.f32 %v6324_v59, %v11186_v18  ;;  %v6326_v44 = vpop.f32.mrb[10].mxu0 }
 0x5c0   :  { %v7011_v2 = vadd.f32 %v6326_v44, %v11182_v13  ;;  %v6328_v41 = vpop.f32.mrb[11].mxu0 }
 0x5c1   :  { %v6953_v12 = vpack.c.bf16 %v7010_v1, %v7009_v8  ;;  %v7012_v45 = vadd.f32 %v6328_v41, %v11186_v18 }
 0x5c3   :  { %6465 = vst.msk [vmem:[%s11307_s7 + $0x40] sm:$0xff] %vm10296_vm3, %v6953_v12  ;;  %v6954_v38 = vpack.c.bf16 %v7012_v45, %v7011_v2 }
 0x5c5   :  { %6466 = vst.msk [vmem:[%s11307_s7 + $0x48] sm:$0xff] %vm10296_vm3, %v6954_v38  ;;  %v6332_v63 = vpop.f32.mrb[12].mxu0 }
 0x5c6   :  { %v7013_v50 = vadd.f32 %v6332_v63, %v11182_v13  ;;  %v6334_v37 = vpop.f32.mrb[13].mxu0 }
 0x5c7   :  { %v7014_v9 = vadd.f32 %v6334_v37, %v11186_v18  ;;  %v6336_v34 = vpop.f32.mrb[14].mxu0 }
 0x5c8   :  { %v7015_v36 = vadd.f32 %v6336_v34, %v11182_v13  ;;  %v6338_v23 = vpop.f32.mrb[15].mxu0 }
 0x5c9   :  { %v6955_v17 = vpack.c.bf16 %v7014_v9, %v7013_v50  ;;  %v7016_v31 = vadd.f32 %v6338_v23, %v11186_v18 }
 0x5cb   :  { %6467 = vst.msk [vmem:[%s11307_s7 + $0x50] sm:$0xff] %vm10296_vm3, %v6955_v17  ;;  %v6956_v30 = vpack.c.bf16 %v7016_v31, %v7015_v36 }
 0x5cd   :  { %6468 = vst.msk [vmem:[%s11307_s7 + $0x58] sm:$0xff] %vm10296_vm3, %v6956_v30  ;;  %v6342_v35 = vpop.f32.mrb[16].mxu0 }
 0x5ce   :  { %v7017_v46 = vadd.f32 %v6342_v35, %v11182_v13  ;;  %v6344_v22 = vpop.f32.mrb[17].mxu0 }
 0x5cf   :  { %v7018_v11 = vadd.f32 %v6344_v22, %v11186_v18  ;;  %v6346_v7 = vpop.f32.mrb[18].mxu0 }
 0x5d0   :  { %v7019_v32 = vadd.f32 %v6346_v7, %v11182_v13  ;;  %v6348_v42 = vpop.f32.mrb[19].mxu0 }
 0x5d1   :  { %v6957_v61 = vpack.c.bf16 %v7018_v11, %v7017_v46  ;;  %v7020_v56 = vadd.f32 %v6348_v42, %v11186_v18 }
 0x5d3   :  { %6469 = vst.msk [vmem:[%s11307_s7 + $0x60] sm:$0xff] %vm10296_vm3, %v6957_v61  ;;  %v6958_v16 = vpack.c.bf16 %v7020_v56, %v7019_v32 }
 0x5d5   :  { %6470 = vst.msk [vmem:[%s11307_s7 + $0x68] sm:$0xff] %vm10296_vm3, %v6958_v16  ;;  %v6352_v25 = vpop.f32.mrb[20].mxu0 }
 0x5d6   :  { %v7021_v51 = vadd.f32 %v6352_v25, %v11182_v13  ;;  %v6354_v26 = vpop.f32.mrb[21].mxu0 }
 0x5d7   :  { %v7022_v62 = vadd.f32 %v6354_v26, %v11186_v18  ;;  %v6356_v10 = vpop.f32.mrb[22].mxu0 }
 0x5d8   :  { %v7023_v48 = vadd.f32 %v6356_v10, %v11182_v13  ;;  %v6358_v57 = vpop.f32.mrb[23].mxu0 }
 0x5d9   :  { %v6959_v29 = vpack.c.bf16 %v7022_v62, %v7021_v51  ;;  %v7024_v55 = vadd.f32 %v6358_v57, %v11186_v18 }
 0x5db   :  { %6471 = vst.msk [vmem:[%s11307_s7 + $0x70] sm:$0xff] %vm10296_vm3, %v6959_v29  ;;  %v6960_v27 = vpack.c.bf16 %v7024_v55, %v7023_v48 }
 0x5dd   :  { %6472 = vst.msk [vmem:[%s11307_s7 + $0x78] sm:$0xff] %vm10296_vm3, %v6960_v27 }

</bundles_post_ra>
